<compile_context>
chip_gen: v7x
topology: tpu7x:2x2x1
jax: 0.10.0
libtpu: 0.0.40
codegen_flags: <defaults>
</compile_context>

<pallas_src>
import functools

import jax
import jax.numpy as jnp
from jax.experimental import pallas as pl
from jax.experimental.pallas import tpu as pltpu


_MM_DTYPE = jnp.bfloat16  # MXU-native matmul inputs; accumulation stays f32.


# ----------------------------------------------------------------------------
# Small in-kernel helpers (pure jnp/lax, traced inside the Pallas kernels)
# ----------------------------------------------------------------------------
def _mm(a, b):
    """a @ b with bf16 MXU inputs, f32 accumulation."""
    return jnp.dot(a.astype(_MM_DTYPE), b.astype(_MM_DTYPE),
                   preferred_element_type=jnp.float32)


def _mm_t(a, b):
    """a @ b^T (contract last dims), bf16 inputs, f32 accumulation."""
    return jax.lax.dot_general(a.astype(_MM_DTYPE), b.astype(_MM_DTYPE),
                               (((1,), (1,)), ((), ())),
                               preferred_element_type=jnp.float32)


def _ln(x, g, b, eps=1e-5):
    mu = jnp.mean(x, axis=-1, keepdims=True)
    var = jnp.mean(jnp.square(x - mu), axis=-1, keepdims=True)
    return (x - mu) * jax.lax.rsqrt(var + eps) * g + b


def _softmax_last(s):
    s = s - jnp.max(s, axis=-1, keepdims=True)
    e = jnp.exp(s)
    return e * pl.reciprocal(jnp.sum(e, axis=-1, keepdims=True), approx=True)


def _mha_core(q, k, v, nhead):
    """q:(L,D), k/v:(S,D) f32 -> (L,D). Static unroll over heads; all data VMEM-resident."""
    D = q.shape[-1]
    dh = D // nhead
    scale = 1.0 / (dh ** 0.5)
    outs = []
    for h in range(nhead):
        sl = slice(h * dh, (h + 1) * dh)
        s = _mm_t(q[:, sl], k[:, sl]) * scale           # (L, S)
        p = _softmax_last(s)
        outs.append(_mm(p, v[:, sl]))                   # (L, dh)
    return jnp.concatenate(outs, axis=-1)               # (L, D)


# ----------------------------------------------------------------------------
# BlockSpec helpers
# ----------------------------------------------------------------------------
def _vmem():
    return pl.BlockSpec(memory_space=pltpu.MemorySpace.VMEM)


def _rep_spec(a):
    """Full-extent block, same block for every grid step (weights stay VMEM-resident)."""
    nz = (0,) * a.ndim
    return pl.BlockSpec(a.shape, lambda *_, _z=nz: _z)


def _round_up(x, m):
    return ((x + m - 1) // m) * m


# ----------------------------------------------------------------------------
# Fused kernel 1: encoder "depth" MLP block  (Linear -> Tanh -> LayerNorm) x 5
# ----------------------------------------------------------------------------
def _depth_mlp_kernel(x_ref, *refs):
    *param_refs, o_ref = refs
    h = x_ref[...].astype(jnp.float32)
    nb = len(param_refs) // 4
    for i in range(nb):
        w, b, g, bt = param_refs[4 * i:4 * i + 4]
        h = jnp.tanh(_mm(h, w[...]) + b[...])
        h = _ln(h, g[...], bt[...])
    o_ref[...] = h


def depth_mlp(x, blocks, max_tile=256):
    """x: (M, K0) -> (M, D_out); row-tiled grid, all weights resident in VMEM."""
    M, K0 = x.shape
    d_out = blocks[-1]["w"].shape[1]
    tm = min(_round_up(M, 8), max_tile)
    mp = _round_up(M, tm)
    xp = jnp.pad(x, ((0, mp - M), (0, 0))) if mp != M else x

    params = []
    for blk in blocks:
        params += [blk["w"], blk["b"], blk["g"], blk["bt"]]

    out = pl.pallas_call(
        _depth_mlp_kernel,
        grid=(mp // tm,),
        out_shape=jax.ShapeDtypeStruct((mp, d_out), jnp.float32),
        in_specs=[pl.BlockSpec((tm, K0), lambda i: (i, 0))]
                 + [_rep_spec(a) for a in params],
        out_specs=pl.BlockSpec((tm, d_out), lambda i: (i, 0)),
        compiler_params=pltpu.CompilerParams(dimension_semantics=("parallel",)),
    )(xp, *params)
    return out[:M]


# ----------------------------------------------------------------------------
# Fused kernel 2: post-norm TransformerEncoderLayer + relu(res(img)) residual
# ----------------------------------------------------------------------------
def _encoder_layer_kernel(x_ref, img_ref,
                          wqkv_ref, bqkv_ref, wo_ref, bo_ref,
                          ln1g_ref, ln1b_ref,
                          f1w_ref, f1b_ref, f2w_ref, f2b_ref,
                          ln2g_ref, ln2b_ref,
                          resw_ref, resb_ref,
                          o_ref, *, nhead):
    x = x_ref[...].astype(jnp.float32)                       # (N, D)
    D = x.shape[-1]

    # self-attention: single (D, 3D) in-projection
    qkv = _mm(x, wqkv_ref[...]) + bqkv_ref[...]              # (N, 3D)
    q, k, v = qkv[:, :D], qkv[:, D:2 * D], qkv[:, 2 * D:]
    a = _mha_core(q, k, v, nhead)
    a = _mm(a, wo_ref[...]) + bo_ref[...]
    x = _ln(x + a, ln1g_ref[...], ln1b_ref[...])

    # FFN
    h = jnp.maximum(_mm(x, f1w_ref[...]) + f1b_ref[...], 0.0)
    h = _mm(h, f2w_ref[...]) + f2b_ref[...]
    x = _ln(x + h, ln2g_ref[...], ln2b_ref[...])

    # residual from raw patches: x + relu(img @ Wres + bres)
    r = jnp.maximum(_mm(img_ref[...].astype(jnp.float32), resw_ref[...]) + resb_ref[...], 0.0)
    o_ref[...] = x + r


def encoder_layer(x, img, p, nhead):
    B, N, D = x.shape
    Pd = img.shape[-1]
    args = (x, img,
            p["w_qkv"], p["b_qkv"], p["w_o"], p["b_o"],
            p["ln1_g"], p["ln1_b"],
            p["ffn1_w"], p["ffn1_b"], p["ffn2_w"], p["ffn2_b"],
            p["ln2_g"], p["ln2_b"],
            p["res_w"], p["res_b"])
    in_specs = ([pl.BlockSpec((None, N, D), lambda b: (b, 0, 0)),
                 pl.BlockSpec((None, N, Pd), lambda b: (b, 0, 0))]
                + [_rep_spec(a) for a in args[2:]])
    return pl.pallas_call(
        functools.partial(_encoder_layer_kernel, nhead=nhead),
        grid=(B,),
        out_shape=jax.ShapeDtypeStruct((B, N, D), jnp.float32),
        in_specs=in_specs,
        out_specs=pl.BlockSpec((None, N, D), lambda b: (b, 0, 0)),
        compiler_params=pltpu.CompilerParams(dimension_semantics=("parallel",)),
    )(*args)


# ----------------------------------------------------------------------------
# Fused kernel 3: TransformerDecoderLayer (self-attn -> LN2 -> cross-attn -> LN1 -> FFN -> LN3)
# ----------------------------------------------------------------------------
def _decoder_layer_kernel(tgt_ref, src_ref,
                          s_wqkv, s_bqkv, s_wo, s_bo, ln2g, ln2b,
                          c_wq, c_bq, c_wkv, c_bkv, c_wo, c_bo, ln1g, ln1b,
                          f1w, f1b, f2w, f2b, ln3g, ln3b,
                          o_ref, *, nhead):
    t = tgt_ref[...].astype(jnp.float32)                     # (L, D)
    s = src_ref[...].astype(jnp.float32)                     # (S, D)
    D = t.shape[-1]

    # self-attention
    qkv = _mm(t, s_wqkv[...]) + s_bqkv[...]
    q, k, v = qkv[:, :D], qkv[:, D:2 * D], qkv[:, 2 * D:]
    a = _mha_core(q, k, v, nhead)
    a = _mm(a, s_wo[...]) + s_bo[...]
    t = _ln(t + a, ln2g[...], ln2b[...])

    # cross-attention (q from tgt, k/v from src; combined (D, 2D) kv projection)
    q = _mm(t, c_wq[...]) + c_bq[...]
    kv = _mm(s, c_wkv[...]) + c_bkv[...]
    k, v = kv[:, :D], kv[:, D:]
    a = _mha_core(q, k, v, nhead)
    a = _mm(a, c_wo[...]) + c_bo[...]
    t = _ln(t + a, ln1g[...], ln1b[...])

    # FFN
    h = jnp.maximum(_mm(t, f1w[...]) + f1b[...], 0.0)
    h = _mm(h, f2w[...]) + f2b[...]
    o_ref[...] = _ln(t + h, ln3g[...], ln3b[...])


def decoder_layer(tgt, src, p, nhead):
    B, L, D = tgt.shape
    S = src.shape[1]
    sa, ca = p["self"], p["cross"]
    args = (tgt, src,
            sa["w_qkv"], sa["b_qkv"], sa["w_o"], sa["b_o"],
            p["ln2_g"], p["ln2_b"],
            ca["w_q"], ca["b_q"], ca["w_kv"], ca["b_kv"], ca["w_o"], ca["b_o"],
            p["ln1_g"], p["ln1_b"],
            p["ffn1_w"], p["ffn1_b"], p["ffn2_w"], p["ffn2_b"],
            p["ln3_g"], p["ln3_b"])
    in_specs = ([pl.BlockSpec((None, L, D), lambda b: (b, 0, 0)),
                 pl.BlockSpec((None, S, D), lambda b: (b, 0, 0))]
                + [_rep_spec(a) for a in args[2:]])
    return pl.pallas_call(
        functools.partial(_decoder_layer_kernel, nhead=nhead),
        grid=(B,),
        out_shape=jax.ShapeDtypeStruct((B, L, D), jnp.float32),
        in_specs=in_specs,
        out_specs=pl.BlockSpec((None, L, D), lambda b: (b, 0, 0)),
        compiler_params=pltpu.CompilerParams(dimension_semantics=("parallel",)),
    )(*args)


# ----------------------------------------------------------------------------
# Fused kernel 4: mlp_head (LayerNorm -> Linear) + prototype softmax scores
# ----------------------------------------------------------------------------
def _head_kernel(x_ref, g_ref, b_ref, hw_ref, hb_ref, proto_ref, cls_ref, prot_ref):
    x = x_ref[...].astype(jnp.float32)                       # (TM, D)
    h = _ln(x, g_ref[...], b_ref[...])
    cls_ref[...] = _mm(h, hw_ref[...]) + hb_ref[...]         # (TM, C)
    # score_prot = softmax(x @ prototypes^T) — uses the raw (un-normed) features
    logits = _mm_t(x, proto_ref[...])                        # (TM, C)
    prot_ref[...] = _softmax_last(logits)


def head_and_proto(x, head_ln_g, head_ln_b, head_w, head_b, prototypes, max_tile=256):
    M, D = x.shape
    C = head_w.shape[1]
    tm = min(_round_up(M, 8), max_tile)
    mp = _round_up(M, tm)
    xp = jnp.pad(x, ((0, mp - M), (0, 0))) if mp != M else x
    params = (head_ln_g, head_ln_b, head_w, head_b, prototypes)
    cls, prot = pl.pallas_call(
        _head_kernel,
        grid=(mp // tm,),
        out_shape=(jax.ShapeDtypeStruct((mp, C), jnp.float32),
                   jax.ShapeDtypeStruct((mp, C), jnp.float32)),
        in_specs=[pl.BlockSpec((tm, D), lambda i: (i, 0))]
                 + [_rep_spec(a) for a in params],
        out_specs=(pl.BlockSpec((tm, C), lambda i: (i, 0)),
                   pl.BlockSpec((tm, C), lambda i: (i, 0))),
        compiler_params=pltpu.CompilerParams(dimension_semantics=("parallel",)),
    )(xp, *params)
    return cls[:M], prot[:M]


# ----------------------------------------------------------------------------
# Kernel 5: tiny WSI classifier linear  (B, Q*D) @ (Q*D, C)
# ----------------------------------------------------------------------------
def _wsi_kernel(x_ref, w_ref, b_ref, o_ref):
    o_ref[...] = _mm(x_ref[...].astype(jnp.float32), w_ref[...]) + b_ref[...]


def wsi_classifier(hs_flat, w, b):
    B = hs_flat.shape[0]
    C = w.shape[1]
    return pl.pallas_call(
        _wsi_kernel,
        out_shape=jax.ShapeDtypeStruct((B, C), jnp.float32),
        in_specs=[_vmem(), _vmem(), _vmem()],
        out_specs=_vmem(),
    )(hs_flat, w, b)


# ----------------------------------------------------------------------------
# Model composition (JAX glue over the fused Pallas kernels)
# ----------------------------------------------------------------------------
def iibmil_forward(img, params, *, dim, depth, num_queries, enc_nhead=2, dec_nhead=4):
    B, N, _ = img.shape
    enc = params["encoder"]

    x = img
    for i in range(depth):
        h = depth_mlp(x.reshape(B * N, x.shape[-1]), enc["mlp"][i])     # fused MLP block
        x = h.reshape(B, N, dim)
        x = encoder_layer(x, img, enc["layer"][i], nhead=enc_nhead)     # fused transformer + residual

    x_instance = x
    patch_cls_flat, score_prot = head_and_proto(
        x.reshape(B * N, dim),
        enc["head_ln_g"], enc["head_ln_b"], enc["head_w"], enc["head_b"],
        params["prototypes"])
    patch_cls = patch_cls_flat.reshape(B, N, -1)

    # query embeddings expanded across batch, then 2 decoder layers (nhead=4)
    tgt = jnp.broadcast_to(params["query_embed"][None, :, :], (B, num_queries, dim))
    hs = tgt
    for lp in params["decoder"]:
        hs = decoder_layer(hs, x_instance, lp, nhead=dec_nhead)

    wsi_out = wsi_classifier(hs.reshape(B, num_queries * dim),
                             params["wsi_w"], params["wsi_b"])
    return patch_cls, x_instance, score_prot, wsi_out


# ----------------------------------------------------------------------------
# Deterministic parameter initialization (synthetic; matches module shapes)
# ----------------------------------------------------------------------------
def init_params(key, num_classes, patch_dim, dim, depth, num_queries,
                enc_ffn=2048, dec_ffn=None):
    if dec_ffn is None:
        dec_ffn = dim * 2                                   # IIBMIL uses dim_feedforward=dim*2
    kit = iter(jax.random.split(key, 512))

    def dense(din, dout):
        w = jax.random.normal(next(kit), (din, dout), jnp.float32) * (1.0 / (din ** 0.5))
        return w, jnp.zeros((1, dout), jnp.float32)

    def ln(d):
        return jnp.ones((1, d), jnp.float32), jnp.zeros((1, d), jnp.float32)

    def attn_self(d):
        wqkv, bqkv = dense(d, 3 * d)
        wo, bo = dense(d, d)
        return {"w_qkv": wqkv, "b_qkv": bqkv, "w_o": wo, "b_o": bo}

    def attn_cross(d):
        wq, bq = dense(d, d)
        wkv, bkv = dense(d, 2 * d)
        wo, bo = dense(d, d)
        return {"w_q": wq, "b_q": bq, "w_kv": wkv, "b_kv": bkv, "w_o": wo, "b_o": bo}

    enc = {"mlp": [], "layer": []}
    for i in range(depth):
        ind = patch_dim if i == 0 else dim
        mlp_dims = [(ind, 2 * dim), (2 * dim, 4 * dim), (4 * dim, 2 * dim),
                    (2 * dim, 2 * dim), (2 * dim, dim)]
        blocks = []
        for a, b_ in mlp_dims:
            w, b = dense(a, b_)
            g, bt = ln(b_)
            blocks.append({"w": w, "b": b, "g": g, "bt": bt})
        enc["mlp"].append(blocks)

        sa = attn_self(dim)
        ln1g, ln1b = ln(dim)
        ln2g, ln2b = ln(dim)
        f1w, f1b = dense(dim, enc_ffn)
        f2w, f2b = dense(enc_ffn, dim)
        rw, rb = dense(patch_dim, dim)
        enc["layer"].append({
            "w_qkv": sa["w_qkv"], "b_qkv": sa["b_qkv"], "w_o": sa["w_o"], "b_o": sa["b_o"],
            "ln1_g": ln1g, "ln1_b": ln1b,
            "ffn1_w": f1w, "ffn1_b": f1b, "ffn2_w": f2w, "ffn2_b": f2b,
            "ln2_g": ln2g, "ln2_b": ln2b,
            "res_w": rw, "res_b": rb,
        })
    hg, hb = ln(dim)
    hw, hbias = dense(dim, num_classes)
    enc["head_ln_g"], enc["head_ln_b"] = hg, hb
    enc["head_w"], enc["head_b"] = hw, hbias

    dec = []
    for _ in range(2):                                      # num_decoder_layers = 2
        ln1g, ln1b = ln(dim)
        ln2g, ln2b = ln(dim)
        ln3g, ln3b = ln(dim)
        f1w, f1b = dense(dim, dec_ffn)
        f2w, f2b = dense(dec_ffn, dim)
        dec.append({"self": attn_self(dim), "cross": attn_cross(dim),
                    "ln1_g": ln1g, "ln1_b": ln1b,
                    "ln2_g": ln2g, "ln2_b": ln2b,
                    "ln3_g": ln3g, "ln3_b": ln3b,
                    "ffn1_w": f1w, "ffn1_b": f1b, "ffn2_w": f2w, "ffn2_b": f2b})

    wsi_w, wsi_b = dense(dim * num_queries, num_classes)
    return {
        "encoder": enc,
        "decoder": dec,
        "query_embed": jax.random.normal(next(kit), (num_queries, dim), jnp.float32),
        "wsi_w": wsi_w, "wsi_b": wsi_b,
        "prototypes": jnp.zeros((num_classes, dim), jnp.float32),   # register_buffer zeros
    }


# ----------------------------------------------------------------------------
# Demo
# ----------------------------------------------------------------------------
if __name__ == "__main__":
    NUM_CLASSES, PATCH_DIM, DIM, DEPTH, NUM_QUERIES = 4, 24, 32, 2, 5
    BS, PATCH_NUM = 2, 8

    key = jax.random.PRNGKey(0)
    pkey, xkey = jax.random.split(key)
    params = init_params(pkey, NUM_CLASSES, PATCH_DIM, DIM, DEPTH, NUM_QUERIES)
    img = jax.random.normal(xkey, (BS, PATCH_NUM, PATCH_DIM), jnp.float32)

    fwd = jax.jit(functools.partial(iibmil_forward, dim=DIM, depth=DEPTH,
                                    num_queries=NUM_QUERIES))
    patch_cls, x_instance, score_prot, wsi_out = fwd(img, params)
    for out in (patch_cls, x_instance, score_prot, wsi_out):
        jax.block_until_ready(out)

    assert patch_cls.shape == (BS, PATCH_NUM, NUM_CLASSES)
    assert x_instance.shape == (BS, PATCH_NUM, DIM)
    assert score_prot.shape == (BS * PATCH_NUM, NUM_CLASSES)
    assert wsi_out.shape == (BS, NUM_CLASSES)
    assert bool(jnp.all(jnp.isfinite(patch_cls)))
    assert bool(jnp.all(jnp.isfinite(x_instance)))
    assert bool(jnp.all(jnp.isfinite(wsi_out)))
    # prototypes buffer is zeros -> (near-)uniform softmax (approx reciprocal tolerance)
    assert bool(jnp.allclose(score_prot, 1.0 / NUM_CLASSES, atol=1e-2))

    print("KERNEL_OK")
</pallas_src>

<mosaic_0001>
module attributes {stable_mosaic.version = 11 : i64} {
  func.func @_depth_mlp_kernel(%arg0: i32, %arg1: memref<16x24xf32, #tpu.memory_space<vmem>>, %arg2: memref<24x64xf32, #tpu.memory_space<vmem>>, %arg3: memref<1x64xf32, #tpu.memory_space<vmem>>, %arg4: memref<1x64xf32, #tpu.memory_space<vmem>>, %arg5: memref<1x64xf32, #tpu.memory_space<vmem>>, %arg6: memref<64x128xf32, #tpu.memory_space<vmem>>, %arg7: memref<1x128xf32, #tpu.memory_space<vmem>>, %arg8: memref<1x128xf32, #tpu.memory_space<vmem>>, %arg9: memref<1x128xf32, #tpu.memory_space<vmem>>, %arg10: memref<128x64xf32, #tpu.memory_space<vmem>>, %arg11: memref<1x64xf32, #tpu.memory_space<vmem>>, %arg12: memref<1x64xf32, #tpu.memory_space<vmem>>, %arg13: memref<1x64xf32, #tpu.memory_space<vmem>>, %arg14: memref<64x64xf32, #tpu.memory_space<vmem>>, %arg15: memref<1x64xf32, #tpu.memory_space<vmem>>, %arg16: memref<1x64xf32, #tpu.memory_space<vmem>>, %arg17: memref<1x64xf32, #tpu.memory_space<vmem>>, %arg18: memref<64x32xf32, #tpu.memory_space<vmem>>, %arg19: memref<1x32xf32, #tpu.memory_space<vmem>>, %arg20: memref<1x32xf32, #tpu.memory_space<vmem>>, %arg21: memref<1x32xf32, #tpu.memory_space<vmem>>, %arg22: memref<16x32xf32, #tpu.memory_space<vmem>>) attributes {dimension_semantics = [#tpu.dimension_semantics<parallel>], iteration_bounds = array<i64: 1>, scalar_prefetch = 0 : i64, scratch_operands = 0 : i64, tpu.core_type = #tpu.core_type<tc>, window_params = [{transform_indices = @transform_0, window_bounds = array<i64: 16, 24>}, {pipeline_mode = #tpu.pipeline_mode<synchronous>, transform_indices = @transform_1, window_bounds = array<i64: 24, 64>}, {pipeline_mode = #tpu.pipeline_mode<synchronous>, transform_indices = @transform_2, window_bounds = array<i64: 1, 64>}, {pipeline_mode = #tpu.pipeline_mode<synchronous>, transform_indices = @transform_3, window_bounds = array<i64: 1, 64>}, {pipeline_mode = #tpu.pipeline_mode<synchronous>, transform_indices = @transform_4, window_bounds = array<i64: 1, 64>}, {pipeline_mode = #tpu.pipeline_mode<synchronous>, transform_indices = @transform_5, window_bounds = array<i64: 64, 128>}, {pipeline_mode = #tpu.pipeline_mode<synchronous>, transform_indices = @transform_6, window_bounds = array<i64: 1, 128>}, {pipeline_mode = #tpu.pipeline_mode<synchronous>, transform_indices = @transform_7, window_bounds = array<i64: 1, 128>}, {pipeline_mode = #tpu.pipeline_mode<synchronous>, transform_indices = @transform_8, window_bounds = array<i64: 1, 128>}, {pipeline_mode = #tpu.pipeline_mode<synchronous>, transform_indices = @transform_9, window_bounds = array<i64: 128, 64>}, {pipeline_mode = #tpu.pipeline_mode<synchronous>, transform_indices = @transform_10, window_bounds = array<i64: 1, 64>}, {pipeline_mode = #tpu.pipeline_mode<synchronous>, transform_indices = @transform_11, window_bounds = array<i64: 1, 64>}, {pipeline_mode = #tpu.pipeline_mode<synchronous>, transform_indices = @transform_12, window_bounds = array<i64: 1, 64>}, {pipeline_mode = #tpu.pipeline_mode<synchronous>, transform_indices = @transform_13, window_bounds = array<i64: 64, 64>}, {pipeline_mode = #tpu.pipeline_mode<synchronous>, transform_indices = @transform_14, window_bounds = array<i64: 1, 64>}, {pipeline_mode = #tpu.pipeline_mode<synchronous>, transform_indices = @transform_15, window_bounds = array<i64: 1, 64>}, {pipeline_mode = #tpu.pipeline_mode<synchronous>, transform_indices = @transform_16, window_bounds = array<i64: 1, 64>}, {pipeline_mode = #tpu.pipeline_mode<synchronous>, transform_indices = @transform_17, window_bounds = array<i64: 64, 32>}, {pipeline_mode = #tpu.pipeline_mode<synchronous>, transform_indices = @transform_18, window_bounds = array<i64: 1, 32>}, {pipeline_mode = #tpu.pipeline_mode<synchronous>, transform_indices = @transform_19, window_bounds = array<i64: 1, 32>}, {pipeline_mode = #tpu.pipeline_mode<synchronous>, transform_indices = @transform_20, window_bounds = array<i64: 1, 32>}, {transform_indices = @transform_21, window_bounds = array<i64: 16, 32>}]} {
    %c0 = arith.constant 0 : index
    %c0_0 = arith.constant 0 : index
    %0 = vector.load %arg1[%c0, %c0_0] : memref<16x24xf32, #tpu.memory_space<vmem>>, vector<16x24xf32>
    %c0_1 = arith.constant 0 : index
    %c0_2 = arith.constant 0 : index
    %1 = vector.load %arg2[%c0_1, %c0_2] : memref<24x64xf32, #tpu.memory_space<vmem>>, vector<24x64xf32>
    %2 = arith.truncf %0 : vector<16x24xf32> to vector<16x24xbf16>
    %3 = arith.truncf %1 : vector<24x64xf32> to vector<24x64xbf16>
    %cst = arith.constant dense<0.000000e+00> : vector<16x64xf32>
    %4 = tpu.matmul %2, %3, %cst {dimension_numbers = #tpu.dot_dimension_numbers<[1], [0], [0], [1], [0, 0, 1, 1], [], []>} : vector<16x24xbf16>, vector<24x64xbf16>, vector<16x64xf32> -> vector<16x64xf32>
    %c0_3 = arith.constant 0 : index
    %c0_4 = arith.constant 0 : index
    %5 = vector.load %arg3[%c0_3, %c0_4] : memref<1x64xf32, #tpu.memory_space<vmem>>, vector<1x64xf32>
    %6 = vector.broadcast %5 : vector<1x64xf32> to vector<16x64xf32>
    %7 = arith.addf %4, %6 : vector<16x64xf32>
    %8 = math.tanh %7 : vector<16x64xf32>
    %c0_5 = arith.constant 0 : index
    %c0_6 = arith.constant 0 : index
    %9 = vector.load %arg4[%c0_5, %c0_6] : memref<1x64xf32, #tpu.memory_space<vmem>>, vector<1x64xf32>
    %c0_7 = arith.constant 0 : index
    %c0_8 = arith.constant 0 : index
    %10 = vector.load %arg5[%c0_7, %c0_8] : memref<1x64xf32, #tpu.memory_space<vmem>>, vector<1x64xf32>
    %cst_9 = arith.constant dense<0.000000e+00> : vector<16xf32>
    %11 = vector.multi_reduction <add>, %8, %cst_9 [1] : vector<16x64xf32> to vector<16xf32>
    %12 = vector.shape_cast %11 : vector<16xf32> to vector<16x1xf32>
    %cst_10 = arith.constant 6.400000e+01 : f32
    %13 = vector.broadcast %cst_10 : f32 to vector<16x1xf32>
    %14 = arith.divf %12, %13 : vector<16x1xf32>
    %15 = vector.broadcast %14 : vector<16x1xf32> to vector<16x64xf32>
    %16 = arith.subf %8, %15 : vector<16x64xf32>
    %17 = arith.mulf %16, %16 : vector<16x64xf32>
    %cst_11 = arith.constant dense<0.000000e+00> : vector<16xf32>
    %18 = vector.multi_reduction <add>, %17, %cst_11 [1] : vector<16x64xf32> to vector<16xf32>
    %19 = vector.shape_cast %18 : vector<16xf32> to vector<16x1xf32>
    %cst_12 = arith.constant 6.400000e+01 : f32
    %20 = vector.broadcast %cst_12 : f32 to vector<16x1xf32>
    %21 = arith.divf %19, %20 : vector<16x1xf32>
    %22 = vector.broadcast %14 : vector<16x1xf32> to vector<16x64xf32>
    %23 = arith.subf %8, %22 : vector<16x64xf32>
    %cst_13 = arith.constant 9.99999974E-6 : f32
    %24 = vector.broadcast %cst_13 : f32 to vector<16x1xf32>
    %25 = arith.addf %21, %24 : vector<16x1xf32>
    %26 = math.rsqrt %25 : vector<16x1xf32>
    %27 = vector.broadcast %26 : vector<16x1xf32> to vector<16x64xf32>
    %28 = arith.mulf %23, %27 : vector<16x64xf32>
    %29 = vector.broadcast %9 : vector<1x64xf32> to vector<16x64xf32>
    %30 = arith.mulf %28, %29 : vector<16x64xf32>
    %31 = vector.broadcast %10 : vector<1x64xf32> to vector<16x64xf32>
    %32 = arith.addf %30, %31 : vector<16x64xf32>
    %c0_14 = arith.constant 0 : index
    %c0_15 = arith.constant 0 : index
    %33 = vector.load %arg6[%c0_14, %c0_15] : memref<64x128xf32, #tpu.memory_space<vmem>>, vector<64x128xf32>
    %34 = arith.truncf %32 : vector<16x64xf32> to vector<16x64xbf16>
    %35 = arith.truncf %33 : vector<64x128xf32> to vector<64x128xbf16>
    %cst_16 = arith.constant dense<0.000000e+00> : vector<16x128xf32>
    %36 = tpu.matmul %34, %35, %cst_16 {dimension_numbers = #tpu.dot_dimension_numbers<[1], [0], [0], [1], [0, 0, 1, 1], [], []>} : vector<16x64xbf16>, vector<64x128xbf16>, vector<16x128xf32> -> vector<16x128xf32>
    %c0_17 = arith.constant 0 : index
    %c0_18 = arith.constant 0 : index
    %37 = vector.load %arg7[%c0_17, %c0_18] : memref<1x128xf32, #tpu.memory_space<vmem>>, vector<1x128xf32>
    %38 = vector.broadcast %37 : vector<1x128xf32> to vector<16x128xf32>
    %39 = arith.addf %36, %38 : vector<16x128xf32>
    %40 = math.tanh %39 : vector<16x128xf32>
    %c0_19 = arith.constant 0 : index
    %c0_20 = arith.constant 0 : index
    %41 = vector.load %arg8[%c0_19, %c0_20] : memref<1x128xf32, #tpu.memory_space<vmem>>, vector<1x128xf32>
    %c0_21 = arith.constant 0 : index
    %c0_22 = arith.constant 0 : index
    %42 = vector.load %arg9[%c0_21, %c0_22] : memref<1x128xf32, #tpu.memory_space<vmem>>, vector<1x128xf32>
    %cst_23 = arith.constant dense<0.000000e+00> : vector<16xf32>
    %43 = vector.multi_reduction <add>, %40, %cst_23 [1] : vector<16x128xf32> to vector<16xf32>
    %44 = vector.shape_cast %43 : vector<16xf32> to vector<16x1xf32>
    %cst_24 = arith.constant 1.280000e+02 : f32
    %45 = vector.broadcast %cst_24 : f32 to vector<16x1xf32>
    %46 = arith.divf %44, %45 : vector<16x1xf32>
    %47 = vector.broadcast %46 : vector<16x1xf32> to vector<16x128xf32>
    %48 = arith.subf %40, %47 : vector<16x128xf32>
    %49 = arith.mulf %48, %48 : vector<16x128xf32>
    %cst_25 = arith.constant dense<0.000000e+00> : vector<16xf32>
    %50 = vector.multi_reduction <add>, %49, %cst_25 [1] : vector<16x128xf32> to vector<16xf32>
    %51 = vector.shape_cast %50 : vector<16xf32> to vector<16x1xf32>
    %cst_26 = arith.constant 1.280000e+02 : f32
    %52 = vector.broadcast %cst_26 : f32 to vector<16x1xf32>
    %53 = arith.divf %51, %52 : vector<16x1xf32>
    %54 = vector.broadcast %46 : vector<16x1xf32> to vector<16x128xf32>
    %55 = arith.subf %40, %54 : vector<16x128xf32>
    %cst_27 = arith.constant 9.99999974E-6 : f32
    %56 = vector.broadcast %cst_27 : f32 to vector<16x1xf32>
    %57 = arith.addf %53, %56 : vector<16x1xf32>
    %58 = math.rsqrt %57 : vector<16x1xf32>
    %59 = vector.broadcast %58 : vector<16x1xf32> to vector<16x128xf32>
    %60 = arith.mulf %55, %59 : vector<16x128xf32>
    %61 = vector.broadcast %41 : vector<1x128xf32> to vector<16x128xf32>
    %62 = arith.mulf %60, %61 : vector<16x128xf32>
    %63 = vector.broadcast %42 : vector<1x128xf32> to vector<16x128xf32>
    %64 = arith.addf %62, %63 : vector<16x128xf32>
    %c0_28 = arith.constant 0 : index
    %c0_29 = arith.constant 0 : index
    %65 = vector.load %arg10[%c0_28, %c0_29] : memref<128x64xf32, #tpu.memory_space<vmem>>, vector<128x64xf32>
    %66 = arith.truncf %64 : vector<16x128xf32> to vector<16x128xbf16>
    %67 = arith.truncf %65 : vector<128x64xf32> to vector<128x64xbf16>
    %cst_30 = arith.constant dense<0.000000e+00> : vector<16x64xf32>
    %68 = tpu.matmul %66, %67, %cst_30 {dimension_numbers = #tpu.dot_dimension_numbers<[1], [0], [0], [1], [0, 0, 1, 1], [], []>} : vector<16x128xbf16>, vector<128x64xbf16>, vector<16x64xf32> -> vector<16x64xf32>
    %c0_31 = arith.constant 0 : index
    %c0_32 = arith.constant 0 : index
    %69 = vector.load %arg11[%c0_31, %c0_32] : memref<1x64xf32, #tpu.memory_space<vmem>>, vector<1x64xf32>
    %70 = vector.broadcast %69 : vector<1x64xf32> to vector<16x64xf32>
    %71 = arith.addf %68, %70 : vector<16x64xf32>
    %72 = math.tanh %71 : vector<16x64xf32>
    %c0_33 = arith.constant 0 : index
    %c0_34 = arith.constant 0 : index
    %73 = vector.load %arg12[%c0_33, %c0_34] : memref<1x64xf32, #tpu.memory_space<vmem>>, vector<1x64xf32>
    %c0_35 = arith.constant 0 : index
    %c0_36 = arith.constant 0 : index
    %74 = vector.load %arg13[%c0_35, %c0_36] : memref<1x64xf32, #tpu.memory_space<vmem>>, vector<1x64xf32>
    %cst_37 = arith.constant dense<0.000000e+00> : vector<16xf32>
    %75 = vector.multi_reduction <add>, %72, %cst_37 [1] : vector<16x64xf32> to vector<16xf32>
    %76 = vector.shape_cast %75 : vector<16xf32> to vector<16x1xf32>
    %cst_38 = arith.constant 6.400000e+01 : f32
    %77 = vector.broadcast %cst_38 : f32 to vector<16x1xf32>
    %78 = arith.divf %76, %77 : vector<16x1xf32>
    %79 = vector.broadcast %78 : vector<16x1xf32> to vector<16x64xf32>
    %80 = arith.subf %72, %79 : vector<16x64xf32>
    %81 = arith.mulf %80, %80 : vector<16x64xf32>
    %cst_39 = arith.constant dense<0.000000e+00> : vector<16xf32>
    %82 = vector.multi_reduction <add>, %81, %cst_39 [1] : vector<16x64xf32> to vector<16xf32>
    %83 = vector.shape_cast %82 : vector<16xf32> to vector<16x1xf32>
    %cst_40 = arith.constant 6.400000e+01 : f32
    %84 = vector.broadcast %cst_40 : f32 to vector<16x1xf32>
    %85 = arith.divf %83, %84 : vector<16x1xf32>
    %86 = vector.broadcast %78 : vector<16x1xf32> to vector<16x64xf32>
    %87 = arith.subf %72, %86 : vector<16x64xf32>
    %cst_41 = arith.constant 9.99999974E-6 : f32
    %88 = vector.broadcast %cst_41 : f32 to vector<16x1xf32>
    %89 = arith.addf %85, %88 : vector<16x1xf32>
    %90 = math.rsqrt %89 : vector<16x1xf32>
    %91 = vector.broadcast %90 : vector<16x1xf32> to vector<16x64xf32>
    %92 = arith.mulf %87, %91 : vector<16x64xf32>
    %93 = vector.broadcast %73 : vector<1x64xf32> to vector<16x64xf32>
    %94 = arith.mulf %92, %93 : vector<16x64xf32>
    %95 = vector.broadcast %74 : vector<1x64xf32> to vector<16x64xf32>
    %96 = arith.addf %94, %95 : vector<16x64xf32>
    %c0_42 = arith.constant 0 : index
    %c0_43 = arith.constant 0 : index
    %97 = vector.load %arg14[%c0_42, %c0_43] : memref<64x64xf32, #tpu.memory_space<vmem>>, vector<64x64xf32>
    %98 = arith.truncf %96 : vector<16x64xf32> to vector<16x64xbf16>
    %99 = arith.truncf %97 : vector<64x64xf32> to vector<64x64xbf16>
    %cst_44 = arith.constant dense<0.000000e+00> : vector<16x64xf32>
    %100 = tpu.matmul %98, %99, %cst_44 {dimension_numbers = #tpu.dot_dimension_numbers<[1], [0], [0], [1], [0, 0, 1, 1], [], []>} : vector<16x64xbf16>, vector<64x64xbf16>, vector<16x64xf32> -> vector<16x64xf32>
    %c0_45 = arith.constant 0 : index
    %c0_46 = arith.constant 0 : index
    %101 = vector.load %arg15[%c0_45, %c0_46] : memref<1x64xf32, #tpu.memory_space<vmem>>, vector<1x64xf32>
    %102 = vector.broadcast %101 : vector<1x64xf32> to vector<16x64xf32>
    %103 = arith.addf %100, %102 : vector<16x64xf32>
    %104 = math.tanh %103 : vector<16x64xf32>
    %c0_47 = arith.constant 0 : index
    %c0_48 = arith.constant 0 : index
    %105 = vector.load %arg16[%c0_47, %c0_48] : memref<1x64xf32, #tpu.memory_space<vmem>>, vector<1x64xf32>
    %c0_49 = arith.constant 0 : index
    %c0_50 = arith.constant 0 : index
    %106 = vector.load %arg17[%c0_49, %c0_50] : memref<1x64xf32, #tpu.memory_space<vmem>>, vector<1x64xf32>
    %cst_51 = arith.constant dense<0.000000e+00> : vector<16xf32>
    %107 = vector.multi_reduction <add>, %104, %cst_51 [1] : vector<16x64xf32> to vector<16xf32>
    %108 = vector.shape_cast %107 : vector<16xf32> to vector<16x1xf32>
    %cst_52 = arith.constant 6.400000e+01 : f32
    %109 = vector.broadcast %cst_52 : f32 to vector<16x1xf32>
    %110 = arith.divf %108, %109 : vector<16x1xf32>
    %111 = vector.broadcast %110 : vector<16x1xf32> to vector<16x64xf32>
    %112 = arith.subf %104, %111 : vector<16x64xf32>
    %113 = arith.mulf %112, %112 : vector<16x64xf32>
    %cst_53 = arith.constant dense<0.000000e+00> : vector<16xf32>
    %114 = vector.multi_reduction <add>, %113, %cst_53 [1] : vector<16x64xf32> to vector<16xf32>
    %115 = vector.shape_cast %114 : vector<16xf32> to vector<16x1xf32>
    %cst_54 = arith.constant 6.400000e+01 : f32
    %116 = vector.broadcast %cst_54 : f32 to vector<16x1xf32>
    %117 = arith.divf %115, %116 : vector<16x1xf32>
    %118 = vector.broadcast %110 : vector<16x1xf32> to vector<16x64xf32>
    %119 = arith.subf %104, %118 : vector<16x64xf32>
    %cst_55 = arith.constant 9.99999974E-6 : f32
    %120 = vector.broadcast %cst_55 : f32 to vector<16x1xf32>
    %121 = arith.addf %117, %120 : vector<16x1xf32>
    %122 = math.rsqrt %121 : vector<16x1xf32>
    %123 = vector.broadcast %122 : vector<16x1xf32> to vector<16x64xf32>
    %124 = arith.mulf %119, %123 : vector<16x64xf32>
    %125 = vector.broadcast %105 : vector<1x64xf32> to vector<16x64xf32>
    %126 = arith.mulf %124, %125 : vector<16x64xf32>
    %127 = vector.broadcast %106 : vector<1x64xf32> to vector<16x64xf32>
    %128 = arith.addf %126, %127 : vector<16x64xf32>
    %c0_56 = arith.constant 0 : index
    %c0_57 = arith.constant 0 : index
    %129 = vector.load %arg18[%c0_56, %c0_57] : memref<64x32xf32, #tpu.memory_space<vmem>>, vector<64x32xf32>
    %130 = arith.truncf %128 : vector<16x64xf32> to vector<16x64xbf16>
    %131 = arith.truncf %129 : vector<64x32xf32> to vector<64x32xbf16>
    %cst_58 = arith.constant dense<0.000000e+00> : vector<16x32xf32>
    %132 = tpu.matmul %130, %131, %cst_58 {dimension_numbers = #tpu.dot_dimension_numbers<[1], [0], [0], [1], [0, 0, 1, 1], [], []>} : vector<16x64xbf16>, vector<64x32xbf16>, vector<16x32xf32> -> vector<16x32xf32>
    %c0_59 = arith.constant 0 : index
    %c0_60 = arith.constant 0 : index
    %133 = vector.load %arg19[%c0_59, %c0_60] : memref<1x32xf32, #tpu.memory_space<vmem>>, vector<1x32xf32>
    %134 = vector.broadcast %133 : vector<1x32xf32> to vector<16x32xf32>
    %135 = arith.addf %132, %134 : vector<16x32xf32>
    %136 = math.tanh %135 : vector<16x32xf32>
    %c0_61 = arith.constant 0 : index
    %c0_62 = arith.constant 0 : index
    %137 = vector.load %arg20[%c0_61, %c0_62] : memref<1x32xf32, #tpu.memory_space<vmem>>, vector<1x32xf32>
    %c0_63 = arith.constant 0 : index
    %c0_64 = arith.constant 0 : index
    %138 = vector.load %arg21[%c0_63, %c0_64] : memref<1x32xf32, #tpu.memory_space<vmem>>, vector<1x32xf32>
    %cst_65 = arith.constant dense<0.000000e+00> : vector<16xf32>
    %139 = vector.multi_reduction <add>, %136, %cst_65 [1] : vector<16x32xf32> to vector<16xf32>
    %140 = vector.shape_cast %139 : vector<16xf32> to vector<16x1xf32>
    %cst_66 = arith.constant 3.200000e+01 : f32
    %141 = vector.broadcast %cst_66 : f32 to vector<16x1xf32>
    %142 = arith.divf %140, %141 : vector<16x1xf32>
    %143 = vector.broadcast %142 : vector<16x1xf32> to vector<16x32xf32>
    %144 = arith.subf %136, %143 : vector<16x32xf32>
    %145 = arith.mulf %144, %144 : vector<16x32xf32>
    %cst_67 = arith.constant dense<0.000000e+00> : vector<16xf32>
    %146 = vector.multi_reduction <add>, %145, %cst_67 [1] : vector<16x32xf32> to vector<16xf32>
    %147 = vector.shape_cast %146 : vector<16xf32> to vector<16x1xf32>
    %cst_68 = arith.constant 3.200000e+01 : f32
    %148 = vector.broadcast %cst_68 : f32 to vector<16x1xf32>
    %149 = arith.divf %147, %148 : vector<16x1xf32>
    %150 = vector.broadcast %142 : vector<16x1xf32> to vector<16x32xf32>
    %151 = arith.subf %136, %150 : vector<16x32xf32>
    %cst_69 = arith.constant 9.99999974E-6 : f32
    %152 = vector.broadcast %cst_69 : f32 to vector<16x1xf32>
    %153 = arith.addf %149, %152 : vector<16x1xf32>
    %154 = math.rsqrt %153 : vector<16x1xf32>
    %155 = vector.broadcast %154 : vector<16x1xf32> to vector<16x32xf32>
    %156 = arith.mulf %151, %155 : vector<16x32xf32>
    %157 = vector.broadcast %137 : vector<1x32xf32> to vector<16x32xf32>
    %158 = arith.mulf %156, %157 : vector<16x32xf32>
    %159 = vector.broadcast %138 : vector<1x32xf32> to vector<16x32xf32>
    %160 = arith.addf %158, %159 : vector<16x32xf32>
    %c0_70 = arith.constant 0 : index
    %c0_71 = arith.constant 0 : index
    %161 = vector.load %arg22[%c0_70, %c0_71] : memref<16x32xf32, #tpu.memory_space<vmem>>, vector<16x32xf32>
    tpu.vector_store %arg22[%c0_70, %c0_71], %160 {strides = array<i32>} : memref<16x32xf32, #tpu.memory_space<vmem>>, vector<16x32xf32>,
    return
  }
  func.func @transform_0(%arg0: i32) -> (i32, i32) {
    %c0_i32 = arith.constant 0 : i32
    %c0_i32_0 = arith.constant 0 : i32
    return %arg0, %c0_i32 : i32, i32
  }
  func.func @transform_1(%arg0: i32) -> (i32, i32) {
    %c0_i32 = arith.constant 0 : i32
    %c0_i32_0 = arith.constant 0 : i32
    %c0_i32_1 = arith.constant 0 : i32
    return %c0_i32, %c0_i32_0 : i32, i32
  }
  func.func @transform_2(%arg0: i32) -> (i32, i32) {
    %c0_i32 = arith.constant 0 : i32
    %c0_i32_0 = arith.constant 0 : i32
    %c0_i32_1 = arith.constant 0 : i32
    return %c0_i32, %c0_i32_0 : i32, i32
  }
  func.func @transform_3(%arg0: i32) -> (i32, i32) {
    %c0_i32 = arith.constant 0 : i32
    %c0_i32_0 = arith.constant 0 : i32
    %c0_i32_1 = arith.constant 0 : i32
    return %c0_i32, %c0_i32_0 : i32, i32
  }
  func.func @transform_4(%arg0: i32) -> (i32, i32) {
    %c0_i32 = arith.constant 0 : i32
    %c0_i32_0 = arith.constant 0 : i32
    %c0_i32_1 = arith.constant 0 : i32
    return %c0_i32, %c0_i32_0 : i32, i32
  }
  func.func @transform_5(%arg0: i32) -> (i32, i32) {
    %c0_i32 = arith.constant 0 : i32
    %c0_i32_0 = arith.constant 0 : i32
    %c0_i32_1 = arith.constant 0 : i32
    return %c0_i32, %c0_i32_0 : i32, i32
  }
  func.func @transform_6(%arg0: i32) -> (i32, i32) {
    %c0_i32 = arith.constant 0 : i32
    %c0_i32_0 = arith.constant 0 : i32
    %c0_i32_1 = arith.constant 0 : i32
    return %c0_i32, %c0_i32_0 : i32, i32
  }
  func.func @transform_7(%arg0: i32) -> (i32, i32) {
    %c0_i32 = arith.constant 0 : i32
    %c0_i32_0 = arith.constant 0 : i32
    %c0_i32_1 = arith.constant 0 : i32
    return %c0_i32, %c0_i32_0 : i32, i32
  }
  func.func @transform_8(%arg0: i32) -> (i32, i32) {
    %c0_i32 = arith.constant 0 : i32
    %c0_i32_0 = arith.constant 0 : i32
    %c0_i32_1 = arith.constant 0 : i32
    return %c0_i32, %c0_i32_0 : i32, i32
  }
  func.func @transform_9(%arg0: i32) -> (i32, i32) {
    %c0_i32 = arith.constant 0 : i32
    %c0_i32_0 = arith.constant 0 : i32
    %c0_i32_1 = arith.constant 0 : i32
    return %c0_i32, %c0_i32_0 : i32, i32
  }
  func.func @transform_10(%arg0: i32) -> (i32, i32) {
    %c0_i32 = arith.constant 0 : i32
    %c0_i32_0 = arith.constant 0 : i32
    %c0_i32_1 = arith.constant 0 : i32
    return %c0_i32, %c0_i32_0 : i32, i32
  }
  func.func @transform_11(%arg0: i32) -> (i32, i32) {
    %c0_i32 = arith.constant 0 : i32
    %c0_i32_0 = arith.constant 0 : i32
    %c0_i32_1 = arith.constant 0 : i32
    return %c0_i32, %c0_i32_0 : i32, i32
  }
  func.func @transform_12(%arg0: i32) -> (i32, i32) {
    %c0_i32 = arith.constant 0 : i32
    %c0_i32_0 = arith.constant 0 : i32
    %c0_i32_1 = arith.constant 0 : i32
    return %c0_i32, %c0_i32_0 : i32, i32
  }
  func.func @transform_13(%arg0: i32) -> (i32, i32) {
    %c0_i32 = arith.constant 0 : i32
    %c0_i32_0 = arith.constant 0 : i32
    %c0_i32_1 = arith.constant 0 : i32
    return %c0_i32, %c0_i32_0 : i32, i32
  }
  func.func @transform_14(%arg0: i32) -> (i32, i32) {
    %c0_i32 = arith.constant 0 : i32
    %c0_i32_0 = arith.constant 0 : i32
    %c0_i32_1 = arith.constant 0 : i32
    return %c0_i32, %c0_i32_0 : i32, i32
  }
  func.func @transform_15(%arg0: i32) -> (i32, i32) {
    %c0_i32 = arith.constant 0 : i32
    %c0_i32_0 = arith.constant 0 : i32
    %c0_i32_1 = arith.constant 0 : i32
    return %c0_i32, %c0_i32_0 : i32, i32
  }
  func.func @transform_16(%arg0: i32) -> (i32, i32) {
    %c0_i32 = arith.constant 0 : i32
    %c0_i32_0 = arith.constant 0 : i32
    %c0_i32_1 = arith.constant 0 : i32
    return %c0_i32, %c0_i32_0 : i32, i32
  }
  func.func @transform_17(%arg0: i32) -> (i32, i32) {
    %c0_i32 = arith.constant 0 : i32
    %c0_i32_0 = arith.constant 0 : i32
    %c0_i32_1 = arith.constant 0 : i32
    return %c0_i32, %c0_i32_0 : i32, i32
  }
  func.func @transform_18(%arg0: i32) -> (i32, i32) {
    %c0_i32 = arith.constant 0 : i32
    %c0_i32_0 = arith.constant 0 : i32
    %c0_i32_1 = arith.constant 0 : i32
    return %c0_i32, %c0_i32_0 : i32, i32
  }
  func.func @transform_19(%arg0: i32) -> (i32, i32) {
    %c0_i32 = arith.constant 0 : i32
    %c0_i32_0 = arith.constant 0 : i32
    %c0_i32_1 = arith.constant 0 : i32
    return %c0_i32, %c0_i32_0 : i32, i32
  }
  func.func @transform_20(%arg0: i32) -> (i32, i32) {
    %c0_i32 = arith.constant 0 : i32
    %c0_i32_0 = arith.constant 0 : i32
    %c0_i32_1 = arith.constant 0 : i32
    return %c0_i32, %c0_i32_0 : i32, i32
  }
  func.func @transform_21(%arg0: i32) -> (i32, i32) {
    %c0_i32 = arith.constant 0 : i32
    %c0_i32_0 = arith.constant 0 : i32
    return %arg0, %c0_i32 : i32, i32
  }
}

module attributes {stable_mosaic.version = 11 : i64} {
  func.func @_encoder_layer_kernel(%arg0: i32, %arg1: memref<1x8x32xf32, #tpu.memory_space<vmem>>, %arg2: memref<1x8x24xf32, #tpu.memory_space<vmem>>, %arg3: memref<32x96xf32, #tpu.memory_space<vmem>>, %arg4: memref<1x96xf32, #tpu.memory_space<vmem>>, %arg5: memref<32x32xf32, #tpu.memory_space<vmem>>, %arg6: memref<1x32xf32, #tpu.memory_space<vmem>>, %arg7: memref<1x32xf32, #tpu.memory_space<vmem>>, %arg8: memref<1x32xf32, #tpu.memory_space<vmem>>, %arg9: memref<32x2048xf32, #tpu.memory_space<vmem>>, %arg10: memref<1x2048xf32, #tpu.memory_space<vmem>>, %arg11: memref<2048x32xf32, #tpu.memory_space<vmem>>, %arg12: memref<1x32xf32, #tpu.memory_space<vmem>>, %arg13: memref<1x32xf32, #tpu.memory_space<vmem>>, %arg14: memref<1x32xf32, #tpu.memory_space<vmem>>, %arg15: memref<24x32xf32, #tpu.memory_space<vmem>>, %arg16: memref<1x32xf32, #tpu.memory_space<vmem>>, %arg17: memref<1x8x32xf32, #tpu.memory_space<vmem>>) attributes {dimension_semantics = [#tpu.dimension_semantics<parallel>], iteration_bounds = array<i64: 2>, scalar_prefetch = 0 : i64, scratch_operands = 0 : i64, tpu.core_type = #tpu.core_type<tc>, window_params = [{transform_indices = @transform_0, window_bounds = array<i64: 1, 8, 32>}, {transform_indices = @transform_1, window_bounds = array<i64: 1, 8, 24>}, {pipeline_mode = #tpu.pipeline_mode<synchronous>, transform_indices = @transform_2, window_bounds = array<i64: 32, 96>}, {pipeline_mode = #tpu.pipeline_mode<synchronous>, transform_indices = @transform_3, window_bounds = array<i64: 1, 96>}, {pipeline_mode = #tpu.pipeline_mode<synchronous>, transform_indices = @transform_4, window_bounds = array<i64: 32, 32>}, {pipeline_mode = #tpu.pipeline_mode<synchronous>, transform_indices = @transform_5, window_bounds = array<i64: 1, 32>}, {pipeline_mode = #tpu.pipeline_mode<synchronous>, transform_indices = @transform_6, window_bounds = array<i64: 1, 32>}, {pipeline_mode = #tpu.pipeline_mode<synchronous>, transform_indices = @transform_7, window_bounds = array<i64: 1, 32>}, {pipeline_mode = #tpu.pipeline_mode<synchronous>, transform_indices = @transform_8, window_bounds = array<i64: 32, 2048>}, {pipeline_mode = #tpu.pipeline_mode<synchronous>, transform_indices = @transform_9, window_bounds = array<i64: 1, 2048>}, {pipeline_mode = #tpu.pipeline_mode<synchronous>, transform_indices = @transform_10, window_bounds = array<i64: 2048, 32>}, {pipeline_mode = #tpu.pipeline_mode<synchronous>, transform_indices = @transform_11, window_bounds = array<i64: 1, 32>}, {pipeline_mode = #tpu.pipeline_mode<synchronous>, transform_indices = @transform_12, window_bounds = array<i64: 1, 32>}, {pipeline_mode = #tpu.pipeline_mode<synchronous>, transform_indices = @transform_13, window_bounds = array<i64: 1, 32>}, {pipeline_mode = #tpu.pipeline_mode<synchronous>, transform_indices = @transform_14, window_bounds = array<i64: 24, 32>}, {pipeline_mode = #tpu.pipeline_mode<synchronous>, transform_indices = @transform_15, window_bounds = array<i64: 1, 32>}, {transform_indices = @transform_16, window_bounds = array<i64: 1, 8, 32>}]} {
    %c0 = arith.constant 0 : index
    %c0_0 = arith.constant 0 : index
    %c0_1 = arith.constant 0 : index
    %0 = vector.load %arg1[%c0, %c0_0, %c0_1] : memref<1x8x32xf32, #tpu.memory_space<vmem>>, vector<1x8x32xf32>
    %1 = vector.shape_cast %0 : vector<1x8x32xf32> to vector<8x32xf32>
    %c0_2 = arith.constant 0 : index
    %c0_3 = arith.constant 0 : index
    %2 = vector.load %arg3[%c0_2, %c0_3] : memref<32x96xf32, #tpu.memory_space<vmem>>, vector<32x96xf32>
    %3 = arith.truncf %1 : vector<8x32xf32> to vector<8x32xbf16>
    %4 = arith.truncf %2 : vector<32x96xf32> to vector<32x96xbf16>
    %cst = arith.constant dense<0.000000e+00> : vector<8x96xf32>
    %5 = tpu.matmul %3, %4, %cst {dimension_numbers = #tpu.dot_dimension_numbers<[1], [0], [0], [1], [0, 0, 1, 1], [], []>} : vector<8x32xbf16>, vector<32x96xbf16>, vector<8x96xf32> -> vector<8x96xf32>
    %c0_4 = arith.constant 0 : index
    %c0_5 = arith.constant 0 : index
    %6 = vector.load %arg4[%c0_4, %c0_5] : memref<1x96xf32, #tpu.memory_space<vmem>>, vector<1x96xf32>
    %7 = vector.broadcast %6 : vector<1x96xf32> to vector<8x96xf32>
    %8 = arith.addf %5, %7 : vector<8x96xf32>
    %9 = vector.extract_strided_slice %8 {offsets = [0, 0], sizes = [8, 32], strides = [1, 1]} : vector<8x96xf32> to vector<8x32xf32>
    %10 = vector.extract_strided_slice %8 {offsets = [0, 32], sizes = [8, 32], strides = [1, 1]} : vector<8x96xf32> to vector<8x32xf32>
    %11 = vector.extract_strided_slice %8 {offsets = [0, 64], sizes = [8, 32], strides = [1, 1]} : vector<8x96xf32> to vector<8x32xf32>
    %12 = vector.extract_strided_slice %9 {offsets = [0, 0], sizes = [8, 16], strides = [1, 1]} : vector<8x32xf32> to vector<8x16xf32>
    %13 = vector.extract_strided_slice %10 {offsets = [0, 0], sizes = [8, 16], strides = [1, 1]} : vector<8x32xf32> to vector<8x16xf32>
    %14 = arith.truncf %12 : vector<8x16xf32> to vector<8x16xbf16>
    %15 = arith.truncf %13 : vector<8x16xf32> to vector<8x16xbf16>
    %cst_6 = arith.constant dense<0.000000e+00> : vector<8x8xf32>
    %16 = tpu.matmul %14, %15, %cst_6 {dimension_numbers = #tpu.dot_dimension_numbers<[1], [1], [0], [0], [0, 0, 1, 0], [], []>} : vector<8x16xbf16>, vector<8x16xbf16>, vector<8x8xf32> -> vector<8x8xf32>
    %cst_7 = arith.constant 2.500000e-01 : f32
    %17 = vector.broadcast %cst_7 : f32 to vector<8x8xf32>
    %18 = arith.mulf %16, %17 : vector<8x8xf32>
    %cst_8 = arith.constant dense<0xFF800000> : vector<8xf32>
    %19 = vector.multi_reduction <maximumf>, %18, %cst_8 [1] : vector<8x8xf32> to vector<8xf32>
    %20 = vector.shape_cast %19 : vector<8xf32> to vector<8x1xf32>
    %21 = vector.broadcast %20 : vector<8x1xf32> to vector<8x8xf32>
    %22 = arith.subf %18, %21 : vector<8x8xf32>
    %23 = math.exp %22 : vector<8x8xf32>
    %cst_9 = arith.constant dense<0.000000e+00> : vector<8xf32>
    %24 = vector.multi_reduction <add>, %23, %cst_9 [1] : vector<8x8xf32> to vector<8xf32>
    %25 = vector.shape_cast %24 : vector<8xf32> to vector<8x1xf32>
    %26 = tpu.reciprocal %25 {approx = true} : vector<8x1xf32> -> vector<8x1xf32>
    %27 = vector.broadcast %26 : vector<8x1xf32> to vector<8x8xf32>
    %28 = arith.mulf %23, %27 : vector<8x8xf32>
    %29 = vector.extract_strided_slice %11 {offsets = [0, 0], sizes = [8, 16], strides = [1, 1]} : vector<8x32xf32> to vector<8x16xf32>
    %30 = arith.truncf %28 : vector<8x8xf32> to vector<8x8xbf16>
    %31 = arith.truncf %29 : vector<8x16xf32> to vector<8x16xbf16>
    %cst_10 = arith.constant dense<0.000000e+00> : vector<8x16xf32>
    %32 = tpu.matmul %30, %31, %cst_10 {dimension_numbers = #tpu.dot_dimension_numbers<[1], [0], [0], [1], [0, 0, 1, 1], [], []>} : vector<8x8xbf16>, vector<8x16xbf16>, vector<8x16xf32> -> vector<8x16xf32>
    %33 = vector.extract_strided_slice %9 {offsets = [0, 16], sizes = [8, 16], strides = [1, 1]} : vector<8x32xf32> to vector<8x16xf32>
    %34 = vector.extract_strided_slice %10 {offsets = [0, 16], sizes = [8, 16], strides = [1, 1]} : vector<8x32xf32> to vector<8x16xf32>
    %35 = arith.truncf %33 : vector<8x16xf32> to vector<8x16xbf16>
    %36 = arith.truncf %34 : vector<8x16xf32> to vector<8x16xbf16>
    %cst_11 = arith.constant dense<0.000000e+00> : vector<8x8xf32>
    %37 = tpu.matmul %35, %36, %cst_11 {dimension_numbers = #tpu.dot_dimension_numbers<[1], [1], [0], [0], [0, 0, 1, 0], [], []>} : vector<8x16xbf16>, vector<8x16xbf16>, vector<8x8xf32> -> vector<8x8xf32>
    %cst_12 = arith.constant 2.500000e-01 : f32
    %38 = vector.broadcast %cst_12 : f32 to vector<8x8xf32>
    %39 = arith.mulf %37, %38 : vector<8x8xf32>
    %cst_13 = arith.constant dense<0xFF800000> : vector<8xf32>
    %40 = vector.multi_reduction <maximumf>, %39, %cst_13 [1] : vector<8x8xf32> to vector<8xf32>
    %41 = vector.shape_cast %40 : vector<8xf32> to vector<8x1xf32>
    %42 = vector.broadcast %41 : vector<8x1xf32> to vector<8x8xf32>
    %43 = arith.subf %39, %42 : vector<8x8xf32>
    %44 = math.exp %43 : vector<8x8xf32>
    %cst_14 = arith.constant dense<0.000000e+00> : vector<8xf32>
    %45 = vector.multi_reduction <add>, %44, %cst_14 [1] : vector<8x8xf32> to vector<8xf32>
    %46 = vector.shape_cast %45 : vector<8xf32> to vector<8x1xf32>
    %47 = tpu.reciprocal %46 {approx = true} : vector<8x1xf32> -> vector<8x1xf32>
    %48 = vector.broadcast %47 : vector<8x1xf32> to vector<8x8xf32>
    %49 = arith.mulf %44, %48 : vector<8x8xf32>
    %50 = vector.extract_strided_slice %11 {offsets = [0, 16], sizes = [8, 16], strides = [1, 1]} : vector<8x32xf32> to vector<8x16xf32>
    %51 = arith.truncf %49 : vector<8x8xf32> to vector<8x8xbf16>
    %52 = arith.truncf %50 : vector<8x16xf32> to vector<8x16xbf16>
    %cst_15 = arith.constant dense<0.000000e+00> : vector<8x16xf32>
    %53 = tpu.matmul %51, %52, %cst_15 {dimension_numbers = #tpu.dot_dimension_numbers<[1], [0], [0], [1], [0, 0, 1, 1], [], []>} : vector<8x8xbf16>, vector<8x16xbf16>, vector<8x16xf32> -> vector<8x16xf32>
    %54 = tpu.concatenate %32, %53 in 1 : vector<8x16xf32>, vector<8x16xf32> -> vector<8x32xf32>
    %c0_16 = arith.constant 0 : index
    %c0_17 = arith.constant 0 : index
    %55 = vector.load %arg5[%c0_16, %c0_17] : memref<32x32xf32, #tpu.memory_space<vmem>>, vector<32x32xf32>
    %56 = arith.truncf %54 : vector<8x32xf32> to vector<8x32xbf16>
    %57 = arith.truncf %55 : vector<32x32xf32> to vector<32x32xbf16>
    %cst_18 = arith.constant dense<0.000000e+00> : vector<8x32xf32>
    %58 = tpu.matmul %56, %57, %cst_18 {dimension_numbers = #tpu.dot_dimension_numbers<[1], [0], [0], [1], [0, 0, 1, 1], [], []>} : vector<8x32xbf16>, vector<32x32xbf16>, vector<8x32xf32> -> vector<8x32xf32>
    %c0_19 = arith.constant 0 : index
    %c0_20 = arith.constant 0 : index
    %59 = vector.load %arg6[%c0_19, %c0_20] : memref<1x32xf32, #tpu.memory_space<vmem>>, vector<1x32xf32>
    %60 = vector.broadcast %59 : vector<1x32xf32> to vector<8x32xf32>
    %61 = arith.addf %58, %60 : vector<8x32xf32>
    %62 = arith.addf %1, %61 : vector<8x32xf32>
    %c0_21 = arith.constant 0 : index
    %c0_22 = arith.constant 0 : index
    %63 = vector.load %arg7[%c0_21, %c0_22] : memref<1x32xf32, #tpu.memory_space<vmem>>, vector<1x32xf32>
    %c0_23 = arith.constant 0 : index
    %c0_24 = arith.constant 0 : index
    %64 = vector.load %arg8[%c0_23, %c0_24] : memref<1x32xf32, #tpu.memory_space<vmem>>, vector<1x32xf32>
    %cst_25 = arith.constant dense<0.000000e+00> : vector<8xf32>
    %65 = vector.multi_reduction <add>, %62, %cst_25 [1] : vector<8x32xf32> to vector<8xf32>
    %66 = vector.shape_cast %65 : vector<8xf32> to vector<8x1xf32>
    %cst_26 = arith.constant 3.200000e+01 : f32
    %67 = vector.broadcast %cst_26 : f32 to vector<8x1xf32>
    %68 = arith.divf %66, %67 : vector<8x1xf32>
    %69 = vector.broadcast %68 : vector<8x1xf32> to vector<8x32xf32>
    %70 = arith.subf %62, %69 : vector<8x32xf32>
    %71 = arith.mulf %70, %70 : vector<8x32xf32>
    %cst_27 = arith.constant dense<0.000000e+00> : vector<8xf32>
    %72 = vector.multi_reduction <add>, %71, %cst_27 [1] : vector<8x32xf32> to vector<8xf32>
    %73 = vector.shape_cast %72 : vector<8xf32> to vector<8x1xf32>
    %cst_28 = arith.constant 3.200000e+01 : f32
    %74 = vector.broadcast %cst_28 : f32 to vector<8x1xf32>
    %75 = arith.divf %73, %74 : vector<8x1xf32>
    %76 = vector.broadcast %68 : vector<8x1xf32> to vector<8x32xf32>
    %77 = arith.subf %62, %76 : vector<8x32xf32>
    %cst_29 = arith.constant 9.99999974E-6 : f32
    %78 = vector.broadcast %cst_29 : f32 to vector<8x1xf32>
    %79 = arith.addf %75, %78 : vector<8x1xf32>
    %80 = math.rsqrt %79 : vector<8x1xf32>
    %81 = vector.broadcast %80 : vector<8x1xf32> to vector<8x32xf32>
    %82 = arith.mulf %77, %81 : vector<8x32xf32>
    %83 = vector.broadcast %63 : vector<1x32xf32> to vector<8x32xf32>
    %84 = arith.mulf %82, %83 : vector<8x32xf32>
    %85 = vector.broadcast %64 : vector<1x32xf32> to vector<8x32xf32>
    %86 = arith.addf %84, %85 : vector<8x32xf32>
    %c0_30 = arith.constant 0 : index
    %c0_31 = arith.constant 0 : index
    %87 = vector.load %arg9[%c0_30, %c0_31] : memref<32x2048xf32, #tpu.memory_space<vmem>>, vector<32x2048xf32>
    %88 = arith.truncf %86 : vector<8x32xf32> to vector<8x32xbf16>
    %89 = arith.truncf %87 : vector<32x2048xf32> to vector<32x2048xbf16>
    %cst_32 = arith.constant dense<0.000000e+00> : vector<8x2048xf32>
    %90 = tpu.matmul %88, %89, %cst_32 {dimension_numbers = #tpu.dot_dimension_numbers<[1], [0], [0], [1], [0, 0, 1, 1], [], []>} : vector<8x32xbf16>, vector<32x2048xbf16>, vector<8x2048xf32> -> vector<8x2048xf32>
    %c0_33 = arith.constant 0 : index
    %c0_34 = arith.constant 0 : index
    %91 = vector.load %arg10[%c0_33, %c0_34] : memref<1x2048xf32, #tpu.memory_space<vmem>>, vector<1x2048xf32>
    %92 = vector.broadcast %91 : vector<1x2048xf32> to vector<8x2048xf32>
    %93 = arith.addf %90, %92 : vector<8x2048xf32>
    %cst_35 = arith.constant 0.000000e+00 : f32
    %94 = vector.broadcast %cst_35 : f32 to vector<8x2048xf32>
    %95 = arith.maximumf %93, %94 : vector<8x2048xf32>
    %c0_36 = arith.constant 0 : index
    %c0_37 = arith.constant 0 : index
    %96 = vector.load %arg11[%c0_36, %c0_37] : memref<2048x32xf32, #tpu.memory_space<vmem>>, vector<2048x32xf32>
    %97 = arith.truncf %95 : vector<8x2048xf32> to vector<8x2048xbf16>
    %98 = arith.truncf %96 : vector<2048x32xf32> to vector<2048x32xbf16>
    %cst_38 = arith.constant dense<0.000000e+00> : vector<8x32xf32>
    %99 = tpu.matmul %97, %98, %cst_38 {dimension_numbers = #tpu.dot_dimension_numbers<[1], [0], [0], [1], [0, 0, 1, 1], [], []>} : vector<8x2048xbf16>, vector<2048x32xbf16>, vector<8x32xf32> -> vector<8x32xf32>
    %c0_39 = arith.constant 0 : index
    %c0_40 = arith.constant 0 : index
    %100 = vector.load %arg12[%c0_39, %c0_40] : memref<1x32xf32, #tpu.memory_space<vmem>>, vector<1x32xf32>
    %101 = vector.broadcast %100 : vector<1x32xf32> to vector<8x32xf32>
    %102 = arith.addf %99, %101 : vector<8x32xf32>
    %103 = arith.addf %86, %102 : vector<8x32xf32>
    %c0_41 = arith.constant 0 : index
    %c0_42 = arith.constant 0 : index
    %104 = vector.load %arg13[%c0_41, %c0_42] : memref<1x32xf32, #tpu.memory_space<vmem>>, vector<1x32xf32>
    %c0_43 = arith.constant 0 : index
    %c0_44 = arith.constant 0 : index
    %105 = vector.load %arg14[%c0_43, %c0_44] : memref<1x32xf32, #tpu.memory_space<vmem>>, vector<1x32xf32>
    %cst_45 = arith.constant dense<0.000000e+00> : vector<8xf32>
    %106 = vector.multi_reduction <add>, %103, %cst_45 [1] : vector<8x32xf32> to vector<8xf32>
    %107 = vector.shape_cast %106 : vector<8xf32> to vector<8x1xf32>
    %cst_46 = arith.constant 3.200000e+01 : f32
    %108 = vector.broadcast %cst_46 : f32 to vector<8x1xf32>
    %109 = arith.divf %107, %108 : vector<8x1xf32>
    %110 = vector.broadcast %109 : vector<8x1xf32> to vector<8x32xf32>
    %111 = arith.subf %103, %110 : vector<8x32xf32>
    %112 = arith.mulf %111, %111 : vector<8x32xf32>
    %cst_47 = arith.constant dense<0.000000e+00> : vector<8xf32>
    %113 = vector.multi_reduction <add>, %112, %cst_47 [1] : vector<8x32xf32> to vector<8xf32>
    %114 = vector.shape_cast %113 : vector<8xf32> to vector<8x1xf32>
    %cst_48 = arith.constant 3.200000e+01 : f32
    %115 = vector.broadcast %cst_48 : f32 to vector<8x1xf32>
    %116 = arith.divf %114, %115 : vector<8x1xf32>
    %117 = vector.broadcast %109 : vector<8x1xf32> to vector<8x32xf32>
    %118 = arith.subf %103, %117 : vector<8x32xf32>
    %cst_49 = arith.constant 9.99999974E-6 : f32
    %119 = vector.broadcast %cst_49 : f32 to vector<8x1xf32>
    %120 = arith.addf %116, %119 : vector<8x1xf32>
    %121 = math.rsqrt %120 : vector<8x1xf32>
    %122 = vector.broadcast %121 : vector<8x1xf32> to vector<8x32xf32>
    %123 = arith.mulf %118, %122 : vector<8x32xf32>
    %124 = vector.broadcast %104 : vector<1x32xf32> to vector<8x32xf32>
    %125 = arith.mulf %123, %124 : vector<8x32xf32>
    %126 = vector.broadcast %105 : vector<1x32xf32> to vector<8x32xf32>
    %127 = arith.addf %125, %126 : vector<8x32xf32>
    %c0_50 = arith.constant 0 : index
    %c0_51 = arith.constant 0 : index
    %c0_52 = arith.constant 0 : index
    %128 = vector.load %arg2[%c0_50, %c0_51, %c0_52] : memref<1x8x24xf32, #tpu.memory_space<vmem>>, vector<1x8x24xf32>
    %129 = vector.shape_cast %128 : vector<1x8x24xf32> to vector<8x24xf32>
    %c0_53 = arith.constant 0 : index
    %c0_54 = arith.constant 0 : index
    %130 = vector.load %arg15[%c0_53, %c0_54] : memref<24x32xf32, #tpu.memory_space<vmem>>, vector<24x32xf32>
    %131 = arith.truncf %129 : vector<8x24xf32> to vector<8x24xbf16>
    %132 = arith.truncf %130 : vector<24x32xf32> to vector<24x32xbf16>
    %cst_55 = arith.constant dense<0.000000e+00> : vector<8x32xf32>
    %133 = tpu.matmul %131, %132, %cst_55 {dimension_numbers = #tpu.dot_dimension_numbers<[1], [0], [0], [1], [0, 0, 1, 1], [], []>} : vector<8x24xbf16>, vector<24x32xbf16>, vector<8x32xf32> -> vector<8x32xf32>
    %c0_56 = arith.constant 0 : index
    %c0_57 = arith.constant 0 : index
    %134 = vector.load %arg16[%c0_56, %c0_57] : memref<1x32xf32, #tpu.memory_space<vmem>>, vector<1x32xf32>
    %135 = vector.broadcast %134 : vector<1x32xf32> to vector<8x32xf32>
    %136 = arith.addf %133, %135 : vector<8x32xf32>
    %cst_58 = arith.constant 0.000000e+00 : f32
    %137 = vector.broadcast %cst_58 : f32 to vector<8x32xf32>
    %138 = arith.maximumf %136, %137 : vector<8x32xf32>
    %139 = arith.addf %127, %138 : vector<8x32xf32>
    %c0_59 = arith.constant 0 : index
    %c0_60 = arith.constant 0 : index
    %c0_61 = arith.constant 0 : index
    %140 = vector.load %arg17[%c0_59, %c0_60, %c0_61] : memref<1x8x32xf32, #tpu.memory_space<vmem>>, vector<1x8x32xf32>
    %141 = vector.shape_cast %140 : vector<1x8x32xf32> to vector<8x32xf32>
    %142 = vector.shape_cast %139 : vector<8x32xf32> to vector<1x8x32xf32>
    tpu.vector_store %arg17[%c0_59, %c0_60, %c0_61], %142 {strides = array<i32>} : memref<1x8x32xf32, #tpu.memory_space<vmem>>, vector<1x8x32xf32>,
    return
  }
  func.func @transform_0(%arg0: i32) -> (i32, i32, i32) {
    %c0_i32 = arith.constant 0 : i32
    %c0_i32_0 = arith.constant 0 : i32
    %c0_i32_1 = arith.constant 0 : i32
    return %arg0, %c0_i32, %c0_i32_0 : i32, i32, i32
  }
  func.func @transform_1(%arg0: i32) -> (i32, i32, i32) {
    %c0_i32 = arith.constant 0 : i32
    %c0_i32_0 = arith.constant 0 : i32
    %c0_i32_1 = arith.constant 0 : i32
    return %arg0, %c0_i32, %c0_i32_0 : i32, i32, i32
  }
  func.func @transform_2(%arg0: i32) -> (i32, i32) {
    %c0_i32 = arith.constant 0 : i32
    %c0_i32_0 = arith.constant 0 : i32
    %c0_i32_1 = arith.constant 0 : i32
    return %c0_i32, %c0_i32_0 : i32, i32
  }
  func.func @transform_3(%arg0: i32) -> (i32, i32) {
    %c0_i32 = arith.constant 0 : i32
    %c0_i32_0 = arith.constant 0 : i32
    %c0_i32_1 = arith.constant 0 : i32
    return %c0_i32, %c0_i32_0 : i32, i32
  }
  func.func @transform_4(%arg0: i32) -> (i32, i32) {
    %c0_i32 = arith.constant 0 : i32
    %c0_i32_0 = arith.constant 0 : i32
    %c0_i32_1 = arith.constant 0 : i32
    return %c0_i32, %c0_i32_0 : i32, i32
  }
  func.func @transform_5(%arg0: i32) -> (i32, i32) {
    %c0_i32 = arith.constant 0 : i32
    %c0_i32_0 = arith.constant 0 : i32
    %c0_i32_1 = arith.constant 0 : i32
    return %c0_i32, %c0_i32_0 : i32, i32
  }
  func.func @transform_6(%arg0: i32) -> (i32, i32) {
    %c0_i32 = arith.constant 0 : i32
    %c0_i32_0 = arith.constant 0 : i32
    %c0_i32_1 = arith.constant 0 : i32
    return %c0_i32, %c0_i32_0 : i32, i32
  }
  func.func @transform_7(%arg0: i32) -> (i32, i32) {
    %c0_i32 = arith.constant 0 : i32
    %c0_i32_0 = arith.constant 0 : i32
    %c0_i32_1 = arith.constant 0 : i32
    return %c0_i32, %c0_i32_0 : i32, i32
  }
  func.func @transform_8(%arg0: i32) -> (i32, i32) {
    %c0_i32 = arith.constant 0 : i32
    %c0_i32_0 = arith.constant 0 : i32
    %c0_i32_1 = arith.constant 0 : i32
    return %c0_i32, %c0_i32_0 : i32, i32
  }
  func.func @transform_9(%arg0: i32) -> (i32, i32) {
    %c0_i32 = arith.constant 0 : i32
    %c0_i32_0 = arith.constant 0 : i32
    %c0_i32_1 = arith.constant 0 : i32
    return %c0_i32, %c0_i32_0 : i32, i32
  }
  func.func @transform_10(%arg0: i32) -> (i32, i32) {
    %c0_i32 = arith.constant 0 : i32
    %c0_i32_0 = arith.constant 0 : i32
    %c0_i32_1 = arith.constant 0 : i32
    return %c0_i32, %c0_i32_0 : i32, i32
  }
  func.func @transform_11(%arg0: i32) -> (i32, i32) {
    %c0_i32 = arith.constant 0 : i32
    %c0_i32_0 = arith.constant 0 : i32
    %c0_i32_1 = arith.constant 0 : i32
    return %c0_i32, %c0_i32_0 : i32, i32
  }
  func.func @transform_12(%arg0: i32) -> (i32, i32) {
    %c0_i32 = arith.constant 0 : i32
    %c0_i32_0 = arith.constant 0 : i32
    %c0_i32_1 = arith.constant 0 : i32
    return %c0_i32, %c0_i32_0 : i32, i32
  }
  func.func @transform_13(%arg0: i32) -> (i32, i32) {
    %c0_i32 = arith.constant 0 : i32
    %c0_i32_0 = arith.constant 0 : i32
    %c0_i32_1 = arith.constant 0 : i32
    return %c0_i32, %c0_i32_0 : i32, i32
  }
  func.func @transform_14(%arg0: i32) -> (i32, i32) {
    %c0_i32 = arith.constant 0 : i32
    %c0_i32_0 = arith.constant 0 : i32
    %c0_i32_1 = arith.constant 0 : i32
    return %c0_i32, %c0_i32_0 : i32, i32
  }
  func.func @transform_15(%arg0: i32) -> (i32, i32) {
    %c0_i32 = arith.constant 0 : i32
    %c0_i32_0 = arith.constant 0 : i32
    %c0_i32_1 = arith.constant 0 : i32
    return %c0_i32, %c0_i32_0 : i32, i32
  }
  func.func @transform_16(%arg0: i32) -> (i32, i32, i32) {
    %c0_i32 = arith.constant 0 : i32
    %c0_i32_0 = arith.constant 0 : i32
    %c0_i32_1 = arith.constant 0 : i32
    return %arg0, %c0_i32, %c0_i32_0 : i32, i32, i32
  }
}

module attributes {stable_mosaic.version = 11 : i64} {
  func.func @_depth_mlp_kernel(%arg0: i32, %arg1: memref<16x32xf32, #tpu.memory_space<vmem>>, %arg2: memref<32x64xf32, #tpu.memory_space<vmem>>, %arg3: memref<1x64xf32, #tpu.memory_space<vmem>>, %arg4: memref<1x64xf32, #tpu.memory_space<vmem>>, %arg5: memref<1x64xf32, #tpu.memory_space<vmem>>, %arg6: memref<64x128xf32, #tpu.memory_space<vmem>>, %arg7: memref<1x128xf32, #tpu.memory_space<vmem>>, %arg8: memref<1x128xf32, #tpu.memory_space<vmem>>, %arg9: memref<1x128xf32, #tpu.memory_space<vmem>>, %arg10: memref<128x64xf32, #tpu.memory_space<vmem>>, %arg11: memref<1x64xf32, #tpu.memory_space<vmem>>, %arg12: memref<1x64xf32, #tpu.memory_space<vmem>>, %arg13: memref<1x64xf32, #tpu.memory_space<vmem>>, %arg14: memref<64x64xf32, #tpu.memory_space<vmem>>, %arg15: memref<1x64xf32, #tpu.memory_space<vmem>>, %arg16: memref<1x64xf32, #tpu.memory_space<vmem>>, %arg17: memref<1x64xf32, #tpu.memory_space<vmem>>, %arg18: memref<64x32xf32, #tpu.memory_space<vmem>>, %arg19: memref<1x32xf32, #tpu.memory_space<vmem>>, %arg20: memref<1x32xf32, #tpu.memory_space<vmem>>, %arg21: memref<1x32xf32, #tpu.memory_space<vmem>>, %arg22: memref<16x32xf32, #tpu.memory_space<vmem>>) attributes {dimension_semantics = [#tpu.dimension_semantics<parallel>], iteration_bounds = array<i64: 1>, scalar_prefetch = 0 : i64, scratch_operands = 0 : i64, tpu.core_type = #tpu.core_type<tc>, window_params = [{transform_indices = @transform_0, window_bounds = array<i64: 16, 32>}, {pipeline_mode = #tpu.pipeline_mode<synchronous>, transform_indices = @transform_1, window_bounds = array<i64: 32, 64>}, {pipeline_mode = #tpu.pipeline_mode<synchronous>, transform_indices = @transform_2, window_bounds = array<i64: 1, 64>}, {pipeline_mode = #tpu.pipeline_mode<synchronous>, transform_indices = @transform_3, window_bounds = array<i64: 1, 64>}, {pipeline_mode = #tpu.pipeline_mode<synchronous>, transform_indices = @transform_4, window_bounds = array<i64: 1, 64>}, {pipeline_mode = #tpu.pipeline_mode<synchronous>, transform_indices = @transform_5, window_bounds = array<i64: 64, 128>}, {pipeline_mode = #tpu.pipeline_mode<synchronous>, transform_indices = @transform_6, window_bounds = array<i64: 1, 128>}, {pipeline_mode = #tpu.pipeline_mode<synchronous>, transform_indices = @transform_7, window_bounds = array<i64: 1, 128>}, {pipeline_mode = #tpu.pipeline_mode<synchronous>, transform_indices = @transform_8, window_bounds = array<i64: 1, 128>}, {pipeline_mode = #tpu.pipeline_mode<synchronous>, transform_indices = @transform_9, window_bounds = array<i64: 128, 64>}, {pipeline_mode = #tpu.pipeline_mode<synchronous>, transform_indices = @transform_10, window_bounds = array<i64: 1, 64>}, {pipeline_mode = #tpu.pipeline_mode<synchronous>, transform_indices = @transform_11, window_bounds = array<i64: 1, 64>}, {pipeline_mode = #tpu.pipeline_mode<synchronous>, transform_indices = @transform_12, window_bounds = array<i64: 1, 64>}, {pipeline_mode = #tpu.pipeline_mode<synchronous>, transform_indices = @transform_13, window_bounds = array<i64: 64, 64>}, {pipeline_mode = #tpu.pipeline_mode<synchronous>, transform_indices = @transform_14, window_bounds = array<i64: 1, 64>}, {pipeline_mode = #tpu.pipeline_mode<synchronous>, transform_indices = @transform_15, window_bounds = array<i64: 1, 64>}, {pipeline_mode = #tpu.pipeline_mode<synchronous>, transform_indices = @transform_16, window_bounds = array<i64: 1, 64>}, {pipeline_mode = #tpu.pipeline_mode<synchronous>, transform_indices = @transform_17, window_bounds = array<i64: 64, 32>}, {pipeline_mode = #tpu.pipeline_mode<synchronous>, transform_indices = @transform_18, window_bounds = array<i64: 1, 32>}, {pipeline_mode = #tpu.pipeline_mode<synchronous>, transform_indices = @transform_19, window_bounds = array<i64: 1, 32>}, {pipeline_mode = #tpu.pipeline_mode<synchronous>, transform_indices = @transform_20, window_bounds = array<i64: 1, 32>}, {transform_indices = @transform_21, window_bounds = array<i64: 16, 32>}]} {
    %c0 = arith.constant 0 : index
    %c0_0 = arith.constant 0 : index
    %0 = vector.load %arg1[%c0, %c0_0] : memref<16x32xf32, #tpu.memory_space<vmem>>, vector<16x32xf32>
    %c0_1 = arith.constant 0 : index
    %c0_2 = arith.constant 0 : index
    %1 = vector.load %arg2[%c0_1, %c0_2] : memref<32x64xf32, #tpu.memory_space<vmem>>, vector<32x64xf32>
    %2 = arith.truncf %0 : vector<16x32xf32> to vector<16x32xbf16>
    %3 = arith.truncf %1 : vector<32x64xf32> to vector<32x64xbf16>
    %cst = arith.constant dense<0.000000e+00> : vector<16x64xf32>
    %4 = tpu.matmul %2, %3, %cst {dimension_numbers = #tpu.dot_dimension_numbers<[1], [0], [0], [1], [0, 0, 1, 1], [], []>} : vector<16x32xbf16>, vector<32x64xbf16>, vector<16x64xf32> -> vector<16x64xf32>
    %c0_3 = arith.constant 0 : index
    %c0_4 = arith.constant 0 : index
    %5 = vector.load %arg3[%c0_3, %c0_4] : memref<1x64xf32, #tpu.memory_space<vmem>>, vector<1x64xf32>
    %6 = vector.broadcast %5 : vector<1x64xf32> to vector<16x64xf32>
    %7 = arith.addf %4, %6 : vector<16x64xf32>
    %8 = math.tanh %7 : vector<16x64xf32>
    %c0_5 = arith.constant 0 : index
    %c0_6 = arith.constant 0 : index
    %9 = vector.load %arg4[%c0_5, %c0_6] : memref<1x64xf32, #tpu.memory_space<vmem>>, vector<1x64xf32>
    %c0_7 = arith.constant 0 : index
    %c0_8 = arith.constant 0 : index
    %10 = vector.load %arg5[%c0_7, %c0_8] : memref<1x64xf32, #tpu.memory_space<vmem>>, vector<1x64xf32>
    %cst_9 = arith.constant dense<0.000000e+00> : vector<16xf32>
    %11 = vector.multi_reduction <add>, %8, %cst_9 [1] : vector<16x64xf32> to vector<16xf32>
    %12 = vector.shape_cast %11 : vector<16xf32> to vector<16x1xf32>
    %cst_10 = arith.constant 6.400000e+01 : f32
    %13 = vector.broadcast %cst_10 : f32 to vector<16x1xf32>
    %14 = arith.divf %12, %13 : vector<16x1xf32>
    %15 = vector.broadcast %14 : vector<16x1xf32> to vector<16x64xf32>
    %16 = arith.subf %8, %15 : vector<16x64xf32>
    %17 = arith.mulf %16, %16 : vector<16x64xf32>
    %cst_11 = arith.constant dense<0.000000e+00> : vector<16xf32>
    %18 = vector.multi_reduction <add>, %17, %cst_11 [1] : vector<16x64xf32> to vector<16xf32>
    %19 = vector.shape_cast %18 : vector<16xf32> to vector<16x1xf32>
    %cst_12 = arith.constant 6.400000e+01 : f32
    %20 = vector.broadcast %cst_12 : f32 to vector<16x1xf32>
    %21 = arith.divf %19, %20 : vector<16x1xf32>
    %22 = vector.broadcast %14 : vector<16x1xf32> to vector<16x64xf32>
    %23 = arith.subf %8, %22 : vector<16x64xf32>
    %cst_13 = arith.constant 9.99999974E-6 : f32
    %24 = vector.broadcast %cst_13 : f32 to vector<16x1xf32>
    %25 = arith.addf %21, %24 : vector<16x1xf32>
    %26 = math.rsqrt %25 : vector<16x1xf32>
    %27 = vector.broadcast %26 : vector<16x1xf32> to vector<16x64xf32>
    %28 = arith.mulf %23, %27 : vector<16x64xf32>
    %29 = vector.broadcast %9 : vector<1x64xf32> to vector<16x64xf32>
    %30 = arith.mulf %28, %29 : vector<16x64xf32>
    %31 = vector.broadcast %10 : vector<1x64xf32> to vector<16x64xf32>
    %32 = arith.addf %30, %31 : vector<16x64xf32>
    %c0_14 = arith.constant 0 : index
    %c0_15 = arith.constant 0 : index
    %33 = vector.load %arg6[%c0_14, %c0_15] : memref<64x128xf32, #tpu.memory_space<vmem>>, vector<64x128xf32>
    %34 = arith.truncf %32 : vector<16x64xf32> to vector<16x64xbf16>
    %35 = arith.truncf %33 : vector<64x128xf32> to vector<64x128xbf16>
    %cst_16 = arith.constant dense<0.000000e+00> : vector<16x128xf32>
    %36 = tpu.matmul %34, %35, %cst_16 {dimension_numbers = #tpu.dot_dimension_numbers<[1], [0], [0], [1], [0, 0, 1, 1], [], []>} : vector<16x64xbf16>, vector<64x128xbf16>, vector<16x128xf32> -> vector<16x128xf32>
    %c0_17 = arith.constant 0 : index
    %c0_18 = arith.constant 0 : index
    %37 = vector.load %arg7[%c0_17, %c0_18] : memref<1x128xf32, #tpu.memory_space<vmem>>, vector<1x128xf32>
    %38 = vector.broadcast %37 : vector<1x128xf32> to vector<16x128xf32>
    %39 = arith.addf %36, %38 : vector<16x128xf32>
    %40 = math.tanh %39 : vector<16x128xf32>
    %c0_19 = arith.constant 0 : index
    %c0_20 = arith.constant 0 : index
    %41 = vector.load %arg8[%c0_19, %c0_20] : memref<1x128xf32, #tpu.memory_space<vmem>>, vector<1x128xf32>
    %c0_21 = arith.constant 0 : index
    %c0_22 = arith.constant 0 : index
    %42 = vector.load %arg9[%c0_21, %c0_22] : memref<1x128xf32, #tpu.memory_space<vmem>>, vector<1x128xf32>
    %cst_23 = arith.constant dense<0.000000e+00> : vector<16xf32>
    %43 = vector.multi_reduction <add>, %40, %cst_23 [1] : vector<16x128xf32> to vector<16xf32>
    %44 = vector.shape_cast %43 : vector<16xf32> to vector<16x1xf32>
    %cst_24 = arith.constant 1.280000e+02 : f32
    %45 = vector.broadcast %cst_24 : f32 to vector<16x1xf32>
    %46 = arith.divf %44, %45 : vector<16x1xf32>
    %47 = vector.broadcast %46 : vector<16x1xf32> to vector<16x128xf32>
    %48 = arith.subf %40, %47 : vector<16x128xf32>
    %49 = arith.mulf %48, %48 : vector<16x128xf32>
    %cst_25 = arith.constant dense<0.000000e+00> : vector<16xf32>
    %50 = vector.multi_reduction <add>, %49, %cst_25 [1] : vector<16x128xf32> to vector<16xf32>
    %51 = vector.shape_cast %50 : vector<16xf32> to vector<16x1xf32>
    %cst_26 = arith.constant 1.280000e+02 : f32
    %52 = vector.broadcast %cst_26 : f32 to vector<16x1xf32>
    %53 = arith.divf %51, %52 : vector<16x1xf32>
    %54 = vector.broadcast %46 : vector<16x1xf32> to vector<16x128xf32>
    %55 = arith.subf %40, %54 : vector<16x128xf32>
    %cst_27 = arith.constant 9.99999974E-6 : f32
    %56 = vector.broadcast %cst_27 : f32 to vector<16x1xf32>
    %57 = arith.addf %53, %56 : vector<16x1xf32>
    %58 = math.rsqrt %57 : vector<16x1xf32>
    %59 = vector.broadcast %58 : vector<16x1xf32> to vector<16x128xf32>
    %60 = arith.mulf %55, %59 : vector<16x128xf32>
    %61 = vector.broadcast %41 : vector<1x128xf32> to vector<16x128xf32>
    %62 = arith.mulf %60, %61 : vector<16x128xf32>
    %63 = vector.broadcast %42 : vector<1x128xf32> to vector<16x128xf32>
    %64 = arith.addf %62, %63 : vector<16x128xf32>
    %c0_28 = arith.constant 0 : index
    %c0_29 = arith.constant 0 : index
    %65 = vector.load %arg10[%c0_28, %c0_29] : memref<128x64xf32, #tpu.memory_space<vmem>>, vector<128x64xf32>
    %66 = arith.truncf %64 : vector<16x128xf32> to vector<16x128xbf16>
    %67 = arith.truncf %65 : vector<128x64xf32> to vector<128x64xbf16>
    %cst_30 = arith.constant dense<0.000000e+00> : vector<16x64xf32>
    %68 = tpu.matmul %66, %67, %cst_30 {dimension_numbers = #tpu.dot_dimension_numbers<[1], [0], [0], [1], [0, 0, 1, 1], [], []>} : vector<16x128xbf16>, vector<128x64xbf16>, vector<16x64xf32> -> vector<16x64xf32>
    %c0_31 = arith.constant 0 : index
    %c0_32 = arith.constant 0 : index
    %69 = vector.load %arg11[%c0_31, %c0_32] : memref<1x64xf32, #tpu.memory_space<vmem>>, vector<1x64xf32>
    %70 = vector.broadcast %69 : vector<1x64xf32> to vector<16x64xf32>
    %71 = arith.addf %68, %70 : vector<16x64xf32>
    %72 = math.tanh %71 : vector<16x64xf32>
    %c0_33 = arith.constant 0 : index
    %c0_34 = arith.constant 0 : index
    %73 = vector.load %arg12[%c0_33, %c0_34] : memref<1x64xf32, #tpu.memory_space<vmem>>, vector<1x64xf32>
    %c0_35 = arith.constant 0 : index
    %c0_36 = arith.constant 0 : index
    %74 = vector.load %arg13[%c0_35, %c0_36] : memref<1x64xf32, #tpu.memory_space<vmem>>, vector<1x64xf32>
    %cst_37 = arith.constant dense<0.000000e+00> : vector<16xf32>
    %75 = vector.multi_reduction <add>, %72, %cst_37 [1] : vector<16x64xf32> to vector<16xf32>
    %76 = vector.shape_cast %75 : vector<16xf32> to vector<16x1xf32>
    %cst_38 = arith.constant 6.400000e+01 : f32
    %77 = vector.broadcast %cst_38 : f32 to vector<16x1xf32>
    %78 = arith.divf %76, %77 : vector<16x1xf32>
    %79 = vector.broadcast %78 : vector<16x1xf32> to vector<16x64xf32>
    %80 = arith.subf %72, %79 : vector<16x64xf32>
    %81 = arith.mulf %80, %80 : vector<16x64xf32>
    %cst_39 = arith.constant dense<0.000000e+00> : vector<16xf32>
    %82 = vector.multi_reduction <add>, %81, %cst_39 [1] : vector<16x64xf32> to vector<16xf32>
    %83 = vector.shape_cast %82 : vector<16xf32> to vector<16x1xf32>
    %cst_40 = arith.constant 6.400000e+01 : f32
    %84 = vector.broadcast %cst_40 : f32 to vector<16x1xf32>
    %85 = arith.divf %83, %84 : vector<16x1xf32>
    %86 = vector.broadcast %78 : vector<16x1xf32> to vector<16x64xf32>
    %87 = arith.subf %72, %86 : vector<16x64xf32>
    %cst_41 = arith.constant 9.99999974E-6 : f32
    %88 = vector.broadcast %cst_41 : f32 to vector<16x1xf32>
    %89 = arith.addf %85, %88 : vector<16x1xf32>
    %90 = math.rsqrt %89 : vector<16x1xf32>
    %91 = vector.broadcast %90 : vector<16x1xf32> to vector<16x64xf32>
    %92 = arith.mulf %87, %91 : vector<16x64xf32>
    %93 = vector.broadcast %73 : vector<1x64xf32> to vector<16x64xf32>
    %94 = arith.mulf %92, %93 : vector<16x64xf32>
    %95 = vector.broadcast %74 : vector<1x64xf32> to vector<16x64xf32>
    %96 = arith.addf %94, %95 : vector<16x64xf32>
    %c0_42 = arith.constant 0 : index
    %c0_43 = arith.constant 0 : index
    %97 = vector.load %arg14[%c0_42, %c0_43] : memref<64x64xf32, #tpu.memory_space<vmem>>, vector<64x64xf32>
    %98 = arith.truncf %96 : vector<16x64xf32> to vector<16x64xbf16>
    %99 = arith.truncf %97 : vector<64x64xf32> to vector<64x64xbf16>
    %cst_44 = arith.constant dense<0.000000e+00> : vector<16x64xf32>
    %100 = tpu.matmul %98, %99, %cst_44 {dimension_numbers = #tpu.dot_dimension_numbers<[1], [0], [0], [1], [0, 0, 1, 1], [], []>} : vector<16x64xbf16>, vector<64x64xbf16>, vector<16x64xf32> -> vector<16x64xf32>
    %c0_45 = arith.constant 0 : index
    %c0_46 = arith.constant 0 : index
    %101 = vector.load %arg15[%c0_45, %c0_46] : memref<1x64xf32, #tpu.memory_space<vmem>>, vector<1x64xf32>
    %102 = vector.broadcast %101 : vector<1x64xf32> to vector<16x64xf32>
    %103 = arith.addf %100, %102 : vector<16x64xf32>
    %104 = math.tanh %103 : vector<16x64xf32>
    %c0_47 = arith.constant 0 : index
    %c0_48 = arith.constant 0 : index
    %105 = vector.load %arg16[%c0_47, %c0_48] : memref<1x64xf32, #tpu.memory_space<vmem>>, vector<1x64xf32>
    %c0_49 = arith.constant 0 : index
    %c0_50 = arith.constant 0 : index
    %106 = vector.load %arg17[%c0_49, %c0_50] : memref<1x64xf32, #tpu.memory_space<vmem>>, vector<1x64xf32>
    %cst_51 = arith.constant dense<0.000000e+00> : vector<16xf32>
    %107 = vector.multi_reduction <add>, %104, %cst_51 [1] : vector<16x64xf32> to vector<16xf32>
    %108 = vector.shape_cast %107 : vector<16xf32> to vector<16x1xf32>
    %cst_52 = arith.constant 6.400000e+01 : f32
    %109 = vector.broadcast %cst_52 : f32 to vector<16x1xf32>
    %110 = arith.divf %108, %109 : vector<16x1xf32>
    %111 = vector.broadcast %110 : vector<16x1xf32> to vector<16x64xf32>
    %112 = arith.subf %104, %111 : vector<16x64xf32>
    %113 = arith.mulf %112, %112 : vector<16x64xf32>
    %cst_53 = arith.constant dense<0.000000e+00> : vector<16xf32>
    %114 = vector.multi_reduction <add>, %113, %cst_53 [1] : vector<16x64xf32> to vector<16xf32>
    %115 = vector.shape_cast %114 : vector<16xf32> to vector<16x1xf32>
    %cst_54 = arith.constant 6.400000e+01 : f32
    %116 = vector.broadcast %cst_54 : f32 to vector<16x1xf32>
    %117 = arith.divf %115, %116 : vector<16x1xf32>
    %118 = vector.broadcast %110 : vector<16x1xf32> to vector<16x64xf32>
    %119 = arith.subf %104, %118 : vector<16x64xf32>
    %cst_55 = arith.constant 9.99999974E-6 : f32
    %120 = vector.broadcast %cst_55 : f32 to vector<16x1xf32>
    %121 = arith.addf %117, %120 : vector<16x1xf32>
    %122 = math.rsqrt %121 : vector<16x1xf32>
    %123 = vector.broadcast %122 : vector<16x1xf32> to vector<16x64xf32>
    %124 = arith.mulf %119, %123 : vector<16x64xf32>
    %125 = vector.broadcast %105 : vector<1x64xf32> to vector<16x64xf32>
    %126 = arith.mulf %124, %125 : vector<16x64xf32>
    %127 = vector.broadcast %106 : vector<1x64xf32> to vector<16x64xf32>
    %128 = arith.addf %126, %127 : vector<16x64xf32>
    %c0_56 = arith.constant 0 : index
    %c0_57 = arith.constant 0 : index
    %129 = vector.load %arg18[%c0_56, %c0_57] : memref<64x32xf32, #tpu.memory_space<vmem>>, vector<64x32xf32>
    %130 = arith.truncf %128 : vector<16x64xf32> to vector<16x64xbf16>
    %131 = arith.truncf %129 : vector<64x32xf32> to vector<64x32xbf16>
    %cst_58 = arith.constant dense<0.000000e+00> : vector<16x32xf32>
    %132 = tpu.matmul %130, %131, %cst_58 {dimension_numbers = #tpu.dot_dimension_numbers<[1], [0], [0], [1], [0, 0, 1, 1], [], []>} : vector<16x64xbf16>, vector<64x32xbf16>, vector<16x32xf32> -> vector<16x32xf32>
    %c0_59 = arith.constant 0 : index
    %c0_60 = arith.constant 0 : index
    %133 = vector.load %arg19[%c0_59, %c0_60] : memref<1x32xf32, #tpu.memory_space<vmem>>, vector<1x32xf32>
    %134 = vector.broadcast %133 : vector<1x32xf32> to vector<16x32xf32>
    %135 = arith.addf %132, %134 : vector<16x32xf32>
    %136 = math.tanh %135 : vector<16x32xf32>
    %c0_61 = arith.constant 0 : index
    %c0_62 = arith.constant 0 : index
    %137 = vector.load %arg20[%c0_61, %c0_62] : memref<1x32xf32, #tpu.memory_space<vmem>>, vector<1x32xf32>
    %c0_63 = arith.constant 0 : index
    %c0_64 = arith.constant 0 : index
    %138 = vector.load %arg21[%c0_63, %c0_64] : memref<1x32xf32, #tpu.memory_space<vmem>>, vector<1x32xf32>
    %cst_65 = arith.constant dense<0.000000e+00> : vector<16xf32>
    %139 = vector.multi_reduction <add>, %136, %cst_65 [1] : vector<16x32xf32> to vector<16xf32>
    %140 = vector.shape_cast %139 : vector<16xf32> to vector<16x1xf32>
    %cst_66 = arith.constant 3.200000e+01 : f32
    %141 = vector.broadcast %cst_66 : f32 to vector<16x1xf32>
    %142 = arith.divf %140, %141 : vector<16x1xf32>
    %143 = vector.broadcast %142 : vector<16x1xf32> to vector<16x32xf32>
    %144 = arith.subf %136, %143 : vector<16x32xf32>
    %145 = arith.mulf %144, %144 : vector<16x32xf32>
    %cst_67 = arith.constant dense<0.000000e+00> : vector<16xf32>
    %146 = vector.multi_reduction <add>, %145, %cst_67 [1] : vector<16x32xf32> to vector<16xf32>
    %147 = vector.shape_cast %146 : vector<16xf32> to vector<16x1xf32>
    %cst_68 = arith.constant 3.200000e+01 : f32
    %148 = vector.broadcast %cst_68 : f32 to vector<16x1xf32>
    %149 = arith.divf %147, %148 : vector<16x1xf32>
    %150 = vector.broadcast %142 : vector<16x1xf32> to vector<16x32xf32>
    %151 = arith.subf %136, %150 : vector<16x32xf32>
    %cst_69 = arith.constant 9.99999974E-6 : f32
    %152 = vector.broadcast %cst_69 : f32 to vector<16x1xf32>
    %153 = arith.addf %149, %152 : vector<16x1xf32>
    %154 = math.rsqrt %153 : vector<16x1xf32>
    %155 = vector.broadcast %154 : vector<16x1xf32> to vector<16x32xf32>
    %156 = arith.mulf %151, %155 : vector<16x32xf32>
    %157 = vector.broadcast %137 : vector<1x32xf32> to vector<16x32xf32>
    %158 = arith.mulf %156, %157 : vector<16x32xf32>
    %159 = vector.broadcast %138 : vector<1x32xf32> to vector<16x32xf32>
    %160 = arith.addf %158, %159 : vector<16x32xf32>
    %c0_70 = arith.constant 0 : index
    %c0_71 = arith.constant 0 : index
    %161 = vector.load %arg22[%c0_70, %c0_71] : memref<16x32xf32, #tpu.memory_space<vmem>>, vector<16x32xf32>
    tpu.vector_store %arg22[%c0_70, %c0_71], %160 {strides = array<i32>} : memref<16x32xf32, #tpu.memory_space<vmem>>, vector<16x32xf32>,
    return
  }
  func.func @transform_0(%arg0: i32) -> (i32, i32) {
    %c0_i32 = arith.constant 0 : i32
    %c0_i32_0 = arith.constant 0 : i32
    return %arg0, %c0_i32 : i32, i32
  }
  func.func @transform_1(%arg0: i32) -> (i32, i32) {
    %c0_i32 = arith.constant 0 : i32
    %c0_i32_0 = arith.constant 0 : i32
    %c0_i32_1 = arith.constant 0 : i32
    return %c0_i32, %c0_i32_0 : i32, i32
  }
  func.func @transform_2(%arg0: i32) -> (i32, i32) {
    %c0_i32 = arith.constant 0 : i32
    %c0_i32_0 = arith.constant 0 : i32
    %c0_i32_1 = arith.constant 0 : i32
    return %c0_i32, %c0_i32_0 : i32, i32
  }
  func.func @transform_3(%arg0: i32) -> (i32, i32) {
    %c0_i32 = arith.constant 0 : i32
    %c0_i32_0 = arith.constant 0 : i32
    %c0_i32_1 = arith.constant 0 : i32
    return %c0_i32, %c0_i32_0 : i32, i32
  }
  func.func @transform_4(%arg0: i32) -> (i32, i32) {
    %c0_i32 = arith.constant 0 : i32
    %c0_i32_0 = arith.constant 0 : i32
    %c0_i32_1 = arith.constant 0 : i32
    return %c0_i32, %c0_i32_0 : i32, i32
  }
  func.func @transform_5(%arg0: i32) -> (i32, i32) {
    %c0_i32 = arith.constant 0 : i32
    %c0_i32_0 = arith.constant 0 : i32
    %c0_i32_1 = arith.constant 0 : i32
    return %c0_i32, %c0_i32_0 : i32, i32
  }
  func.func @transform_6(%arg0: i32) -> (i32, i32) {
    %c0_i32 = arith.constant 0 : i32
    %c0_i32_0 = arith.constant 0 : i32
    %c0_i32_1 = arith.constant 0 : i32
    return %c0_i32, %c0_i32_0 : i32, i32
  }
  func.func @transform_7(%arg0: i32) -> (i32, i32) {
    %c0_i32 = arith.constant 0 : i32
    %c0_i32_0 = arith.constant 0 : i32
    %c0_i32_1 = arith.constant 0 : i32
    return %c0_i32, %c0_i32_0 : i32, i32
  }
  func.func @transform_8(%arg0: i32) -> (i32, i32) {
    %c0_i32 = arith.constant 0 : i32
    %c0_i32_0 = arith.constant 0 : i32
    %c0_i32_1 = arith.constant 0 : i32
    return %c0_i32, %c0_i32_0 : i32, i32
  }
  func.func @transform_9(%arg0: i32) -> (i32, i32) {
    %c0_i32 = arith.constant 0 : i32
    %c0_i32_0 = arith.constant 0 : i32
    %c0_i32_1 = arith.constant 0 : i32
    return %c0_i32, %c0_i32_0 : i32, i32
  }
  func.func @transform_10(%arg0: i32) -> (i32, i32) {
    %c0_i32 = arith.constant 0 : i32
    %c0_i32_0 = arith.constant 0 : i32
    %c0_i32_1 = arith.constant 0 : i32
    return %c0_i32, %c0_i32_0 : i32, i32
  }
  func.func @transform_11(%arg0: i32) -> (i32, i32) {
    %c0_i32 = arith.constant 0 : i32
    %c0_i32_0 = arith.constant 0 : i32
    %c0_i32_1 = arith.constant 0 : i32
    return %c0_i32, %c0_i32_0 : i32, i32
  }
  func.func @transform_12(%arg0: i32) -> (i32, i32) {
    %c0_i32 = arith.constant 0 : i32
    %c0_i32_0 = arith.constant 0 : i32
    %c0_i32_1 = arith.constant 0 : i32
    return %c0_i32, %c0_i32_0 : i32, i32
  }
  func.func @transform_13(%arg0: i32) -> (i32, i32) {
    %c0_i32 = arith.constant 0 : i32
    %c0_i32_0 = arith.constant 0 : i32
    %c0_i32_1 = arith.constant 0 : i32
    return %c0_i32, %c0_i32_0 : i32, i32
  }
  func.func @transform_14(%arg0: i32) -> (i32, i32) {
    %c0_i32 = arith.constant 0 : i32
    %c0_i32_0 = arith.constant 0 : i32
    %c0_i32_1 = arith.constant 0 : i32
    return %c0_i32, %c0_i32_0 : i32, i32
  }
  func.func @transform_15(%arg0: i32) -> (i32, i32) {
    %c0_i32 = arith.constant 0 : i32
    %c0_i32_0 = arith.constant 0 : i32
    %c0_i32_1 = arith.constant 0 : i32
    return %c0_i32, %c0_i32_0 : i32, i32
  }
  func.func @transform_16(%arg0: i32) -> (i32, i32) {
    %c0_i32 = arith.constant 0 : i32
    %c0_i32_0 = arith.constant 0 : i32
    %c0_i32_1 = arith.constant 0 : i32
    return %c0_i32, %c0_i32_0 : i32, i32
  }
  func.func @transform_17(%arg0: i32) -> (i32, i32) {
    %c0_i32 = arith.constant 0 : i32
    %c0_i32_0 = arith.constant 0 : i32
    %c0_i32_1 = arith.constant 0 : i32
    return %c0_i32, %c0_i32_0 : i32, i32
  }
  func.func @transform_18(%arg0: i32) -> (i32, i32) {
    %c0_i32 = arith.constant 0 : i32
    %c0_i32_0 = arith.constant 0 : i32
    %c0_i32_1 = arith.constant 0 : i32
    return %c0_i32, %c0_i32_0 : i32, i32
  }
  func.func @transform_19(%arg0: i32) -> (i32, i32) {
    %c0_i32 = arith.constant 0 : i32
    %c0_i32_0 = arith.constant 0 : i32
    %c0_i32_1 = arith.constant 0 : i32
    return %c0_i32, %c0_i32_0 : i32, i32
  }
  func.func @transform_20(%arg0: i32) -> (i32, i32) {
    %c0_i32 = arith.constant 0 : i32
    %c0_i32_0 = arith.constant 0 : i32
    %c0_i32_1 = arith.constant 0 : i32
    return %c0_i32, %c0_i32_0 : i32, i32
  }
  func.func @transform_21(%arg0: i32) -> (i32, i32) {
    %c0_i32 = arith.constant 0 : i32
    %c0_i32_0 = arith.constant 0 : i32
    return %arg0, %c0_i32 : i32, i32
  }
}

module attributes {stable_mosaic.version = 11 : i64} {
  func.func @_head_kernel(%arg0: i32, %arg1: memref<16x32xf32, #tpu.memory_space<vmem>>, %arg2: memref<1x32xf32, #tpu.memory_space<vmem>>, %arg3: memref<1x32xf32, #tpu.memory_space<vmem>>, %arg4: memref<32x4xf32, #tpu.memory_space<vmem>>, %arg5: memref<1x4xf32, #tpu.memory_space<vmem>>, %arg6: memref<4x32xf32, #tpu.memory_space<vmem>>, %arg7: memref<16x4xf32, #tpu.memory_space<vmem>>, %arg8: memref<16x4xf32, #tpu.memory_space<vmem>>) attributes {dimension_semantics = [#tpu.dimension_semantics<parallel>], iteration_bounds = array<i64: 1>, scalar_prefetch = 0 : i64, scratch_operands = 0 : i64, tpu.core_type = #tpu.core_type<tc>, window_params = [{transform_indices = @transform_0, window_bounds = array<i64: 16, 32>}, {pipeline_mode = #tpu.pipeline_mode<synchronous>, transform_indices = @transform_1, window_bounds = array<i64: 1, 32>}, {pipeline_mode = #tpu.pipeline_mode<synchronous>, transform_indices = @transform_2, window_bounds = array<i64: 1, 32>}, {pipeline_mode = #tpu.pipeline_mode<synchronous>, transform_indices = @transform_3, window_bounds = array<i64: 32, 4>}, {pipeline_mode = #tpu.pipeline_mode<synchronous>, transform_indices = @transform_4, window_bounds = array<i64: 1, 4>}, {pipeline_mode = #tpu.pipeline_mode<synchronous>, transform_indices = @transform_5, window_bounds = array<i64: 4, 32>}, {transform_indices = @transform_6, window_bounds = array<i64: 16, 4>}, {transform_indices = @transform_7, window_bounds = array<i64: 16, 4>}]} {
    %c0 = arith.constant 0 : index
    %c0_0 = arith.constant 0 : index
    %0 = vector.load %arg1[%c0, %c0_0] : memref<16x32xf32, #tpu.memory_space<vmem>>, vector<16x32xf32>
    %c0_1 = arith.constant 0 : index
    %c0_2 = arith.constant 0 : index
    %1 = vector.load %arg2[%c0_1, %c0_2] : memref<1x32xf32, #tpu.memory_space<vmem>>, vector<1x32xf32>
    %c0_3 = arith.constant 0 : index
    %c0_4 = arith.constant 0 : index
    %2 = vector.load %arg3[%c0_3, %c0_4] : memref<1x32xf32, #tpu.memory_space<vmem>>, vector<1x32xf32>
    %cst = arith.constant dense<0.000000e+00> : vector<16xf32>
    %3 = vector.multi_reduction <add>, %0, %cst [1] : vector<16x32xf32> to vector<16xf32>
    %4 = vector.shape_cast %3 : vector<16xf32> to vector<16x1xf32>
    %cst_5 = arith.constant 3.200000e+01 : f32
    %5 = vector.broadcast %cst_5 : f32 to vector<16x1xf32>
    %6 = arith.divf %4, %5 : vector<16x1xf32>
    %7 = vector.broadcast %6 : vector<16x1xf32> to vector<16x32xf32>
    %8 = arith.subf %0, %7 : vector<16x32xf32>
    %9 = arith.mulf %8, %8 : vector<16x32xf32>
    %cst_6 = arith.constant dense<0.000000e+00> : vector<16xf32>
    %10 = vector.multi_reduction <add>, %9, %cst_6 [1] : vector<16x32xf32> to vector<16xf32>
    %11 = vector.shape_cast %10 : vector<16xf32> to vector<16x1xf32>
    %cst_7 = arith.constant 3.200000e+01 : f32
    %12 = vector.broadcast %cst_7 : f32 to vector<16x1xf32>
    %13 = arith.divf %11, %12 : vector<16x1xf32>
    %14 = vector.broadcast %6 : vector<16x1xf32> to vector<16x32xf32>
    %15 = arith.subf %0, %14 : vector<16x32xf32>
    %cst_8 = arith.constant 9.99999974E-6 : f32
    %16 = vector.broadcast %cst_8 : f32 to vector<16x1xf32>
    %17 = arith.addf %13, %16 : vector<16x1xf32>
    %18 = math.rsqrt %17 : vector<16x1xf32>
    %19 = vector.broadcast %18 : vector<16x1xf32> to vector<16x32xf32>
    %20 = arith.mulf %15, %19 : vector<16x32xf32>
    %21 = vector.broadcast %1 : vector<1x32xf32> to vector<16x32xf32>
    %22 = arith.mulf %20, %21 : vector<16x32xf32>
    %23 = vector.broadcast %2 : vector<1x32xf32> to vector<16x32xf32>
    %24 = arith.addf %22, %23 : vector<16x32xf32>
    %c0_9 = arith.constant 0 : index
    %c0_10 = arith.constant 0 : index
    %25 = vector.load %arg4[%c0_9, %c0_10] : memref<32x4xf32, #tpu.memory_space<vmem>>, vector<32x4xf32>
    %26 = arith.truncf %24 : vector<16x32xf32> to vector<16x32xbf16>
    %27 = arith.truncf %25 : vector<32x4xf32> to vector<32x4xbf16>
    %cst_11 = arith.constant dense<0.000000e+00> : vector<16x4xf32>
    %28 = tpu.matmul %26, %27, %cst_11 {dimension_numbers = #tpu.dot_dimension_numbers<[1], [0], [0], [1], [0, 0, 1, 1], [], []>} : vector<16x32xbf16>, vector<32x4xbf16>, vector<16x4xf32> -> vector<16x4xf32>
    %c0_12 = arith.constant 0 : index
    %c0_13 = arith.constant 0 : index
    %29 = vector.load %arg5[%c0_12, %c0_13] : memref<1x4xf32, #tpu.memory_space<vmem>>, vector<1x4xf32>
    %30 = vector.broadcast %29 : vector<1x4xf32> to vector<16x4xf32>
    %31 = arith.addf %28, %30 : vector<16x4xf32>
    %c0_14 = arith.constant 0 : index
    %c0_15 = arith.constant 0 : index
    %32 = vector.load %arg7[%c0_14, %c0_15] : memref<16x4xf32, #tpu.memory_space<vmem>>, vector<16x4xf32>
    tpu.vector_store %arg7[%c0_14, %c0_15], %31 {strides = array<i32>} : memref<16x4xf32, #tpu.memory_space<vmem>>, vector<16x4xf32>,
    %c0_16 = arith.constant 0 : index
    %c0_17 = arith.constant 0 : index
    %33 = vector.load %arg6[%c0_16, %c0_17] : memref<4x32xf32, #tpu.memory_space<vmem>>, vector<4x32xf32>
    %34 = arith.truncf %0 : vector<16x32xf32> to vector<16x32xbf16>
    %35 = arith.truncf %33 : vector<4x32xf32> to vector<4x32xbf16>
    %cst_18 = arith.constant dense<0.000000e+00> : vector<16x4xf32>
    %36 = tpu.matmul %34, %35, %cst_18 {dimension_numbers = #tpu.dot_dimension_numbers<[1], [1], [0], [0], [0, 0, 1, 0], [], []>} : vector<16x32xbf16>, vector<4x32xbf16>, vector<16x4xf32> -> vector<16x4xf32>
    %cst_19 = arith.constant dense<0xFF800000> : vector<16xf32>
    %37 = vector.multi_reduction <maximumf>, %36, %cst_19 [1] : vector<16x4xf32> to vector<16xf32>
    %38 = vector.shape_cast %37 : vector<16xf32> to vector<16x1xf32>
    %39 = vector.broadcast %38 : vector<16x1xf32> to vector<16x4xf32>
    %40 = arith.subf %36, %39 : vector<16x4xf32>
    %41 = math.exp %40 : vector<16x4xf32>
    %cst_20 = arith.constant dense<0.000000e+00> : vector<16xf32>
    %42 = vector.multi_reduction <add>, %41, %cst_20 [1] : vector<16x4xf32> to vector<16xf32>
    %43 = vector.shape_cast %42 : vector<16xf32> to vector<16x1xf32>
    %44 = tpu.reciprocal %43 {approx = true} : vector<16x1xf32> -> vector<16x1xf32>
    %45 = vector.broadcast %44 : vector<16x1xf32> to vector<16x4xf32>
    %46 = arith.mulf %41, %45 : vector<16x4xf32>
    %c0_21 = arith.constant 0 : index
    %c0_22 = arith.constant 0 : index
    %47 = vector.load %arg8[%c0_21, %c0_22] : memref<16x4xf32, #tpu.memory_space<vmem>>, vector<16x4xf32>
    tpu.vector_store %arg8[%c0_21, %c0_22], %46 {strides = array<i32>} : memref<16x4xf32, #tpu.memory_space<vmem>>, vector<16x4xf32>,
    return
  }
  func.func @transform_0(%arg0: i32) -> (i32, i32) {
    %c0_i32 = arith.constant 0 : i32
    %c0_i32_0 = arith.constant 0 : i32
    return %arg0, %c0_i32 : i32, i32
  }
  func.func @transform_1(%arg0: i32) -> (i32, i32) {
    %c0_i32 = arith.constant 0 : i32
    %c0_i32_0 = arith.constant 0 : i32
    %c0_i32_1 = arith.constant 0 : i32
    return %c0_i32, %c0_i32_0 : i32, i32
  }
  func.func @transform_2(%arg0: i32) -> (i32, i32) {
    %c0_i32 = arith.constant 0 : i32
    %c0_i32_0 = arith.constant 0 : i32
    %c0_i32_1 = arith.constant 0 : i32
    return %c0_i32, %c0_i32_0 : i32, i32
  }
  func.func @transform_3(%arg0: i32) -> (i32, i32) {
    %c0_i32 = arith.constant 0 : i32
    %c0_i32_0 = arith.constant 0 : i32
    %c0_i32_1 = arith.constant 0 : i32
    return %c0_i32, %c0_i32_0 : i32, i32
  }
  func.func @transform_4(%arg0: i32) -> (i32, i32) {
    %c0_i32 = arith.constant 0 : i32
    %c0_i32_0 = arith.constant 0 : i32
    %c0_i32_1 = arith.constant 0 : i32
    return %c0_i32, %c0_i32_0 : i32, i32
  }
  func.func @transform_5(%arg0: i32) -> (i32, i32) {
    %c0_i32 = arith.constant 0 : i32
    %c0_i32_0 = arith.constant 0 : i32
    %c0_i32_1 = arith.constant 0 : i32
    return %c0_i32, %c0_i32_0 : i32, i32
  }
  func.func @transform_6(%arg0: i32) -> (i32, i32) {
    %c0_i32 = arith.constant 0 : i32
    %c0_i32_0 = arith.constant 0 : i32
    return %arg0, %c0_i32 : i32, i32
  }
  func.func @transform_7(%arg0: i32) -> (i32, i32) {
    %c0_i32 = arith.constant 0 : i32
    %c0_i32_0 = arith.constant 0 : i32
    return %arg0, %c0_i32 : i32, i32
  }
}

module attributes {stable_mosaic.version = 11 : i64} {
  func.func @_wsi_kernel(%arg0: memref<2x160xf32, #tpu.memory_space<vmem>>, %arg1: memref<160x4xf32, #tpu.memory_space<vmem>>, %arg2: memref<1x4xf32, #tpu.memory_space<vmem>>, %arg3: memref<2x4xf32, #tpu.memory_space<vmem>>) attributes {dimension_semantics = [], scalar_prefetch = 0 : i64, scratch_operands = 0 : i64, tpu.core_type = #tpu.core_type<tc>} {
    %c0 = arith.constant 0 : index
    %c0_0 = arith.constant 0 : index
    %0 = vector.load %arg0[%c0, %c0_0] : memref<2x160xf32, #tpu.memory_space<vmem>>, vector<2x160xf32>
    %c0_1 = arith.constant 0 : index
    %c0_2 = arith.constant 0 : index
    %1 = vector.load %arg1[%c0_1, %c0_2] : memref<160x4xf32, #tpu.memory_space<vmem>>, vector<160x4xf32>
    %2 = arith.truncf %0 : vector<2x160xf32> to vector<2x160xbf16>
    %3 = arith.truncf %1 : vector<160x4xf32> to vector<160x4xbf16>
    %cst = arith.constant dense<0.000000e+00> : vector<2x4xf32>
    %4 = tpu.matmul %2, %3, %cst {dimension_numbers = #tpu.dot_dimension_numbers<[1], [0], [0], [1], [0, 0, 1, 1], [], []>} : vector<2x160xbf16>, vector<160x4xbf16>, vector<2x4xf32> -> vector<2x4xf32>
    %c0_3 = arith.constant 0 : index
    %c0_4 = arith.constant 0 : index
    %5 = vector.load %arg2[%c0_3, %c0_4] : memref<1x4xf32, #tpu.memory_space<vmem>>, vector<1x4xf32>
    %6 = vector.broadcast %5 : vector<1x4xf32> to vector<2x4xf32>
    %7 = arith.addf %4, %6 : vector<2x4xf32>
    %c0_5 = arith.constant 0 : index
    %c0_6 = arith.constant 0 : index
    %8 = vector.load %arg3[%c0_5, %c0_6] : memref<2x4xf32, #tpu.memory_space<vmem>>, vector<2x4xf32>
    tpu.vector_store %arg3[%c0_5, %c0_6], %7 {strides = array<i32>} : memref<2x4xf32, #tpu.memory_space<vmem>>, vector<2x4xf32>,
    return
  }
}

module attributes {stable_mosaic.version = 11 : i64} {
  func.func @_decoder_layer_kernel(%arg0: i32, %arg1: memref<1x5x32xf32, #tpu.memory_space<vmem>>, %arg2: memref<1x8x32xf32, #tpu.memory_space<vmem>>, %arg3: memref<32x96xf32, #tpu.memory_space<vmem>>, %arg4: memref<1x96xf32, #tpu.memory_space<vmem>>, %arg5: memref<32x32xf32, #tpu.memory_space<vmem>>, %arg6: memref<1x32xf32, #tpu.memory_space<vmem>>, %arg7: memref<1x32xf32, #tpu.memory_space<vmem>>, %arg8: memref<1x32xf32, #tpu.memory_space<vmem>>, %arg9: memref<32x32xf32, #tpu.memory_space<vmem>>, %arg10: memref<1x32xf32, #tpu.memory_space<vmem>>, %arg11: memref<32x64xf32, #tpu.memory_space<vmem>>, %arg12: memref<1x64xf32, #tpu.memory_space<vmem>>, %arg13: memref<32x32xf32, #tpu.memory_space<vmem>>, %arg14: memref<1x32xf32, #tpu.memory_space<vmem>>, %arg15: memref<1x32xf32, #tpu.memory_space<vmem>>, %arg16: memref<1x32xf32, #tpu.memory_space<vmem>>, %arg17: memref<32x64xf32, #tpu.memory_space<vmem>>, %arg18: memref<1x64xf32, #tpu.memory_space<vmem>>, %arg19: memref<64x32xf32, #tpu.memory_space<vmem>>, %arg20: memref<1x32xf32, #tpu.memory_space<vmem>>, %arg21: memref<1x32xf32, #tpu.memory_space<vmem>>, %arg22: memref<1x32xf32, #tpu.memory_space<vmem>>, %arg23: memref<1x5x32xf32, #tpu.memory_space<vmem>>) attributes {dimension_semantics = [#tpu.dimension_semantics<parallel>], iteration_bounds = array<i64: 2>, scalar_prefetch = 0 : i64, scratch_operands = 0 : i64, tpu.core_type = #tpu.core_type<tc>, window_params = [{transform_indices = @transform_0, window_bounds = array<i64: 1, 5, 32>}, {transform_indices = @transform_1, window_bounds = array<i64: 1, 8, 32>}, {pipeline_mode = #tpu.pipeline_mode<synchronous>, transform_indices = @transform_2, window_bounds = array<i64: 32, 96>}, {pipeline_mode = #tpu.pipeline_mode<synchronous>, transform_indices = @transform_3, window_bounds = array<i64: 1, 96>}, {pipeline_mode = #tpu.pipeline_mode<synchronous>, transform_indices = @transform_4, window_bounds = array<i64: 32, 32>}, {pipeline_mode = #tpu.pipeline_mode<synchronous>, transform_indices = @transform_5, window_bounds = array<i64: 1, 32>}, {pipeline_mode = #tpu.pipeline_mode<synchronous>, transform_indices = @transform_6, window_bounds = array<i64: 1, 32>}, {pipeline_mode = #tpu.pipeline_mode<synchronous>, transform_indices = @transform_7, window_bounds = array<i64: 1, 32>}, {pipeline_mode = #tpu.pipeline_mode<synchronous>, transform_indices = @transform_8, window_bounds = array<i64: 32, 32>}, {pipeline_mode = #tpu.pipeline_mode<synchronous>, transform_indices = @transform_9, window_bounds = array<i64: 1, 32>}, {pipeline_mode = #tpu.pipeline_mode<synchronous>, transform_indices = @transform_10, window_bounds = array<i64: 32, 64>}, {pipeline_mode = #tpu.pipeline_mode<synchronous>, transform_indices = @transform_11, window_bounds = array<i64: 1, 64>}, {pipeline_mode = #tpu.pipeline_mode<synchronous>, transform_indices = @transform_12, window_bounds = array<i64: 32, 32>}, {pipeline_mode = #tpu.pipeline_mode<synchronous>, transform_indices = @transform_13, window_bounds = array<i64: 1, 32>}, {pipeline_mode = #tpu.pipeline_mode<synchronous>, transform_indices = @transform_14, window_bounds = array<i64: 1, 32>}, {pipeline_mode = #tpu.pipeline_mode<synchronous>, transform_indices = @transform_15, window_bounds = array<i64: 1, 32>}, {pipeline_mode = #tpu.pipeline_mode<synchronous>, transform_indices = @transform_16, window_bounds = array<i64: 32, 64>}, {pipeline_mode = #tpu.pipeline_mode<synchronous>, transform_indices = @transform_17, window_bounds = array<i64: 1, 64>}, {pipeline_mode = #tpu.pipeline_mode<synchronous>, transform_indices = @transform_18, window_bounds = array<i64: 64, 32>}, {pipeline_mode = #tpu.pipeline_mode<synchronous>, transform_indices = @transform_19, window_bounds = array<i64: 1, 32>}, {pipeline_mode = #tpu.pipeline_mode<synchronous>, transform_indices = @transform_20, window_bounds = array<i64: 1, 32>}, {pipeline_mode = #tpu.pipeline_mode<synchronous>, transform_indices = @transform_21, window_bounds = array<i64: 1, 32>}, {transform_indices = @transform_22, window_bounds = array<i64: 1, 5, 32>}]} {
    %c0 = arith.constant 0 : index
    %c0_0 = arith.constant 0 : index
    %c0_1 = arith.constant 0 : index
    %0 = vector.load %arg1[%c0, %c0_0, %c0_1] : memref<1x5x32xf32, #tpu.memory_space<vmem>>, vector<1x5x32xf32>
    %1 = vector.shape_cast %0 : vector<1x5x32xf32> to vector<5x32xf32>
    %c0_2 = arith.constant 0 : index
    %c0_3 = arith.constant 0 : index
    %c0_4 = arith.constant 0 : index
    %2 = vector.load %arg2[%c0_2, %c0_3, %c0_4] : memref<1x8x32xf32, #tpu.memory_space<vmem>>, vector<1x8x32xf32>
    %3 = vector.shape_cast %2 : vector<1x8x32xf32> to vector<8x32xf32>
    %c0_5 = arith.constant 0 : index
    %c0_6 = arith.constant 0 : index
    %4 = vector.load %arg3[%c0_5, %c0_6] : memref<32x96xf32, #tpu.memory_space<vmem>>, vector<32x96xf32>
    %5 = arith.truncf %1 : vector<5x32xf32> to vector<5x32xbf16>
    %6 = arith.truncf %4 : vector<32x96xf32> to vector<32x96xbf16>
    %cst = arith.constant dense<0.000000e+00> : vector<5x96xf32>
    %7 = tpu.matmul %5, %6, %cst {dimension_numbers = #tpu.dot_dimension_numbers<[1], [0], [0], [1], [0, 0, 1, 1], [], []>} : vector<5x32xbf16>, vector<32x96xbf16>, vector<5x96xf32> -> vector<5x96xf32>
    %c0_7 = arith.constant 0 : index
    %c0_8 = arith.constant 0 : index
    %8 = vector.load %arg4[%c0_7, %c0_8] : memref<1x96xf32, #tpu.memory_space<vmem>>, vector<1x96xf32>
    %9 = vector.broadcast %8 : vector<1x96xf32> to vector<5x96xf32>
    %10 = arith.addf %7, %9 : vector<5x96xf32>
    %11 = vector.extract_strided_slice %10 {offsets = [0, 0], sizes = [5, 32], strides = [1, 1]} : vector<5x96xf32> to vector<5x32xf32>
    %12 = vector.extract_strided_slice %10 {offsets = [0, 32], sizes = [5, 32], strides = [1, 1]} : vector<5x96xf32> to vector<5x32xf32>
    %13 = vector.extract_strided_slice %10 {offsets = [0, 64], sizes = [5, 32], strides = [1, 1]} : vector<5x96xf32> to vector<5x32xf32>
    %14 = vector.extract_strided_slice %11 {offsets = [0, 0], sizes = [5, 8], strides = [1, 1]} : vector<5x32xf32> to vector<5x8xf32>
    %15 = vector.extract_strided_slice %12 {offsets = [0, 0], sizes = [5, 8], strides = [1, 1]} : vector<5x32xf32> to vector<5x8xf32>
    %16 = arith.truncf %14 : vector<5x8xf32> to vector<5x8xbf16>
    %17 = arith.truncf %15 : vector<5x8xf32> to vector<5x8xbf16>
    %cst_9 = arith.constant dense<0.000000e+00> : vector<5x5xf32>
    %18 = tpu.matmul %16, %17, %cst_9 {dimension_numbers = #tpu.dot_dimension_numbers<[1], [1], [0], [0], [0, 0, 1, 0], [], []>} : vector<5x8xbf16>, vector<5x8xbf16>, vector<5x5xf32> -> vector<5x5xf32>
    %cst_10 = arith.constant 0.353553385 : f32
    %19 = vector.broadcast %cst_10 : f32 to vector<5x5xf32>
    %20 = arith.mulf %18, %19 : vector<5x5xf32>
    %cst_11 = arith.constant dense<0xFF800000> : vector<5xf32>
    %21 = vector.multi_reduction <maximumf>, %20, %cst_11 [1] : vector<5x5xf32> to vector<5xf32>
    %22 = vector.shape_cast %21 : vector<5xf32> to vector<5x1xf32>
    %23 = vector.broadcast %22 : vector<5x1xf32> to vector<5x5xf32>
    %24 = arith.subf %20, %23 : vector<5x5xf32>
    %25 = math.exp %24 : vector<5x5xf32>
    %cst_12 = arith.constant dense<0.000000e+00> : vector<5xf32>
    %26 = vector.multi_reduction <add>, %25, %cst_12 [1] : vector<5x5xf32> to vector<5xf32>
    %27 = vector.shape_cast %26 : vector<5xf32> to vector<5x1xf32>
    %28 = tpu.reciprocal %27 {approx = true} : vector<5x1xf32> -> vector<5x1xf32>
    %29 = vector.broadcast %28 : vector<5x1xf32> to vector<5x5xf32>
    %30 = arith.mulf %25, %29 : vector<5x5xf32>
    %31 = vector.extract_strided_slice %13 {offsets = [0, 0], sizes = [5, 8], strides = [1, 1]} : vector<5x32xf32> to vector<5x8xf32>
    %32 = arith.truncf %30 : vector<5x5xf32> to vector<5x5xbf16>
    %33 = arith.truncf %31 : vector<5x8xf32> to vector<5x8xbf16>
    %cst_13 = arith.constant dense<0.000000e+00> : vector<5x8xf32>
    %34 = tpu.matmul %32, %33, %cst_13 {dimension_numbers = #tpu.dot_dimension_numbers<[1], [0], [0], [1], [0, 0, 1, 1], [], []>} : vector<5x5xbf16>, vector<5x8xbf16>, vector<5x8xf32> -> vector<5x8xf32>
    %35 = vector.extract_strided_slice %11 {offsets = [0, 8], sizes = [5, 8], strides = [1, 1]} : vector<5x32xf32> to vector<5x8xf32>
    %36 = vector.extract_strided_slice %12 {offsets = [0, 8], sizes = [5, 8], strides = [1, 1]} : vector<5x32xf32> to vector<5x8xf32>
    %37 = arith.truncf %35 : vector<5x8xf32> to vector<5x8xbf16>
    %38 = arith.truncf %36 : vector<5x8xf32> to vector<5x8xbf16>
    %cst_14 = arith.constant dense<0.000000e+00> : vector<5x5xf32>
    %39 = tpu.matmul %37, %38, %cst_14 {dimension_numbers = #tpu.dot_dimension_numbers<[1], [1], [0], [0], [0, 0, 1, 0], [], []>} : vector<5x8xbf16>, vector<5x8xbf16>, vector<5x5xf32> -> vector<5x5xf32>
    %cst_15 = arith.constant 0.353553385 : f32
    %40 = vector.broadcast %cst_15 : f32 to vector<5x5xf32>
    %41 = arith.mulf %39, %40 : vector<5x5xf32>
    %cst_16 = arith.constant dense<0xFF800000> : vector<5xf32>
    %42 = vector.multi_reduction <maximumf>, %41, %cst_16 [1] : vector<5x5xf32> to vector<5xf32>
    %43 = vector.shape_cast %42 : vector<5xf32> to vector<5x1xf32>
    %44 = vector.broadcast %43 : vector<5x1xf32> to vector<5x5xf32>
    %45 = arith.subf %41, %44 : vector<5x5xf32>
    %46 = math.exp %45 : vector<5x5xf32>
    %cst_17 = arith.constant dense<0.000000e+00> : vector<5xf32>
    %47 = vector.multi_reduction <add>, %46, %cst_17 [1] : vector<5x5xf32> to vector<5xf32>
    %48 = vector.shape_cast %47 : vector<5xf32> to vector<5x1xf32>
    %49 = tpu.reciprocal %48 {approx = true} : vector<5x1xf32> -> vector<5x1xf32>
    %50 = vector.broadcast %49 : vector<5x1xf32> to vector<5x5xf32>
    %51 = arith.mulf %46, %50 : vector<5x5xf32>
    %52 = vector.extract_strided_slice %13 {offsets = [0, 8], sizes = [5, 8], strides = [1, 1]} : vector<5x32xf32> to vector<5x8xf32>
    %53 = arith.truncf %51 : vector<5x5xf32> to vector<5x5xbf16>
    %54 = arith.truncf %52 : vector<5x8xf32> to vector<5x8xbf16>
    %cst_18 = arith.constant dense<0.000000e+00> : vector<5x8xf32>
    %55 = tpu.matmul %53, %54, %cst_18 {dimension_numbers = #tpu.dot_dimension_numbers<[1], [0], [0], [1], [0, 0, 1, 1], [], []>} : vector<5x5xbf16>, vector<5x8xbf16>, vector<5x8xf32> -> vector<5x8xf32>
    %56 = vector.extract_strided_slice %11 {offsets = [0, 16], sizes = [5, 8], strides = [1, 1]} : vector<5x32xf32> to vector<5x8xf32>
    %57 = vector.extract_strided_slice %12 {offsets = [0, 16], sizes = [5, 8], strides = [1, 1]} : vector<5x32xf32> to vector<5x8xf32>
    %58 = arith.truncf %56 : vector<5x8xf32> to vector<5x8xbf16>
    %59 = arith.truncf %57 : vector<5x8xf32> to vector<5x8xbf16>
    %cst_19 = arith.constant dense<0.000000e+00> : vector<5x5xf32>
    %60 = tpu.matmul %58, %59, %cst_19 {dimension_numbers = #tpu.dot_dimension_numbers<[1], [1], [0], [0], [0, 0, 1, 0], [], []>} : vector<5x8xbf16>, vector<5x8xbf16>, vector<5x5xf32> -> vector<5x5xf32>
    %cst_20 = arith.constant 0.353553385 : f32
    %61 = vector.broadcast %cst_20 : f32 to vector<5x5xf32>
    %62 = arith.mulf %60, %61 : vector<5x5xf32>
    %cst_21 = arith.constant dense<0xFF800000> : vector<5xf32>
    %63 = vector.multi_reduction <maximumf>, %62, %cst_21 [1] : vector<5x5xf32> to vector<5xf32>
    %64 = vector.shape_cast %63 : vector<5xf32> to vector<5x1xf32>
    %65 = vector.broadcast %64 : vector<5x1xf32> to vector<5x5xf32>
    %66 = arith.subf %62, %65 : vector<5x5xf32>
    %67 = math.exp %66 : vector<5x5xf32>
    %cst_22 = arith.constant dense<0.000000e+00> : vector<5xf32>
    %68 = vector.multi_reduction <add>, %67, %cst_22 [1] : vector<5x5xf32> to vector<5xf32>
    %69 = vector.shape_cast %68 : vector<5xf32> to vector<5x1xf32>
    %70 = tpu.reciprocal %69 {approx = true} : vector<5x1xf32> -> vector<5x1xf32>
    %71 = vector.broadcast %70 : vector<5x1xf32> to vector<5x5xf32>
    %72 = arith.mulf %67, %71 : vector<5x5xf32>
    %73 = vector.extract_strided_slice %13 {offsets = [0, 16], sizes = [5, 8], strides = [1, 1]} : vector<5x32xf32> to vector<5x8xf32>
    %74 = arith.truncf %72 : vector<5x5xf32> to vector<5x5xbf16>
    %75 = arith.truncf %73 : vector<5x8xf32> to vector<5x8xbf16>
    %cst_23 = arith.constant dense<0.000000e+00> : vector<5x8xf32>
    %76 = tpu.matmul %74, %75, %cst_23 {dimension_numbers = #tpu.dot_dimension_numbers<[1], [0], [0], [1], [0, 0, 1, 1], [], []>} : vector<5x5xbf16>, vector<5x8xbf16>, vector<5x8xf32> -> vector<5x8xf32>
    %77 = vector.extract_strided_slice %11 {offsets = [0, 24], sizes = [5, 8], strides = [1, 1]} : vector<5x32xf32> to vector<5x8xf32>
    %78 = vector.extract_strided_slice %12 {offsets = [0, 24], sizes = [5, 8], strides = [1, 1]} : vector<5x32xf32> to vector<5x8xf32>
    %79 = arith.truncf %77 : vector<5x8xf32> to vector<5x8xbf16>
    %80 = arith.truncf %78 : vector<5x8xf32> to vector<5x8xbf16>
    %cst_24 = arith.constant dense<0.000000e+00> : vector<5x5xf32>
    %81 = tpu.matmul %79, %80, %cst_24 {dimension_numbers = #tpu.dot_dimension_numbers<[1], [1], [0], [0], [0, 0, 1, 0], [], []>} : vector<5x8xbf16>, vector<5x8xbf16>, vector<5x5xf32> -> vector<5x5xf32>
    %cst_25 = arith.constant 0.353553385 : f32
    %82 = vector.broadcast %cst_25 : f32 to vector<5x5xf32>
    %83 = arith.mulf %81, %82 : vector<5x5xf32>
    %cst_26 = arith.constant dense<0xFF800000> : vector<5xf32>
    %84 = vector.multi_reduction <maximumf>, %83, %cst_26 [1] : vector<5x5xf32> to vector<5xf32>
    %85 = vector.shape_cast %84 : vector<5xf32> to vector<5x1xf32>
    %86 = vector.broadcast %85 : vector<5x1xf32> to vector<5x5xf32>
    %87 = arith.subf %83, %86 : vector<5x5xf32>
    %88 = math.exp %87 : vector<5x5xf32>
    %cst_27 = arith.constant dense<0.000000e+00> : vector<5xf32>
    %89 = vector.multi_reduction <add>, %88, %cst_27 [1] : vector<5x5xf32> to vector<5xf32>
    %90 = vector.shape_cast %89 : vector<5xf32> to vector<5x1xf32>
    %91 = tpu.reciprocal %90 {approx = true} : vector<5x1xf32> -> vector<5x1xf32>
    %92 = vector.broadcast %91 : vector<5x1xf32> to vector<5x5xf32>
    %93 = arith.mulf %88, %92 : vector<5x5xf32>
    %94 = vector.extract_strided_slice %13 {offsets = [0, 24], sizes = [5, 8], strides = [1, 1]} : vector<5x32xf32> to vector<5x8xf32>
    %95 = arith.truncf %93 : vector<5x5xf32> to vector<5x5xbf16>
    %96 = arith.truncf %94 : vector<5x8xf32> to vector<5x8xbf16>
    %cst_28 = arith.constant dense<0.000000e+00> : vector<5x8xf32>
    %97 = tpu.matmul %95, %96, %cst_28 {dimension_numbers = #tpu.dot_dimension_numbers<[1], [0], [0], [1], [0, 0, 1, 1], [], []>} : vector<5x5xbf16>, vector<5x8xbf16>, vector<5x8xf32> -> vector<5x8xf32>
    %98 = tpu.concatenate %34, %55, %76, %97 in 1 : vector<5x8xf32>, vector<5x8xf32>, vector<5x8xf32>, vector<5x8xf32> -> vector<5x32xf32>
    %c0_29 = arith.constant 0 : index
    %c0_30 = arith.constant 0 : index
    %99 = vector.load %arg5[%c0_29, %c0_30] : memref<32x32xf32, #tpu.memory_space<vmem>>, vector<32x32xf32>
    %100 = arith.truncf %98 : vector<5x32xf32> to vector<5x32xbf16>
    %101 = arith.truncf %99 : vector<32x32xf32> to vector<32x32xbf16>
    %cst_31 = arith.constant dense<0.000000e+00> : vector<5x32xf32>
    %102 = tpu.matmul %100, %101, %cst_31 {dimension_numbers = #tpu.dot_dimension_numbers<[1], [0], [0], [1], [0, 0, 1, 1], [], []>} : vector<5x32xbf16>, vector<32x32xbf16>, vector<5x32xf32> -> vector<5x32xf32>
    %c0_32 = arith.constant 0 : index
    %c0_33 = arith.constant 0 : index
    %103 = vector.load %arg6[%c0_32, %c0_33] : memref<1x32xf32, #tpu.memory_space<vmem>>, vector<1x32xf32>
    %104 = vector.broadcast %103 : vector<1x32xf32> to vector<5x32xf32>
    %105 = arith.addf %102, %104 : vector<5x32xf32>
    %106 = arith.addf %1, %105 : vector<5x32xf32>
    %c0_34 = arith.constant 0 : index
    %c0_35 = arith.constant 0 : index
    %107 = vector.load %arg7[%c0_34, %c0_35] : memref<1x32xf32, #tpu.memory_space<vmem>>, vector<1x32xf32>
    %c0_36 = arith.constant 0 : index
    %c0_37 = arith.constant 0 : index
    %108 = vector.load %arg8[%c0_36, %c0_37] : memref<1x32xf32, #tpu.memory_space<vmem>>, vector<1x32xf32>
    %cst_38 = arith.constant dense<0.000000e+00> : vector<5xf32>
    %109 = vector.multi_reduction <add>, %106, %cst_38 [1] : vector<5x32xf32> to vector<5xf32>
    %110 = vector.shape_cast %109 : vector<5xf32> to vector<5x1xf32>
    %cst_39 = arith.constant 3.200000e+01 : f32
    %111 = vector.broadcast %cst_39 : f32 to vector<5x1xf32>
    %112 = arith.divf %110, %111 : vector<5x1xf32>
    %113 = vector.broadcast %112 : vector<5x1xf32> to vector<5x32xf32>
    %114 = arith.subf %106, %113 : vector<5x32xf32>
    %115 = arith.mulf %114, %114 : vector<5x32xf32>
    %cst_40 = arith.constant dense<0.000000e+00> : vector<5xf32>
    %116 = vector.multi_reduction <add>, %115, %cst_40 [1] : vector<5x32xf32> to vector<5xf32>
    %117 = vector.shape_cast %116 : vector<5xf32> to vector<5x1xf32>
    %cst_41 = arith.constant 3.200000e+01 : f32
    %118 = vector.broadcast %cst_41 : f32 to vector<5x1xf32>
    %119 = arith.divf %117, %118 : vector<5x1xf32>
    %120 = vector.broadcast %112 : vector<5x1xf32> to vector<5x32xf32>
    %121 = arith.subf %106, %120 : vector<5x32xf32>
    %cst_42 = arith.constant 9.99999974E-6 : f32
    %122 = vector.broadcast %cst_42 : f32 to vector<5x1xf32>
    %123 = arith.addf %119, %122 : vector<5x1xf32>
    %124 = math.rsqrt %123 : vector<5x1xf32>
    %125 = vector.broadcast %124 : vector<5x1xf32> to vector<5x32xf32>
    %126 = arith.mulf %121, %125 : vector<5x32xf32>
    %127 = vector.broadcast %107 : vector<1x32xf32> to vector<5x32xf32>
    %128 = arith.mulf %126, %127 : vector<5x32xf32>
    %129 = vector.broadcast %108 : vector<1x32xf32> to vector<5x32xf32>
    %130 = arith.addf %128, %129 : vector<5x32xf32>
    %c0_43 = arith.constant 0 : index
    %c0_44 = arith.constant 0 : index
    %131 = vector.load %arg9[%c0_43, %c0_44] : memref<32x32xf32, #tpu.memory_space<vmem>>, vector<32x32xf32>
    %132 = arith.truncf %130 : vector<5x32xf32> to vector<5x32xbf16>
    %133 = arith.truncf %131 : vector<32x32xf32> to vector<32x32xbf16>
    %cst_45 = arith.constant dense<0.000000e+00> : vector<5x32xf32>
    %134 = tpu.matmul %132, %133, %cst_45 {dimension_numbers = #tpu.dot_dimension_numbers<[1], [0], [0], [1], [0, 0, 1, 1], [], []>} : vector<5x32xbf16>, vector<32x32xbf16>, vector<5x32xf32> -> vector<5x32xf32>
    %c0_46 = arith.constant 0 : index
    %c0_47 = arith.constant 0 : index
    %135 = vector.load %arg10[%c0_46, %c0_47] : memref<1x32xf32, #tpu.memory_space<vmem>>, vector<1x32xf32>
    %136 = vector.broadcast %135 : vector<1x32xf32> to vector<5x32xf32>
    %137 = arith.addf %134, %136 : vector<5x32xf32>
    %c0_48 = arith.constant 0 : index
    %c0_49 = arith.constant 0 : index
    %138 = vector.load %arg11[%c0_48, %c0_49] : memref<32x64xf32, #tpu.memory_space<vmem>>, vector<32x64xf32>
    %139 = arith.truncf %3 : vector<8x32xf32> to vector<8x32xbf16>
    %140 = arith.truncf %138 : vector<32x64xf32> to vector<32x64xbf16>
    %cst_50 = arith.constant dense<0.000000e+00> : vector<8x64xf32>
    %141 = tpu.matmul %139, %140, %cst_50 {dimension_numbers = #tpu.dot_dimension_numbers<[1], [0], [0], [1], [0, 0, 1, 1], [], []>} : vector<8x32xbf16>, vector<32x64xbf16>, vector<8x64xf32> -> vector<8x64xf32>
    %c0_51 = arith.constant 0 : index
    %c0_52 = arith.constant 0 : index
    %142 = vector.load %arg12[%c0_51, %c0_52] : memref<1x64xf32, #tpu.memory_space<vmem>>, vector<1x64xf32>
    %143 = vector.broadcast %142 : vector<1x64xf32> to vector<8x64xf32>
    %144 = arith.addf %141, %143 : vector<8x64xf32>
    %145 = vector.extract_strided_slice %144 {offsets = [0, 0], sizes = [8, 32], strides = [1, 1]} : vector<8x64xf32> to vector<8x32xf32>
    %146 = vector.extract_strided_slice %144 {offsets = [0, 32], sizes = [8, 32], strides = [1, 1]} : vector<8x64xf32> to vector<8x32xf32>
    %147 = vector.extract_strided_slice %137 {offsets = [0, 0], sizes = [5, 8], strides = [1, 1]} : vector<5x32xf32> to vector<5x8xf32>
    %148 = vector.extract_strided_slice %145 {offsets = [0, 0], sizes = [8, 8], strides = [1, 1]} : vector<8x32xf32> to vector<8x8xf32>
    %149 = arith.truncf %147 : vector<5x8xf32> to vector<5x8xbf16>
    %150 = arith.truncf %148 : vector<8x8xf32> to vector<8x8xbf16>
    %cst_53 = arith.constant dense<0.000000e+00> : vector<5x8xf32>
    %151 = tpu.matmul %149, %150, %cst_53 {dimension_numbers = #tpu.dot_dimension_numbers<[1], [1], [0], [0], [0, 0, 1, 0], [], []>} : vector<5x8xbf16>, vector<8x8xbf16>, vector<5x8xf32> -> vector<5x8xf32>
    %cst_54 = arith.constant 0.353553385 : f32
    %152 = vector.broadcast %cst_54 : f32 to vector<5x8xf32>
    %153 = arith.mulf %151, %152 : vector<5x8xf32>
    %cst_55 = arith.constant dense<0xFF800000> : vector<5xf32>
    %154 = vector.multi_reduction <maximumf>, %153, %cst_55 [1] : vector<5x8xf32> to vector<5xf32>
    %155 = vector.shape_cast %154 : vector<5xf32> to vector<5x1xf32>
    %156 = vector.broadcast %155 : vector<5x1xf32> to vector<5x8xf32>
    %157 = arith.subf %153, %156 : vector<5x8xf32>
    %158 = math.exp %157 : vector<5x8xf32>
    %cst_56 = arith.constant dense<0.000000e+00> : vector<5xf32>
    %159 = vector.multi_reduction <add>, %158, %cst_56 [1] : vector<5x8xf32> to vector<5xf32>
    %160 = vector.shape_cast %159 : vector<5xf32> to vector<5x1xf32>
    %161 = tpu.reciprocal %160 {approx = true} : vector<5x1xf32> -> vector<5x1xf32>
    %162 = vector.broadcast %161 : vector<5x1xf32> to vector<5x8xf32>
    %163 = arith.mulf %158, %162 : vector<5x8xf32>
    %164 = vector.extract_strided_slice %146 {offsets = [0, 0], sizes = [8, 8], strides = [1, 1]} : vector<8x32xf32> to vector<8x8xf32>
    %165 = arith.truncf %163 : vector<5x8xf32> to vector<5x8xbf16>
    %166 = arith.truncf %164 : vector<8x8xf32> to vector<8x8xbf16>
    %cst_57 = arith.constant dense<0.000000e+00> : vector<5x8xf32>
    %167 = tpu.matmul %165, %166, %cst_57 {dimension_numbers = #tpu.dot_dimension_numbers<[1], [0], [0], [1], [0, 0, 1, 1], [], []>} : vector<5x8xbf16>, vector<8x8xbf16>, vector<5x8xf32> -> vector<5x8xf32>
    %168 = vector.extract_strided_slice %137 {offsets = [0, 8], sizes = [5, 8], strides = [1, 1]} : vector<5x32xf32> to vector<5x8xf32>
    %169 = vector.extract_strided_slice %145 {offsets = [0, 8], sizes = [8, 8], strides = [1, 1]} : vector<8x32xf32> to vector<8x8xf32>
    %170 = arith.truncf %168 : vector<5x8xf32> to vector<5x8xbf16>
    %171 = arith.truncf %169 : vector<8x8xf32> to vector<8x8xbf16>
    %cst_58 = arith.constant dense<0.000000e+00> : vector<5x8xf32>
    %172 = tpu.matmul %170, %171, %cst_58 {dimension_numbers = #tpu.dot_dimension_numbers<[1], [1], [0], [0], [0, 0, 1, 0], [], []>} : vector<5x8xbf16>, vector<8x8xbf16>, vector<5x8xf32> -> vector<5x8xf32>
    %cst_59 = arith.constant 0.353553385 : f32
    %173 = vector.broadcast %cst_59 : f32 to vector<5x8xf32>
    %174 = arith.mulf %172, %173 : vector<5x8xf32>
    %cst_60 = arith.constant dense<0xFF800000> : vector<5xf32>
    %175 = vector.multi_reduction <maximumf>, %174, %cst_60 [1] : vector<5x8xf32> to vector<5xf32>
    %176 = vector.shape_cast %175 : vector<5xf32> to vector<5x1xf32>
    %177 = vector.broadcast %176 : vector<5x1xf32> to vector<5x8xf32>
    %178 = arith.subf %174, %177 : vector<5x8xf32>
    %179 = math.exp %178 : vector<5x8xf32>
    %cst_61 = arith.constant dense<0.000000e+00> : vector<5xf32>
    %180 = vector.multi_reduction <add>, %179, %cst_61 [1] : vector<5x8xf32> to vector<5xf32>
    %181 = vector.shape_cast %180 : vector<5xf32> to vector<5x1xf32>
    %182 = tpu.reciprocal %181 {approx = true} : vector<5x1xf32> -> vector<5x1xf32>
    %183 = vector.broadcast %182 : vector<5x1xf32> to vector<5x8xf32>
    %184 = arith.mulf %179, %183 : vector<5x8xf32>
    %185 = vector.extract_strided_slice %146 {offsets = [0, 8], sizes = [8, 8], strides = [1, 1]} : vector<8x32xf32> to vector<8x8xf32>
    %186 = arith.truncf %184 : vector<5x8xf32> to vector<5x8xbf16>
    %187 = arith.truncf %185 : vector<8x8xf32> to vector<8x8xbf16>
    %cst_62 = arith.constant dense<0.000000e+00> : vector<5x8xf32>
    %188 = tpu.matmul %186, %187, %cst_62 {dimension_numbers = #tpu.dot_dimension_numbers<[1], [0], [0], [1], [0, 0, 1, 1], [], []>} : vector<5x8xbf16>, vector<8x8xbf16>, vector<5x8xf32> -> vector<5x8xf32>
    %189 = vector.extract_strided_slice %137 {offsets = [0, 16], sizes = [5, 8], strides = [1, 1]} : vector<5x32xf32> to vector<5x8xf32>
    %190 = vector.extract_strided_slice %145 {offsets = [0, 16], sizes = [8, 8], strides = [1, 1]} : vector<8x32xf32> to vector<8x8xf32>
    %191 = arith.truncf %189 : vector<5x8xf32> to vector<5x8xbf16>
    %192 = arith.truncf %190 : vector<8x8xf32> to vector<8x8xbf16>
    %cst_63 = arith.constant dense<0.000000e+00> : vector<5x8xf32>
    %193 = tpu.matmul %191, %192, %cst_63 {dimension_numbers = #tpu.dot_dimension_numbers<[1], [1], [0], [0], [0, 0, 1, 0], [], []>} : vector<5x8xbf16>, vector<8x8xbf16>, vector<5x8xf32> -> vector<5x8xf32>
    %cst_64 = arith.constant 0.353553385 : f32
    %194 = vector.broadcast %cst_64 : f32 to vector<5x8xf32>
    %195 = arith.mulf %193, %194 : vector<5x8xf32>
    %cst_65 = arith.constant dense<0xFF800000> : vector<5xf32>
    %196 = vector.multi_reduction <maximumf>, %195, %cst_65 [1] : vector<5x8xf32> to vector<5xf32>
    %197 = vector.shape_cast %196 : vector<5xf32> to vector<5x1xf32>
    %198 = vector.broadcast %197 : vector<5x1xf32> to vector<5x8xf32>
    %199 = arith.subf %195, %198 : vector<5x8xf32>
    %200 = math.exp %199 : vector<5x8xf32>
    %cst_66 = arith.constant dense<0.000000e+00> : vector<5xf32>
    %201 = vector.multi_reduction <add>, %200, %cst_66 [1] : vector<5x8xf32> to vector<5xf32>
    %202 = vector.shape_cast %201 : vector<5xf32> to vector<5x1xf32>
    %203 = tpu.reciprocal %202 {approx = true} : vector<5x1xf32> -> vector<5x1xf32>
    %204 = vector.broadcast %203 : vector<5x1xf32> to vector<5x8xf32>
    %205 = arith.mulf %200, %204 : vector<5x8xf32>
    %206 = vector.extract_strided_slice %146 {offsets = [0, 16], sizes = [8, 8], strides = [1, 1]} : vector<8x32xf32> to vector<8x8xf32>
    %207 = arith.truncf %205 : vector<5x8xf32> to vector<5x8xbf16>
    %208 = arith.truncf %206 : vector<8x8xf32> to vector<8x8xbf16>
    %cst_67 = arith.constant dense<0.000000e+00> : vector<5x8xf32>
    %209 = tpu.matmul %207, %208, %cst_67 {dimension_numbers = #tpu.dot_dimension_numbers<[1], [0], [0], [1], [0, 0, 1, 1], [], []>} : vector<5x8xbf16>, vector<8x8xbf16>, vector<5x8xf32> -> vector<5x8xf32>
    %210 = vector.extract_strided_slice %137 {offsets = [0, 24], sizes = [5, 8], strides = [1, 1]} : vector<5x32xf32> to vector<5x8xf32>
    %211 = vector.extract_strided_slice %145 {offsets = [0, 24], sizes = [8, 8], strides = [1, 1]} : vector<8x32xf32> to vector<8x8xf32>
    %212 = arith.truncf %210 : vector<5x8xf32> to vector<5x8xbf16>
    %213 = arith.truncf %211 : vector<8x8xf32> to vector<8x8xbf16>
    %cst_68 = arith.constant dense<0.000000e+00> : vector<5x8xf32>
    %214 = tpu.matmul %212, %213, %cst_68 {dimension_numbers = #tpu.dot_dimension_numbers<[1], [1], [0], [0], [0, 0, 1, 0], [], []>} : vector<5x8xbf16>, vector<8x8xbf16>, vector<5x8xf32> -> vector<5x8xf32>
    %cst_69 = arith.constant 0.353553385 : f32
    %215 = vector.broadcast %cst_69 : f32 to vector<5x8xf32>
    %216 = arith.mulf %214, %215 : vector<5x8xf32>
    %cst_70 = arith.constant dense<0xFF800000> : vector<5xf32>
    %217 = vector.multi_reduction <maximumf>, %216, %cst_70 [1] : vector<5x8xf32> to vector<5xf32>
    %218 = vector.shape_cast %217 : vector<5xf32> to vector<5x1xf32>
    %219 = vector.broadcast %218 : vector<5x1xf32> to vector<5x8xf32>
    %220 = arith.subf %216, %219 : vector<5x8xf32>
    %221 = math.exp %220 : vector<5x8xf32>
    %cst_71 = arith.constant dense<0.000000e+00> : vector<5xf32>
    %222 = vector.multi_reduction <add>, %221, %cst_71 [1] : vector<5x8xf32> to vector<5xf32>
    %223 = vector.shape_cast %222 : vector<5xf32> to vector<5x1xf32>
    %224 = tpu.reciprocal %223 {approx = true} : vector<5x1xf32> -> vector<5x1xf32>
    %225 = vector.broadcast %224 : vector<5x1xf32> to vector<5x8xf32>
    %226 = arith.mulf %221, %225 : vector<5x8xf32>
    %227 = vector.extract_strided_slice %146 {offsets = [0, 24], sizes = [8, 8], strides = [1, 1]} : vector<8x32xf32> to vector<8x8xf32>
    %228 = arith.truncf %226 : vector<5x8xf32> to vector<5x8xbf16>
    %229 = arith.truncf %227 : vector<8x8xf32> to vector<8x8xbf16>
    %cst_72 = arith.constant dense<0.000000e+00> : vector<5x8xf32>
    %230 = tpu.matmul %228, %229, %cst_72 {dimension_numbers = #tpu.dot_dimension_numbers<[1], [0], [0], [1], [0, 0, 1, 1], [], []>} : vector<5x8xbf16>, vector<8x8xbf16>, vector<5x8xf32> -> vector<5x8xf32>
    %231 = tpu.concatenate %167, %188, %209, %230 in 1 : vector<5x8xf32>, vector<5x8xf32>, vector<5x8xf32>, vector<5x8xf32> -> vector<5x32xf32>
    %c0_73 = arith.constant 0 : index
    %c0_74 = arith.constant 0 : index
    %232 = vector.load %arg13[%c0_73, %c0_74] : memref<32x32xf32, #tpu.memory_space<vmem>>, vector<32x32xf32>
    %233 = arith.truncf %231 : vector<5x32xf32> to vector<5x32xbf16>
    %234 = arith.truncf %232 : vector<32x32xf32> to vector<32x32xbf16>
    %cst_75 = arith.constant dense<0.000000e+00> : vector<5x32xf32>
    %235 = tpu.matmul %233, %234, %cst_75 {dimension_numbers = #tpu.dot_dimension_numbers<[1], [0], [0], [1], [0, 0, 1, 1], [], []>} : vector<5x32xbf16>, vector<32x32xbf16>, vector<5x32xf32> -> vector<5x32xf32>
    %c0_76 = arith.constant 0 : index
    %c0_77 = arith.constant 0 : index
    %236 = vector.load %arg14[%c0_76, %c0_77] : memref<1x32xf32, #tpu.memory_space<vmem>>, vector<1x32xf32>
    %237 = vector.broadcast %236 : vector<1x32xf32> to vector<5x32xf32>
    %238 = arith.addf %235, %237 : vector<5x32xf32>
    %239 = arith.addf %130, %238 : vector<5x32xf32>
    %c0_78 = arith.constant 0 : index
    %c0_79 = arith.constant 0 : index
    %240 = vector.load %arg15[%c0_78, %c0_79] : memref<1x32xf32, #tpu.memory_space<vmem>>, vector<1x32xf32>
    %c0_80 = arith.constant 0 : index
    %c0_81 = arith.constant 0 : index
    %241 = vector.load %arg16[%c0_80, %c0_81] : memref<1x32xf32, #tpu.memory_space<vmem>>, vector<1x32xf32>
    %cst_82 = arith.constant dense<0.000000e+00> : vector<5xf32>
    %242 = vector.multi_reduction <add>, %239, %cst_82 [1] : vector<5x32xf32> to vector<5xf32>
    %243 = vector.shape_cast %242 : vector<5xf32> to vector<5x1xf32>
    %cst_83 = arith.constant 3.200000e+01 : f32
    %244 = vector.broadcast %cst_83 : f32 to vector<5x1xf32>
    %245 = arith.divf %243, %244 : vector<5x1xf32>
    %246 = vector.broadcast %245 : vector<5x1xf32> to vector<5x32xf32>
    %247 = arith.subf %239, %246 : vector<5x32xf32>
    %248 = arith.mulf %247, %247 : vector<5x32xf32>
    %cst_84 = arith.constant dense<0.000000e+00> : vector<5xf32>
    %249 = vector.multi_reduction <add>, %248, %cst_84 [1] : vector<5x32xf32> to vector<5xf32>
    %250 = vector.shape_cast %249 : vector<5xf32> to vector<5x1xf32>
    %cst_85 = arith.constant 3.200000e+01 : f32
    %251 = vector.broadcast %cst_85 : f32 to vector<5x1xf32>
    %252 = arith.divf %250, %251 : vector<5x1xf32>
    %253 = vector.broadcast %245 : vector<5x1xf32> to vector<5x32xf32>
    %254 = arith.subf %239, %253 : vector<5x32xf32>
    %cst_86 = arith.constant 9.99999974E-6 : f32
    %255 = vector.broadcast %cst_86 : f32 to vector<5x1xf32>
    %256 = arith.addf %252, %255 : vector<5x1xf32>
    %257 = math.rsqrt %256 : vector<5x1xf32>
    %258 = vector.broadcast %257 : vector<5x1xf32> to vector<5x32xf32>
    %259 = arith.mulf %254, %258 : vector<5x32xf32>
    %260 = vector.broadcast %240 : vector<1x32xf32> to vector<5x32xf32>
    %261 = arith.mulf %259, %260 : vector<5x32xf32>
    %262 = vector.broadcast %241 : vector<1x32xf32> to vector<5x32xf32>
    %263 = arith.addf %261, %262 : vector<5x32xf32>
    %c0_87 = arith.constant 0 : index
    %c0_88 = arith.constant 0 : index
    %264 = vector.load %arg17[%c0_87, %c0_88] : memref<32x64xf32, #tpu.memory_space<vmem>>, vector<32x64xf32>
    %265 = arith.truncf %263 : vector<5x32xf32> to vector<5x32xbf16>
    %266 = arith.truncf %264 : vector<32x64xf32> to vector<32x64xbf16>
    %cst_89 = arith.constant dense<0.000000e+00> : vector<5x64xf32>
    %267 = tpu.matmul %265, %266, %cst_89 {dimension_numbers = #tpu.dot_dimension_numbers<[1], [0], [0], [1], [0, 0, 1, 1], [], []>} : vector<5x32xbf16>, vector<32x64xbf16>, vector<5x64xf32> -> vector<5x64xf32>
    %c0_90 = arith.constant 0 : index
    %c0_91 = arith.constant 0 : index
    %268 = vector.load %arg18[%c0_90, %c0_91] : memref<1x64xf32, #tpu.memory_space<vmem>>, vector<1x64xf32>
    %269 = vector.broadcast %268 : vector<1x64xf32> to vector<5x64xf32>
    %270 = arith.addf %267, %269 : vector<5x64xf32>
    %cst_92 = arith.constant 0.000000e+00 : f32
    %271 = vector.broadcast %cst_92 : f32 to vector<5x64xf32>
    %272 = arith.maximumf %270, %271 : vector<5x64xf32>
    %c0_93 = arith.constant 0 : index
    %c0_94 = arith.constant 0 : index
    %273 = vector.load %arg19[%c0_93, %c0_94] : memref<64x32xf32, #tpu.memory_space<vmem>>, vector<64x32xf32>
    %274 = arith.truncf %272 : vector<5x64xf32> to vector<5x64xbf16>
    %275 = arith.truncf %273 : vector<64x32xf32> to vector<64x32xbf16>
    %cst_95 = arith.constant dense<0.000000e+00> : vector<5x32xf32>
    %276 = tpu.matmul %274, %275, %cst_95 {dimension_numbers = #tpu.dot_dimension_numbers<[1], [0], [0], [1], [0, 0, 1, 1], [], []>} : vector<5x64xbf16>, vector<64x32xbf16>, vector<5x32xf32> -> vector<5x32xf32>
    %c0_96 = arith.constant 0 : index
    %c0_97 = arith.constant 0 : index
    %277 = vector.load %arg20[%c0_96, %c0_97] : memref<1x32xf32, #tpu.memory_space<vmem>>, vector<1x32xf32>
    %278 = vector.broadcast %277 : vector<1x32xf32> to vector<5x32xf32>
    %279 = arith.addf %276, %278 : vector<5x32xf32>
    %280 = arith.addf %263, %279 : vector<5x32xf32>
    %c0_98 = arith.constant 0 : index
    %c0_99 = arith.constant 0 : index
    %281 = vector.load %arg21[%c0_98, %c0_99] : memref<1x32xf32, #tpu.memory_space<vmem>>, vector<1x32xf32>
    %c0_100 = arith.constant 0 : index
    %c0_101 = arith.constant 0 : index
    %282 = vector.load %arg22[%c0_100, %c0_101] : memref<1x32xf32, #tpu.memory_space<vmem>>, vector<1x32xf32>
    %cst_102 = arith.constant dense<0.000000e+00> : vector<5xf32>
    %283 = vector.multi_reduction <add>, %280, %cst_102 [1] : vector<5x32xf32> to vector<5xf32>
    %284 = vector.shape_cast %283 : vector<5xf32> to vector<5x1xf32>
    %cst_103 = arith.constant 3.200000e+01 : f32
    %285 = vector.broadcast %cst_103 : f32 to vector<5x1xf32>
    %286 = arith.divf %284, %285 : vector<5x1xf32>
    %287 = vector.broadcast %286 : vector<5x1xf32> to vector<5x32xf32>
    %288 = arith.subf %280, %287 : vector<5x32xf32>
    %289 = arith.mulf %288, %288 : vector<5x32xf32>
    %cst_104 = arith.constant dense<0.000000e+00> : vector<5xf32>
    %290 = vector.multi_reduction <add>, %289, %cst_104 [1] : vector<5x32xf32> to vector<5xf32>
    %291 = vector.shape_cast %290 : vector<5xf32> to vector<5x1xf32>
    %cst_105 = arith.constant 3.200000e+01 : f32
    %292 = vector.broadcast %cst_105 : f32 to vector<5x1xf32>
    %293 = arith.divf %291, %292 : vector<5x1xf32>
    %294 = vector.broadcast %286 : vector<5x1xf32> to vector<5x32xf32>
    %295 = arith.subf %280, %294 : vector<5x32xf32>
    %cst_106 = arith.constant 9.99999974E-6 : f32
    %296 = vector.broadcast %cst_106 : f32 to vector<5x1xf32>
    %297 = arith.addf %293, %296 : vector<5x1xf32>
    %298 = math.rsqrt %297 : vector<5x1xf32>
    %299 = vector.broadcast %298 : vector<5x1xf32> to vector<5x32xf32>
    %300 = arith.mulf %295, %299 : vector<5x32xf32>
    %301 = vector.broadcast %281 : vector<1x32xf32> to vector<5x32xf32>
    %302 = arith.mulf %300, %301 : vector<5x32xf32>
    %303 = vector.broadcast %282 : vector<1x32xf32> to vector<5x32xf32>
    %304 = arith.addf %302, %303 : vector<5x32xf32>
    %c0_107 = arith.constant 0 : index
    %c0_108 = arith.constant 0 : index
    %c0_109 = arith.constant 0 : index
    %305 = vector.load %arg23[%c0_107, %c0_108, %c0_109] : memref<1x5x32xf32, #tpu.memory_space<vmem>>, vector<1x5x32xf32>
    %306 = vector.shape_cast %305 : vector<1x5x32xf32> to vector<5x32xf32>
    %307 = vector.shape_cast %304 : vector<5x32xf32> to vector<1x5x32xf32>
    tpu.vector_store %arg23[%c0_107, %c0_108, %c0_109], %307 {strides = array<i32>} : memref<1x5x32xf32, #tpu.memory_space<vmem>>, vector<1x5x32xf32>,
    return
  }
  func.func @transform_0(%arg0: i32) -> (i32, i32, i32) {
    %c0_i32 = arith.constant 0 : i32
    %c0_i32_0 = arith.constant 0 : i32
    %c0_i32_1 = arith.constant 0 : i32
    return %arg0, %c0_i32, %c0_i32_0 : i32, i32, i32
  }
  func.func @transform_1(%arg0: i32) -> (i32, i32, i32) {
    %c0_i32 = arith.constant 0 : i32
    %c0_i32_0 = arith.constant 0 : i32
    %c0_i32_1 = arith.constant 0 : i32
    return %arg0, %c0_i32, %c0_i32_0 : i32, i32, i32
  }
  func.func @transform_2(%arg0: i32) -> (i32, i32) {
    %c0_i32 = arith.constant 0 : i32
    %c0_i32_0 = arith.constant 0 : i32
    %c0_i32_1 = arith.constant 0 : i32
    return %c0_i32, %c0_i32_0 : i32, i32
  }
  func.func @transform_3(%arg0: i32) -> (i32, i32) {
    %c0_i32 = arith.constant 0 : i32
    %c0_i32_0 = arith.constant 0 : i32
    %c0_i32_1 = arith.constant 0 : i32
    return %c0_i32, %c0_i32_0 : i32, i32
  }
  func.func @transform_4(%arg0: i32) -> (i32, i32) {
    %c0_i32 = arith.constant 0 : i32
    %c0_i32_0 = arith.constant 0 : i32
    %c0_i32_1 = arith.constant 0 : i32
    return %c0_i32, %c0_i32_0 : i32, i32
  }
  func.func @transform_5(%arg0: i32) -> (i32, i32) {
    %c0_i32 = arith.constant 0 : i32
    %c0_i32_0 = arith.constant 0 : i32
    %c0_i32_1 = arith.constant 0 : i32
    return %c0_i32, %c0_i32_0 : i32, i32
  }
  func.func @transform_6(%arg0: i32) -> (i32, i32) {
    %c0_i32 = arith.constant 0 : i32
    %c0_i32_0 = arith.constant 0 : i32
    %c0_i32_1 = arith.constant 0 : i32
    return %c0_i32, %c0_i32_0 : i32, i32
  }
  func.func @transform_7(%arg0: i32) -> (i32, i32) {
    %c0_i32 = arith.constant 0 : i32
    %c0_i32_0 = arith.constant 0 : i32
    %c0_i32_1 = arith.constant 0 : i32
    return %c0_i32, %c0_i32_0 : i32, i32
  }
  func.func @transform_8(%arg0: i32) -> (i32, i32) {
    %c0_i32 = arith.constant 0 : i32
    %c0_i32_0 = arith.constant 0 : i32
    %c0_i32_1 = arith.constant 0 : i32
    return %c0_i32, %c0_i32_0 : i32, i32
  }
  func.func @transform_9(%arg0: i32) -> (i32, i32) {
    %c0_i32 = arith.constant 0 : i32
    %c0_i32_0 = arith.constant 0 : i32
    %c0_i32_1 = arith.constant 0 : i32
    return %c0_i32, %c0_i32_0 : i32, i32
  }
  func.func @transform_10(%arg0: i32) -> (i32, i32) {
    %c0_i32 = arith.constant 0 : i32
    %c0_i32_0 = arith.constant 0 : i32
    %c0_i32_1 = arith.constant 0 : i32
    return %c0_i32, %c0_i32_0 : i32, i32
  }
  func.func @transform_11(%arg0: i32) -> (i32, i32) {
    %c0_i32 = arith.constant 0 : i32
    %c0_i32_0 = arith.constant 0 : i32
    %c0_i32_1 = arith.constant 0 : i32
    return %c0_i32, %c0_i32_0 : i32, i32
  }
  func.func @transform_12(%arg0: i32) -> (i32, i32) {
    %c0_i32 = arith.constant 0 : i32
    %c0_i32_0 = arith.constant 0 : i32
    %c0_i32_1 = arith.constant 0 : i32
    return %c0_i32, %c0_i32_0 : i32, i32
  }
  func.func @transform_13(%arg0: i32) -> (i32, i32) {
    %c0_i32 = arith.constant 0 : i32
    %c0_i32_0 = arith.constant 0 : i32
    %c0_i32_1 = arith.constant 0 : i32
    return %c0_i32, %c0_i32_0 : i32, i32
  }
  func.func @transform_14(%arg0: i32) -> (i32, i32) {
    %c0_i32 = arith.constant 0 : i32
    %c0_i32_0 = arith.constant 0 : i32
    %c0_i32_1 = arith.constant 0 : i32
    return %c0_i32, %c0_i32_0 : i32, i32
  }
  func.func @transform_15(%arg0: i32) -> (i32, i32) {
    %c0_i32 = arith.constant 0 : i32
    %c0_i32_0 = arith.constant 0 : i32
    %c0_i32_1 = arith.constant 0 : i32
    return %c0_i32, %c0_i32_0 : i32, i32
  }
  func.func @transform_16(%arg0: i32) -> (i32, i32) {
    %c0_i32 = arith.constant 0 : i32
    %c0_i32_0 = arith.constant 0 : i32
    %c0_i32_1 = arith.constant 0 : i32
    return %c0_i32, %c0_i32_0 : i32, i32
  }
  func.func @transform_17(%arg0: i32) -> (i32, i32) {
    %c0_i32 = arith.constant 0 : i32
    %c0_i32_0 = arith.constant 0 : i32
    %c0_i32_1 = arith.constant 0 : i32
    return %c0_i32, %c0_i32_0 : i32, i32
  }
  func.func @transform_18(%arg0: i32) -> (i32, i32) {
    %c0_i32 = arith.constant 0 : i32
    %c0_i32_0 = arith.constant 0 : i32
    %c0_i32_1 = arith.constant 0 : i32
    return %c0_i32, %c0_i32_0 : i32, i32
  }
  func.func @transform_19(%arg0: i32) -> (i32, i32) {
    %c0_i32 = arith.constant 0 : i32
    %c0_i32_0 = arith.constant 0 : i32
    %c0_i32_1 = arith.constant 0 : i32
    return %c0_i32, %c0_i32_0 : i32, i32
  }
  func.func @transform_20(%arg0: i32) -> (i32, i32) {
    %c0_i32 = arith.constant 0 : i32
    %c0_i32_0 = arith.constant 0 : i32
    %c0_i32_1 = arith.constant 0 : i32
    return %c0_i32, %c0_i32_0 : i32, i32
  }
  func.func @transform_21(%arg0: i32) -> (i32, i32) {
    %c0_i32 = arith.constant 0 : i32
    %c0_i32_0 = arith.constant 0 : i32
    %c0_i32_1 = arith.constant 0 : i32
    return %c0_i32, %c0_i32_0 : i32, i32
  }
  func.func @transform_22(%arg0: i32) -> (i32, i32, i32) {
    %c0_i32 = arith.constant 0 : i32
    %c0_i32_0 = arith.constant 0 : i32
    %c0_i32_1 = arith.constant 0 : i32
    return %arg0, %c0_i32, %c0_i32_0 : i32, i32, i32
  }
}

module attributes {stable_mosaic.version = 11 : i64} {
  func.func @_decoder_layer_kernel(%arg0: i32, %arg1: memref<1x5x32xf32, #tpu.memory_space<vmem>>, %arg2: memref<1x8x32xf32, #tpu.memory_space<vmem>>, %arg3: memref<32x96xf32, #tpu.memory_space<vmem>>, %arg4: memref<1x96xf32, #tpu.memory_space<vmem>>, %arg5: memref<32x32xf32, #tpu.memory_space<vmem>>, %arg6: memref<1x32xf32, #tpu.memory_space<vmem>>, %arg7: memref<1x32xf32, #tpu.memory_space<vmem>>, %arg8: memref<1x32xf32, #tpu.memory_space<vmem>>, %arg9: memref<32x32xf32, #tpu.memory_space<vmem>>, %arg10: memref<1x32xf32, #tpu.memory_space<vmem>>, %arg11: memref<32x64xf32, #tpu.memory_space<vmem>>, %arg12: memref<1x64xf32, #tpu.memory_space<vmem>>, %arg13: memref<32x32xf32, #tpu.memory_space<vmem>>, %arg14: memref<1x32xf32, #tpu.memory_space<vmem>>, %arg15: memref<1x32xf32, #tpu.memory_space<vmem>>, %arg16: memref<1x32xf32, #tpu.memory_space<vmem>>, %arg17: memref<32x64xf32, #tpu.memory_space<vmem>>, %arg18: memref<1x64xf32, #tpu.memory_space<vmem>>, %arg19: memref<64x32xf32, #tpu.memory_space<vmem>>, %arg20: memref<1x32xf32, #tpu.memory_space<vmem>>, %arg21: memref<1x32xf32, #tpu.memory_space<vmem>>, %arg22: memref<1x32xf32, #tpu.memory_space<vmem>>, %arg23: memref<1x5x32xf32, #tpu.memory_space<vmem>>) attributes {dimension_semantics = [#tpu.dimension_semantics<parallel>], iteration_bounds = array<i64: 2>, scalar_prefetch = 0 : i64, scratch_operands = 0 : i64, tpu.core_type = #tpu.core_type<tc>, window_params = [{transform_indices = @transform_0, window_bounds = array<i64: 1, 5, 32>}, {transform_indices = @transform_1, window_bounds = array<i64: 1, 8, 32>}, {pipeline_mode = #tpu.pipeline_mode<synchronous>, transform_indices = @transform_2, window_bounds = array<i64: 32, 96>}, {pipeline_mode = #tpu.pipeline_mode<synchronous>, transform_indices = @transform_3, window_bounds = array<i64: 1, 96>}, {pipeline_mode = #tpu.pipeline_mode<synchronous>, transform_indices = @transform_4, window_bounds = array<i64: 32, 32>}, {pipeline_mode = #tpu.pipeline_mode<synchronous>, transform_indices = @transform_5, window_bounds = array<i64: 1, 32>}, {pipeline_mode = #tpu.pipeline_mode<synchronous>, transform_indices = @transform_6, window_bounds = array<i64: 1, 32>}, {pipeline_mode = #tpu.pipeline_mode<synchronous>, transform_indices = @transform_7, window_bounds = array<i64: 1, 32>}, {pipeline_mode = #tpu.pipeline_mode<synchronous>, transform_indices = @transform_8, window_bounds = array<i64: 32, 32>}, {pipeline_mode = #tpu.pipeline_mode<synchronous>, transform_indices = @transform_9, window_bounds = array<i64: 1, 32>}, {pipeline_mode = #tpu.pipeline_mode<synchronous>, transform_indices = @transform_10, window_bounds = array<i64: 32, 64>}, {pipeline_mode = #tpu.pipeline_mode<synchronous>, transform_indices = @transform_11, window_bounds = array<i64: 1, 64>}, {pipeline_mode = #tpu.pipeline_mode<synchronous>, transform_indices = @transform_12, window_bounds = array<i64: 32, 32>}, {pipeline_mode = #tpu.pipeline_mode<synchronous>, transform_indices = @transform_13, window_bounds = array<i64: 1, 32>}, {pipeline_mode = #tpu.pipeline_mode<synchronous>, transform_indices = @transform_14, window_bounds = array<i64: 1, 32>}, {pipeline_mode = #tpu.pipeline_mode<synchronous>, transform_indices = @transform_15, window_bounds = array<i64: 1, 32>}, {pipeline_mode = #tpu.pipeline_mode<synchronous>, transform_indices = @transform_16, window_bounds = array<i64: 32, 64>}, {pipeline_mode = #tpu.pipeline_mode<synchronous>, transform_indices = @transform_17, window_bounds = array<i64: 1, 64>}, {pipeline_mode = #tpu.pipeline_mode<synchronous>, transform_indices = @transform_18, window_bounds = array<i64: 64, 32>}, {pipeline_mode = #tpu.pipeline_mode<synchronous>, transform_indices = @transform_19, window_bounds = array<i64: 1, 32>}, {pipeline_mode = #tpu.pipeline_mode<synchronous>, transform_indices = @transform_20, window_bounds = array<i64: 1, 32>}, {pipeline_mode = #tpu.pipeline_mode<synchronous>, transform_indices = @transform_21, window_bounds = array<i64: 1, 32>}, {transform_indices = @transform_22, window_bounds = array<i64: 1, 5, 32>}]} {
    %c0 = arith.constant 0 : index
    %c0_0 = arith.constant 0 : index
    %c0_1 = arith.constant 0 : index
    %0 = vector.load %arg1[%c0, %c0_0, %c0_1] : memref<1x5x32xf32, #tpu.memory_space<vmem>>, vector<1x5x32xf32>
    %1 = vector.shape_cast %0 : vector<1x5x32xf32> to vector<5x32xf32>
    %c0_2 = arith.constant 0 : index
    %c0_3 = arith.constant 0 : index
    %c0_4 = arith.constant 0 : index
    %2 = vector.load %arg2[%c0_2, %c0_3, %c0_4] : memref<1x8x32xf32, #tpu.memory_space<vmem>>, vector<1x8x32xf32>
    %3 = vector.shape_cast %2 : vector<1x8x32xf32> to vector<8x32xf32>
    %c0_5 = arith.constant 0 : index
    %c0_6 = arith.constant 0 : index
    %4 = vector.load %arg3[%c0_5, %c0_6] : memref<32x96xf32, #tpu.memory_space<vmem>>, vector<32x96xf32>
    %5 = arith.truncf %1 : vector<5x32xf32> to vector<5x32xbf16>
    %6 = arith.truncf %4 : vector<32x96xf32> to vector<32x96xbf16>
    %cst = arith.constant dense<0.000000e+00> : vector<5x96xf32>
    %7 = tpu.matmul %5, %6, %cst {dimension_numbers = #tpu.dot_dimension_numbers<[1], [0], [0], [1], [0, 0, 1, 1], [], []>} : vector<5x32xbf16>, vector<32x96xbf16>, vector<5x96xf32> -> vector<5x96xf32>
    %c0_7 = arith.constant 0 : index
    %c0_8 = arith.constant 0 : index
    %8 = vector.load %arg4[%c0_7, %c0_8] : memref<1x96xf32, #tpu.memory_space<vmem>>, vector<1x96xf32>
    %9 = vector.broadcast %8 : vector<1x96xf32> to vector<5x96xf32>
    %10 = arith.addf %7, %9 : vector<5x96xf32>
    %11 = vector.extract_strided_slice %10 {offsets = [0, 0], sizes = [5, 32], strides = [1, 1]} : vector<5x96xf32> to vector<5x32xf32>
    %12 = vector.extract_strided_slice %10 {offsets = [0, 32], sizes = [5, 32], strides = [1, 1]} : vector<5x96xf32> to vector<5x32xf32>
    %13 = vector.extract_strided_slice %10 {offsets = [0, 64], sizes = [5, 32], strides = [1, 1]} : vector<5x96xf32> to vector<5x32xf32>
    %14 = vector.extract_strided_slice %11 {offsets = [0, 0], sizes = [5, 8], strides = [1, 1]} : vector<5x32xf32> to vector<5x8xf32>
    %15 = vector.extract_strided_slice %12 {offsets = [0, 0], sizes = [5, 8], strides = [1, 1]} : vector<5x32xf32> to vector<5x8xf32>
    %16 = arith.truncf %14 : vector<5x8xf32> to vector<5x8xbf16>
    %17 = arith.truncf %15 : vector<5x8xf32> to vector<5x8xbf16>
    %cst_9 = arith.constant dense<0.000000e+00> : vector<5x5xf32>
    %18 = tpu.matmul %16, %17, %cst_9 {dimension_numbers = #tpu.dot_dimension_numbers<[1], [1], [0], [0], [0, 0, 1, 0], [], []>} : vector<5x8xbf16>, vector<5x8xbf16>, vector<5x5xf32> -> vector<5x5xf32>
    %cst_10 = arith.constant 0.353553385 : f32
    %19 = vector.broadcast %cst_10 : f32 to vector<5x5xf32>
    %20 = arith.mulf %18, %19 : vector<5x5xf32>
    %cst_11 = arith.constant dense<0xFF800000> : vector<5xf32>
    %21 = vector.multi_reduction <maximumf>, %20, %cst_11 [1] : vector<5x5xf32> to vector<5xf32>
    %22 = vector.shape_cast %21 : vector<5xf32> to vector<5x1xf32>
    %23 = vector.broadcast %22 : vector<5x1xf32> to vector<5x5xf32>
    %24 = arith.subf %20, %23 : vector<5x5xf32>
    %25 = math.exp %24 : vector<5x5xf32>
    %cst_12 = arith.constant dense<0.000000e+00> : vector<5xf32>
    %26 = vector.multi_reduction <add>, %25, %cst_12 [1] : vector<5x5xf32> to vector<5xf32>
    %27 = vector.shape_cast %26 : vector<5xf32> to vector<5x1xf32>
    %28 = tpu.reciprocal %27 {approx = true} : vector<5x1xf32> -> vector<5x1xf32>
    %29 = vector.broadcast %28 : vector<5x1xf32> to vector<5x5xf32>
    %30 = arith.mulf %25, %29 : vector<5x5xf32>
    %31 = vector.extract_strided_slice %13 {offsets = [0, 0], sizes = [5, 8], strides = [1, 1]} : vector<5x32xf32> to vector<5x8xf32>
    %32 = arith.truncf %30 : vector<5x5xf32> to vector<5x5xbf16>
    %33 = arith.truncf %31 : vector<5x8xf32> to vector<5x8xbf16>
    %cst_13 = arith.constant dense<0.000000e+00> : vector<5x8xf32>
    %34 = tpu.matmul %32, %33, %cst_13 {dimension_numbers = #tpu.dot_dimension_numbers<[1], [0], [0], [1], [0, 0, 1, 1], [], []>} : vector<5x5xbf16>, vector<5x8xbf16>, vector<5x8xf32> -> vector<5x8xf32>
    %35 = vector.extract_strided_slice %11 {offsets = [0, 8], sizes = [5, 8], strides = [1, 1]} : vector<5x32xf32> to vector<5x8xf32>
    %36 = vector.extract_strided_slice %12 {offsets = [0, 8], sizes = [5, 8], strides = [1, 1]} : vector<5x32xf32> to vector<5x8xf32>
    %37 = arith.truncf %35 : vector<5x8xf32> to vector<5x8xbf16>
    %38 = arith.truncf %36 : vector<5x8xf32> to vector<5x8xbf16>
    %cst_14 = arith.constant dense<0.000000e+00> : vector<5x5xf32>
    %39 = tpu.matmul %37, %38, %cst_14 {dimension_numbers = #tpu.dot_dimension_numbers<[1], [1], [0], [0], [0, 0, 1, 0], [], []>} : vector<5x8xbf16>, vector<5x8xbf16>, vector<5x5xf32> -> vector<5x5xf32>
    %cst_15 = arith.constant 0.353553385 : f32
    %40 = vector.broadcast %cst_15 : f32 to vector<5x5xf32>
    %41 = arith.mulf %39, %40 : vector<5x5xf32>
    %cst_16 = arith.constant dense<0xFF800000> : vector<5xf32>
    %42 = vector.multi_reduction <maximumf>, %41, %cst_16 [1] : vector<5x5xf32> to vector<5xf32>
    %43 = vector.shape_cast %42 : vector<5xf32> to vector<5x1xf32>
    %44 = vector.broadcast %43 : vector<5x1xf32> to vector<5x5xf32>
    %45 = arith.subf %41, %44 : vector<5x5xf32>
    %46 = math.exp %45 : vector<5x5xf32>
    %cst_17 = arith.constant dense<0.000000e+00> : vector<5xf32>
    %47 = vector.multi_reduction <add>, %46, %cst_17 [1] : vector<5x5xf32> to vector<5xf32>
    %48 = vector.shape_cast %47 : vector<5xf32> to vector<5x1xf32>
    %49 = tpu.reciprocal %48 {approx = true} : vector<5x1xf32> -> vector<5x1xf32>
    %50 = vector.broadcast %49 : vector<5x1xf32> to vector<5x5xf32>
    %51 = arith.mulf %46, %50 : vector<5x5xf32>
    %52 = vector.extract_strided_slice %13 {offsets = [0, 8], sizes = [5, 8], strides = [1, 1]} : vector<5x32xf32> to vector<5x8xf32>
    %53 = arith.truncf %51 : vector<5x5xf32> to vector<5x5xbf16>
    %54 = arith.truncf %52 : vector<5x8xf32> to vector<5x8xbf16>
    %cst_18 = arith.constant dense<0.000000e+00> : vector<5x8xf32>
    %55 = tpu.matmul %53, %54, %cst_18 {dimension_numbers = #tpu.dot_dimension_numbers<[1], [0], [0], [1], [0, 0, 1, 1], [], []>} : vector<5x5xbf16>, vector<5x8xbf16>, vector<5x8xf32> -> vector<5x8xf32>
    %56 = vector.extract_strided_slice %11 {offsets = [0, 16], sizes = [5, 8], strides = [1, 1]} : vector<5x32xf32> to vector<5x8xf32>
    %57 = vector.extract_strided_slice %12 {offsets = [0, 16], sizes = [5, 8], strides = [1, 1]} : vector<5x32xf32> to vector<5x8xf32>
    %58 = arith.truncf %56 : vector<5x8xf32> to vector<5x8xbf16>
    %59 = arith.truncf %57 : vector<5x8xf32> to vector<5x8xbf16>
    %cst_19 = arith.constant dense<0.000000e+00> : vector<5x5xf32>
    %60 = tpu.matmul %58, %59, %cst_19 {dimension_numbers = #tpu.dot_dimension_numbers<[1], [1], [0], [0], [0, 0, 1, 0], [], []>} : vector<5x8xbf16>, vector<5x8xbf16>, vector<5x5xf32> -> vector<5x5xf32>
    %cst_20 = arith.constant 0.353553385 : f32
    %61 = vector.broadcast %cst_20 : f32 to vector<5x5xf32>
    %62 = arith.mulf %60, %61 : vector<5x5xf32>
    %cst_21 = arith.constant dense<0xFF800000> : vector<5xf32>
    %63 = vector.multi_reduction <maximumf>, %62, %cst_21 [1] : vector<5x5xf32> to vector<5xf32>
    %64 = vector.shape_cast %63 : vector<5xf32> to vector<5x1xf32>
    %65 = vector.broadcast %64 : vector<5x1xf32> to vector<5x5xf32>
    %66 = arith.subf %62, %65 : vector<5x5xf32>
    %67 = math.exp %66 : vector<5x5xf32>
    %cst_22 = arith.constant dense<0.000000e+00> : vector<5xf32>
    %68 = vector.multi_reduction <add>, %67, %cst_22 [1] : vector<5x5xf32> to vector<5xf32>
    %69 = vector.shape_cast %68 : vector<5xf32> to vector<5x1xf32>
    %70 = tpu.reciprocal %69 {approx = true} : vector<5x1xf32> -> vector<5x1xf32>
    %71 = vector.broadcast %70 : vector<5x1xf32> to vector<5x5xf32>
    %72 = arith.mulf %67, %71 : vector<5x5xf32>
    %73 = vector.extract_strided_slice %13 {offsets = [0, 16], sizes = [5, 8], strides = [1, 1]} : vector<5x32xf32> to vector<5x8xf32>
    %74 = arith.truncf %72 : vector<5x5xf32> to vector<5x5xbf16>
    %75 = arith.truncf %73 : vector<5x8xf32> to vector<5x8xbf16>
    %cst_23 = arith.constant dense<0.000000e+00> : vector<5x8xf32>
    %76 = tpu.matmul %74, %75, %cst_23 {dimension_numbers = #tpu.dot_dimension_numbers<[1], [0], [0], [1], [0, 0, 1, 1], [], []>} : vector<5x5xbf16>, vector<5x8xbf16>, vector<5x8xf32> -> vector<5x8xf32>
    %77 = vector.extract_strided_slice %11 {offsets = [0, 24], sizes = [5, 8], strides = [1, 1]} : vector<5x32xf32> to vector<5x8xf32>
    %78 = vector.extract_strided_slice %12 {offsets = [0, 24], sizes = [5, 8], strides = [1, 1]} : vector<5x32xf32> to vector<5x8xf32>
    %79 = arith.truncf %77 : vector<5x8xf32> to vector<5x8xbf16>
    %80 = arith.truncf %78 : vector<5x8xf32> to vector<5x8xbf16>
    %cst_24 = arith.constant dense<0.000000e+00> : vector<5x5xf32>
    %81 = tpu.matmul %79, %80, %cst_24 {dimension_numbers = #tpu.dot_dimension_numbers<[1], [1], [0], [0], [0, 0, 1, 0], [], []>} : vector<5x8xbf16>, vector<5x8xbf16>, vector<5x5xf32> -> vector<5x5xf32>
    %cst_25 = arith.constant 0.353553385 : f32
    %82 = vector.broadcast %cst_25 : f32 to vector<5x5xf32>
    %83 = arith.mulf %81, %82 : vector<5x5xf32>
    %cst_26 = arith.constant dense<0xFF800000> : vector<5xf32>
    %84 = vector.multi_reduction <maximumf>, %83, %cst_26 [1] : vector<5x5xf32> to vector<5xf32>
    %85 = vector.shape_cast %84 : vector<5xf32> to vector<5x1xf32>
    %86 = vector.broadcast %85 : vector<5x1xf32> to vector<5x5xf32>
    %87 = arith.subf %83, %86 : vector<5x5xf32>
    %88 = math.exp %87 : vector<5x5xf32>
    %cst_27 = arith.constant dense<0.000000e+00> : vector<5xf32>
    %89 = vector.multi_reduction <add>, %88, %cst_27 [1] : vector<5x5xf32> to vector<5xf32>
    %90 = vector.shape_cast %89 : vector<5xf32> to vector<5x1xf32>
    %91 = tpu.reciprocal %90 {approx = true} : vector<5x1xf32> -> vector<5x1xf32>
    %92 = vector.broadcast %91 : vector<5x1xf32> to vector<5x5xf32>
    %93 = arith.mulf %88, %92 : vector<5x5xf32>
    %94 = vector.extract_strided_slice %13 {offsets = [0, 24], sizes = [5, 8], strides = [1, 1]} : vector<5x32xf32> to vector<5x8xf32>
    %95 = arith.truncf %93 : vector<5x5xf32> to vector<5x5xbf16>
    %96 = arith.truncf %94 : vector<5x8xf32> to vector<5x8xbf16>
    %cst_28 = arith.constant dense<0.000000e+00> : vector<5x8xf32>
    %97 = tpu.matmul %95, %96, %cst_28 {dimension_numbers = #tpu.dot_dimension_numbers<[1], [0], [0], [1], [0, 0, 1, 1], [], []>} : vector<5x5xbf16>, vector<5x8xbf16>, vector<5x8xf32> -> vector<5x8xf32>
    %98 = tpu.concatenate %34, %55, %76, %97 in 1 : vector<5x8xf32>, vector<5x8xf32>, vector<5x8xf32>, vector<5x8xf32> -> vector<5x32xf32>
    %c0_29 = arith.constant 0 : index
    %c0_30 = arith.constant 0 : index
    %99 = vector.load %arg5[%c0_29, %c0_30] : memref<32x32xf32, #tpu.memory_space<vmem>>, vector<32x32xf32>
    %100 = arith.truncf %98 : vector<5x32xf32> to vector<5x32xbf16>
    %101 = arith.truncf %99 : vector<32x32xf32> to vector<32x32xbf16>
    %cst_31 = arith.constant dense<0.000000e+00> : vector<5x32xf32>
    %102 = tpu.matmul %100, %101, %cst_31 {dimension_numbers = #tpu.dot_dimension_numbers<[1], [0], [0], [1], [0, 0, 1, 1], [], []>} : vector<5x32xbf16>, vector<32x32xbf16>, vector<5x32xf32> -> vector<5x32xf32>
    %c0_32 = arith.constant 0 : index
    %c0_33 = arith.constant 0 : index
    %103 = vector.load %arg6[%c0_32, %c0_33] : memref<1x32xf32, #tpu.memory_space<vmem>>, vector<1x32xf32>
    %104 = vector.broadcast %103 : vector<1x32xf32> to vector<5x32xf32>
    %105 = arith.addf %102, %104 : vector<5x32xf32>
    %106 = arith.addf %1, %105 : vector<5x32xf32>
    %c0_34 = arith.constant 0 : index
    %c0_35 = arith.constant 0 : index
    %107 = vector.load %arg7[%c0_34, %c0_35] : memref<1x32xf32, #tpu.memory_space<vmem>>, vector<1x32xf32>
    %c0_36 = arith.constant 0 : index
    %c0_37 = arith.constant 0 : index
    %108 = vector.load %arg8[%c0_36, %c0_37] : memref<1x32xf32, #tpu.memory_space<vmem>>, vector<1x32xf32>
    %cst_38 = arith.constant dense<0.000000e+00> : vector<5xf32>
    %109 = vector.multi_reduction <add>, %106, %cst_38 [1] : vector<5x32xf32> to vector<5xf32>
    %110 = vector.shape_cast %109 : vector<5xf32> to vector<5x1xf32>
    %cst_39 = arith.constant 3.200000e+01 : f32
    %111 = vector.broadcast %cst_39 : f32 to vector<5x1xf32>
    %112 = arith.divf %110, %111 : vector<5x1xf32>
    %113 = vector.broadcast %112 : vector<5x1xf32> to vector<5x32xf32>
    %114 = arith.subf %106, %113 : vector<5x32xf32>
    %115 = arith.mulf %114, %114 : vector<5x32xf32>
    %cst_40 = arith.constant dense<0.000000e+00> : vector<5xf32>
    %116 = vector.multi_reduction <add>, %115, %cst_40 [1] : vector<5x32xf32> to vector<5xf32>
    %117 = vector.shape_cast %116 : vector<5xf32> to vector<5x1xf32>
    %cst_41 = arith.constant 3.200000e+01 : f32
    %118 = vector.broadcast %cst_41 : f32 to vector<5x1xf32>
    %119 = arith.divf %117, %118 : vector<5x1xf32>
    %120 = vector.broadcast %112 : vector<5x1xf32> to vector<5x32xf32>
    %121 = arith.subf %106, %120 : vector<5x32xf32>
    %cst_42 = arith.constant 9.99999974E-6 : f32
    %122 = vector.broadcast %cst_42 : f32 to vector<5x1xf32>
    %123 = arith.addf %119, %122 : vector<5x1xf32>
    %124 = math.rsqrt %123 : vector<5x1xf32>
    %125 = vector.broadcast %124 : vector<5x1xf32> to vector<5x32xf32>
    %126 = arith.mulf %121, %125 : vector<5x32xf32>
    %127 = vector.broadcast %107 : vector<1x32xf32> to vector<5x32xf32>
    %128 = arith.mulf %126, %127 : vector<5x32xf32>
    %129 = vector.broadcast %108 : vector<1x32xf32> to vector<5x32xf32>
    %130 = arith.addf %128, %129 : vector<5x32xf32>
    %c0_43 = arith.constant 0 : index
    %c0_44 = arith.constant 0 : index
    %131 = vector.load %arg9[%c0_43, %c0_44] : memref<32x32xf32, #tpu.memory_space<vmem>>, vector<32x32xf32>
    %132 = arith.truncf %130 : vector<5x32xf32> to vector<5x32xbf16>
    %133 = arith.truncf %131 : vector<32x32xf32> to vector<32x32xbf16>
    %cst_45 = arith.constant dense<0.000000e+00> : vector<5x32xf32>
    %134 = tpu.matmul %132, %133, %cst_45 {dimension_numbers = #tpu.dot_dimension_numbers<[1], [0], [0], [1], [0, 0, 1, 1], [], []>} : vector<5x32xbf16>, vector<32x32xbf16>, vector<5x32xf32> -> vector<5x32xf32>
    %c0_46 = arith.constant 0 : index
    %c0_47 = arith.constant 0 : index
    %135 = vector.load %arg10[%c0_46, %c0_47] : memref<1x32xf32, #tpu.memory_space<vmem>>, vector<1x32xf32>
    %136 = vector.broadcast %135 : vector<1x32xf32> to vector<5x32xf32>
    %137 = arith.addf %134, %136 : vector<5x32xf32>
    %c0_48 = arith.constant 0 : index
    %c0_49 = arith.constant 0 : index
    %138 = vector.load %arg11[%c0_48, %c0_49] : memref<32x64xf32, #tpu.memory_space<vmem>>, vector<32x64xf32>
    %139 = arith.truncf %3 : vector<8x32xf32> to vector<8x32xbf16>
    %140 = arith.truncf %138 : vector<32x64xf32> to vector<32x64xbf16>
    %cst_50 = arith.constant dense<0.000000e+00> : vector<8x64xf32>
    %141 = tpu.matmul %139, %140, %cst_50 {dimension_numbers = #tpu.dot_dimension_numbers<[1], [0], [0], [1], [0, 0, 1, 1], [], []>} : vector<8x32xbf16>, vector<32x64xbf16>, vector<8x64xf32> -> vector<8x64xf32>
    %c0_51 = arith.constant 0 : index
    %c0_52 = arith.constant 0 : index
    %142 = vector.load %arg12[%c0_51, %c0_52] : memref<1x64xf32, #tpu.memory_space<vmem>>, vector<1x64xf32>
    %143 = vector.broadcast %142 : vector<1x64xf32> to vector<8x64xf32>
    %144 = arith.addf %141, %143 : vector<8x64xf32>
    %145 = vector.extract_strided_slice %144 {offsets = [0, 0], sizes = [8, 32], strides = [1, 1]} : vector<8x64xf32> to vector<8x32xf32>
    %146 = vector.extract_strided_slice %144 {offsets = [0, 32], sizes = [8, 32], strides = [1, 1]} : vector<8x64xf32> to vector<8x32xf32>
    %147 = vector.extract_strided_slice %137 {offsets = [0, 0], sizes = [5, 8], strides = [1, 1]} : vector<5x32xf32> to vector<5x8xf32>
    %148 = vector.extract_strided_slice %145 {offsets = [0, 0], sizes = [8, 8], strides = [1, 1]} : vector<8x32xf32> to vector<8x8xf32>
    %149 = arith.truncf %147 : vector<5x8xf32> to vector<5x8xbf16>
    %150 = arith.truncf %148 : vector<8x8xf32> to vector<8x8xbf16>
    %cst_53 = arith.constant dense<0.000000e+00> : vector<5x8xf32>
    %151 = tpu.matmul %149, %150, %cst_53 {dimension_numbers = #tpu.dot_dimension_numbers<[1], [1], [0], [0], [0, 0, 1, 0], [], []>} : vector<5x8xbf16>, vector<8x8xbf16>, vector<5x8xf32> -> vector<5x8xf32>
    %cst_54 = arith.constant 0.353553385 : f32
    %152 = vector.broadcast %cst_54 : f32 to vector<5x8xf32>
    %153 = arith.mulf %151, %152 : vector<5x8xf32>
    %cst_55 = arith.constant dense<0xFF800000> : vector<5xf32>
    %154 = vector.multi_reduction <maximumf>, %153, %cst_55 [1] : vector<5x8xf32> to vector<5xf32>
    %155 = vector.shape_cast %154 : vector<5xf32> to vector<5x1xf32>
    %156 = vector.broadcast %155 : vector<5x1xf32> to vector<5x8xf32>
    %157 = arith.subf %153, %156 : vector<5x8xf32>
    %158 = math.exp %157 : vector<5x8xf32>
    %cst_56 = arith.constant dense<0.000000e+00> : vector<5xf32>
    %159 = vector.multi_reduction <add>, %158, %cst_56 [1] : vector<5x8xf32> to vector<5xf32>
    %160 = vector.shape_cast %159 : vector<5xf32> to vector<5x1xf32>
    %161 = tpu.reciprocal %160 {approx = true} : vector<5x1xf32> -> vector<5x1xf32>
    %162 = vector.broadcast %161 : vector<5x1xf32> to vector<5x8xf32>
    %163 = arith.mulf %158, %162 : vector<5x8xf32>
    %164 = vector.extract_strided_slice %146 {offsets = [0, 0], sizes = [8, 8], strides = [1, 1]} : vector<8x32xf32> to vector<8x8xf32>
    %165 = arith.truncf %163 : vector<5x8xf32> to vector<5x8xbf16>
    %166 = arith.truncf %164 : vector<8x8xf32> to vector<8x8xbf16>
    %cst_57 = arith.constant dense<0.000000e+00> : vector<5x8xf32>
    %167 = tpu.matmul %165, %166, %cst_57 {dimension_numbers = #tpu.dot_dimension_numbers<[1], [0], [0], [1], [0, 0, 1, 1], [], []>} : vector<5x8xbf16>, vector<8x8xbf16>, vector<5x8xf32> -> vector<5x8xf32>
    %168 = vector.extract_strided_slice %137 {offsets = [0, 8], sizes = [5, 8], strides = [1, 1]} : vector<5x32xf32> to vector<5x8xf32>
    %169 = vector.extract_strided_slice %145 {offsets = [0, 8], sizes = [8, 8], strides = [1, 1]} : vector<8x32xf32> to vector<8x8xf32>
    %170 = arith.truncf %168 : vector<5x8xf32> to vector<5x8xbf16>
    %171 = arith.truncf %169 : vector<8x8xf32> to vector<8x8xbf16>
    %cst_58 = arith.constant dense<0.000000e+00> : vector<5x8xf32>
    %172 = tpu.matmul %170, %171, %cst_58 {dimension_numbers = #tpu.dot_dimension_numbers<[1], [1], [0], [0], [0, 0, 1, 0], [], []>} : vector<5x8xbf16>, vector<8x8xbf16>, vector<5x8xf32> -> vector<5x8xf32>
    %cst_59 = arith.constant 0.353553385 : f32
    %173 = vector.broadcast %cst_59 : f32 to vector<5x8xf32>
    %174 = arith.mulf %172, %173 : vector<5x8xf32>
    %cst_60 = arith.constant dense<0xFF800000> : vector<5xf32>
    %175 = vector.multi_reduction <maximumf>, %174, %cst_60 [1] : vector<5x8xf32> to vector<5xf32>
    %176 = vector.shape_cast %175 : vector<5xf32> to vector<5x1xf32>
    %177 = vector.broadcast %176 : vector<5x1xf32> to vector<5x8xf32>
    %178 = arith.subf %174, %177 : vector<5x8xf32>
    %179 = math.exp %178 : vector<5x8xf32>
    %cst_61 = arith.constant dense<0.000000e+00> : vector<5xf32>
    %180 = vector.multi_reduction <add>, %179, %cst_61 [1] : vector<5x8xf32> to vector<5xf32>
    %181 = vector.shape_cast %180 : vector<5xf32> to vector<5x1xf32>
    %182 = tpu.reciprocal %181 {approx = true} : vector<5x1xf32> -> vector<5x1xf32>
    %183 = vector.broadcast %182 : vector<5x1xf32> to vector<5x8xf32>
    %184 = arith.mulf %179, %183 : vector<5x8xf32>
    %185 = vector.extract_strided_slice %146 {offsets = [0, 8], sizes = [8, 8], strides = [1, 1]} : vector<8x32xf32> to vector<8x8xf32>
    %186 = arith.truncf %184 : vector<5x8xf32> to vector<5x8xbf16>
    %187 = arith.truncf %185 : vector<8x8xf32> to vector<8x8xbf16>
    %cst_62 = arith.constant dense<0.000000e+00> : vector<5x8xf32>
    %188 = tpu.matmul %186, %187, %cst_62 {dimension_numbers = #tpu.dot_dimension_numbers<[1], [0], [0], [1], [0, 0, 1, 1], [], []>} : vector<5x8xbf16>, vector<8x8xbf16>, vector<5x8xf32> -> vector<5x8xf32>
    %189 = vector.extract_strided_slice %137 {offsets = [0, 16], sizes = [5, 8], strides = [1, 1]} : vector<5x32xf32> to vector<5x8xf32>
    %190 = vector.extract_strided_slice %145 {offsets = [0, 16], sizes = [8, 8], strides = [1, 1]} : vector<8x32xf32> to vector<8x8xf32>
    %191 = arith.truncf %189 : vector<5x8xf32> to vector<5x8xbf16>
    %192 = arith.truncf %190 : vector<8x8xf32> to vector<8x8xbf16>
    %cst_63 = arith.constant dense<0.000000e+00> : vector<5x8xf32>
    %193 = tpu.matmul %191, %192, %cst_63 {dimension_numbers = #tpu.dot_dimension_numbers<[1], [1], [0], [0], [0, 0, 1, 0], [], []>} : vector<5x8xbf16>, vector<8x8xbf16>, vector<5x8xf32> -> vector<5x8xf32>
    %cst_64 = arith.constant 0.353553385 : f32
    %194 = vector.broadcast %cst_64 : f32 to vector<5x8xf32>
    %195 = arith.mulf %193, %194 : vector<5x8xf32>
    %cst_65 = arith.constant dense<0xFF800000> : vector<5xf32>
    %196 = vector.multi_reduction <maximumf>, %195, %cst_65 [1] : vector<5x8xf32> to vector<5xf32>
    %197 = vector.shape_cast %196 : vector<5xf32> to vector<5x1xf32>
    %198 = vector.broadcast %197 : vector<5x1xf32> to vector<5x8xf32>
    %199 = arith.subf %195, %198 : vector<5x8xf32>
    %200 = math.exp %199 : vector<5x8xf32>
    %cst_66 = arith.constant dense<0.000000e+00> : vector<5xf32>
    %201 = vector.multi_reduction <add>, %200, %cst_66 [1] : vector<5x8xf32> to vector<5xf32>
    %202 = vector.shape_cast %201 : vector<5xf32> to vector<5x1xf32>
    %203 = tpu.reciprocal %202 {approx = true} : vector<5x1xf32> -> vector<5x1xf32>
    %204 = vector.broadcast %203 : vector<5x1xf32> to vector<5x8xf32>
    %205 = arith.mulf %200, %204 : vector<5x8xf32>
    %206 = vector.extract_strided_slice %146 {offsets = [0, 16], sizes = [8, 8], strides = [1, 1]} : vector<8x32xf32> to vector<8x8xf32>
    %207 = arith.truncf %205 : vector<5x8xf32> to vector<5x8xbf16>
    %208 = arith.truncf %206 : vector<8x8xf32> to vector<8x8xbf16>
    %cst_67 = arith.constant dense<0.000000e+00> : vector<5x8xf32>
    %209 = tpu.matmul %207, %208, %cst_67 {dimension_numbers = #tpu.dot_dimension_numbers<[1], [0], [0], [1], [0, 0, 1, 1], [], []>} : vector<5x8xbf16>, vector<8x8xbf16>, vector<5x8xf32> -> vector<5x8xf32>
    %210 = vector.extract_strided_slice %137 {offsets = [0, 24], sizes = [5, 8], strides = [1, 1]} : vector<5x32xf32> to vector<5x8xf32>
    %211 = vector.extract_strided_slice %145 {offsets = [0, 24], sizes = [8, 8], strides = [1, 1]} : vector<8x32xf32> to vector<8x8xf32>
    %212 = arith.truncf %210 : vector<5x8xf32> to vector<5x8xbf16>
    %213 = arith.truncf %211 : vector<8x8xf32> to vector<8x8xbf16>
    %cst_68 = arith.constant dense<0.000000e+00> : vector<5x8xf32>
    %214 = tpu.matmul %212, %213, %cst_68 {dimension_numbers = #tpu.dot_dimension_numbers<[1], [1], [0], [0], [0, 0, 1, 0], [], []>} : vector<5x8xbf16>, vector<8x8xbf16>, vector<5x8xf32> -> vector<5x8xf32>
    %cst_69 = arith.constant 0.353553385 : f32
    %215 = vector.broadcast %cst_69 : f32 to vector<5x8xf32>
    %216 = arith.mulf %214, %215 : vector<5x8xf32>
    %cst_70 = arith.constant dense<0xFF800000> : vector<5xf32>
    %217 = vector.multi_reduction <maximumf>, %216, %cst_70 [1] : vector<5x8xf32> to vector<5xf32>
    %218 = vector.shape_cast %217 : vector<5xf32> to vector<5x1xf32>
    %219 = vector.broadcast %218 : vector<5x1xf32> to vector<5x8xf32>
    %220 = arith.subf %216, %219 : vector<5x8xf32>
    %221 = math.exp %220 : vector<5x8xf32>
    %cst_71 = arith.constant dense<0.000000e+00> : vector<5xf32>
    %222 = vector.multi_reduction <add>, %221, %cst_71 [1] : vector<5x8xf32> to vector<5xf32>
    %223 = vector.shape_cast %222 : vector<5xf32> to vector<5x1xf32>
    %224 = tpu.reciprocal %223 {approx = true} : vector<5x1xf32> -> vector<5x1xf32>
    %225 = vector.broadcast %224 : vector<5x1xf32> to vector<5x8xf32>
    %226 = arith.mulf %221, %225 : vector<5x8xf32>
    %227 = vector.extract_strided_slice %146 {offsets = [0, 24], sizes = [8, 8], strides = [1, 1]} : vector<8x32xf32> to vector<8x8xf32>
    %228 = arith.truncf %226 : vector<5x8xf32> to vector<5x8xbf16>
    %229 = arith.truncf %227 : vector<8x8xf32> to vector<8x8xbf16>
    %cst_72 = arith.constant dense<0.000000e+00> : vector<5x8xf32>
    %230 = tpu.matmul %228, %229, %cst_72 {dimension_numbers = #tpu.dot_dimension_numbers<[1], [0], [0], [1], [0, 0, 1, 1], [], []>} : vector<5x8xbf16>, vector<8x8xbf16>, vector<5x8xf32> -> vector<5x8xf32>
    %231 = tpu.concatenate %167, %188, %209, %230 in 1 : vector<5x8xf32>, vector<5x8xf32>, vector<5x8xf32>, vector<5x8xf32> -> vector<5x32xf32>
    %c0_73 = arith.constant 0 : index
    %c0_74 = arith.constant 0 : index
    %232 = vector.load %arg13[%c0_73, %c0_74] : memref<32x32xf32, #tpu.memory_space<vmem>>, vector<32x32xf32>
    %233 = arith.truncf %231 : vector<5x32xf32> to vector<5x32xbf16>
    %234 = arith.truncf %232 : vector<32x32xf32> to vector<32x32xbf16>
    %cst_75 = arith.constant dense<0.000000e+00> : vector<5x32xf32>
    %235 = tpu.matmul %233, %234, %cst_75 {dimension_numbers = #tpu.dot_dimension_numbers<[1], [0], [0], [1], [0, 0, 1, 1], [], []>} : vector<5x32xbf16>, vector<32x32xbf16>, vector<5x32xf32> -> vector<5x32xf32>
    %c0_76 = arith.constant 0 : index
    %c0_77 = arith.constant 0 : index
    %236 = vector.load %arg14[%c0_76, %c0_77] : memref<1x32xf32, #tpu.memory_space<vmem>>, vector<1x32xf32>
    %237 = vector.broadcast %236 : vector<1x32xf32> to vector<5x32xf32>
    %238 = arith.addf %235, %237 : vector<5x32xf32>
    %239 = arith.addf %130, %238 : vector<5x32xf32>
    %c0_78 = arith.constant 0 : index
    %c0_79 = arith.constant 0 : index
    %240 = vector.load %arg15[%c0_78, %c0_79] : memref<1x32xf32, #tpu.memory_space<vmem>>, vector<1x32xf32>
    %c0_80 = arith.constant 0 : index
    %c0_81 = arith.constant 0 : index
    %241 = vector.load %arg16[%c0_80, %c0_81] : memref<1x32xf32, #tpu.memory_space<vmem>>, vector<1x32xf32>
    %cst_82 = arith.constant dense<0.000000e+00> : vector<5xf32>
    %242 = vector.multi_reduction <add>, %239, %cst_82 [1] : vector<5x32xf32> to vector<5xf32>
    %243 = vector.shape_cast %242 : vector<5xf32> to vector<5x1xf32>
    %cst_83 = arith.constant 3.200000e+01 : f32
    %244 = vector.broadcast %cst_83 : f32 to vector<5x1xf32>
    %245 = arith.divf %243, %244 : vector<5x1xf32>
    %246 = vector.broadcast %245 : vector<5x1xf32> to vector<5x32xf32>
    %247 = arith.subf %239, %246 : vector<5x32xf32>
    %248 = arith.mulf %247, %247 : vector<5x32xf32>
    %cst_84 = arith.constant dense<0.000000e+00> : vector<5xf32>
    %249 = vector.multi_reduction <add>, %248, %cst_84 [1] : vector<5x32xf32> to vector<5xf32>
    %250 = vector.shape_cast %249 : vector<5xf32> to vector<5x1xf32>
    %cst_85 = arith.constant 3.200000e+01 : f32
    %251 = vector.broadcast %cst_85 : f32 to vector<5x1xf32>
    %252 = arith.divf %250, %251 : vector<5x1xf32>
    %253 = vector.broadcast %245 : vector<5x1xf32> to vector<5x32xf32>
    %254 = arith.subf %239, %253 : vector<5x32xf32>
    %cst_86 = arith.constant 9.99999974E-6 : f32
    %255 = vector.broadcast %cst_86 : f32 to vector<5x1xf32>
    %256 = arith.addf %252, %255 : vector<5x1xf32>
    %257 = math.rsqrt %256 : vector<5x1xf32>
    %258 = vector.broadcast %257 : vector<5x1xf32> to vector<5x32xf32>
    %259 = arith.mulf %254, %258 : vector<5x32xf32>
    %260 = vector.broadcast %240 : vector<1x32xf32> to vector<5x32xf32>
    %261 = arith.mulf %259, %260 : vector<5x32xf32>
    %262 = vector.broadcast %241 : vector<1x32xf32> to vector<5x32xf32>
    %263 = arith.addf %261, %262 : vector<5x32xf32>
    %c0_87 = arith.constant 0 : index
    %c0_88 = arith.constant 0 : index
    %264 = vector.load %arg17[%c0_87, %c0_88] : memref<32x64xf32, #tpu.memory_space<vmem>>, vector<32x64xf32>
    %265 = arith.truncf %263 : vector<5x32xf32> to vector<5x32xbf16>
    %266 = arith.truncf %264 : vector<32x64xf32> to vector<32x64xbf16>
    %cst_89 = arith.constant dense<0.000000e+00> : vector<5x64xf32>
    %267 = tpu.matmul %265, %266, %cst_89 {dimension_numbers = #tpu.dot_dimension_numbers<[1], [0], [0], [1], [0, 0, 1, 1], [], []>} : vector<5x32xbf16>, vector<32x64xbf16>, vector<5x64xf32> -> vector<5x64xf32>
    %c0_90 = arith.constant 0 : index
    %c0_91 = arith.constant 0 : index
    %268 = vector.load %arg18[%c0_90, %c0_91] : memref<1x64xf32, #tpu.memory_space<vmem>>, vector<1x64xf32>
    %269 = vector.broadcast %268 : vector<1x64xf32> to vector<5x64xf32>
    %270 = arith.addf %267, %269 : vector<5x64xf32>
    %cst_92 = arith.constant 0.000000e+00 : f32
    %271 = vector.broadcast %cst_92 : f32 to vector<5x64xf32>
    %272 = arith.maximumf %270, %271 : vector<5x64xf32>
    %c0_93 = arith.constant 0 : index
    %c0_94 = arith.constant 0 : index
    %273 = vector.load %arg19[%c0_93, %c0_94] : memref<64x32xf32, #tpu.memory_space<vmem>>, vector<64x32xf32>
    %274 = arith.truncf %272 : vector<5x64xf32> to vector<5x64xbf16>
    %275 = arith.truncf %273 : vector<64x32xf32> to vector<64x32xbf16>
    %cst_95 = arith.constant dense<0.000000e+00> : vector<5x32xf32>
    %276 = tpu.matmul %274, %275, %cst_95 {dimension_numbers = #tpu.dot_dimension_numbers<[1], [0], [0], [1], [0, 0, 1, 1], [], []>} : vector<5x64xbf16>, vector<64x32xbf16>, vector<5x32xf32> -> vector<5x32xf32>
    %c0_96 = arith.constant 0 : index
    %c0_97 = arith.constant 0 : index
    %277 = vector.load %arg20[%c0_96, %c0_97] : memref<1x32xf32, #tpu.memory_space<vmem>>, vector<1x32xf32>
    %278 = vector.broadcast %277 : vector<1x32xf32> to vector<5x32xf32>
    %279 = arith.addf %276, %278 : vector<5x32xf32>
    %280 = arith.addf %263, %279 : vector<5x32xf32>
    %c0_98 = arith.constant 0 : index
    %c0_99 = arith.constant 0 : index
    %281 = vector.load %arg21[%c0_98, %c0_99] : memref<1x32xf32, #tpu.memory_space<vmem>>, vector<1x32xf32>
    %c0_100 = arith.constant 0 : index
    %c0_101 = arith.constant 0 : index
    %282 = vector.load %arg22[%c0_100, %c0_101] : memref<1x32xf32, #tpu.memory_space<vmem>>, vector<1x32xf32>
    %cst_102 = arith.constant dense<0.000000e+00> : vector<5xf32>
    %283 = vector.multi_reduction <add>, %280, %cst_102 [1] : vector<5x32xf32> to vector<5xf32>
    %284 = vector.shape_cast %283 : vector<5xf32> to vector<5x1xf32>
    %cst_103 = arith.constant 3.200000e+01 : f32
    %285 = vector.broadcast %cst_103 : f32 to vector<5x1xf32>
    %286 = arith.divf %284, %285 : vector<5x1xf32>
    %287 = vector.broadcast %286 : vector<5x1xf32> to vector<5x32xf32>
    %288 = arith.subf %280, %287 : vector<5x32xf32>
    %289 = arith.mulf %288, %288 : vector<5x32xf32>
    %cst_104 = arith.constant dense<0.000000e+00> : vector<5xf32>
    %290 = vector.multi_reduction <add>, %289, %cst_104 [1] : vector<5x32xf32> to vector<5xf32>
    %291 = vector.shape_cast %290 : vector<5xf32> to vector<5x1xf32>
    %cst_105 = arith.constant 3.200000e+01 : f32
    %292 = vector.broadcast %cst_105 : f32 to vector<5x1xf32>
    %293 = arith.divf %291, %292 : vector<5x1xf32>
    %294 = vector.broadcast %286 : vector<5x1xf32> to vector<5x32xf32>
    %295 = arith.subf %280, %294 : vector<5x32xf32>
    %cst_106 = arith.constant 9.99999974E-6 : f32
    %296 = vector.broadcast %cst_106 : f32 to vector<5x1xf32>
    %297 = arith.addf %293, %296 : vector<5x1xf32>
    %298 = math.rsqrt %297 : vector<5x1xf32>
    %299 = vector.broadcast %298 : vector<5x1xf32> to vector<5x32xf32>
    %300 = arith.mulf %295, %299 : vector<5x32xf32>
    %301 = vector.broadcast %281 : vector<1x32xf32> to vector<5x32xf32>
    %302 = arith.mulf %300, %301 : vector<5x32xf32>
    %303 = vector.broadcast %282 : vector<1x32xf32> to vector<5x32xf32>
    %304 = arith.addf %302, %303 : vector<5x32xf32>
    %c0_107 = arith.constant 0 : index
    %c0_108 = arith.constant 0 : index
    %c0_109 = arith.constant 0 : index
    %305 = vector.load %arg23[%c0_107, %c0_108, %c0_109] : memref<1x5x32xf32, #tpu.memory_space<vmem>>, vector<1x5x32xf32>
    %306 = vector.shape_cast %305 : vector<1x5x32xf32> to vector<5x32xf32>
    %307 = vector.shape_cast %304 : vector<5x32xf32> to vector<1x5x32xf32>
    tpu.vector_store %arg23[%c0_107, %c0_108, %c0_109], %307 {strides = array<i32>} : memref<1x5x32xf32, #tpu.memory_space<vmem>>, vector<1x5x32xf32>,
    return
  }
  func.func @transform_0(%arg0: i32) -> (i32, i32, i32) {
    %c0_i32 = arith.constant 0 : i32
    %c0_i32_0 = arith.constant 0 : i32
    %c0_i32_1 = arith.constant 0 : i32
    return %arg0, %c0_i32, %c0_i32_0 : i32, i32, i32
  }
  func.func @transform_1(%arg0: i32) -> (i32, i32, i32) {
    %c0_i32 = arith.constant 0 : i32
    %c0_i32_0 = arith.constant 0 : i32
    %c0_i32_1 = arith.constant 0 : i32
    return %arg0, %c0_i32, %c0_i32_0 : i32, i32, i32
  }
  func.func @transform_2(%arg0: i32) -> (i32, i32) {
    %c0_i32 = arith.constant 0 : i32
    %c0_i32_0 = arith.constant 0 : i32
    %c0_i32_1 = arith.constant 0 : i32
    return %c0_i32, %c0_i32_0 : i32, i32
  }
  func.func @transform_3(%arg0: i32) -> (i32, i32) {
    %c0_i32 = arith.constant 0 : i32
    %c0_i32_0 = arith.constant 0 : i32
    %c0_i32_1 = arith.constant 0 : i32
    return %c0_i32, %c0_i32_0 : i32, i32
  }
  func.func @transform_4(%arg0: i32) -> (i32, i32) {
    %c0_i32 = arith.constant 0 : i32
    %c0_i32_0 = arith.constant 0 : i32
    %c0_i32_1 = arith.constant 0 : i32
    return %c0_i32, %c0_i32_0 : i32, i32
  }
  func.func @transform_5(%arg0: i32) -> (i32, i32) {
    %c0_i32 = arith.constant 0 : i32
    %c0_i32_0 = arith.constant 0 : i32
    %c0_i32_1 = arith.constant 0 : i32
    return %c0_i32, %c0_i32_0 : i32, i32
  }
  func.func @transform_6(%arg0: i32) -> (i32, i32) {
    %c0_i32 = arith.constant 0 : i32
    %c0_i32_0 = arith.constant 0 : i32
    %c0_i32_1 = arith.constant 0 : i32
    return %c0_i32, %c0_i32_0 : i32, i32
  }
  func.func @transform_7(%arg0: i32) -> (i32, i32) {
    %c0_i32 = arith.constant 0 : i32
    %c0_i32_0 = arith.constant 0 : i32
    %c0_i32_1 = arith.constant 0 : i32
    return %c0_i32, %c0_i32_0 : i32, i32
  }
  func.func @transform_8(%arg0: i32) -> (i32, i32) {
    %c0_i32 = arith.constant 0 : i32
    %c0_i32_0 = arith.constant 0 : i32
    %c0_i32_1 = arith.constant 0 : i32
    return %c0_i32, %c0_i32_0 : i32, i32
  }
  func.func @transform_9(%arg0: i32) -> (i32, i32) {
    %c0_i32 = arith.constant 0 : i32
    %c0_i32_0 = arith.constant 0 : i32
    %c0_i32_1 = arith.constant 0 : i32
    return %c0_i32, %c0_i32_0 : i32, i32
  }
  func.func @transform_10(%arg0: i32) -> (i32, i32) {
    %c0_i32 = arith.constant 0 : i32
    %c0_i32_0 = arith.constant 0 : i32
    %c0_i32_1 = arith.constant 0 : i32
    return %c0_i32, %c0_i32_0 : i32, i32
  }
  func.func @transform_11(%arg0: i32) -> (i32, i32) {
    %c0_i32 = arith.constant 0 : i32
    %c0_i32_0 = arith.constant 0 : i32
    %c0_i32_1 = arith.constant 0 : i32
    return %c0_i32, %c0_i32_0 : i32, i32
  }
  func.func @transform_12(%arg0: i32) -> (i32, i32) {
    %c0_i32 = arith.constant 0 : i32
    %c0_i32_0 = arith.constant 0 : i32
    %c0_i32_1 = arith.constant 0 : i32
    return %c0_i32, %c0_i32_0 : i32, i32
  }
  func.func @transform_13(%arg0: i32) -> (i32, i32) {
    %c0_i32 = arith.constant 0 : i32
    %c0_i32_0 = arith.constant 0 : i32
    %c0_i32_1 = arith.constant 0 : i32
    return %c0_i32, %c0_i32_0 : i32, i32
  }
  func.func @transform_14(%arg0: i32) -> (i32, i32) {
    %c0_i32 = arith.constant 0 : i32
    %c0_i32_0 = arith.constant 0 : i32
    %c0_i32_1 = arith.constant 0 : i32
    return %c0_i32, %c0_i32_0 : i32, i32
  }
  func.func @transform_15(%arg0: i32) -> (i32, i32) {
    %c0_i32 = arith.constant 0 : i32
    %c0_i32_0 = arith.constant 0 : i32
    %c0_i32_1 = arith.constant 0 : i32
    return %c0_i32, %c0_i32_0 : i32, i32
  }
  func.func @transform_16(%arg0: i32) -> (i32, i32) {
    %c0_i32 = arith.constant 0 : i32
    %c0_i32_0 = arith.constant 0 : i32
    %c0_i32_1 = arith.constant 0 : i32
    return %c0_i32, %c0_i32_0 : i32, i32
  }
  func.func @transform_17(%arg0: i32) -> (i32, i32) {
    %c0_i32 = arith.constant 0 : i32
    %c0_i32_0 = arith.constant 0 : i32
    %c0_i32_1 = arith.constant 0 : i32
    return %c0_i32, %c0_i32_0 : i32, i32
  }
  func.func @transform_18(%arg0: i32) -> (i32, i32) {
    %c0_i32 = arith.constant 0 : i32
    %c0_i32_0 = arith.constant 0 : i32
    %c0_i32_1 = arith.constant 0 : i32
    return %c0_i32, %c0_i32_0 : i32, i32
  }
  func.func @transform_19(%arg0: i32) -> (i32, i32) {
    %c0_i32 = arith.constant 0 : i32
    %c0_i32_0 = arith.constant 0 : i32
    %c0_i32_1 = arith.constant 0 : i32
    return %c0_i32, %c0_i32_0 : i32, i32
  }
  func.func @transform_20(%arg0: i32) -> (i32, i32) {
    %c0_i32 = arith.constant 0 : i32
    %c0_i32_0 = arith.constant 0 : i32
    %c0_i32_1 = arith.constant 0 : i32
    return %c0_i32, %c0_i32_0 : i32, i32
  }
  func.func @transform_21(%arg0: i32) -> (i32, i32) {
    %c0_i32 = arith.constant 0 : i32
    %c0_i32_0 = arith.constant 0 : i32
    %c0_i32_1 = arith.constant 0 : i32
    return %c0_i32, %c0_i32_0 : i32, i32
  }
  func.func @transform_22(%arg0: i32) -> (i32, i32, i32) {
    %c0_i32 = arith.constant 0 : i32
    %c0_i32_0 = arith.constant 0 : i32
    %c0_i32_1 = arith.constant 0 : i32
    return %arg0, %c0_i32, %c0_i32_0 : i32, i32, i32
  }
}

</mosaic_0001>

<bundles_post_ra>
// kernel: iibmil_forward.8
= control target key start
LH: loop header
LB: loop body
LE: loop exit
PB: predicated region body
PF: predicated region fallthrough
CT: control target
= control target key end

     0   :  { %s1495_s0 = inlined_call_operand.vmem [shape: f32[16,24], index: 0, kind: input, shape index: {}]   ;;  %s1496_s1 = inlined_call_operand.vmem [shape: f32[24,64], index: 1, kind: input, shape index: {}]   ;;  %s1497_s2 = inlined_call_operand.vmem [shape: f32[1,64], index: 2, kind: input, shape index: {}]   ;;  %s1498_s3 = inlined_call_operand.vmem [shape: f32[1,64], index: 3, kind: input, shape index: {}]   ;;  %s1499_s4 = inlined_call_operand.vmem [shape: f32[1,64], index: 4, kind: input, shape index: {}]   ;;  %s1500_s5 = inlined_call_operand.vmem [shape: f32[64,128], index: 5, kind: input, shape index: {}]   ;;  %s1501_s6 = inlined_call_operand.vmem [shape: f32[1,128], index: 6, kind: input, shape index: {}]   ;;  %s1502_s7 = inlined_call_operand.vmem [shape: f32[1,128], index: 7, kind: input, shape index: {}]   ;;  %s1503_s8 = inlined_call_operand.vmem [shape: f32[1,128], index: 8, kind: input, shape index: {}]   ;;  %s1504_s9 = inlined_call_operand.vmem [shape: f32[128,64], index: 9, kind: input, shape index: {}]   ;;  %s1505_s10 = inlined_call_operand.vmem [shape: f32[1,64], index: 10, kind: input, shape index: {}]   ;;  %s1506_s11 = inlined_call_operand.vmem [shape: f32[1,64], index: 11, kind: input, shape index: {}]   ;;  %s1507_s12 = inlined_call_operand.hbm [shape: f32[1,64], index: 12, kind: input, shape index: {}]   ;;  %s1508_s13 = inlined_call_operand.hbm [shape: f32[64,64], index: 13, kind: input, shape index: {}]   ;;  %s1509_s14 = inlined_call_operand.hbm [shape: f32[1,64], index: 14, kind: input, shape index: {}]   ;;  %s1510_s15 = inlined_call_operand.hbm [shape: f32[1,64], index: 15, kind: input, shape index: {}]   ;;  %s1511_s16 = inlined_call_operand.hbm [shape: f32[1,64], index: 16, kind: input, shape index: {}]   ;;  %s1512_s17 = inlined_call_operand.vmem [shape: f32[64,32], index: 17, kind: input, shape index: {}]   ;;  %s1513_s18 = inlined_call_operand.hbm [shape: f32[1,32], index: 18, kind: input, shape index: {}]   ;;  %s1514_s19 = inlined_call_operand.hbm [shape: f32[1,32], index: 19, kind: input, shape index: {}]   ;;  %s1515_s20 = inlined_call_operand.hbm [shape: f32[1,32], index: 20, kind: input, shape index: {}]   ;;  %s1516_s21 = inlined_call_operand.vmem [shape: f32[16,32], index: 21, kind: output, shape index: {}]  }
   0x1   :  { %1521 = sst [smem:[#allocation20_spill]] %s1495_s0 }
   0x2   :  { %1522 = sst [smem:[#allocation21_spill]] %s1496_s1 }
   0x3   :  { %1523 = sst [smem:[#allocation22_spill]] %s1497_s2 }
   0x4   :  { %1524 = sst [smem:[#allocation23_spill]] %s1498_s3 }
   0x5   :  { %1525 = sst [smem:[#allocation24_spill]] %s1499_s4 }
   0x6   :  { %1526 = sst [smem:[#allocation25_spill]] %s1500_s5 }
   0x7   :  { %1527 = sst [smem:[#allocation26_spill]] %s1516_s21 }
   0x8   :  { %26 = vsyncpa [#allocation3], 0 }
   0x9   :  { %27 = vsyncpa [#allocation5], 0 }
   0xa   :  { %28 = vsyncpa [#allocation8], 0 }
   0xb   :  { %29 = vsyncpa [#allocation11], 0 }
   0xc   :  { %30 = vsyncpa [#allocation14], 0  ;;  %s1083_s2 = smov [#allocation4]   ;;  %s897_s3 = scalar_lea.hbm %s1508_s13, 1024 }
   0xd   :  { %s70_s25 = sshll.u32 %s1083_s2, 4  ;;  %p898_p0 = scmp.ne.s32.totalorder %s1508_s13, %s897_s3  ;;  %s71_s25 = int_to_ptr.vmem [resolvable:$true] %s70_s25 }
   0xe   :  { %p901_p1 = scmp.lt.u32.totalorder %s897_s3, %s1508_s13 }
  0x10   :  { %p903_p2 = pnand %p901_p1, %p898_p0 }
  0x12   :  { %906 = shalt.err (!%p903_p2)
}
  0x13   :  { %s907_s30 = scalar_lea.vmem %s71_s25, 1024  ;;  %p912_p4 = scmp.lt.s32.totalorder %s71_s25, %s71_s25 }
  0x14   :  { %p908_p3 = scmp.ne.s32.totalorder %s71_s25, %s907_s30  ;;  %p913_p5 = scmp.lt.s32.totalorder %s907_s30, %s907_s30 }
  0x16   :  { %p914_p6 = por %p913_p5, %p912_p4 }
  0x18   :  { %p915_p7 = pnand %p914_p6, %p908_p3 }
  0x1a   :  { %918 = shalt.err (!%p915_p7)
}
  0x1b   :  { %s1084_s5 = smov 128   ;;  %s1085_s22 = smov 8  }
  0x1c   :  { %76 = dma.hbm_to_vmem [thread:$0]  %s1508_s13, 1024, %s71_s25, [#allocation5], %s1084_s5, %s1084_s5, %s1085_s22  }
  0x1d   :  { %s1086_s24 = smov [#allocation7]   ;;  %s1087_s26 = smov [#allocation10]  }
  0x1e   :  { %s93_s2 = sshll.u32 %s1086_s24, 4  ;;  %s115_s27 = sshll.u32 %s1087_s26, 4  ;;  %s94_s2 = int_to_ptr.vmem [resolvable:$true] %s93_s2  ;;  %s116_s27 = int_to_ptr.vmem [resolvable:$true] %s115_s27 }
  0x1f   :  { %s919_s29 = scalar_lea.hbm %s1510_s15, 16 }
  0x20   :  { %p920_p8 = scmp.ne.s32.totalorder %s1510_s15, %s919_s29  ;;  %p923_p9 = scmp.lt.u32.totalorder %s919_s29, %s1510_s15 }
  0x22   :  { %p925_p10 = pnand %p923_p9, %p920_p8 }
  0x24   :  { %928 = shalt.err (!%p925_p10)
}
  0x25   :  { %s929_s13 = scalar_lea.vmem %s94_s2, 16  ;;  %s933_s25 = scalar_lea.vmem %s94_s2, 32 }
  0x26   :  { %p930_p11 = scmp.ne.s32.totalorder %s94_s2, %s929_s13  ;;  %p934_p12 = scmp.lt.s32.totalorder %s94_s2, %s94_s2 }
  0x27   :  { %p935_p13 = scmp.lt.s32.totalorder %s933_s25, %s929_s13 }
  0x29   :  { %p936_p0 = por %p935_p13, %p934_p12 }
  0x2b   :  { %p937_p1 = pnand %p936_p0, %p930_p11 }
  0x2d   :  { %940 = shalt.err (!%p937_p1)
}
  0x2e   :  { %96 = dma.hbm_to_vmem [thread:$0]  %s1510_s15, 16, %s94_s2, [#allocation8]  }
  0x2f   :  { %s941_s21 = scalar_lea.hbm %s1513_s18, 16 }
  0x30   :  { %p942_p2 = scmp.ne.s32.totalorder %s1513_s18, %s941_s21  ;;  %p945_p3 = scmp.lt.u32.totalorder %s941_s21, %s1513_s18 }
  0x32   :  { %p947_p4 = pnand %p945_p3, %p942_p2 }
  0x34   :  { %950 = shalt.err (!%p947_p4)
}
  0x35   :  { %s951_s29 = scalar_lea.vmem %s116_s27, 16  ;;  %s955_s0 = scalar_lea.vmem %s116_s27, 32 }
  0x36   :  { %p952_p5 = scmp.ne.s32.totalorder %s116_s27, %s951_s29  ;;  %p956_p6 = scmp.lt.s32.totalorder %s116_s27, %s116_s27 }
  0x37   :  { %p957_p7 = scmp.lt.s32.totalorder %s955_s0, %s951_s29 }
  0x39   :  { %p958_p8 = por %p957_p7, %p956_p6 }
  0x3b   :  { %p959_p9 = pnand %p958_p8, %p952_p5 }
  0x3d   :  { %962 = shalt.err (!%p959_p9)
}
  0x3e   :  { %118 = dma.hbm_to_vmem [thread:$0]  %s1513_s18, 16, %s116_s27, [#allocation11]  }
  0x3f   :  { %s1088_s4 = smov [#allocation2]   ;;  %s1089_s13 = smov [#allocation6]  }
  0x40   :  { %s61_s30 = sshll.u32 %s1088_s4, 4  ;;  %s83_s25 = sshll.u32 %s1089_s13, 4  ;;  %s62_s30 = int_to_ptr.vmem [resolvable:$true] %s61_s30  ;;  %s84_s25 = int_to_ptr.vmem [resolvable:$true] %s83_s25 }
  0x41   :  { %s963_s23 = scalar_lea.hbm %s1507_s12, 16 }
  0x42   :  { %p964_p10 = scmp.ne.s32.totalorder %s1507_s12, %s963_s23  ;;  %p967_p11 = scmp.lt.u32.totalorder %s963_s23, %s1507_s12 }
  0x44   :  { %p969_p12 = pnand %p967_p11, %p964_p10 }
  0x46   :  { %972 = shalt.err (!%p969_p12)
}
  0x47   :  { %s973_s18 = scalar_lea.vmem %s62_s30, 16  ;;  %s977_s27 = scalar_lea.vmem %s62_s30, 32 }
  0x48   :  { %p974_p13 = scmp.ne.s32.totalorder %s62_s30, %s973_s18  ;;  %p978_p0 = scmp.lt.s32.totalorder %s62_s30, %s62_s30 }
  0x49   :  { %p979_p1 = scmp.lt.s32.totalorder %s977_s27, %s973_s18 }
  0x4b   :  { %p980_p2 = por %p979_p1, %p978_p0 }
  0x4d   :  { %p981_p3 = pnand %p980_p2, %p974_p13 }
  0x4f   :  { %984 = shalt.err (!%p981_p3)
}
  0x50   :  { %64 = dma.hbm_to_vmem [thread:$0]  %s1507_s12, 16, %s62_s30, [#allocation3]  }
  0x51   :  { %s985_s15 = scalar_lea.hbm %s1509_s14, 16 }
  0x52   :  { %p986_p4 = scmp.ne.s32.totalorder %s1509_s14, %s985_s15  ;;  %p989_p5 = scmp.lt.u32.totalorder %s985_s15, %s1509_s14 }
  0x54   :  { %p991_p6 = pnand %p989_p5, %p986_p4 }
  0x56   :  { %994 = shalt.err (!%p991_p6)
}
  0x57   :  { %s995_s22 = scalar_lea.vmem %s84_s25, 16  ;;  %s999_s23 = scalar_lea.vmem %s84_s25, 32 }
  0x58   :  { %p996_p7 = scmp.ne.s32.totalorder %s84_s25, %s995_s22  ;;  %p1000_p8 = scmp.lt.s32.totalorder %s84_s25, %s84_s25 }
  0x59   :  { %p1001_p9 = scmp.lt.s32.totalorder %s999_s23, %s995_s22 }
  0x5b   :  { %p1002_p10 = por %p1001_p9, %p1000_p8 }
  0x5d   :  { %p1003_p11 = pnand %p1002_p10, %p996_p7 }
  0x5f   :  { %1006 = shalt.err (!%p1003_p11)
}
  0x60   :  { %86 = dma.hbm_to_vmem [thread:$0]  %s1509_s14, 16, %s84_s25, [#allocation5]  }
  0x61   :  { %s1090_s1 = smov [#allocation9]   ;;  %s1091_s24 = smov [#allocation12]  }
  0x62   :  { %s103_s21 = sshll.u32 %s1090_s1, 4  ;;  %s125_s26 = sshll.u32 %s1091_s24, 4  ;;  %s104_s21 = int_to_ptr.vmem [resolvable:$true] %s103_s21  ;;  %s126_s26 = int_to_ptr.vmem [resolvable:$true] %s125_s26 }
  0x63   :  { %s1007_s3 = scalar_lea.hbm %s1511_s16, 16 }
  0x64   :  { %p1008_p12 = scmp.ne.s32.totalorder %s1511_s16, %s1007_s3  ;;  %p1011_p13 = scmp.lt.u32.totalorder %s1007_s3, %s1511_s16 }
  0x66   :  { %p1013_p0 = pnand %p1011_p13, %p1008_p12 }
  0x68   :  { %1016 = shalt.err (!%p1013_p0)
}
  0x69   :  { %s1017_s14 = scalar_lea.vmem %s104_s21, 16  ;;  %s1021_s25 = scalar_lea.vmem %s104_s21, 32 }
  0x6a   :  { %p1018_p1 = scmp.ne.s32.totalorder %s104_s21, %s1017_s14  ;;  %p1022_p2 = scmp.lt.s32.totalorder %s104_s21, %s104_s21 }
  0x6b   :  { %p1023_p3 = scmp.lt.s32.totalorder %s1021_s25, %s1017_s14 }
  0x6d   :  { %p1024_p4 = por %p1023_p3, %p1022_p2 }
  0x6f   :  { %p1025_p5 = pnand %p1024_p4, %p1018_p1 }
  0x71   :  { %1028 = shalt.err (!%p1025_p5)
}
  0x72   :  { %106 = dma.hbm_to_vmem [thread:$0]  %s1511_s16, 16, %s104_s21, [#allocation8]  }
  0x73   :  { %s1029_s22 = scalar_lea.hbm %s1514_s19, 16 }
  0x74   :  { %p1030_p6 = scmp.ne.s32.totalorder %s1514_s19, %s1029_s22  ;;  %p1033_p7 = scmp.lt.u32.totalorder %s1029_s22, %s1514_s19 }
  0x76   :  { %p1035_p8 = pnand %p1033_p7, %p1030_p6 }
  0x78   :  { %1038 = shalt.err (!%p1035_p8)
}
  0x79   :  { %s1039_s24 = scalar_lea.vmem %s126_s26, 16  ;;  %s1043_s18 = scalar_lea.vmem %s126_s26, 32 }
  0x7a   :  { %p1040_p9 = scmp.ne.s32.totalorder %s126_s26, %s1039_s24  ;;  %p1044_p10 = scmp.lt.s32.totalorder %s126_s26, %s126_s26 }
  0x7b   :  { %p1045_p11 = scmp.lt.s32.totalorder %s1043_s18, %s1039_s24 }
  0x7d   :  { %p1046_p12 = por %p1045_p11, %p1044_p10 }
  0x7f   :  { %p1047_p13 = pnand %p1046_p12, %p1040_p9 }
  0x81   :  { %1050 = shalt.err (!%p1047_p13)
}
  0x82   :  { %128 = dma.hbm_to_vmem [thread:$0]  %s1514_s19, 16, %s126_s26, [#allocation11]  }
  0x83   :  { %s1092_s27 = smov [#allocation13]   ;;  %s1051_s0 = scalar_lea.hbm %s1515_s20, 16 }
  0x84   :  { %s135_s3 = sshll.u32 %s1092_s27, 4  ;;  %p1052_p0 = scmp.ne.s32.totalorder %s1515_s20, %s1051_s0  ;;  %s136_s3 = int_to_ptr.vmem [resolvable:$true] %s135_s3 }
  0x85   :  { %p1055_p1 = scmp.lt.u32.totalorder %s1051_s0, %s1515_s20 }
  0x87   :  { %p1057_p2 = pnand %p1055_p1, %p1052_p0 }
  0x89   :  { %1060 = shalt.err (!%p1057_p2)
}
  0x8a   :  { %s1061_s4 = scalar_lea.vmem %s136_s3, 16  ;;  %s1065_s19 = scalar_lea.vmem %s136_s3, 32 }
  0x8b   :  { %p1062_p3 = scmp.ne.s32.totalorder %s136_s3, %s1061_s4  ;;  %p1066_p4 = scmp.lt.s32.totalorder %s136_s3, %s136_s3 }
  0x8c   :  { %p1067_p5 = scmp.lt.s32.totalorder %s1065_s19, %s1061_s4 }
  0x8e   :  { %p1068_p6 = por %p1067_p5, %p1066_p4 }
  0x90   :  { %p1069_p7 = pnand %p1068_p6, %p1062_p3 }
  0x92   :  { %1072 = shalt.err (!%p1069_p7)
}
  0x93   :  { %138 = dma.hbm_to_vmem [thread:$0]  %s1515_s20, 16, %s136_s3, [#allocation14]  }
  0x94   :  { %1073 = dma.done.wait [#allocation3], 16  }
  0x95   :  { %1074 = vsyncadd [#allocation3], 4294967280 }
  0x96   :  { %1075 = dma.done.wait [#allocation5], 1040  }
  0x97   :  { %1076 = vsyncadd [#allocation5], 4294966256 }
  0x98   :  { %1077 = dma.done.wait [#allocation8], 32  }
  0x99   :  { %1078 = vsyncadd [#allocation8], 4294967264 }
  0x9a   :  { %1079 = dma.done.wait [#allocation11], 32  }
  0x9b   :  { %1080 = vsyncadd [#allocation11], 4294967264 }
  0x9c   :  { %1081 = dma.done.wait [#allocation14], 16  }
  0x9d   :  { %1082 = vsyncadd [#allocation14], 4294967280  ;;  %v1093_v0 = vmov 0.0   ;;  %vm1094_vm0 = vmmov 0   ;;  %s1528_s22 = sld [smem:[#allocation21_spill]]  ;;  %vm183_vm1 = vcmask 1043456  }
  0x9e   :  { %781 = vmatprep.subr.bf16.mxu0 %v1093_v0  ;;  %785 = vmatprep.mubr.msk.bf16.mxu0 %vm1094_vm0, %v1093_v0  ;;  %s1529_s16 = sld [smem:[#allocation20_spill]]  ;;  %vm179_vm2 = vcmask 195584   ;;  %s1530_s29 = sld [smem:[#allocation22_spill]]  ;;  %vm232_vm3 = vcmask 523264   ;;  %v739_v60 = vld [vmem:[%s1501_s6] ss:$0 sm:$0xff] }
  0x9f   :  { %789 = vmatprep.subr.bf16.mxu1 %v1093_v0  ;;  %797 = vmatprep.mubr.msk.bf16.mxu1 %vm1094_vm0, %v1093_v0  ;;  %s1531_s14 = sld [smem:[#allocation25_spill]]  ;;  %s1532_s21 = sld [smem:[#allocation23_spill]]  ;;  %vm680_vm4 = vcmask 261120  }
  0xa0   :  { %s1533_s28 = sld [smem:[#allocation24_spill]]  ;;  %s1534_s25 = sld [smem:[#allocation26_spill]] }
  0xa3   :  { %v166_v1 = vld [vmem:[%s1528_s22] sm:$0xff]  ;;  %v167_v2 = vld [vmem:[%s1528_s22 + $0x8] sm:$0xff]  ;;  %v168_v3 = vld [vmem:[%s1528_s22 + $0x10] sm:$0xff] }
  0xa4   :  { %v170_v4 = vpack.c.bf16 %v167_v2, %v166_v1  ;;  %v171_v5 = vpack.c.bf16 %v168_v3, %v168_v3  ;;  %v164_v6 = vld [vmem:[%s1529_s16] sm:$0xff]  ;;  %v165_v7 = vld [vmem:[%s1529_s16 + $0x8] sm:$0xff] }
  0xa5   :  { %v169_v9 = vpack.c.bf16 %v165_v7, %v164_v6  ;;  %v735_v10 = vld [vmem:[%s1530_s29] ss:$0 sm:$0xff]  ;;  %v277_v32 = vld [vmem:[%s1531_s14 + $0x8] sm:$0xff]  ;;  %v278_v34 = vld [vmem:[%s1531_s14 + $0x10] sm:$0xff] }
  0xa6   :  { %782 = vmatpush3.bf16.msra.mxu0 %v170_v4  ;;  %v185_v8 = vsel %vm183_vm1, %v171_v5, 0  ;;  %v276_v31 = vld [vmem:[%s1531_s14] sm:$0xff]  ;;  %v279_v35 = vld [vmem:[%s1531_s14 + $0x18] sm:$0xff]  ;;  %v281_v38 = vld [vmem:[%s1531_s14 + $0x28] sm:$0xff] }
  0xa7   :  { %783 = vmatprep.subr.bf16.mxu0 %v1093_v0  ;;  %v285_v33 = vpack.c.bf16 %v277_v32, %v276_v31  ;;  %v286_v36 = vpack.c.bf16 %v279_v35, %v278_v34  ;;  %v280_v37 = vld [vmem:[%s1531_s14 + $0x20] sm:$0xff]  ;;  %v282_v40 = vld [vmem:[%s1531_s14 + $0x30] sm:$0xff]  ;;  %v283_v41 = vld [vmem:[%s1531_s14 + $0x38] sm:$0xff] }
  0xa8   :  { %v287_v39 = vpack.c.bf16 %v281_v38, %v280_v37  ;;  %v288_v42 = vpack.c.bf16 %v283_v41, %v282_v40  ;;  %v737_v51 = vld [vmem:[%s1532_s21] ss:$0 sm:$0xff]  ;;  %v384_v7 = vld [vmem:[%s1504_s9 + $0x8] sm:$0xff]  ;;  %v397_v35 = vld [vmem:[%s1504_s9 + $0x70] sm:$0xff] }
  0xa9   :  { %790 = vmatpush3.bf16.msra.mxu1 %v285_v33  ;;  %v738_v55 = vld [vmem:[%s1533_s28] ss:$0 sm:$0xff]  ;;  %v396_v33 = vld [vmem:[%s1504_s9 + $0x68] sm:$0xff] }
  0xaa   :  { %784 = vmatpush3.bf16.msra.mxu0 %v185_v8  ;;  %791 = vmatprep.subr.bf16.mxu1 %v1093_v0  ;;  %v383_v6 = vld [vmem:[%s1504_s9] sm:$0xff]  ;;  %v385_v8 = vld [vmem:[%s1504_s9 + $0x10] sm:$0xff] }
  0xab   :  { %801 = vmatprep.subr.bf16.mxu0 %v1093_v0  ;;  %v395_v32 = vld [vmem:[%s1504_s9 + $0x60] sm:$0xff] }
  0xac   :  { %v406_v34 = vpack.c.bf16 %v396_v33, %v395_v32  ;;  %v744_v32 = vld [vmem:[%s1506_s11] ss:$0 sm:$0xff] }
  0xad   :  { %786 = vmatmul.mubr.msk.bf16.vlgmr.msra.gmra.mrb[0].mxu0 %vm179_vm2, %v169_v9  ;;  %792 = vmatpush3.bf16.msra.mxu1 %v286_v36  ;;  %v400_v9 = vpack.c.bf16 %v384_v7, %v383_v6  ;;  %v398_v36 = vld [vmem:[%s1504_s9 + $0x78] sm:$0xff] }
  0xae   :  { %817 = vmatprep.mubr.msk.bf16.mxu0 %vm1094_vm0, %v1093_v0  ;;  %793 = vmatprep.subr.bf16.mxu1 %v1093_v0  ;;  %v407_v37 = vpack.c.bf16 %v398_v36, %v397_v35 }
  0xaf   :  { %802 = vmatpush3.bf16.msra.mxu0 %v400_v9 }
  0xb0   :  { %803 = vmatprep.subr.bf16.mxu0 %v1093_v0 }
  0xb1   :  { %794 = vmatpush3.bf16.msra.mxu1 %v287_v39 }
  0xb2   :  { %795 = vmatprep.subr.bf16.mxu1 %v1093_v0 }
  0xb5   :  { %796 = vmatpush3.bf16.msra.mxu1 %v288_v42 }
  0xb6   :  { %821 = vmatprep.subr.bf16.mxu1 %v1093_v0 }
 0x180   :  { %v221_v11 = vpop.f32.mrb[0].mxu0 }
 0x181   :  { %v222_v12 = vadd.f32 %v735_v10, %v221_v11  ;;  %v787_v13 = vpop.f32.mrb[1].mxu0 }
 0x182   :  { %v224_v14 = vpop.f32.mrb[2].mxu0 }
 0x183   :  { %857 = vtanh.f32 %v222_v12  ;;  %v225_v15 = vadd.f32 %v735_v10, %v224_v14  ;;  %v788_v16 = vpop.f32.mrb[3].mxu0  ;;  %v386_v10 = vld [vmem:[%s1504_s9 + $0x18] sm:$0xff] }
 0x184   :  { %v401_v11 = vpack.c.bf16 %v386_v10, %v385_v8 }
 0x185   :  { %859 = vtanh.f32 %v225_v15 }
 0x186   :  { %804 = vmatpush3.bf16.msra.mxu0 %v401_v11 }
 0x187   :  { %805 = vmatprep.subr.bf16.mxu0 %v1093_v0 }
 0x18d   :  { %v858_v17 = vpop.eup %857 }
 0x18e   :  { %v233_v18 = vsel %vm232_vm3, %v858_v17, 0.0 }
 0x18f   :  { %v860_v19 = vpop.eup %859  ;;  %234 = vadd.xlane.f32.xlu0 %v233_v18 }
 0x190   :  { %v236_v20 = vsel %vm232_vm3, %v860_v19, 0.0 }
 0x193   :  { %237 = vadd.xlane.f32.xlu0 %v236_v20  ;;  %v387_v20 = vld [vmem:[%s1504_s9 + $0x20] sm:$0xff] }
 0x21c   :  { %v235_v21 = vpop.xlane.xlu0 %234 }
 0x21d   :  { %v240_v22 = vmul.f32 0.015625, %v235_v21  ;;  %v388_v21 = vld [vmem:[%s1504_s9 + $0x28] sm:$0xff] }
 0x21f   :  { %v242_v23 = vsub.f32 %v858_v17, %v240_v22  ;;  %v402_v22 = vpack.c.bf16 %v388_v21, %v387_v20  ;;  %v507_v20 = vld [vmem:[#allocation4 + $0x28] sm:$0xff] }
 0x220   :  { %v238_v24 = vpop.xlane.xlu0 %237 }
 0x221   :  { %v241_v25 = vmul.f32 0.015625, %v238_v24  ;;  %v244_v26 = vmul.f32 %v242_v23, %v242_v23  ;;  %806 = vmatpush3.bf16.msra.mxu0 %v402_v22  ;;  %v390_v24 = vld [vmem:[%s1504_s9 + $0x38] sm:$0xff] }
 0x222   :  { %807 = vmatprep.subr.bf16.mxu0 %v1093_v0  ;;  %v508_v22 = vld [vmem:[#allocation4 + $0x30] sm:$0xff] }
 0x223   :  { %v243_v27 = vsub.f32 %v860_v19, %v241_v25  ;;  %v246_v28 = vsel %vm232_vm3, %v244_v26, 0.0  ;;  %v391_v26 = vld [vmem:[%s1504_s9 + $0x40] sm:$0xff] }
 0x224   :  { %247 = vadd.xlane.f32.xlu1 %v246_v28 }
 0x225   :  { %v245_v29 = vmul.f32 %v243_v27, %v243_v27 }
 0x227   :  { %v249_v30 = vsel %vm232_vm3, %v245_v29, 0.0  ;;  %v393_v29 = vld [vmem:[%s1504_s9 + $0x50] sm:$0xff] }
 0x228   :  { %250 = vadd.xlane.f32.xlu1 %v249_v30  ;;  %v394_v30 = vld [vmem:[%s1504_s9 + $0x58] sm:$0xff] }
 0x229   :  { %v405_v31 = vpack.c.bf16 %v394_v30, %v393_v29 }
 0x2b1   :  { %v248_v43 = vpop.xlane.xlu1 %247 }
 0x2b2   :  { %v252_v44 = vmul.f32 0.015625, %v248_v43 }
 0x2b4   :  { %v254_v45 = vadd.f32 1e-05, %v252_v44 }
 0x2b5   :  { %v251_v46 = vpop.xlane.xlu1 %250 }
 0x2b6   :  { %861 = vrsqrt.f32 %v254_v45  ;;  %v253_v47 = vmul.f32 0.015625, %v251_v46  ;;  %v741_v45 = vld [vmem:[%s1502_s7] ss:$0 sm:$0xff] }
 0x2b8   :  { %v255_v48 = vadd.f32 1e-05, %v253_v47 }
 0x2ba   :  { %863 = vrsqrt.f32 %v255_v48 }
 0x2c0   :  { %v862_v49 = vpop.eup %861 }
 0x2c1   :  { %v258_v50 = vmul.f32 %v862_v49, %v242_v23  ;;  %v389_v23 = vld [vmem:[%s1504_s9 + $0x30] sm:$0xff] }
 0x2c2   :  { %v403_v25 = vpack.c.bf16 %v390_v24, %v389_v23  ;;  %v509_v23 = vld [vmem:[#allocation4 + $0x38] sm:$0xff] }
 0x2c3   :  { %v266_v54 = vmul.f32 %v737_v51, %v258_v50  ;;  %v742_v50 = vld [vmem:[%s1503_s8] ss:$0 sm:$0xff]  ;;  %v514_v24 = vpack.c.bf16 %v509_v23, %v508_v22  ;;  %v749_v23 = vld [vmem:[#allocation9] ss:$0 sm:$0xff] }
 0x2c4   :  { %v864_v52 = vpop.eup %863  ;;  %808 = vmatpush3.bf16.msra.mxu0 %v403_v25 }
 0x2c5   :  { %v259_v53 = vmul.f32 %v864_v52, %v243_v27  ;;  %v274_v57 = vadd.f32 %v738_v55, %v266_v54  ;;  %809 = vmatprep.subr.bf16.mxu0 %v1093_v0  ;;  %v392_v27 = vld [vmem:[%s1504_s9 + $0x48] sm:$0xff] }
 0x2c6   :  { %v404_v28 = vpack.c.bf16 %v392_v27, %v391_v26 }
 0x2c7   :  { %v267_v56 = vmul.f32 %v737_v51, %v259_v53 }
 0x2c8   :  { %810 = vmatpush3.bf16.msra.mxu0 %v404_v28 }
 0x2c9   :  { %v275_v58 = vadd.f32 %v738_v55, %v267_v56  ;;  %811 = vmatprep.subr.bf16.mxu0 %v1093_v0  ;;  %v743_v55 = vld [vmem:[%s1505_s10] ss:$0 sm:$0xff] }
 0x2cb   :  { %v284_v59 = vpack.c.bf16 %v275_v58, %v274_v57 }
 0x2cc   :  { %812 = vmatpush3.bf16.msra.mxu0 %v405_v31 }
 0x2cd   :  { %798 = vmatmul.mubr.msk.bf16.vlgmr.msra.gmra.mrb[0].mxu1 %vm232_vm3, %v284_v59  ;;  %813 = vmatprep.subr.bf16.mxu0 %v1093_v0 }
 0x2ce   :  { %829 = vmatprep.mubr.msk.bf16.mxu1 %vm1094_vm0, %v1093_v0 }
 0x2d0   :  { %814 = vmatpush3.bf16.msra.mxu0 %v406_v34 }
 0x2d1   :  { %815 = vmatprep.subr.bf16.mxu0 %v1093_v0 }
 0x2d4   :  { %816 = vmatpush3.bf16.msra.mxu0 %v407_v37  ;;  %v745_v37 = vld [vmem:[#allocation2] ss:$0 sm:$0xff] }
 0x3a0   :  { %v333_v61 = vpop.f32.mrb[0].mxu1 }
 0x3a1   :  { %v334_v62 = vadd.f32 %v739_v60, %v333_v61  ;;  %v799_v63 = vpop.f32.mrb[1].mxu1 }
 0x3a2   :  { %v336_v1 = vpop.f32.mrb[2].mxu1 }
 0x3a3   :  { %865 = vtanh.f32 %v334_v62  ;;  %v337_v2 = vadd.f32 %v739_v60, %v336_v1  ;;  %v800_v3 = vpop.f32.mrb[3].mxu1 }
 0x3a5   :  { %867 = vtanh.f32 %v337_v2 }
 0x3ad   :  { %v866_v4 = vpop.eup %865 }
 0x3ae   :  { %344 = vadd.xlane.f32.xlu0 %v866_v4 }
 0x3af   :  { %v868_v5 = vpop.eup %867 }
 0x3b0   :  { %346 = vadd.xlane.f32.xlu1 %v868_v5 }
 0x43b   :  { %v345_v12 = vpop.xlane.xlu0 %344 }
 0x43c   :  { %v349_v13 = vmul.f32 0.0078125, %v345_v12 }
 0x43d   :  { %v347_v14 = vpop.xlane.xlu1 %346 }
 0x43e   :  { %v351_v15 = vsub.f32 %v866_v4, %v349_v13  ;;  %v350_v16 = vmul.f32 0.0078125, %v347_v14  ;;  %v502_v13 = vld [vmem:[#allocation4] sm:$0xff]  ;;  %v503_v14 = vld [vmem:[#allocation4 + $0x8] sm:$0xff] }
 0x440   :  { %v352_v17 = vsub.f32 %v868_v5, %v350_v16  ;;  %v353_v18 = vmul.f32 %v351_v15, %v351_v15  ;;  %v504_v16 = vld [vmem:[#allocation4 + $0x10] sm:$0xff] }
 0x442   :  { %355 = vadd.xlane.f32.xlu0 %v353_v18  ;;  %v354_v19 = vmul.f32 %v352_v17, %v352_v17 }
 0x444   :  { %357 = vadd.xlane.f32.xlu1 %v354_v19  ;;  %v506_v19 = vld [vmem:[#allocation4 + $0x20] sm:$0xff] }
 0x445   :  { %v513_v21 = vpack.c.bf16 %v507_v20, %v506_v19 }
 0x4cf   :  { %v356_v38 = vpop.xlane.xlu0 %355 }
 0x4d0   :  { %v359_v39 = vmul.f32 0.0078125, %v356_v38 }
 0x4d1   :  { %v358_v40 = vpop.xlane.xlu1 %357 }
 0x4d2   :  { %v361_v41 = vadd.f32 1e-05, %v359_v39  ;;  %v360_v42 = vmul.f32 0.0078125, %v358_v40 }
 0x4d4   :  { %869 = vrsqrt.f32 %v361_v41  ;;  %v362_v43 = vadd.f32 1e-05, %v360_v42  ;;  %v746_v42 = vld [vmem:[#allocation6] ss:$0 sm:$0xff] }
 0x4d6   :  { %871 = vrsqrt.f32 %v362_v43 }
 0x4de   :  { %v870_v44 = vpop.eup %869 }
 0x4df   :  { %v365_v46 = vmul.f32 %v870_v44, %v351_v15  ;;  %v511_v15 = vpack.c.bf16 %v503_v14, %v502_v13 }
 0x4e0   :  { %v872_v47 = vpop.eup %871 }
 0x4e1   :  { %v366_v48 = vmul.f32 %v872_v47, %v352_v17  ;;  %v373_v49 = vmul.f32 %v741_v45, %v365_v46  ;;  %822 = vmatpush3.bf16.msra.mxu1 %v511_v15  ;;  %v505_v17 = vld [vmem:[#allocation4 + $0x18] sm:$0xff] }
 0x4e2   :  { %823 = vmatprep.subr.bf16.mxu1 %v1093_v0  ;;  %v512_v18 = vpack.c.bf16 %v505_v17, %v504_v16 }
 0x4e3   :  { %v374_v51 = vmul.f32 %v741_v45, %v366_v48  ;;  %v381_v52 = vadd.f32 %v742_v50, %v373_v49 }
 0x4e5   :  { %v382_v53 = vadd.f32 %v742_v50, %v374_v51  ;;  %824 = vmatpush3.bf16.msra.mxu1 %v512_v18 }
 0x4e6   :  { %825 = vmatprep.subr.bf16.mxu1 %v1093_v0 }
 0x4e7   :  { %v399_v54 = vpack.c.bf16 %v382_v53, %v381_v52 }
 0x4e9   :  { %818 = vmatmul.mubr.bf16.vlgmr.msra.gmra.mrb[4].mxu0 %v399_v54  ;;  %826 = vmatpush3.bf16.msra.mxu1 %v513_v21 }
 0x4ea   :  { %827 = vmatprep.subr.bf16.mxu1 %v1093_v0 }
 0x4ed   :  { %828 = vmatpush3.bf16.msra.mxu1 %v514_v24 }
 0x4ee   :  { %833 = vmatprep.subr.bf16.mxu1 %v1093_v0 }
 0x5bc   :  { %v449_v56 = vpop.f32.mrb[4].mxu0 }
 0x5bd   :  { %v450_v57 = vadd.f32 %v743_v55, %v449_v56  ;;  %v819_v58 = vpop.f32.mrb[5].mxu0 }
 0x5be   :  { %v452_v59 = vpop.f32.mrb[6].mxu0 }
 0x5bf   :  { %873 = vtanh.f32 %v450_v57  ;;  %v453_v60 = vadd.f32 %v743_v55, %v452_v59  ;;  %v820_v61 = vpop.f32.mrb[7].mxu0 }
 0x5c1   :  { %875 = vtanh.f32 %v453_v60 }
 0x5c9   :  { %v874_v62 = vpop.eup %873 }
 0x5ca   :  { %v460_v63 = vsel %vm232_vm3, %v874_v62, 0.0 }
 0x5cb   :  { %v876_v1 = vpop.eup %875  ;;  %461 = vadd.xlane.f32.xlu0 %v460_v63  ;;  %v612_v63 = vld [vmem:[%s1512_s17] sm:$0xff] }
 0x5cc   :  { %v463_v2 = vsel %vm232_vm3, %v876_v1, 0.0 }
 0x5cd   :  { %464 = vadd.xlane.f32.xlu1 %v463_v2 }
 0x658   :  { %v462_v3 = vpop.xlane.xlu0 %461 }
 0x659   :  { %v466_v4 = vmul.f32 0.015625, %v462_v3  ;;  %v614_v3 = vld [vmem:[%s1512_s17 + $0x10] sm:$0xff] }
 0x65a   :  { %v465_v5 = vpop.xlane.xlu1 %464 }
 0x65b   :  { %v468_v6 = vsub.f32 %v874_v62, %v466_v4  ;;  %v467_v7 = vmul.f32 0.015625, %v465_v5  ;;  %v615_v4 = vld [vmem:[%s1512_s17 + $0x18] sm:$0xff] }
 0x65c   :  { %v622_v5 = vpack.c.bf16 %v615_v4, %v614_v3 }
 0x65d   :  { %v469_v8 = vsub.f32 %v876_v1, %v467_v7  ;;  %v470_v9 = vmul.f32 %v468_v6, %v468_v6  ;;  %v613_v1 = vld [vmem:[%s1512_s17 + $0x8] sm:$0xff] }
 0x65e   :  { %v621_v2 = vpack.c.bf16 %v613_v1, %v612_v63  ;;  %v617_v7 = vld [vmem:[%s1512_s17 + $0x28] sm:$0xff] }
 0x65f   :  { %v472_v10 = vsel %vm232_vm3, %v470_v9, 0.0  ;;  %v471_v11 = vmul.f32 %v469_v8, %v469_v8  ;;  %v618_v9 = vld [vmem:[%s1512_s17 + $0x30] sm:$0xff] }
 0x660   :  { %473 = vadd.xlane.f32.xlu0 %v472_v10  ;;  %v619_v10 = vld [vmem:[%s1512_s17 + $0x38] sm:$0xff] }
 0x661   :  { %v475_v12 = vsel %vm232_vm3, %v471_v11, 0.0  ;;  %v624_v11 = vpack.c.bf16 %v619_v10, %v618_v9 }
 0x662   :  { %476 = vadd.xlane.f32.xlu1 %v475_v12 }
 0x6ed   :  { %v474_v25 = vpop.xlane.xlu0 %473 }
 0x6ee   :  { %v478_v26 = vmul.f32 0.015625, %v474_v25 }
 0x6ef   :  { %v477_v27 = vpop.xlane.xlu1 %476 }
 0x6f0   :  { %v480_v28 = vadd.f32 1e-05, %v478_v26  ;;  %v479_v29 = vmul.f32 0.015625, %v477_v27 }
 0x6f2   :  { %877 = vrsqrt.f32 %v480_v28  ;;  %v481_v30 = vadd.f32 1e-05, %v479_v29  ;;  %v750_v28 = vld [vmem:[#allocation10] ss:$0 sm:$0xff] }
 0x6f4   :  { %879 = vrsqrt.f32 %v481_v30 }
 0x6fc   :  { %v878_v31 = vpop.eup %877 }
 0x6fd   :  { %v484_v33 = vmul.f32 %v878_v31, %v468_v6  ;;  %v616_v6 = vld [vmem:[%s1512_s17 + $0x20] sm:$0xff] }
 0x6fe   :  { %v880_v34 = vpop.eup %879 }
 0x6ff   :  { %v492_v35 = vmul.f32 %v744_v32, %v484_v33  ;;  %v485_v36 = vmul.f32 %v880_v34, %v469_v8  ;;  %v623_v8 = vpack.c.bf16 %v617_v7, %v616_v6 }
 0x701   :  { %v493_v38 = vmul.f32 %v744_v32, %v485_v36  ;;  %v500_v39 = vadd.f32 %v745_v37, %v492_v35 }
 0x703   :  { %v501_v40 = vadd.f32 %v745_v37, %v493_v38 }
 0x705   :  { %v510_v41 = vpack.c.bf16 %v501_v40, %v500_v39 }
 0x707   :  { %830 = vmatmul.mubr.msk.bf16.vlgmr.msra.gmra.mrb[4].mxu1 %vm232_vm3, %v510_v41 }
 0x708   :  { %841 = vmatprep.mubr.msk.bf16.mxu1 %vm1094_vm0, %v1093_v0  ;;  %834 = vmatpush3.bf16.msra.mxu1 %v621_v2 }
 0x709   :  { %835 = vmatprep.subr.bf16.mxu1 %v1093_v0 }
 0x70c   :  { %836 = vmatpush3.bf16.msra.mxu1 %v622_v5 }
 0x70d   :  { %837 = vmatprep.subr.bf16.mxu1 %v1093_v0 }
 0x710   :  { %838 = vmatpush3.bf16.msra.mxu1 %v623_v8 }
 0x711   :  { %839 = vmatprep.subr.bf16.mxu1 %v1093_v0  ;;  %v748_v0 = vld [vmem:[#allocation7] ss:$0 sm:$0xff] }
 0x714   :  { %840 = vmatpush3.bf16.msra.mxu1 %v624_v11 }
 0x7da   :  { %v559_v43 = vpop.f32.mrb[4].mxu1 }
 0x7db   :  { %v560_v44 = vadd.f32 %v746_v42, %v559_v43  ;;  %v831_v45 = vpop.f32.mrb[5].mxu1 }
 0x7dc   :  { %v562_v46 = vpop.f32.mrb[6].mxu1 }
 0x7dd   :  { %881 = vtanh.f32 %v560_v44  ;;  %v563_v47 = vadd.f32 %v746_v42, %v562_v46  ;;  %v832_v48 = vpop.f32.mrb[7].mxu1 }
 0x7df   :  { %883 = vtanh.f32 %v563_v47 }
 0x7e7   :  { %v882_v49 = vpop.eup %881 }
 0x7e8   :  { %v570_v50 = vsel %vm232_vm3, %v882_v49, 0.0 }
 0x7e9   :  { %v884_v51 = vpop.eup %883  ;;  %571 = vadd.xlane.f32.xlu0 %v570_v50 }
 0x7ea   :  { %v573_v52 = vsel %vm232_vm3, %v884_v51, 0.0 }
 0x7eb   :  { %574 = vadd.xlane.f32.xlu1 %v573_v52 }
 0x876   :  { %v572_v53 = vpop.xlane.xlu0 %571 }
 0x877   :  { %v576_v54 = vmul.f32 0.015625, %v572_v53 }
 0x878   :  { %v575_v55 = vpop.xlane.xlu1 %574 }
 0x879   :  { %v578_v56 = vsub.f32 %v882_v49, %v576_v54  ;;  %v577_v57 = vmul.f32 0.015625, %v575_v55 }
 0x87b   :  { %v579_v58 = vsub.f32 %v884_v51, %v577_v57  ;;  %v580_v59 = vmul.f32 %v578_v56, %v578_v56 }
 0x87d   :  { %v582_v60 = vsel %vm232_vm3, %v580_v59, 0.0  ;;  %v581_v61 = vmul.f32 %v579_v58, %v579_v58  ;;  %v753_v59 = vld [vmem:[#allocation13] ss:$0 sm:$0xff] }
 0x87e   :  { %583 = vadd.xlane.f32.xlu0 %v582_v60 }
 0x87f   :  { %v585_v62 = vsel %vm232_vm3, %v581_v61, 0.0 }
 0x880   :  { %586 = vadd.xlane.f32.xlu1 %v585_v62 }
 0x90b   :  { %v584_v12 = vpop.xlane.xlu0 %583 }
 0x90c   :  { %v588_v13 = vmul.f32 0.015625, %v584_v12 }
 0x90d   :  { %v587_v14 = vpop.xlane.xlu1 %586 }
 0x90e   :  { %v590_v15 = vadd.f32 1e-05, %v588_v13  ;;  %v589_v16 = vmul.f32 0.015625, %v587_v14 }
 0x910   :  { %885 = vrsqrt.f32 %v590_v15  ;;  %v591_v17 = vadd.f32 1e-05, %v589_v16 }
 0x912   :  { %887 = vrsqrt.f32 %v591_v17 }
 0x91a   :  { %v886_v18 = vpop.eup %885 }
 0x91b   :  { %v594_v19 = vmul.f32 %v886_v18, %v578_v56  ;;  %v752_v56 = vld [vmem:[#allocation12] ss:$0 sm:$0xff] }
 0x91c   :  { %v888_v20 = vpop.eup %887 }
 0x91d   :  { %v602_v21 = vmul.f32 %v748_v0, %v594_v19  ;;  %v595_v22 = vmul.f32 %v888_v20, %v579_v58 }
 0x91f   :  { %v603_v24 = vmul.f32 %v748_v0, %v595_v22  ;;  %v610_v25 = vadd.f32 %v749_v23, %v602_v21 }
 0x921   :  { %v611_v26 = vadd.f32 %v749_v23, %v603_v24 }
 0x923   :  { %v620_v27 = vpack.c.bf16 %v611_v26, %v610_v25 }
 0x925   :  { %842 = vmatmul.mubr.msk.bf16.vlgmr.msra.gmra.mrb[8].mxu1 %vm232_vm3, %v620_v27 }
 0x9f8   :  { %v669_v29 = vpop.f32.mrb[8].mxu1 }
 0x9f9   :  { %v670_v30 = vadd.f32 %v750_v28, %v669_v29  ;;  %v843_v31 = vpop.f32.mrb[9].mxu1 }
 0x9fa   :  { %v672_v32 = vpop.f32.mrb[10].mxu1 }
 0x9fb   :  { %889 = vtanh.f32 %v670_v30  ;;  %v673_v33 = vadd.f32 %v750_v28, %v672_v32  ;;  %v844_v34 = vpop.f32.mrb[11].mxu1 }
 0x9fd   :  { %891 = vtanh.f32 %v673_v33 }
 0xa05   :  { %v890_v35 = vpop.eup %889 }
 0xa06   :  { %v681_v36 = vsel %vm680_vm4, %v890_v35, 0.0 }
 0xa07   :  { %v892_v37 = vpop.eup %891  ;;  %682 = vadd.xlane.f32.xlu0 %v681_v36 }
 0xa08   :  { %v684_v38 = vsel %vm680_vm4, %v892_v37, 0.0 }
 0xa09   :  { %685 = vadd.xlane.f32.xlu1 %v684_v38 }
 0xa94   :  { %v683_v39 = vpop.xlane.xlu0 %682 }
 0xa95   :  { %v688_v40 = vmul.f32 0.03125, %v683_v39 }
 0xa96   :  { %v686_v41 = vpop.xlane.xlu1 %685 }
 0xa97   :  { %v690_v42 = vsub.f32 %v890_v35, %v688_v40  ;;  %v689_v43 = vmul.f32 0.03125, %v686_v41 }
 0xa99   :  { %v691_v44 = vsub.f32 %v892_v37, %v689_v43  ;;  %v692_v45 = vmul.f32 %v690_v42, %v690_v42 }
 0xa9b   :  { %v694_v46 = vsel %vm680_vm4, %v692_v45, 0.0  ;;  %v693_v47 = vmul.f32 %v691_v44, %v691_v44 }
 0xa9c   :  { %695 = vadd.xlane.f32.xlu0 %v694_v46 }
 0xa9d   :  { %v697_v48 = vsel %vm680_vm4, %v693_v47, 0.0 }
 0xa9e   :  { %698 = vadd.xlane.f32.xlu1 %v697_v48 }
 0xb29   :  { %v696_v49 = vpop.xlane.xlu0 %695 }
 0xb2a   :  { %v700_v50 = vmul.f32 0.03125, %v696_v49 }
 0xb2b   :  { %v699_v51 = vpop.xlane.xlu1 %698 }
 0xb2c   :  { %v702_v52 = vadd.f32 1e-05, %v700_v50  ;;  %v701_v53 = vmul.f32 0.03125, %v699_v51 }
 0xb2e   :  { %893 = vrsqrt.f32 %v702_v52  ;;  %v703_v54 = vadd.f32 1e-05, %v701_v53 }
 0xb30   :  { %895 = vrsqrt.f32 %v703_v54 }
 0xb38   :  { %v894_v55 = vpop.eup %893 }
 0xb39   :  { %v706_v57 = vmul.f32 %v894_v55, %v690_v42 }
 0xb3a   :  { %v896_v58 = vpop.eup %895 }
 0xb3b   :  { %v714_v60 = vmul.f32 %v752_v56, %v706_v57  ;;  %v707_v61 = vmul.f32 %v896_v58, %v691_v44 }
 0xb3d   :  { %v722_v62 = vadd.f32 %v753_v59, %v714_v60  ;;  %v715_v63 = vmul.f32 %v752_v56, %v707_v61 }
 0xb3f   :  { %724 = vst.msk [vmem:[%s1534_s25] sm:$0xff] %vm680_vm4, %v722_v62  ;;  %v723_v1 = vadd.f32 %v753_v59, %v715_v63 }
 0xb41   :  { %725 = vst.msk [vmem:[%s1534_s25 + $0x8] sm:$0xff] %vm680_vm4, %v723_v1 }
 0xb42   :  { %730 = vsyncpa [#allocation3], 1 }
 0xb43   :  { %731 = vsyncpa [#allocation5], 1 }
 0xb44   :  { %732 = vsyncpa [#allocation8], 1 }
 0xb45   :  { %733 = vsyncpa [#allocation11], 1 }
 0xb46   :  { %734 = vsyncpa [#allocation14], 1 }

// kernel: iibmil_forward.10
= control target key start
LH: loop header
LB: loop body
LE: loop exit
PB: predicated region body
PF: predicated region fallthrough
CT: control target
= control target key end

     0   :  { %v783_v0 = vmov 0.0   ;;  %vm784_vm0 = vmmov 0   ;;  %vm85_vm1 = vcmask 261120   ;;  %vm134_vm2 = vcmask 523264   ;;  %s1138_s1 = inlined_call_operand.vmem [shape: f32[32,64], index: 1, kind: input, shape index: {}]   ;;  %s1139_s0 = inlined_call_operand.vmem [shape: f32[16,32], index: 0, kind: input, shape index: {}]   ;;  %s1140_s2 = inlined_call_operand.vmem [shape: f32[1,64], index: 2, kind: input, shape index: {}]   ;;  %s1141_s5 = inlined_call_operand.vmem [shape: f32[64,128], index: 5, kind: input, shape index: {}]   ;;  %s1142_s3 = inlined_call_operand.vmem [shape: f32[1,64], index: 3, kind: input, shape index: {}]   ;;  %s1143_s4 = inlined_call_operand.vmem [shape: f32[1,64], index: 4, kind: input, shape index: {}]   ;;  %s1144_s6 = inlined_call_operand.vmem [shape: f32[1,128], index: 6, kind: input, shape index: {}]   ;;  %s1145_s9 = inlined_call_operand.vmem [shape: f32[128,64], index: 9, kind: input, shape index: {}]   ;;  %s1146_s7 = inlined_call_operand.vmem [shape: f32[1,128], index: 7, kind: input, shape index: {}]   ;;  %s1147_s8 = inlined_call_operand.vmem [shape: f32[1,128], index: 8, kind: input, shape index: {}]   ;;  %s1148_s10 = inlined_call_operand.vmem [shape: f32[1,64], index: 10, kind: input, shape index: {}]   ;;  %s1149_s13 = inlined_call_operand.vmem [shape: f32[64,64], index: 13, kind: input, shape index: {}]   ;;  %s1150_s11 = inlined_call_operand.vmem [shape: f32[1,64], index: 11, kind: input, shape index: {}]   ;;  %s1151_s12 = inlined_call_operand.vmem [shape: f32[1,64], index: 12, kind: input, shape index: {}]   ;;  %s1152_s14 = inlined_call_operand.vmem [shape: f32[1,64], index: 14, kind: input, shape index: {}]   ;;  %s1153_s17 = inlined_call_operand.vmem [shape: f32[64,32], index: 17, kind: input, shape index: {}]   ;;  %s1154_s15 = inlined_call_operand.vmem [shape: f32[1,64], index: 15, kind: input, shape index: {}]   ;;  %s1155_s16 = inlined_call_operand.vmem [shape: f32[1,64], index: 16, kind: input, shape index: {}]   ;;  %s1156_s18 = inlined_call_operand.vmem [shape: f32[1,32], index: 18, kind: input, shape index: {}]   ;;  %s1157_s19 = inlined_call_operand.vmem [shape: f32[1,32], index: 19, kind: input, shape index: {}]   ;;  %s1158_s20 = inlined_call_operand.vmem [shape: f32[1,32], index: 20, kind: input, shape index: {}]   ;;  %s1159_s21 = inlined_call_operand.vmem [shape: f32[16,32], index: 21, kind: output, shape index: {}]  }
   0x1   :  { %1163 = sst [smem:[#allocation2_spill]] %s1138_s1  ;;  %677 = vmatprep.subr.bf16.mxu0 %v783_v0  ;;  %681 = vmatprep.mubr.msk.bf16.mxu0 %vm784_vm0, %v783_v0  ;;  %v635_v60 = vld [vmem:[%s1144_s6] ss:$0 sm:$0xff] }
   0x2   :  { %1164 = sst [smem:[#allocation3_spill]] %s1139_s0  ;;  %s1169_s26 = sld [smem:[#allocation2_spill]]  ;;  %685 = vmatprep.subr.bf16.mxu1 %v783_v0  ;;  %693 = vmatprep.mubr.msk.bf16.mxu1 %vm784_vm0, %v783_v0 }
   0x3   :  { %1165 = sst [smem:[#allocation4_spill]] %s1140_s2  ;;  %s1170_s22 = sld [smem:[#allocation3_spill]] }
   0x4   :  { %1166 = sst [smem:[#allocation5_spill]] %s1141_s5  ;;  %s1171_s25 = sld [smem:[#allocation4_spill]] }
   0x5   :  { %1167 = sst [smem:[#allocation6_spill]] %s1142_s3  ;;  %s1172_s5 = sld [smem:[#allocation5_spill]] }
   0x6   :  { %1168 = sst [smem:[#allocation7_spill]] %s1143_s4 }
   0x7   :  { %s1174_s30 = sld [smem:[#allocation7_spill]] }
   0x8   :  { %v71_v1 = vld [vmem:[%s1169_s26] sm:$0xff]  ;;  %v72_v2 = vld [vmem:[%s1169_s26 + $0x8] sm:$0xff]  ;;  %v73_v3 = vld [vmem:[%s1169_s26 + $0x10] sm:$0xff] }
   0x9   :  { %v76_v4 = vpack.c.bf16 %v72_v2, %v71_v1  ;;  %v74_v5 = vld [vmem:[%s1169_s26 + $0x18] sm:$0xff]  ;;  %v69_v7 = vld [vmem:[%s1170_s22] sm:$0xff]  ;;  %v70_v8 = vld [vmem:[%s1170_s22 + $0x8] sm:$0xff] }
   0xa   :  { %v77_v6 = vpack.c.bf16 %v74_v5, %v73_v3  ;;  %v75_v9 = vpack.c.bf16 %v70_v8, %v69_v7  ;;  %v631_v10 = vld [vmem:[%s1171_s25] ss:$0 sm:$0xff]  ;;  %v286_v7 = vld [vmem:[%s1145_s9 + $0x8] sm:$0xff]  ;;  %v287_v8 = vld [vmem:[%s1145_s9 + $0x10] sm:$0xff] }
   0xb   :  { %678 = vmatpush3.bf16.msra.mxu0 %v76_v4  ;;  %v178_v31 = vld [vmem:[%s1172_s5] sm:$0xff]  ;;  %v179_v32 = vld [vmem:[%s1172_s5 + $0x8] sm:$0xff]  ;;  %v180_v34 = vld [vmem:[%s1172_s5 + $0x10] sm:$0xff] }
   0xc   :  { %679 = vmatprep.subr.bf16.mxu0 %v783_v0  ;;  %v187_v33 = vpack.c.bf16 %v179_v32, %v178_v31  ;;  %v181_v35 = vld [vmem:[%s1172_s5 + $0x18] sm:$0xff]  ;;  %v182_v37 = vld [vmem:[%s1172_s5 + $0x20] sm:$0xff]  ;;  %v183_v38 = vld [vmem:[%s1172_s5 + $0x28] sm:$0xff] }
   0xd   :  { %v188_v36 = vpack.c.bf16 %v181_v35, %v180_v34  ;;  %v189_v39 = vpack.c.bf16 %v183_v38, %v182_v37  ;;  %v184_v40 = vld [vmem:[%s1172_s5 + $0x30] sm:$0xff]  ;;  %v185_v41 = vld [vmem:[%s1172_s5 + $0x38] sm:$0xff]  ;;  %s1173_s5 = sld [smem:[#allocation6_spill]]  ;;  %v634_v55 = vld [vmem:[%s1174_s30] ss:$0 sm:$0xff] }
   0xe   :  { %686 = vmatpush3.bf16.msra.mxu1 %v187_v33  ;;  %v190_v42 = vpack.c.bf16 %v185_v41, %v184_v40  ;;  %v297_v32 = vld [vmem:[%s1145_s9 + $0x60] sm:$0xff]  ;;  %v298_v33 = vld [vmem:[%s1145_s9 + $0x68] sm:$0xff]  ;;  %v299_v35 = vld [vmem:[%s1145_s9 + $0x70] sm:$0xff] }
   0xf   :  { %680 = vmatpush3.bf16.msra.mxu0 %v77_v6  ;;  %687 = vmatprep.subr.bf16.mxu1 %v783_v0  ;;  %v285_v6 = vld [vmem:[%s1145_s9] sm:$0xff]  ;;  %v308_v34 = vpack.c.bf16 %v298_v33, %v297_v32 }
  0x10   :  { %697 = vmatprep.subr.bf16.mxu0 %v783_v0  ;;  %v640_v32 = vld [vmem:[%s1150_s11] ss:$0 sm:$0xff] }
  0x12   :  { %682 = vmatmul.mubr.msk.bf16.vlgmr.msra.gmra.mrb[0].mxu0 %vm85_vm1, %v75_v9  ;;  %688 = vmatpush3.bf16.msra.mxu1 %v188_v36  ;;  %v302_v9 = vpack.c.bf16 %v286_v7, %v285_v6  ;;  %v300_v36 = vld [vmem:[%s1145_s9 + $0x78] sm:$0xff] }
  0x13   :  { %713 = vmatprep.mubr.msk.bf16.mxu0 %vm784_vm0, %v783_v0  ;;  %689 = vmatprep.subr.bf16.mxu1 %v783_v0  ;;  %v633_v51 = vld [vmem:[%s1173_s5] ss:$0 sm:$0xff]  ;;  %v309_v37 = vpack.c.bf16 %v300_v36, %v299_v35 }
  0x14   :  { %698 = vmatpush3.bf16.msra.mxu0 %v302_v9 }
  0x15   :  { %699 = vmatprep.subr.bf16.mxu0 %v783_v0 }
  0x16   :  { %690 = vmatpush3.bf16.msra.mxu1 %v189_v39 }
  0x17   :  { %691 = vmatprep.subr.bf16.mxu1 %v783_v0 }
  0x1a   :  { %692 = vmatpush3.bf16.msra.mxu1 %v190_v42 }
  0x1b   :  { %717 = vmatprep.subr.bf16.mxu1 %v783_v0 }
  0xe5   :  { %v123_v11 = vpop.f32.mrb[0].mxu0 }
  0xe6   :  { %v124_v12 = vadd.f32 %v631_v10, %v123_v11  ;;  %v683_v13 = vpop.f32.mrb[1].mxu0 }
  0xe7   :  { %v126_v14 = vpop.f32.mrb[2].mxu0 }
  0xe8   :  { %743 = vtanh.f32 %v124_v12  ;;  %v127_v15 = vadd.f32 %v631_v10, %v126_v14  ;;  %v684_v16 = vpop.f32.mrb[3].mxu0  ;;  %v288_v10 = vld [vmem:[%s1145_s9 + $0x18] sm:$0xff] }
  0xe9   :  { %v303_v11 = vpack.c.bf16 %v288_v10, %v287_v8 }
  0xea   :  { %745 = vtanh.f32 %v127_v15 }
  0xeb   :  { %700 = vmatpush3.bf16.msra.mxu0 %v303_v11 }
  0xec   :  { %701 = vmatprep.subr.bf16.mxu0 %v783_v0 }
  0xf2   :  { %v744_v17 = vpop.eup %743 }
  0xf3   :  { %v135_v18 = vsel %vm134_vm2, %v744_v17, 0.0 }
  0xf4   :  { %v746_v19 = vpop.eup %745  ;;  %136 = vadd.xlane.f32.xlu0 %v135_v18 }
  0xf5   :  { %v138_v20 = vsel %vm134_vm2, %v746_v19, 0.0 }
  0xf8   :  { %139 = vadd.xlane.f32.xlu0 %v138_v20  ;;  %v289_v20 = vld [vmem:[%s1145_s9 + $0x20] sm:$0xff] }
 0x181   :  { %v137_v21 = vpop.xlane.xlu0 %136 }
 0x182   :  { %v142_v22 = vmul.f32 0.015625, %v137_v21  ;;  %v290_v21 = vld [vmem:[%s1145_s9 + $0x28] sm:$0xff] }
 0x184   :  { %v144_v23 = vsub.f32 %v744_v17, %v142_v22  ;;  %v304_v22 = vpack.c.bf16 %v290_v21, %v289_v20  ;;  %v409_v20 = vld [vmem:[%s1149_s13 + $0x28] sm:$0xff] }
 0x185   :  { %v140_v24 = vpop.xlane.xlu0 %139 }
 0x186   :  { %v143_v25 = vmul.f32 0.015625, %v140_v24  ;;  %v146_v26 = vmul.f32 %v144_v23, %v144_v23  ;;  %702 = vmatpush3.bf16.msra.mxu0 %v304_v22  ;;  %v292_v24 = vld [vmem:[%s1145_s9 + $0x38] sm:$0xff]  ;;  %v410_v22 = vld [vmem:[%s1149_s13 + $0x30] sm:$0xff] }
 0x187   :  { %703 = vmatprep.subr.bf16.mxu0 %v783_v0 }
 0x188   :  { %v145_v27 = vsub.f32 %v746_v19, %v143_v25  ;;  %v148_v28 = vsel %vm134_vm2, %v146_v26, 0.0  ;;  %v293_v26 = vld [vmem:[%s1145_s9 + $0x40] sm:$0xff] }
 0x189   :  { %149 = vadd.xlane.f32.xlu1 %v148_v28 }
 0x18a   :  { %v147_v29 = vmul.f32 %v145_v27, %v145_v27 }
 0x18c   :  { %v151_v30 = vsel %vm134_vm2, %v147_v29, 0.0  ;;  %v295_v29 = vld [vmem:[%s1145_s9 + $0x50] sm:$0xff] }
 0x18d   :  { %152 = vadd.xlane.f32.xlu1 %v151_v30  ;;  %v296_v30 = vld [vmem:[%s1145_s9 + $0x58] sm:$0xff] }
 0x18e   :  { %v307_v31 = vpack.c.bf16 %v296_v30, %v295_v29 }
 0x216   :  { %v150_v43 = vpop.xlane.xlu1 %149 }
 0x217   :  { %v154_v44 = vmul.f32 0.015625, %v150_v43 }
 0x219   :  { %v156_v45 = vadd.f32 1e-05, %v154_v44 }
 0x21a   :  { %v153_v46 = vpop.xlane.xlu1 %152 }
 0x21b   :  { %747 = vrsqrt.f32 %v156_v45  ;;  %v155_v47 = vmul.f32 0.015625, %v153_v46  ;;  %v637_v45 = vld [vmem:[%s1146_s7] ss:$0 sm:$0xff] }
 0x21d   :  { %v157_v48 = vadd.f32 1e-05, %v155_v47 }
 0x21f   :  { %749 = vrsqrt.f32 %v157_v48 }
 0x225   :  { %v748_v49 = vpop.eup %747 }
 0x226   :  { %v160_v50 = vmul.f32 %v748_v49, %v144_v23  ;;  %v291_v23 = vld [vmem:[%s1145_s9 + $0x30] sm:$0xff] }
 0x227   :  { %v305_v25 = vpack.c.bf16 %v292_v24, %v291_v23  ;;  %v411_v23 = vld [vmem:[%s1149_s13 + $0x38] sm:$0xff] }
 0x228   :  { %v168_v54 = vmul.f32 %v633_v51, %v160_v50  ;;  %v638_v50 = vld [vmem:[%s1147_s8] ss:$0 sm:$0xff]  ;;  %v416_v24 = vpack.c.bf16 %v411_v23, %v410_v22 }
 0x229   :  { %v750_v52 = vpop.eup %749  ;;  %704 = vmatpush3.bf16.msra.mxu0 %v305_v25  ;;  %v645_v23 = vld [vmem:[%s1155_s16] ss:$0 sm:$0xff] }
 0x22a   :  { %v161_v53 = vmul.f32 %v750_v52, %v145_v27  ;;  %v176_v57 = vadd.f32 %v634_v55, %v168_v54  ;;  %705 = vmatprep.subr.bf16.mxu0 %v783_v0  ;;  %v294_v27 = vld [vmem:[%s1145_s9 + $0x48] sm:$0xff] }
 0x22b   :  { %v306_v28 = vpack.c.bf16 %v294_v27, %v293_v26 }
 0x22c   :  { %v169_v56 = vmul.f32 %v633_v51, %v161_v53 }
 0x22d   :  { %706 = vmatpush3.bf16.msra.mxu0 %v306_v28 }
 0x22e   :  { %v177_v58 = vadd.f32 %v634_v55, %v169_v56  ;;  %707 = vmatprep.subr.bf16.mxu0 %v783_v0  ;;  %v639_v55 = vld [vmem:[%s1148_s10] ss:$0 sm:$0xff] }
 0x230   :  { %v186_v59 = vpack.c.bf16 %v177_v58, %v176_v57 }
 0x231   :  { %708 = vmatpush3.bf16.msra.mxu0 %v307_v31 }
 0x232   :  { %694 = vmatmul.mubr.msk.bf16.vlgmr.msra.gmra.mrb[0].mxu1 %vm134_vm2, %v186_v59  ;;  %709 = vmatprep.subr.bf16.mxu0 %v783_v0 }
 0x233   :  { %725 = vmatprep.mubr.msk.bf16.mxu1 %vm784_vm0, %v783_v0 }
 0x235   :  { %710 = vmatpush3.bf16.msra.mxu0 %v308_v34 }
 0x236   :  { %711 = vmatprep.subr.bf16.mxu0 %v783_v0 }
 0x239   :  { %712 = vmatpush3.bf16.msra.mxu0 %v309_v37  ;;  %v641_v37 = vld [vmem:[%s1151_s12] ss:$0 sm:$0xff] }
 0x305   :  { %v235_v61 = vpop.f32.mrb[0].mxu1 }
 0x306   :  { %v236_v62 = vadd.f32 %v635_v60, %v235_v61  ;;  %v695_v63 = vpop.f32.mrb[1].mxu1 }
 0x307   :  { %v238_v1 = vpop.f32.mrb[2].mxu1 }
 0x308   :  { %751 = vtanh.f32 %v236_v62  ;;  %v239_v2 = vadd.f32 %v635_v60, %v238_v1  ;;  %v696_v3 = vpop.f32.mrb[3].mxu1 }
 0x30a   :  { %753 = vtanh.f32 %v239_v2 }
 0x312   :  { %v752_v4 = vpop.eup %751 }
 0x313   :  { %246 = vadd.xlane.f32.xlu0 %v752_v4 }
 0x314   :  { %v754_v5 = vpop.eup %753 }
 0x315   :  { %248 = vadd.xlane.f32.xlu1 %v754_v5 }
 0x3a0   :  { %v247_v12 = vpop.xlane.xlu0 %246 }
 0x3a1   :  { %v251_v13 = vmul.f32 0.0078125, %v247_v12 }
 0x3a2   :  { %v249_v14 = vpop.xlane.xlu1 %248 }
 0x3a3   :  { %v253_v15 = vsub.f32 %v752_v4, %v251_v13  ;;  %v252_v16 = vmul.f32 0.0078125, %v249_v14  ;;  %v404_v13 = vld [vmem:[%s1149_s13] sm:$0xff]  ;;  %v405_v14 = vld [vmem:[%s1149_s13 + $0x8] sm:$0xff] }
 0x3a5   :  { %v254_v17 = vsub.f32 %v754_v5, %v252_v16  ;;  %v255_v18 = vmul.f32 %v253_v15, %v253_v15  ;;  %v406_v16 = vld [vmem:[%s1149_s13 + $0x10] sm:$0xff] }
 0x3a7   :  { %257 = vadd.xlane.f32.xlu0 %v255_v18  ;;  %v256_v19 = vmul.f32 %v254_v17, %v254_v17 }
 0x3a9   :  { %259 = vadd.xlane.f32.xlu1 %v256_v19  ;;  %v408_v19 = vld [vmem:[%s1149_s13 + $0x20] sm:$0xff] }
 0x3aa   :  { %v415_v21 = vpack.c.bf16 %v409_v20, %v408_v19 }
 0x434   :  { %v258_v38 = vpop.xlane.xlu0 %257 }
 0x435   :  { %v261_v39 = vmul.f32 0.0078125, %v258_v38 }
 0x436   :  { %v260_v40 = vpop.xlane.xlu1 %259 }
 0x437   :  { %v263_v41 = vadd.f32 1e-05, %v261_v39  ;;  %v262_v42 = vmul.f32 0.0078125, %v260_v40 }
 0x439   :  { %755 = vrsqrt.f32 %v263_v41  ;;  %v264_v43 = vadd.f32 1e-05, %v262_v42  ;;  %v642_v42 = vld [vmem:[%s1152_s14] ss:$0 sm:$0xff] }
 0x43b   :  { %757 = vrsqrt.f32 %v264_v43 }
 0x443   :  { %v756_v44 = vpop.eup %755 }
 0x444   :  { %v267_v46 = vmul.f32 %v756_v44, %v253_v15  ;;  %v413_v15 = vpack.c.bf16 %v405_v14, %v404_v13 }
 0x445   :  { %v758_v47 = vpop.eup %757 }
 0x446   :  { %v268_v48 = vmul.f32 %v758_v47, %v254_v17  ;;  %v275_v49 = vmul.f32 %v637_v45, %v267_v46  ;;  %718 = vmatpush3.bf16.msra.mxu1 %v413_v15  ;;  %v407_v17 = vld [vmem:[%s1149_s13 + $0x18] sm:$0xff] }
 0x447   :  { %719 = vmatprep.subr.bf16.mxu1 %v783_v0  ;;  %v414_v18 = vpack.c.bf16 %v407_v17, %v406_v16 }
 0x448   :  { %v276_v51 = vmul.f32 %v637_v45, %v268_v48  ;;  %v283_v52 = vadd.f32 %v638_v50, %v275_v49 }
 0x44a   :  { %v284_v53 = vadd.f32 %v638_v50, %v276_v51  ;;  %720 = vmatpush3.bf16.msra.mxu1 %v414_v18 }
 0x44b   :  { %721 = vmatprep.subr.bf16.mxu1 %v783_v0 }
 0x44c   :  { %v301_v54 = vpack.c.bf16 %v284_v53, %v283_v52 }
 0x44e   :  { %714 = vmatmul.mubr.bf16.vlgmr.msra.gmra.mrb[4].mxu0 %v301_v54  ;;  %722 = vmatpush3.bf16.msra.mxu1 %v415_v21 }
 0x44f   :  { %723 = vmatprep.subr.bf16.mxu1 %v783_v0 }
 0x452   :  { %724 = vmatpush3.bf16.msra.mxu1 %v416_v24 }
 0x453   :  { %729 = vmatprep.subr.bf16.mxu1 %v783_v0 }
 0x521   :  { %v351_v56 = vpop.f32.mrb[4].mxu0 }
 0x522   :  { %v352_v57 = vadd.f32 %v639_v55, %v351_v56  ;;  %v715_v58 = vpop.f32.mrb[5].mxu0 }
 0x523   :  { %v354_v59 = vpop.f32.mrb[6].mxu0 }
 0x524   :  { %759 = vtanh.f32 %v352_v57  ;;  %v355_v60 = vadd.f32 %v639_v55, %v354_v59  ;;  %v716_v61 = vpop.f32.mrb[7].mxu0 }
 0x526   :  { %761 = vtanh.f32 %v355_v60 }
 0x52e   :  { %v760_v62 = vpop.eup %759 }
 0x52f   :  { %v362_v63 = vsel %vm134_vm2, %v760_v62, 0.0 }
 0x530   :  { %v762_v1 = vpop.eup %761  ;;  %363 = vadd.xlane.f32.xlu0 %v362_v63  ;;  %v514_v63 = vld [vmem:[%s1153_s17] sm:$0xff] }
 0x531   :  { %v365_v2 = vsel %vm134_vm2, %v762_v1, 0.0 }
 0x532   :  { %366 = vadd.xlane.f32.xlu1 %v365_v2 }
 0x5bd   :  { %v364_v3 = vpop.xlane.xlu0 %363 }
 0x5be   :  { %v368_v4 = vmul.f32 0.015625, %v364_v3  ;;  %v516_v3 = vld [vmem:[%s1153_s17 + $0x10] sm:$0xff] }
 0x5bf   :  { %v367_v5 = vpop.xlane.xlu1 %366 }
 0x5c0   :  { %v370_v6 = vsub.f32 %v760_v62, %v368_v4  ;;  %v369_v7 = vmul.f32 0.015625, %v367_v5  ;;  %v517_v4 = vld [vmem:[%s1153_s17 + $0x18] sm:$0xff] }
 0x5c1   :  { %v524_v5 = vpack.c.bf16 %v517_v4, %v516_v3 }
 0x5c2   :  { %v371_v8 = vsub.f32 %v762_v1, %v369_v7  ;;  %v372_v9 = vmul.f32 %v370_v6, %v370_v6  ;;  %v515_v1 = vld [vmem:[%s1153_s17 + $0x8] sm:$0xff] }
 0x5c3   :  { %v523_v2 = vpack.c.bf16 %v515_v1, %v514_v63  ;;  %v519_v7 = vld [vmem:[%s1153_s17 + $0x28] sm:$0xff] }
 0x5c4   :  { %v374_v10 = vsel %vm134_vm2, %v372_v9, 0.0  ;;  %v373_v11 = vmul.f32 %v371_v8, %v371_v8  ;;  %v520_v9 = vld [vmem:[%s1153_s17 + $0x30] sm:$0xff] }
 0x5c5   :  { %375 = vadd.xlane.f32.xlu0 %v374_v10  ;;  %v521_v10 = vld [vmem:[%s1153_s17 + $0x38] sm:$0xff] }
 0x5c6   :  { %v377_v12 = vsel %vm134_vm2, %v373_v11, 0.0  ;;  %v526_v11 = vpack.c.bf16 %v521_v10, %v520_v9 }
 0x5c7   :  { %378 = vadd.xlane.f32.xlu1 %v377_v12 }
 0x652   :  { %v376_v25 = vpop.xlane.xlu0 %375 }
 0x653   :  { %v380_v26 = vmul.f32 0.015625, %v376_v25 }
 0x654   :  { %v379_v27 = vpop.xlane.xlu1 %378 }
 0x655   :  { %v382_v28 = vadd.f32 1e-05, %v380_v26  ;;  %v381_v29 = vmul.f32 0.015625, %v379_v27 }
 0x657   :  { %763 = vrsqrt.f32 %v382_v28  ;;  %v383_v30 = vadd.f32 1e-05, %v381_v29  ;;  %v646_v28 = vld [vmem:[%s1156_s18] ss:$0 sm:$0xff] }
 0x659   :  { %765 = vrsqrt.f32 %v383_v30 }
 0x661   :  { %v764_v31 = vpop.eup %763 }
 0x662   :  { %v386_v33 = vmul.f32 %v764_v31, %v370_v6  ;;  %v518_v6 = vld [vmem:[%s1153_s17 + $0x20] sm:$0xff] }
 0x663   :  { %v766_v34 = vpop.eup %765 }
 0x664   :  { %v394_v35 = vmul.f32 %v640_v32, %v386_v33  ;;  %v387_v36 = vmul.f32 %v766_v34, %v371_v8  ;;  %v525_v8 = vpack.c.bf16 %v519_v7, %v518_v6 }
 0x666   :  { %v395_v38 = vmul.f32 %v640_v32, %v387_v36  ;;  %v402_v39 = vadd.f32 %v641_v37, %v394_v35 }
 0x668   :  { %v403_v40 = vadd.f32 %v641_v37, %v395_v38 }
 0x66a   :  { %v412_v41 = vpack.c.bf16 %v403_v40, %v402_v39 }
 0x66c   :  { %726 = vmatmul.mubr.msk.bf16.vlgmr.msra.gmra.mrb[4].mxu1 %vm134_vm2, %v412_v41 }
 0x66d   :  { %737 = vmatprep.mubr.msk.bf16.mxu1 %vm784_vm0, %v783_v0  ;;  %730 = vmatpush3.bf16.msra.mxu1 %v523_v2 }
 0x66e   :  { %731 = vmatprep.subr.bf16.mxu1 %v783_v0 }
 0x671   :  { %732 = vmatpush3.bf16.msra.mxu1 %v524_v5 }
 0x672   :  { %733 = vmatprep.subr.bf16.mxu1 %v783_v0 }
 0x675   :  { %734 = vmatpush3.bf16.msra.mxu1 %v525_v8 }
 0x676   :  { %735 = vmatprep.subr.bf16.mxu1 %v783_v0  ;;  %v644_v0 = vld [vmem:[%s1154_s15] ss:$0 sm:$0xff] }
 0x679   :  { %736 = vmatpush3.bf16.msra.mxu1 %v526_v11 }
 0x73f   :  { %v461_v43 = vpop.f32.mrb[4].mxu1 }
 0x740   :  { %v462_v44 = vadd.f32 %v642_v42, %v461_v43  ;;  %v727_v45 = vpop.f32.mrb[5].mxu1 }
 0x741   :  { %v464_v46 = vpop.f32.mrb[6].mxu1 }
 0x742   :  { %767 = vtanh.f32 %v462_v44  ;;  %v465_v47 = vadd.f32 %v642_v42, %v464_v46  ;;  %v728_v48 = vpop.f32.mrb[7].mxu1 }
 0x744   :  { %769 = vtanh.f32 %v465_v47 }
 0x74c   :  { %v768_v49 = vpop.eup %767 }
 0x74d   :  { %v472_v50 = vsel %vm134_vm2, %v768_v49, 0.0 }
 0x74e   :  { %v770_v51 = vpop.eup %769  ;;  %473 = vadd.xlane.f32.xlu0 %v472_v50 }
 0x74f   :  { %v475_v52 = vsel %vm134_vm2, %v770_v51, 0.0 }
 0x750   :  { %476 = vadd.xlane.f32.xlu1 %v475_v52 }
 0x7db   :  { %v474_v53 = vpop.xlane.xlu0 %473 }
 0x7dc   :  { %v478_v54 = vmul.f32 0.015625, %v474_v53 }
 0x7dd   :  { %v477_v55 = vpop.xlane.xlu1 %476 }
 0x7de   :  { %v480_v56 = vsub.f32 %v768_v49, %v478_v54  ;;  %v479_v57 = vmul.f32 0.015625, %v477_v55 }
 0x7e0   :  { %v481_v58 = vsub.f32 %v770_v51, %v479_v57  ;;  %v482_v59 = vmul.f32 %v480_v56, %v480_v56 }
 0x7e2   :  { %v484_v60 = vsel %vm134_vm2, %v482_v59, 0.0  ;;  %v483_v61 = vmul.f32 %v481_v58, %v481_v58  ;;  %v649_v59 = vld [vmem:[%s1158_s20] ss:$0 sm:$0xff] }
 0x7e3   :  { %485 = vadd.xlane.f32.xlu0 %v484_v60 }
 0x7e4   :  { %v487_v62 = vsel %vm134_vm2, %v483_v61, 0.0 }
 0x7e5   :  { %488 = vadd.xlane.f32.xlu1 %v487_v62 }
 0x870   :  { %v486_v12 = vpop.xlane.xlu0 %485 }
 0x871   :  { %v490_v13 = vmul.f32 0.015625, %v486_v12 }
 0x872   :  { %v489_v14 = vpop.xlane.xlu1 %488 }
 0x873   :  { %v492_v15 = vadd.f32 1e-05, %v490_v13  ;;  %v491_v16 = vmul.f32 0.015625, %v489_v14 }
 0x875   :  { %771 = vrsqrt.f32 %v492_v15  ;;  %v493_v17 = vadd.f32 1e-05, %v491_v16 }
 0x877   :  { %773 = vrsqrt.f32 %v493_v17 }
 0x87f   :  { %v772_v18 = vpop.eup %771 }
 0x880   :  { %v496_v19 = vmul.f32 %v772_v18, %v480_v56  ;;  %v648_v56 = vld [vmem:[%s1157_s19] ss:$0 sm:$0xff] }
 0x881   :  { %v774_v20 = vpop.eup %773 }
 0x882   :  { %v504_v21 = vmul.f32 %v644_v0, %v496_v19  ;;  %v497_v22 = vmul.f32 %v774_v20, %v481_v58 }
 0x884   :  { %v505_v24 = vmul.f32 %v644_v0, %v497_v22  ;;  %v512_v25 = vadd.f32 %v645_v23, %v504_v21 }
 0x886   :  { %v513_v26 = vadd.f32 %v645_v23, %v505_v24 }
 0x888   :  { %v522_v27 = vpack.c.bf16 %v513_v26, %v512_v25 }
 0x88a   :  { %738 = vmatmul.mubr.msk.bf16.vlgmr.msra.gmra.mrb[8].mxu1 %vm134_vm2, %v522_v27 }
 0x95d   :  { %v571_v29 = vpop.f32.mrb[8].mxu1 }
 0x95e   :  { %v572_v30 = vadd.f32 %v646_v28, %v571_v29  ;;  %v739_v31 = vpop.f32.mrb[9].mxu1 }
 0x95f   :  { %v574_v32 = vpop.f32.mrb[10].mxu1 }
 0x960   :  { %775 = vtanh.f32 %v572_v30  ;;  %v575_v33 = vadd.f32 %v646_v28, %v574_v32  ;;  %v740_v34 = vpop.f32.mrb[11].mxu1 }
 0x962   :  { %777 = vtanh.f32 %v575_v33 }
 0x96a   :  { %v776_v35 = vpop.eup %775 }
 0x96b   :  { %v582_v36 = vsel %vm85_vm1, %v776_v35, 0.0 }
 0x96c   :  { %v778_v37 = vpop.eup %777  ;;  %583 = vadd.xlane.f32.xlu0 %v582_v36 }
 0x96d   :  { %v585_v38 = vsel %vm85_vm1, %v778_v37, 0.0 }
 0x96e   :  { %586 = vadd.xlane.f32.xlu1 %v585_v38 }
 0x9f9   :  { %v584_v39 = vpop.xlane.xlu0 %583 }
 0x9fa   :  { %v589_v40 = vmul.f32 0.03125, %v584_v39 }
 0x9fb   :  { %v587_v41 = vpop.xlane.xlu1 %586 }
 0x9fc   :  { %v591_v42 = vsub.f32 %v776_v35, %v589_v40  ;;  %v590_v43 = vmul.f32 0.03125, %v587_v41 }
 0x9fe   :  { %v592_v44 = vsub.f32 %v778_v37, %v590_v43  ;;  %v593_v45 = vmul.f32 %v591_v42, %v591_v42 }
 0xa00   :  { %v595_v46 = vsel %vm85_vm1, %v593_v45, 0.0  ;;  %v594_v47 = vmul.f32 %v592_v44, %v592_v44 }
 0xa01   :  { %596 = vadd.xlane.f32.xlu0 %v595_v46 }
 0xa02   :  { %v598_v48 = vsel %vm85_vm1, %v594_v47, 0.0 }
 0xa03   :  { %599 = vadd.xlane.f32.xlu1 %v598_v48 }
 0xa8e   :  { %v597_v49 = vpop.xlane.xlu0 %596 }
 0xa8f   :  { %v601_v50 = vmul.f32 0.03125, %v597_v49 }
 0xa90   :  { %v600_v51 = vpop.xlane.xlu1 %599 }
 0xa91   :  { %v603_v52 = vadd.f32 1e-05, %v601_v50  ;;  %v602_v53 = vmul.f32 0.03125, %v600_v51 }
 0xa93   :  { %779 = vrsqrt.f32 %v603_v52  ;;  %v604_v54 = vadd.f32 1e-05, %v602_v53 }
 0xa95   :  { %781 = vrsqrt.f32 %v604_v54 }
 0xa9d   :  { %v780_v55 = vpop.eup %779 }
 0xa9e   :  { %v607_v57 = vmul.f32 %v780_v55, %v591_v42 }
 0xa9f   :  { %v782_v58 = vpop.eup %781 }
 0xaa0   :  { %v615_v60 = vmul.f32 %v648_v56, %v607_v57  ;;  %v608_v61 = vmul.f32 %v782_v58, %v592_v44 }
 0xaa2   :  { %v623_v62 = vadd.f32 %v649_v59, %v615_v60  ;;  %v616_v63 = vmul.f32 %v648_v56, %v608_v61 }
 0xaa4   :  { %625 = vst.msk [vmem:[%s1159_s21] sm:$0xff] %vm85_vm1, %v623_v62  ;;  %v624_v1 = vadd.f32 %v649_v59, %v616_v63 }
 0xaa6   :  { %626 = vst.msk [vmem:[%s1159_s21 + $0x8] sm:$0xff] %vm85_vm1, %v624_v1 }

// kernel: iibmil_forward.12
= control target key start
LH: loop header
LB: loop body
LE: loop exit
PB: predicated region body
PF: predicated region fallthrough
CT: control target
= control target key end

     0   :  { %vm30_vm0 = vcmask 261120   ;;  %v255_v1 = vmov 0.0   ;;  %vm256_vm1 = vmmov 0   ;;  %vm132_vm2 = vcmask 31744   ;;  %s354_s0 = inlined_call_operand.vmem [shape: f32[16,32], index: 0, kind: input, shape index: {}]   ;;  %s355_s5 = inlined_call_operand.vmem [shape: f32[4,32], index: 5, kind: input, shape index: {}]   ;;  %s356_s3 = inlined_call_operand.vmem [shape: f32[32,4], index: 3, kind: input, shape index: {}]   ;;  %s357_s1 = inlined_call_operand.vmem [shape: f32[1,32], index: 1, kind: input, shape index: {}]   ;;  %s358_s2 = inlined_call_operand.vmem [shape: f32[1,32], index: 2, kind: input, shape index: {}]   ;;  %s359_s4 = inlined_call_operand.vmem [shape: f32[1,4], index: 4, kind: input, shape index: {}]   ;;  %s360_s6 = inlined_call_operand.vmem [shape: f32[16,4], index: 6, kind: output, shape index: {0}]   ;;  %s361_s7 = inlined_call_operand.vmem [shape: f32[16,4], index: 7, kind: output, shape index: {1}]  }
   0x1   :  { %v26_v0 = vld [vmem:[%s354_s0] sm:$0xff]  ;;  %235 = vmatprep.subr.bf16.mxu1 %v255_v1  ;;  %v27_v3 = vld [vmem:[%s354_s0 + $0x8] sm:$0xff]  ;;  %237 = vmatprep.mubr.msk.bf16.mxu1 %vm256_vm1, %v255_v1  ;;  %v76_v22 = vld [vmem:[%s356_s3 + $0x10] sm:$0xff] }
   0x2   :  { %v135_v2 = vld [vmem:[%s355_s5] sm:$0xf]  ;;  %v31_v4 = vsel %vm30_vm0, %v26_v0, 0.0  ;;  %227 = vmatprep.subr.bf16.mxu0 %v255_v1  ;;  %231 = vmatprep.mubr.msk.bf16.mxu0 %vm256_vm1, %v255_v1  ;;  %v34_v7 = vsel %vm30_vm0, %v27_v3, 0.0  ;;  %v136_v8 = vpack.c.bf16 %v27_v3, %v26_v0  ;;  %v75_v20 = vld [vmem:[%s356_s3 + $0x8] sm:$0xff]  ;;  %v77_v23 = vld [vmem:[%s356_s3 + $0x18] sm:$0xff] }
   0x3   :  { %v137_v5 = vpack.c.bf16 %v135_v2, %v135_v2  ;;  %32 = vadd.xlane.f32.xlu0 %v31_v4  ;;  %v74_v19 = vld [vmem:[%s356_s3] sm:$0xff]  ;;  %v80_v24 = vpack.c.bf16 %v77_v23, %v76_v22 }
   0x4   :  { %v79_v21 = vpack.c.bf16 %v75_v20, %v74_v19  ;;  %v217_v39 = vld [vmem:[%s357_s1] ss:$0 sm:$0xff] }
   0x5   :  { %v142_v6 = vsel %vm30_vm0, %v137_v5, 0  ;;  %v218_v43 = vld [vmem:[%s358_s2] ss:$0 sm:$0xff] }
   0x6   :  { %236 = vmatpush3.bf16.xpose.msra.mxu1 %v142_v6  ;;  %228 = vmatpush3.bf16.msra.mxu0 %v79_v21  ;;  %v219_v60 = vld [vmem:[%s359_s4] ss:$0 sm:$0xff] }
   0x7   :  { %35 = vadd.xlane.f32.xlu0 %v34_v7  ;;  %229 = vmatprep.subr.bf16.mxu0 %v255_v1 }
   0xa   :  { %230 = vmatpush3.bf16.msra.mxu0 %v80_v24 }
   0xd   :  { %238 = vmatmul.mubr.msk.bf16.vlgmr.msra.gmra.mrb[0].mxu1 %vm30_vm0, %v136_v8 }
  0x90   :  { %v33_v9 = vpop.xlane.xlu0 %32 }
  0x91   :  { %v38_v10 = vmul.f32 0.03125, %v33_v9 }
  0x93   :  { %v40_v11 = vsub.f32 %v26_v0, %v38_v10 }
  0x94   :  { %v36_v12 = vpop.xlane.xlu0 %35 }
  0x95   :  { %v39_v13 = vmul.f32 0.03125, %v36_v12  ;;  %v42_v14 = vmul.f32 %v40_v11, %v40_v11 }
  0x97   :  { %v41_v15 = vsub.f32 %v27_v3, %v39_v13  ;;  %v44_v16 = vsel %vm30_vm0, %v42_v14, 0.0 }
  0x98   :  { %45 = vadd.xlane.f32.xlu1 %v44_v16 }
  0x99   :  { %v43_v17 = vmul.f32 %v41_v15, %v41_v15 }
  0x9b   :  { %v47_v18 = vsel %vm30_vm0, %v43_v17, 0.0 }
  0x9c   :  { %48 = vadd.xlane.f32.xlu1 %v47_v18 }
  0xe0   :  { %v178_v25 = vpop.f32.mrb[0].mxu1 }
  0xe1   :  { %v239_v26 = vpop.f32.mrb[1].mxu1  ;;  %v185_v27 = vsel %vm132_vm2, %v178_v25, -inf }
  0xe2   :  { %v181_v28 = vpop.f32.mrb[2].mxu1  ;;  %186 = vmax.xlane.f32.xlu0 %v185_v27 }
  0xe3   :  { %v240_v29 = vpop.f32.mrb[3].mxu1  ;;  %v188_v30 = vsel %vm132_vm2, %v181_v28, -inf }
  0xe4   :  { %189 = vmax.xlane.f32.xlu1 %v188_v30 }
 0x125   :  { %v46_v31 = vpop.xlane.xlu1 %45 }
 0x126   :  { %v50_v32 = vmul.f32 0.03125, %v46_v31 }
 0x128   :  { %v52_v33 = vadd.f32 1e-05, %v50_v32 }
 0x129   :  { %v49_v34 = vpop.xlane.xlu1 %48 }
 0x12a   :  { %243 = vrsqrt.f32 %v52_v33  ;;  %v51_v35 = vmul.f32 0.03125, %v49_v34 }
 0x12c   :  { %v53_v36 = vadd.f32 1e-05, %v51_v35 }
 0x12e   :  { %245 = vrsqrt.f32 %v53_v36 }
 0x134   :  { %v244_v37 = vpop.eup %243 }
 0x135   :  { %v56_v38 = vmul.f32 %v244_v37, %v40_v11 }
 0x137   :  { %v64_v42 = vmul.f32 %v217_v39, %v56_v38 }
 0x138   :  { %v246_v40 = vpop.eup %245 }
 0x139   :  { %v57_v41 = vmul.f32 %v246_v40, %v41_v15  ;;  %v72_v45 = vadd.f32 %v218_v43, %v64_v42 }
 0x13b   :  { %v65_v44 = vmul.f32 %v217_v39, %v57_v41 }
 0x13d   :  { %v73_v46 = vadd.f32 %v218_v43, %v65_v44 }
 0x13f   :  { %v78_v47 = vpack.c.bf16 %v73_v46, %v72_v45 }
 0x141   :  { %232 = vmatmul.mubr.msk.bf16.vlgmr.msra.gmra.mrb[0].mxu0 %vm30_vm0, %v78_v47 }
 0x16f   :  { %v187_v48 = vpop.xlane.xlu0 %186 }
 0x170   :  { %v191_v49 = vsub.f32 %v178_v25, %v187_v48 }
 0x171   :  { %v190_v50 = vpop.xlane.xlu1 %189 }
 0x172   :  { %v193_v51 = vmul.f32 1.442695, %v191_v49  ;;  %v192_v52 = vsub.f32 %v181_v28, %v190_v50 }
 0x174   :  { %247 = vpow2.f32 %v193_v51  ;;  %v195_v53 = vmul.f32 1.442695, %v192_v52 }
 0x176   :  { %249 = vpow2.f32 %v195_v53 }
 0x17e   :  { %v248_v54 = vpop.eup %247 }
 0x17f   :  { %v197_v55 = vsel %vm132_vm2, %v248_v54, 0.0 }
 0x180   :  { %v250_v56 = vpop.eup %249  ;;  %198 = vadd.xlane.f32.xlu0 %v197_v55 }
 0x181   :  { %v200_v57 = vsel %vm132_vm2, %v250_v56, 0.0 }
 0x182   :  { %201 = vadd.xlane.f32.xlu1 %v200_v57 }
 0x20d   :  { %v199_v58 = vpop.xlane.xlu0 %198 }
 0x20e   :  { %251 = vrcp.f32 %v199_v58 }
 0x20f   :  { %v202_v59 = vpop.xlane.xlu1 %201 }
 0x210   :  { %253 = vrcp.f32 %v202_v59 }
 0x214   :  { %v125_v61 = vpop.f32.mrb[0].mxu0 }
 0x215   :  { %v126_v62 = vadd.f32 %v219_v60, %v125_v61  ;;  %v233_v63 = vpop.f32.mrb[1].mxu0 }
 0x216   :  { %v128_v0 = vpop.f32.mrb[2].mxu0 }
 0x217   :  { %133 = vst.msk [vmem:[%s360_s6] sm:$0xff] %vm132_vm2, %v126_v62  ;;  %v129_v2 = vadd.f32 %v219_v60, %v128_v0  ;;  %v234_v3 = vpop.f32.mrb[3].mxu0 }
 0x218   :  { %v252_v1 = vpop.eup %251 }
 0x219   :  { %v205_v4 = vmul.f32 %v252_v1, %v248_v54  ;;  %134 = vst.msk [vmem:[%s360_s6 + $0x8] sm:$0xff] %vm132_vm2, %v129_v2 }
 0x21a   :  { %v254_v5 = vpop.eup %253 }
 0x21b   :  { %207 = vst.msk [vmem:[%s361_s7] sm:$0xff] %vm132_vm2, %v205_v4  ;;  %v206_v6 = vmul.f32 %v254_v5, %v250_v56 }
 0x21d   :  { %208 = vst.msk [vmem:[%s361_s7 + $0x8] sm:$0xff] %vm132_vm2, %v206_v6 }

// kernel: iibmil_forward.9
= control target key start
LH: loop header
LB: loop body
LE: loop exit
PB: predicated region body
PF: predicated region fallthrough
CT: control target
= control target key end

     0   :  { %s2731_s21 = smov 0   ;;  %s3951_s0 = inlined_call_operand.vmem [shape: f32[2,8,32], index: 0, kind: input, shape index: {}]   ;;  %s3952_s1 = inlined_call_operand.vmem [shape: f32[2,8,24], index: 1, kind: input, shape index: {}]   ;;  %s3953_s2 = inlined_call_operand.vmem [shape: f32[32,96], index: 2, kind: input, shape index: {}]   ;;  %s3954_s3 = inlined_call_operand.vmem [shape: f32[1,96], index: 3, kind: input, shape index: {}]   ;;  %s3955_s4 = inlined_call_operand.vmem [shape: f32[32,32], index: 4, kind: input, shape index: {}]   ;;  %s3956_s5 = inlined_call_operand.vmem [shape: f32[1,32], index: 5, kind: input, shape index: {}]   ;;  %s3957_s6 = inlined_call_operand.vmem [shape: f32[1,32], index: 6, kind: input, shape index: {}]   ;;  %s3958_s7 = inlined_call_operand.vmem [shape: f32[1,32], index: 7, kind: input, shape index: {}]   ;;  %s3959_s8 = inlined_call_operand.vmem [shape: f32[32,2048], index: 8, kind: input, shape index: {}]   ;;  %s3960_s9 = inlined_call_operand.vmem [shape: f32[1,2048], index: 9, kind: input, shape index: {}]   ;;  %s3961_s10 = inlined_call_operand.vmem [shape: f32[2048,32], index: 10, kind: input, shape index: {}]   ;;  %s3962_s11 = inlined_call_operand.vmem [shape: f32[1,32], index: 11, kind: input, shape index: {}]   ;;  %s3963_s12 = inlined_call_operand.vmem [shape: f32[1,32], index: 12, kind: input, shape index: {}]   ;;  %s3964_s13 = inlined_call_operand.vmem [shape: f32[1,32], index: 13, kind: input, shape index: {}]   ;;  %s3965_s14 = inlined_call_operand.vmem [shape: f32[24,32], index: 14, kind: input, shape index: {}]   ;;  %s3966_s15 = inlined_call_operand.vmem [shape: f32[1,32], index: 15, kind: input, shape index: {}]   ;;  %s3967_s16 = inlined_call_operand.vmem [shape: f32[2,8,32], index: 16, kind: output, shape index: {}]  }
   0x1   :  { %3968 = sst [smem:[#allocation2_spill]] %s3951_s0 }
   0x2 LB: > { %s2326_s22 = sadd.s32 4294967295, %s2635_s21   ;;  %p2330_p0 = scmp.ge.s32.totalorder %s2635_s21, 1  ;;  %s2635_s21 = sphi %s2731_s21, %s26_s21  }
   0x3   : > { %p470_p1 = scmp.lt.s32.totalorder %s2635_s21, 3 }
   0x5   : > { %p471_p2 = pnand %p2330_p0, %p470_p1 }
   0x6   : > { %v536_v0 = vld [vmem:[%s3953_s2] sm:$0xff] (!%p471_p2)  ;;  %v537_v1 = vld [vmem:[%s3953_s2 + $0x8] sm:$0xff] (!%p471_p2)  ;;  %v538_v2 = vld [vmem:[%s3953_s2 + $0x10] sm:$0xff] (!%p471_p2)  ;;  %p522_p3 = scmp.lt.s32.totalorder (!%p471_p2), %s2326_s22, 1  ;;  %v2637_v3 = vmov (!%p471_p2), 0.0   ;;  %vm2638_vm0 = vmmov (!%p471_p2), 0  }
   0x7   : > { %474 = sbr.rel (%p471_p2) target bundleno = 2611 (0xa33), region = 84  ;;  %2552 = vmatprep.subr.bf16.mxu0 (!%p471_p2), %v2637_v3  ;;  %v541_v4 = vpack.c.bf16 (!%p471_p2), %v537_v1, %v536_v0  ;;  %v539_v5 = vld [vmem:[%s3953_s2 + $0x18] sm:$0xff] (!%p471_p2)  ;;  %2556 = vmatprep.mubr.msk.bf16.mxu0 (!%p471_p2), %vm2638_vm0, %v2637_v3  ;;  %s3969_s19 = sld [smem:[#allocation2_spill]] (!%p471_p2)  ;;  %vm550_vm1 = vcmask (!%p471_p2), 261120   ;;  %v2334_v9 = vld [vmem:[%s3954_s3] ss:$0 sm:$0xff] (!%p471_p2) }
   0x8   : > { %2560 = vmatprep.subr.bf16.mxu1 (!%p471_p2), %v2637_v3  ;;  %2562 = vmatprep.mubr.msk.bf16.mxu1 (!%p471_p2), %vm2638_vm0, %v2637_v3  ;;  %v542_v6 = vpack.c.bf16 (!%p471_p2), %v539_v5, %v538_v2  ;;  %s2639_s24 = smov (!%p471_p2), 112   ;;  %s2640_s25 = smov (!%p471_p2), 96   ;;  %vm598_vm2 = vcmask (!%p471_p2), 130048   ;;  %vm646_vm3 = vcmask (!%p471_p2), 64512   ;;  %vm664_vm4 = vcmask (!%p471_p2), 1043456   ;;  %v824_v55 = vld [vmem:[%s3955_s4] sm:$0xff] (!%p471_p2) }
   0x9   : > { %2553 = vmatpush3.bf16.msra.mxu0 (!%p471_p2), %v541_v4  ;;  %s2641_s26 = smov (!%p471_p2), 80   ;;  %s2642_s27 = smov (!%p471_p2), 64   ;;  %v825_v56 = vld [vmem:[%s3955_s4 + $0x8] sm:$0xff] (!%p471_p2)  ;;  %v826_v58 = vld [vmem:[%s3955_s4 + $0x10] sm:$0xff] (!%p471_p2)  ;;  %v827_v59 = vld [vmem:[%s3955_s4 + $0x18] sm:$0xff] (!%p471_p2)  ;;  %vm2211_vm5 = vcmask (!%p471_p2), 195584  }
   0xa   : > { %2554 = vmatprep.subr.bf16.mxu0 (!%p471_p2), %v2637_v3  ;;  %s2643_s28 = smov (!%p471_p2), 48   ;;  %v829_v57 = vpack.c.bf16 (!%p471_p2), %v825_v56, %v824_v55  ;;  %v830_v60 = vpack.c.bf16 (!%p471_p2), %v827_v59, %v826_v58  ;;  %v2343_v59 = vld [vmem:[%s3958_s7] ss:$0 sm:$0xff] (!%p471_p2) }
   0xd   : > { %2555 = vmatpush3.bf16.msra.mxu0 (!%p471_p2), %v542_v6 }
   0xe   : > { %s3971_s22 = smov (!%p522_p3, %s2326_s22), 1  ;;  %2566 = vmatprep.subr.bf16.mxu0 %v2637_v3 }
   0xf   : > { %s2758_s0 = sshll.u32 %s3971_s22, 3 }
  0x10   : > { %s525_s20 = scalar_lea.vmem %s3969_s19, %s2758_s0  ;;  %s529_s19 = scalar_lea.vmem %s3952_s1, %s2758_s0 }
  0x11   : > { %v2764_v7 = vld [vmem:[%s525_s20] sm:$0xff]  ;;  %s533_s17 = scalar_lea.vmem %s3967_s16, %s2758_s0 }
  0x12   : > { %v540_v8 = vpack.c.bf16 %v2764_v7, %v2764_v7 }
  0x14   : > { %2557 = vmatmul.mubr.msk.bf16.vlgmr.msra.gmra.mrb[0].mxu0 %vm550_vm1, %v540_v8 }
  0x15   : > { %2568 = vmatprep.mubr.msk.bf16.mxu0 %vm2638_vm0, %v2637_v3 }
  0xe7   : > { %v588_v10 = vpop.f32.mrb[0].mxu0 }
  0xe8   : > { %v589_v11 = vadd.f32 %v2334_v9, %v588_v10  ;;  %v2558_v12 = vpop.f32.mrb[1].mxu0  ;;  %v2340_v10 = vld [vmem:[%s3956_s5] ss:$0 sm:$0xff] }
  0xe9   : > { %v591_v13 = vpop.f32.mrb[2].mxu0 }
  0xea   : > { %v594_v14 = vpack.c.bf16 %v589_v11, %v589_v11  ;;  %v2559_v15 = vpop.f32.mrb[3].mxu0 }
  0xec   : > { %708 = vrot.lane.b32.xlu1 %v594_v14, %s2639_s24  ;;  %596 = vrot.lane.b32.xlu0 %v594_v14, %s2640_s25  ;;  %s2644_s24 = smov 16  }
  0xf0   : > { %710 = vrot.lane.b32.xlu0 %v594_v14, %s2641_s26 }
 0x15e   : > { %v597_v16 = vpop.permute.xlu0 %596  ;;  %v709_v20 = vpop.permute.xlu1 %708 }
 0x15f   : > { %v603_v17 = vsel %vm598_vm2, %v597_v16, 0 }
 0x160   : > { %2561 = vmatpush3.bf16.xpose.msra.mxu1 %v603_v17 }
 0x161   : > { %2572 = vmatprep.subr.bf16.mxu1 %v2637_v3 }
 0x162   : > { %v711_v18 = vpop.permute.xlu0 %710 }
 0x163   : > { %v716_v19 = vsel %vm598_vm2, %v711_v18, 0 }
 0x167   : > { %2563 = vmatmul.mubr.msk.bf16.vlgmr.msra.gmra.mrb[0].mxu1 %vm598_vm2, %v594_v14 }
 0x168   : > { %2573 = vmatpush3.bf16.xpose.msra.mxu1 %v716_v19  ;;  %2574 = vmatprep.mubr.msk.bf16.mxu1 %vm2638_vm0, %v2637_v3 }
 0x169   : > { %2584 = vmatprep.subr.bf16.mxu1 %v2637_v3 }
 0x16f   : > { %2575 = vmatmul.mubr.msk.bf16.vlgmr.msra.gmra.mrb[4].mxu1 %vm598_vm2, %v709_v20 }
 0x170   : > { %2588 = vmatprep.mubr.msk.bf16.mxu1 %vm2638_vm0, %v2637_v3  ;;  %2585 = vmatpush3.bf16.msra.mxu1 %v829_v57  ;;  %v2342_v57 = vld [vmem:[%s3957_s6] ss:$0 sm:$0xff] }
 0x171   : > { %2586 = vmatprep.subr.bf16.mxu1 %v2637_v3 }
 0x174   : > { %2587 = vmatpush3.bf16.msra.mxu1 %v830_v60  ;;  %v916_v60 = vld [vmem:[%s3959_s8 + $0x20] sm:$0xff] }
 0x23a   : > { %v639_v21 = vpop.f32.mrb[0].mxu1 }
 0x23b   : > { %v645_v22 = vmul.f32 0.25, %v639_v21  ;;  %v2564_v23 = vpop.f32.mrb[1].mxu1 }
 0x23c   : > { %v642_v24 = vpop.f32.mrb[2].mxu1  ;;  %v913_v23 = vld [vmem:[%s3959_s8 + $0x8] sm:$0xff] }
 0x23d   : > { %v2565_v25 = vpop.f32.mrb[3].mxu1  ;;  %v647_v26 = vsel %vm646_vm3, %v645_v22, -inf  ;;  %v929_v24 = vld [vmem:[%s3959_s8 + $0x88] sm:$0xff] }
 0x23e   : > { %648 = vmax.xlane.f32.xlu1 %v647_v26  ;;  %v978_v25 = vpack.c.bf16 %v929_v24, %v913_v23  ;;  %v931_v26 = vld [vmem:[%s3959_s8 + $0x98] sm:$0xff]  ;;  %v920_v23 = vld [vmem:[%s3959_s8 + $0x40] sm:$0xff] }
 0x23f   : > { %v936_v24 = vld [vmem:[%s3959_s8 + $0xc0] sm:$0xff] }
 0x242   : > { %v752_v27 = vpop.f32.mrb[4].mxu1 }
 0x243   : > { %v758_v28 = vmul.f32 0.25, %v752_v27  ;;  %v2576_v29 = vpop.f32.mrb[5].mxu1  ;;  %v912_v27 = vld [vmem:[%s3959_s8] sm:$0xff] }
 0x244   : > { %v755_v30 = vpop.f32.mrb[6].mxu1 }
 0x245   : > { %v2577_v31 = vpop.f32.mrb[7].mxu1  ;;  %v759_v32 = vsel %vm646_vm3, %v758_v28, -inf }
 0x246   : > { %760 = vmax.xlane.f32.xlu0 %v759_v32  ;;  %v914_v31 = vld [vmem:[%s3959_s8 + $0x10] sm:$0xff] }
 0x247   : > { %v930_v32 = vld [vmem:[%s3959_s8 + $0x90] sm:$0xff] }
 0x2cb   : > { %v649_v33 = vpop.xlane.xlu1 %648 }
 0x2cc   : > { %v650_v34 = vsub.f32 %v645_v22, %v649_v33  ;;  %v979_v33 = vpack.c.bf16 %v930_v32, %v914_v31  ;;  %v971_v31 = vld [vmem:[%s3959_s8 + $0x1d8] sm:$0xff]  ;;  %v985_v32 = vpack.c.bf16 %v936_v24, %v920_v23 }
 0x2cd   : > { %v1443_v23 = vld [vmem:[%s3961_s10 + $0x18] sm:$0xff] }
 0x2ce   : > { %v651_v35 = vmul.f32 1.442695, %v650_v34  ;;  %v945_v34 = vld [vmem:[%s3959_s8 + $0x108] sm:$0xff] }
 0x2d0   : > { %2617 = vpow2.f32 %v651_v35  ;;  %v961_v35 = vld [vmem:[%s3959_s8 + $0x188] sm:$0xff] }
 0x2d3   : > { %v761_v36 = vpop.xlane.xlu0 %760 }
 0x2d4   : > { %v762_v37 = vsub.f32 %v758_v28, %v761_v36  ;;  %v928_v28 = vld [vmem:[%s3959_s8 + $0x80] sm:$0xff]  ;;  %v947_v36 = vld [vmem:[%s3959_s8 + $0x118] sm:$0xff] }
 0x2d5   : > { %v977_v30 = vpack.c.bf16 %v928_v28, %v912_v27  ;;  %v938_v27 = vld [vmem:[%s3959_s8 + $0xd0] sm:$0xff]  ;;  %v953_v28 = vld [vmem:[%s3959_s8 + $0x148] sm:$0xff] }
 0x2d6   : > { %v763_v38 = vmul.f32 1.442695, %v762_v37  ;;  %v994_v37 = vpack.c.bf16 %v961_v35, %v945_v34  ;;  %v952_v34 = vld [vmem:[%s3959_s8 + $0x140] sm:$0xff] }
 0x2d7   : > { %v968_v35 = vld [vmem:[%s3959_s8 + $0x1c0] sm:$0xff] }
 0x2d8   : > { %2619 = vpow2.f32 %v763_v38  ;;  %v963_v38 = vld [vmem:[%s3959_s8 + $0x198] sm:$0xff] }
 0x2da   : > { %v2618_v39 = vpop.eup %2617 }
 0x2db   : > { %v653_v40 = vsel %vm646_vm3, %v2618_v39, 0.0 }
 0x2dc   : > { %654 = vadd.xlane.f32.xlu0 %v653_v40  ;;  %v960_v40 = vld [vmem:[%s3959_s8 + $0x180] sm:$0xff] }
 0x2e2   : > { %v2620_v41 = vpop.eup %2619 }
 0x2e3   : > { %v765_v42 = vsel %vm646_vm3, %v2620_v41, 0.0 }
 0x2e4   : > { %766 = vadd.xlane.f32.xlu1 %v765_v42 }
 0x2f2   : > { %659 = vrot.lane.b32.xlu0 %v594_v14, %s2642_s27 }
 0x2f5   : > { %771 = vrot.lane.b32.xlu1 %v594_v14, %s2643_s28 }
 0x369   : > { %v655_v43 = vpop.xlane.xlu0 %654 }
 0x36a   : > { %2621 = vrcp.f32 %v655_v43  ;;  %v946_v43 = vld [vmem:[%s3959_s8 + $0x110] sm:$0xff] }
 0x36d   : > { %v660_v44 = vpop.permute.xlu0 %659 }
 0x36e   : > { %v666_v45 = vsel %vm664_vm4, %v660_v44, 0  ;;  %v962_v44 = vld [vmem:[%s3959_s8 + $0x190] sm:$0xff] }
 0x36f   : > { %2567 = vmatpush3.bf16.msra.mxu0 %v666_v45  ;;  %v995_v45 = vpack.c.bf16 %v962_v44, %v946_v43  ;;  %v943_v43 = vld [vmem:[%s3959_s8 + $0xf8] sm:$0xff]  ;;  %v1001_v44 = vpack.c.bf16 %v968_v35, %v952_v34  ;;  %v1445_v34 = vld [vmem:[%s3961_s10 + $0x28] sm:$0xff] }
 0x370   : > { %2578 = vmatprep.subr.bf16.mxu0 %v2637_v3 }
 0x371   : > { %v767_v46 = vpop.xlane.xlu1 %766 }
 0x372   : > { %2623 = vrcp.f32 %v767_v46  ;;  %v917_v46 = vld [vmem:[%s3959_s8 + $0x28] sm:$0xff] }
 0x374   : > { %v2622_v47 = vpop.eup %2621 }
 0x375   : > { %v657_v48 = vmul.f32 %v2622_v47, %v2618_v39  ;;  %v772_v49 = vpop.permute.xlu1 %771  ;;  %v944_v39 = vld [vmem:[%s3959_s8 + $0x100] sm:$0xff]  ;;  %v933_v47 = vld [vmem:[%s3959_s8 + $0xa8] sm:$0xff] }
 0x376   : > { %v777_v51 = vsel %vm664_vm4, %v772_v49, 0  ;;  %v993_v42 = vpack.c.bf16 %v960_v40, %v944_v39  ;;  %v2645_v49 = vmov 0   ;;  %v970_v39 = vld [vmem:[%s3959_s8 + $0x1d0] sm:$0xff]  ;;  %v925_v40 = vld [vmem:[%s3959_s8 + $0x68] sm:$0xff] }
 0x377   : > { %v658_v50 = vpack.c.bf16 %v657_v48, %v657_v48  ;;  %v919_v48 = vld [vmem:[%s3959_s8 + $0x38] sm:$0xff] }
 0x379   : > { %2569 = vmatmul.mubr.msk.bf16.vlgmr.msra.gmra.mrb[4].mxu0 %vm646_vm3, %v658_v50  ;;  %v982_v50 = vpack.c.bf16 %v933_v47, %v917_v46  ;;  %v924_v46 = vld [vmem:[%s3959_s8 + $0x60] sm:$0xff] }
 0x37a   : > { %2579 = vmatpush3.bf16.msra.mxu0 %v777_v51  ;;  %2580 = vmatprep.mubr.msk.bf16.mxu0 %vm2638_vm0, %v2637_v3  ;;  %v935_v51 = vld [vmem:[%s3959_s8 + $0xb8] sm:$0xff]  ;;  %v940_v47 = vld [vmem:[%s3959_s8 + $0xe0] sm:$0xff] }
 0x37b   : > { %1096 = vmatprep.subr.bf16.mxu0 %v978_v25 }
 0x37c   : > { %v2624_v52 = vpop.eup %2623 }
 0x37d   : > { %v769_v53 = vmul.f32 %v2624_v52, %v2620_v41  ;;  %v996_v41 = vpack.c.bf16 %v963_v38, %v947_v36  ;;  %v984_v52 = vpack.c.bf16 %v935_v51, %v919_v48  ;;  %v954_v38 = vld [vmem:[%s3959_s8 + $0x150] sm:$0xff] }
 0x37e   : > { %v926_v51 = vld [vmem:[%s3959_s8 + $0x70] sm:$0xff] }
 0x37f   : > { %v770_v54 = vpack.c.bf16 %v769_v53, %v769_v53 }
 0x381   : > { %2581 = vmatmul.mubr.msk.bf16.vlgmr.msra.gmra.mrb[8].mxu0 %vm646_vm3, %v770_v54 }
 0x382   : > { %1097 = vmatpush1.bf16.msra.mxu0 %v977_v30  ;;  %1128 = vmatprep.mubr.bf16.mxu0 %v2645_v49  ;;  %v955_v30 = vld [vmem:[%s3959_s8 + $0x158] sm:$0xff] }
 0x383   : > { %1098 = vmatprep.subr.bf16.mxu0 %v994_v37  ;;  %v1004_v37 = vpack.c.bf16 %v971_v31, %v955_v30  ;;  %v1493_v30 = vld [vmem:[%s3961_s10 + $0x1a8] sm:$0xff] }
 0x386   : > { %1099 = vmatpush1.bf16.msra.mxu0 %v993_v42  ;;  %v927_v42 = vld [vmem:[%s3959_s8 + $0x78] sm:$0xff] }
 0x387   : > { %1178 = vmatprep.subr.bf16.mxu0 %v982_v50  ;;  %v992_v50 = vpack.c.bf16 %v943_v43, %v927_v42 }
 0x44c   : > { %v702_v61 = vpop.f32.mrb[4].mxu0 }
 0x44d   : > { %v2570_v62 = vpop.f32.mrb[5].mxu0 }
 0x44e   : > { %v705_v63 = vpop.f32.mrb[6].mxu0 }
 0x44f   : > { %v2571_v0 = vpop.f32.mrb[7].mxu0  ;;  %v918_v63 = vld [vmem:[%s3959_s8 + $0x30] sm:$0xff] }
 0x450   : > { %v934_v0 = vld [vmem:[%s3959_s8 + $0xb0] sm:$0xff] }
 0x454   : > { %v813_v1 = vpop.f32.mrb[8].mxu0 }
 0x455   : > { %820 = vrot.lane.b32.xlu1 %v813_v1, %s2644_s24  ;;  %v2582_v2 = vpop.f32.mrb[9].mxu0  ;;  %v949_v1 = vld [vmem:[%s3959_s8 + $0x128] sm:$0xff] }
 0x456   : > { %v816_v4 = vpop.f32.mrb[10].mxu0  ;;  %v965_v2 = vld [vmem:[%s3959_s8 + $0x1a8] sm:$0xff] }
 0x457   : > { %v2583_v5 = vpop.f32.mrb[11].mxu0  ;;  %v951_v4 = vld [vmem:[%s3959_s8 + $0x138] sm:$0xff] }
 0x458   : > { %v967_v5 = vld [vmem:[%s3959_s8 + $0x1b8] sm:$0xff] }
 0x4c7   : > { %v821_v6 = vpop.permute.xlu1 %820 }
 0x4c8   : > { %v823_v8 = vsel %vm598_vm2, %v702_v61, %v821_v6  ;;  %v932_v61 = vld [vmem:[%s3959_s8 + $0xa0] sm:$0xff] }
 0x4c9   : > { %v828_v9 = vpack.c.bf16 %v823_v8, %v823_v8  ;;  %v981_v8 = vpack.c.bf16 %v932_v61, %v916_v60  ;;  %v972_v60 = vld [vmem:[%s3959_s8 + $0x1e0] sm:$0xff] }
 0x4cb   : > { %2589 = vmatmul.mubr.msk.bf16.vlgmr.msra.gmra.mrb[8].mxu1 %vm550_vm1, %v828_v9  ;;  %v983_v9 = vpack.c.bf16 %v934_v0, %v918_v63  ;;  %v958_v63 = vld [vmem:[%s3959_s8 + $0x170] sm:$0xff] }
 0x4cc   : > { %1169 = vmatprep.mubr.bf16.mxu1 %v2645_v49  ;;  %v974_v0 = vld [vmem:[%s3959_s8 + $0x1f0] sm:$0xff] }
 0x59e   : > { %v875_v11 = vpop.f32.mrb[8].mxu1 }
 0x59f   : > { %v876_v12 = vadd.f32 %v2340_v10, %v875_v11  ;;  %v2590_v13 = vpop.f32.mrb[9].mxu1  ;;  %v948_v10 = vld [vmem:[%s3959_s8 + $0x120] sm:$0xff] }
 0x5a0   : > { %v878_v14 = vpop.f32.mrb[10].mxu1  ;;  %v964_v11 = vld [vmem:[%s3959_s8 + $0x1a0] sm:$0xff]  ;;  %v998_v13 = vpack.c.bf16 %v965_v2, %v949_v1  ;;  %v1457_v2 = vld [vmem:[%s3961_s10 + $0x88] sm:$0xff] }
 0x5a1   : > { %v2591_v15 = vpop.f32.mrb[11].mxu1  ;;  %v881_v16 = vadd.f32 %v876_v12, %v2764_v7  ;;  %v915_v7 = vld [vmem:[%s3959_s8 + $0x18] sm:$0xff]  ;;  %v1000_v14 = vpack.c.bf16 %v967_v5, %v951_v4  ;;  %v1456_v1 = vld [vmem:[%s3961_s10 + $0x80] sm:$0xff]  ;;  %v1489_v5 = vld [vmem:[%s3961_s10 + $0x188] sm:$0xff] }
 0x5a2   : > { %v980_v29 = vpack.c.bf16 %v931_v26, %v915_v7  ;;  %v950_v15 = vld [vmem:[%s3959_s8 + $0x130] sm:$0xff]  ;;  %v1488_v4 = vld [vmem:[%s3961_s10 + $0x180] sm:$0xff] }
 0x5a3   : > { %v884_v17 = vsel %vm550_vm1, %v881_v16, 0.0  ;;  %v922_v26 = vld [vmem:[%s3959_s8 + $0x50] sm:$0xff] }
 0x5a4   : > { %885 = vadd.xlane.f32.xlu0 %v884_v17  ;;  %1137 = vmatprep.subr.bf16.mxu1 %v980_v29  ;;  %v921_v17 = vld [vmem:[%s3959_s8 + $0x48] sm:$0xff] }
 0x5a5   : > { %1138 = vmatpush1.bf16.msra.mxu1 %v979_v33  ;;  %v969_v29 = vld [vmem:[%s3959_s8 + $0x1c8] sm:$0xff]  ;;  %v987_v33 = vpack.c.bf16 %v938_v27, %v922_v26  ;;  %v1475_v26 = vld [vmem:[%s3961_s10 + $0x118] sm:$0xff]  ;;  %v1460_v27 = vld [vmem:[%s3961_s10 + $0xa0] sm:$0xff] }
 0x5a6   : > { %1139 = vmatprep.subr.bf16.mxu1 %v996_v41  ;;  %v1002_v36 = vpack.c.bf16 %v969_v29, %v953_v28  ;;  %v941_v41 = vld [vmem:[%s3959_s8 + $0xe8] sm:$0xff]  ;;  %v1492_v29 = vld [vmem:[%s3961_s10 + $0x1a0] sm:$0xff] }
 0x5a7   : > { %v990_v48 = vpack.c.bf16 %v941_v41, %v925_v40  ;;  %v1461_v28 = vld [vmem:[%s3961_s10 + $0xa8] sm:$0xff]  ;;  %v1494_v40 = vld [vmem:[%s3961_s10 + $0x1b0] sm:$0xff]  ;;  %v1495_v41 = vld [vmem:[%s3961_s10 + $0x1b8] sm:$0xff] }
 0x5a8   : > { %v1722_v35 = vpack.c.bf16 %v1461_v28, %v1460_v27  ;;  %v1470_v27 = vld [vmem:[%s3961_s10 + $0xf0] sm:$0xff]  ;;  %v1471_v28 = vld [vmem:[%s3961_s10 + $0xf8] sm:$0xff] }
 0x5a9   : > { %1140 = vmatpush1.bf16.msra.mxu1 %v995_v45  ;;  %v1003_v45 = vpack.c.bf16 %v970_v39, %v954_v38  ;;  %v1462_v38 = vld [vmem:[%s3961_s10 + $0xb0] sm:$0xff]  ;;  %v1463_v39 = vld [vmem:[%s3961_s10 + $0xb8] sm:$0xff] }
 0x5aa   : > { %1219 = vmatprep.subr.bf16.mxu1 %v984_v52  ;;  %v942_v52 = vld [vmem:[%s3959_s8 + $0xf0] sm:$0xff] }
 0x631   : > { %v886_v18 = vpop.xlane.xlu0 %885 }
 0x632   : > { %v888_v19 = vmul.f32 0.03125, %v886_v18  ;;  %v937_v18 = vld [vmem:[%s3959_s8 + $0xc8] sm:$0xff] }
 0x633   : > { %v986_v7 = vpack.c.bf16 %v937_v18, %v921_v17  ;;  %v1458_v17 = vld [vmem:[%s3961_s10 + $0x90] sm:$0xff]  ;;  %v1459_v18 = vld [vmem:[%s3961_s10 + $0x98] sm:$0xff] }
 0x634   : > { %v889_v20 = vsub.f32 %v881_v16, %v888_v19  ;;  %v966_v16 = vld [vmem:[%s3959_s8 + $0x1b0] sm:$0xff]  ;;  %v923_v19 = vld [vmem:[%s3959_s8 + $0x58] sm:$0xff]  ;;  %v1721_v24 = vpack.c.bf16 %v1459_v18, %v1458_v17  ;;  %v1468_v17 = vld [vmem:[%s3961_s10 + $0xe0] sm:$0xff] }
 0x635   : > { %v1469_v18 = vld [vmem:[%s3961_s10 + $0xe8] sm:$0xff] }
 0x636   : > { %v890_v21 = vmul.f32 %v889_v20, %v889_v20 }
 0x638   : > { %v891_v22 = vsel %vm550_vm1, %v890_v21, 0.0  ;;  %v997_v21 = vpack.c.bf16 %v964_v11, %v948_v10  ;;  %v1440_v10 = vld [vmem:[%s3961_s10] sm:$0xff]  ;;  %v1441_v11 = vld [vmem:[%s3961_s10 + $0x8] sm:$0xff] }
 0x639   : > { %892 = vadd.xlane.f32.xlu1 %v891_v22  ;;  %v999_v22 = vpack.c.bf16 %v966_v16, %v950_v15  ;;  %v1472_v15 = vld [vmem:[%s3961_s10 + $0x100] sm:$0xff]  ;;  %v1473_v16 = vld [vmem:[%s3961_s10 + $0x108] sm:$0xff] }
 0x6c6   : > { %v893_v53 = vpop.xlane.xlu1 %892 }
 0x6c7   : > { %v894_v54 = vmul.f32 0.03125, %v893_v53  ;;  %v957_v53 = vld [vmem:[%s3959_s8 + $0x168] sm:$0xff] }
 0x6c9   : > { %v895_v55 = vadd.f32 1e-05, %v894_v54  ;;  %v973_v54 = vld [vmem:[%s3959_s8 + $0x1e8] sm:$0xff] }
 0x6ca   : > { %v1006_v61 = vpack.c.bf16 %v973_v54, %v957_v53  ;;  %v1496_v53 = vld [vmem:[%s3961_s10 + $0x1c0] sm:$0xff]  ;;  %v1497_v54 = vld [vmem:[%s3961_s10 + $0x1c8] sm:$0xff] }
 0x6cb   : > { %2625 = vrsqrt.f32 %v895_v55  ;;  %v959_v55 = vld [vmem:[%s3959_s8 + $0x178] sm:$0xff] }
 0x6d5   : > { %v2626_v56 = vpop.eup %2625 }
 0x6d6   : > { %v897_v58 = vmul.f32 %v2626_v56, %v889_v20  ;;  %v939_v20 = vld [vmem:[%s3959_s8 + $0xd8] sm:$0xff] }
 0x6d7   : > { %v988_v25 = vpack.c.bf16 %v939_v20, %v923_v19  ;;  %v975_v56 = vld [vmem:[%s3959_s8 + $0x1f8] sm:$0xff]  ;;  %v1490_v19 = vld [vmem:[%s3961_s10 + $0x190] sm:$0xff] }
 0x6d8   : > { %v904_v62 = vmul.f32 %v2342_v57, %v897_v58  ;;  %v989_v57 = vpack.c.bf16 %v940_v47, %v924_v46  ;;  %v991_v58 = vpack.c.bf16 %v942_v52, %v926_v51  ;;  %v1491_v20 = vld [vmem:[%s3961_s10 + $0x198] sm:$0xff]  ;;  %v1723_v46 = vpack.c.bf16 %v1463_v39, %v1462_v38  ;;  %v1464_v51 = vld [vmem:[%s3961_s10 + $0xc0] sm:$0xff]  ;;  %v1465_v52 = vld [vmem:[%s3961_s10 + $0xc8] sm:$0xff] }
 0x6d9   : > { %v1739_v47 = vpack.c.bf16 %v1495_v41, %v1494_v40  ;;  %v1520_v38 = vld [vmem:[%s3961_s10 + $0x280] sm:$0xff]  ;;  %v1521_v39 = vld [vmem:[%s3961_s10 + $0x288] sm:$0xff] }
 0x6da   : > { %v2909_v6 = vadd.f32 %v2343_v59, %v904_v62  ;;  %v956_v59 = vld [vmem:[%s3959_s8 + $0x160] sm:$0xff]  ;;  %v1008_v62 = vpack.c.bf16 %v975_v56, %v959_v55  ;;  %v1752_v41 = vpack.c.bf16 %v1521_v39, %v1520_v38  ;;  %v1525_v39 = vld [vmem:[%s3961_s10 + $0x2a8] sm:$0xff] }
 0x6db   : > { %v1552_v40 = vld [vmem:[%s3961_s10 + $0x380] sm:$0xff] }
 0x6dc   : > { %v2919_v12 = vpack.c.bf16 %v2909_v6, %v2909_v6 }
 0x6de   : > { %2344 = vmatmul.mubr.msk.bf16.vlgmr.msra.gmra.mrb[12].mxu0 %vm550_vm1, %v2919_v12  ;;  %2345 = vmatmul.mubr.msk.bf16.vlgmr.msra.gmra.mrb[12].mxu1 %vm550_vm1, %v2919_v12 }
 0x6df   : > { %1179 = vmatpush1.bf16.msra.mxu0 %v981_v8  ;;  %1220 = vmatpush1.bf16.msra.mxu1 %v983_v9  ;;  %v1005_v8 = vpack.c.bf16 %v972_v60, %v956_v59  ;;  %v1007_v9 = vpack.c.bf16 %v974_v0, %v958_v63  ;;  %v1724_v59 = vpack.c.bf16 %v1465_v52, %v1464_v51  ;;  %v1466_v63 = vld [vmem:[%s3961_s10 + $0xd0] sm:$0xff]  ;;  %v1467_v0 = vld [vmem:[%s3961_s10 + $0xd8] sm:$0xff]  ;;  %v3267_v52 = vld [vmem:[%s3960_s9] sm:$0xff] }
 0x6e0   : > { %1180 = vmatprep.subr.bf16.mxu0 %v998_v13  ;;  %1221 = vmatprep.subr.bf16.mxu1 %v1000_v14  ;;  %v1720_v13 = vpack.c.bf16 %v1457_v2, %v1456_v1  ;;  %v1736_v14 = vpack.c.bf16 %v1489_v5, %v1488_v4  ;;  %v1740_v60 = vpack.c.bf16 %v1497_v54, %v1496_v53  ;;  %v1498_v1 = vld [vmem:[%s3961_s10 + $0x1d0] sm:$0xff]  ;;  %v1499_v2 = vld [vmem:[%s3961_s10 + $0x1d8] sm:$0xff] }
 0x6e1   : > { %1210 = vmatprep.mubr.bf16.mxu0 %v2645_v49  ;;  %1251 = vmatprep.mubr.bf16.mxu1 %v2645_v49 }
 0x6e3   : > { %1181 = vmatpush1.bf16.msra.mxu0 %v997_v21  ;;  %1222 = vmatpush1.bf16.msra.mxu1 %v999_v22  ;;  %v1712_v21 = vpack.c.bf16 %v1441_v11, %v1440_v10  ;;  %v1728_v22 = vpack.c.bf16 %v1473_v16, %v1472_v15  ;;  %v1741_v10 = vpack.c.bf16 %v1499_v2, %v1498_v1  ;;  %v1451_v11 = vld [vmem:[%s3961_s10 + $0x58] sm:$0xff] }
 0x6e4   : > { %1260 = vmatprep.subr.bf16.mxu0 %v986_v7  ;;  %1301 = vmatprep.subr.bf16.mxu1 %v988_v25  ;;  %v1737_v7 = vpack.c.bf16 %v1491_v20, %v1490_v19  ;;  %v1474_v25 = vld [vmem:[%s3961_s10 + $0x110] sm:$0xff]  ;;  %v1500_v19 = vld [vmem:[%s3961_s10 + $0x1e0] sm:$0xff]  ;;  %v1726_v20 = vpack.c.bf16 %v1469_v18, %v1468_v17  ;;  %v1537_v18 = vld [vmem:[%s3961_s10 + $0x308] sm:$0xff] }
 0x6e6   : > { %2346 = vmatmul.mubr.msk.bf16.vlgmr.msra.gmra.mrb[16].mxu0 %vm550_vm1, %v2919_v12  ;;  %2347 = vmatmul.mubr.msk.bf16.vlgmr.msra.gmra.mrb[16].mxu1 %vm550_vm1, %v2919_v12 }
 0x6e7   : > { %1261 = vmatpush1.bf16.msra.mxu0 %v985_v32  ;;  %1302 = vmatpush1.bf16.msra.mxu1 %v987_v33  ;;  %v1729_v32 = vpack.c.bf16 %v1475_v26, %v1474_v25  ;;  %v1444_v33 = vld [vmem:[%s3961_s10 + $0x20] sm:$0xff]  ;;  %v1485_v25 = vld [vmem:[%s3961_s10 + $0x168] sm:$0xff] }
 0x6e8   : > { %1262 = vmatprep.subr.bf16.mxu0 %v1002_v36  ;;  %1303 = vmatprep.subr.bf16.mxu1 %v1004_v37  ;;  %v1738_v36 = vpack.c.bf16 %v1493_v30, %v1492_v29  ;;  %v1477_v37 = vld [vmem:[%s3961_s10 + $0x128] sm:$0xff]  ;;  %v1714_v42 = vpack.c.bf16 %v1445_v34, %v1444_v33  ;;  %v1502_v29 = vld [vmem:[%s3961_s10 + $0x1f0] sm:$0xff]  ;;  %v1727_v30 = vpack.c.bf16 %v1471_v28, %v1470_v27  ;;  %v1455_v33 = vld [vmem:[%s3961_s10 + $0x78] sm:$0xff] }
 0x6e9   : > { %1292 = vmatprep.mubr.bf16.mxu0 %v2645_v49  ;;  %1333 = vmatprep.mubr.bf16.mxu1 %v2645_v49 }
 0x6eb   : > { %1263 = vmatpush1.bf16.msra.mxu0 %v1001_v44  ;;  %1304 = vmatpush1.bf16.msra.mxu1 %v1003_v45  ;;  %v1446_v44 = vld [vmem:[%s3961_s10 + $0x30] sm:$0xff]  ;;  %v1447_v45 = vld [vmem:[%s3961_s10 + $0x38] sm:$0xff] }
 0x6ec   : > { %1342 = vmatprep.subr.bf16.mxu0 %v990_v48  ;;  %1383 = vmatprep.subr.bf16.mxu1 %v992_v50  ;;  %v1478_v48 = vld [vmem:[%s3961_s10 + $0x130] sm:$0xff]  ;;  %v1479_v50 = vld [vmem:[%s3961_s10 + $0x138] sm:$0xff]  ;;  %v1715_v55 = vpack.c.bf16 %v1447_v45, %v1446_v44  ;;  %v1013_v44 = vlaneseq }
 0x6ed   : > { %v1731_v56 = vpack.c.bf16 %v1479_v50, %v1478_v48 }
 0x6ee   : > { %2348 = vmatmul.mubr.msk.bf16.vlgmr.msra.gmra.mrb[20].mxu0 %vm550_vm1, %v2919_v12  ;;  %2349 = vmatmul.mubr.msk.bf16.vlgmr.msra.gmra.mrb[20].mxu1 %vm550_vm1, %v2919_v12  ;;  %v3249_v45 = vshrl.u32 %v1013_v44, 7 }
 0x6ef   : > { %1343 = vmatpush1.bf16.msra.mxu0 %v989_v57  ;;  %1384 = vmatpush1.bf16.msra.mxu1 %v991_v58  ;;  %v1448_v57 = vld [vmem:[%s3961_s10 + $0x40] sm:$0xff]  ;;  %v1449_v58 = vld [vmem:[%s3961_s10 + $0x48] sm:$0xff] }
 0x6f0   : > { %1344 = vmatprep.subr.bf16.mxu0 %v1006_v61  ;;  %1385 = vmatprep.subr.bf16.mxu1 %v1008_v62  ;;  %v1480_v61 = vld [vmem:[%s3961_s10 + $0x140] sm:$0xff]  ;;  %v1481_v62 = vld [vmem:[%s3961_s10 + $0x148] sm:$0xff]  ;;  %v1716_v4 = vpack.c.bf16 %v1449_v58, %v1448_v57  ;;  %v1015_v50 = vsub.s32 0, %v3249_v45  ;;  %v1023_v51 = vsub.s32 2, %v3249_v45  ;;  %v1019_v53 = vsub.s32 1, %v3249_v45 }
 0x6f1   : > { %1374 = vmatprep.mubr.bf16.mxu0 %v2645_v49  ;;  %1415 = vmatprep.mubr.bf16.mxu1 %v2645_v49  ;;  %v1442_v49 = vld [vmem:[%s3961_s10 + $0x10] sm:$0xff]  ;;  %v1732_v5 = vpack.c.bf16 %v1481_v62, %v1480_v61  ;;  %v1027_v54 = vsub.s32 3, %v3249_v45  ;;  %v1035_v1 = vsub.s32 5, %v3249_v45 }
 0x6f2   : > { %v1713_v31 = vpack.c.bf16 %v1443_v23, %v1442_v49  ;;  %v1453_v49 = vld [vmem:[%s3961_s10 + $0x68] sm:$0xff]  ;;  %v1020_v57 = vrot.slane %v3267_v52, %v1019_v53 }
 0x6f3   : > { %1345 = vmatpush1.bf16.msra.mxu0 %v1005_v8  ;;  %1386 = vmatpush1.bf16.msra.mxu1 %v1007_v9  ;;  %v1450_v8 = vld [vmem:[%s3961_s10 + $0x50] sm:$0xff]  ;;  %v1725_v9 = vpack.c.bf16 %v1467_v0, %v1466_v63  ;;  %v1028_v58 = vrot.slane %v3267_v52, %v1027_v54 }
 0x6f4   : > { %2373 = vmatprep.subr.bf16.mxu0 %v1720_v13  ;;  %2395 = vmatprep.subr.bf16.mxu1 %v1736_v14  ;;  %v1482_v13 = vld [vmem:[%s3961_s10 + $0x150] sm:$0xff]  ;;  %v1483_v14 = vld [vmem:[%s3961_s10 + $0x158] sm:$0xff]  ;;  %v1717_v15 = vpack.c.bf16 %v1451_v11, %v1450_v8  ;;  %v1505_v11 = vld [vmem:[%s3961_s10 + $0x208] sm:$0xff] }
 0x6f5   : > { %v1733_v16 = vpack.c.bf16 %v1483_v14, %v1482_v13  ;;  %v1536_v13 = vld [vmem:[%s3961_s10 + $0x300] sm:$0xff] }
 0x6f6   : > { %2350 = vmatmul.mubr.msk.bf16.vlgmr.msra.gmra.mrb[24].mxu0 %vm550_vm1, %v2919_v12  ;;  %2351 = vmatmul.mubr.msk.bf16.vlgmr.msra.gmra.mrb[24].mxu1 %vm550_vm1, %v2919_v12  ;;  %v1476_v12 = vld [vmem:[%s3961_s10 + $0x120] sm:$0xff]  ;;  %v1760_v28 = vpack.c.bf16 %v1537_v18, %v1536_v13  ;;  %v1527_v13 = vld [vmem:[%s3961_s10 + $0x2b8] sm:$0xff] }
 0x6f7   : > { %2374 = vmatpush3.bf16.msra.mxu0 %v1712_v21  ;;  %2396 = vmatpush3.bf16.msra.mxu1 %v1728_v22  ;;  %v1730_v43 = vpack.c.bf16 %v1477_v37, %v1476_v12  ;;  %v1501_v21 = vld [vmem:[%s3961_s10 + $0x1e8] sm:$0xff]  ;;  %v1452_v22 = vld [vmem:[%s3961_s10 + $0x60] sm:$0xff]  ;;  %v1487_v12 = vld [vmem:[%s3961_s10 + $0x178] sm:$0xff] }
 0x6f8   : > { %2375 = vmatprep.subr.bf16.mxu0 %v1721_v24  ;;  %2397 = vmatprep.subr.bf16.mxu1 %v1737_v7  ;;  %v1742_v23 = vpack.c.bf16 %v1501_v21, %v1500_v19  ;;  %v1718_v24 = vpack.c.bf16 %v1453_v49, %v1452_v22  ;;  %v1484_v7 = vld [vmem:[%s3961_s10 + $0x160] sm:$0xff]  ;;  %v1522_v19 = vld [vmem:[%s3961_s10 + $0x290] sm:$0xff]  ;;  %v1523_v22 = vld [vmem:[%s3961_s10 + $0x298] sm:$0xff] }
 0x6f9   : > { %v1734_v26 = vpack.c.bf16 %v1485_v25, %v1484_v7  ;;  %v1554_v49 = vld [vmem:[%s3961_s10 + $0x390] sm:$0xff] }
 0x6fb   : > { %2376 = vmatpush3.bf16.msra.mxu0 %v1713_v31  ;;  %2398 = vmatpush3.bf16.msra.mxu1 %v1729_v32  ;;  %v1503_v31 = vld [vmem:[%s3961_s10 + $0x1f8] sm:$0xff]  ;;  %v1454_v32 = vld [vmem:[%s3961_s10 + $0x70] sm:$0xff] }
 0x6fc   : > { %2377 = vmatprep.subr.bf16.mxu0 %v1722_v35  ;;  %2399 = vmatprep.subr.bf16.mxu1 %v1738_v36  ;;  %v1743_v34 = vpack.c.bf16 %v1503_v31, %v1502_v29  ;;  %v1719_v35 = vpack.c.bf16 %v1455_v33, %v1454_v32  ;;  %v1486_v36 = vld [vmem:[%s3961_s10 + $0x170] sm:$0xff]  ;;  %v1753_v33 = vpack.c.bf16 %v1523_v22, %v1522_v19 }
 0x6fd   : > { %v1735_v37 = vpack.c.bf16 %v1487_v12, %v1486_v36  ;;  %v1506_v29 = vld [vmem:[%s3961_s10 + $0x210] sm:$0xff]  ;;  %v1539_v36 = vld [vmem:[%s3961_s10 + $0x318] sm:$0xff]  ;;  %v1524_v12 = vld [vmem:[%s3961_s10 + $0x2a0] sm:$0xff] }
 0x6fe   : > { %v1510_v22 = vld [vmem:[%s3961_s10 + $0x230] sm:$0xff] }
 0x6ff   : > { %2378 = vmatpush3.bf16.msra.mxu0 %v1714_v42  ;;  %2400 = vmatpush3.bf16.msra.mxu1 %v1730_v43  ;;  %v1553_v42 = vld [vmem:[%s3961_s10 + $0x388] sm:$0xff] }
 0x700   : > { %2379 = vmatprep.subr.bf16.mxu0 %v1723_v46  ;;  %2401 = vmatprep.subr.bf16.mxu1 %v1739_v47  ;;  %v1768_v43 = vpack.c.bf16 %v1553_v42, %v1552_v40  ;;  %v1039_v46 = vsub.s32 6, %v3249_v45  ;;  %v3255_v47 = vld [vmem:[%s3960_s9 + $0x8] sm:$0xff]  ;;  %v1556_v40 = vld [vmem:[%s3961_s10 + $0x3a0] sm:$0xff] }
 0x702   : > { %v3260_v48 = vrot.slane %v3255_v47, %v1039_v46 }
 0x703   : > { %2380 = vmatpush3.bf16.msra.mxu0 %v1715_v55  ;;  %2402 = vmatpush3.bf16.msra.mxu1 %v1731_v56  ;;  %v1016_v55 = vrot.slane %v3267_v52, %v1015_v50  ;;  %v1024_v56 = vrot.slane %v3267_v52, %v1023_v51 }
 0x704   : > { %2381 = vmatprep.subr.bf16.mxu0 %v1724_v59  ;;  %2403 = vmatprep.subr.bf16.mxu1 %v1740_v60 }
 0x707   : > { %2382 = vmatpush3.bf16.msra.mxu0 %v1716_v4  ;;  %2404 = vmatpush3.bf16.msra.mxu1 %v1732_v5 }
 0x708   : > { %2383 = vmatprep.subr.bf16.mxu0 %v1725_v9  ;;  %2405 = vmatprep.subr.bf16.mxu1 %v1741_v10  ;;  %v1043_v9 = vsub.s32 7, %v3249_v45  ;;  %v1504_v10 = vld [vmem:[%s3961_s10 + $0x200] sm:$0xff] }
 0x709   : > { %v1744_v7 = vpack.c.bf16 %v1505_v11, %v1504_v10 }
 0x70a   : > { %v1044_v27 = vrot.slane %v3267_v52, %v1043_v9 }
 0x70b   : > { %2384 = vmatpush3.bf16.msra.mxu0 %v1717_v15  ;;  %2406 = vmatpush3.bf16.msra.mxu1 %v1733_v16 }
 0x70c   : > { %2385 = vmatprep.subr.bf16.mxu0 %v1726_v20  ;;  %2407 = vmatprep.subr.bf16.mxu1 %v1742_v23  ;;  %v1555_v23 = vld [vmem:[%s3961_s10 + $0x398] sm:$0xff] }
 0x70f   : > { %2386 = vmatpush3.bf16.msra.mxu0 %v1718_v24  ;;  %2408 = vmatpush3.bf16.msra.mxu1 %v1734_v26  ;;  %v1036_v24 = vrot.slane %v3267_v52, %v1035_v1 }
 0x710   : > { %2387 = vmatprep.subr.bf16.mxu0 %v1727_v30  ;;  %2409 = vmatprep.subr.bf16.mxu1 %v1743_v34  ;;  %v1507_v30 = vld [vmem:[%s3961_s10 + $0x218] sm:$0xff]  ;;  %v1769_v34 = vpack.c.bf16 %v1555_v23, %v1554_v49 }
 0x711   : > { %v1745_v44 = vpack.c.bf16 %v1507_v30, %v1506_v29  ;;  %v1511_v49 = vld [vmem:[%s3961_s10 + $0x238] sm:$0xff]  ;;  %v1561_v29 = vld [vmem:[%s3961_s10 + $0x3c8] sm:$0xff] }
 0x713   : > { %2388 = vmatpush3.bf16.msra.mxu0 %v1719_v35  ;;  %2410 = vmatpush3.bf16.msra.mxu1 %v1735_v37  ;;  %v1538_v35 = vld [vmem:[%s3961_s10 + $0x310] sm:$0xff] }
 0x714   : > { %2417 = vmatprep.subr.bf16.mxu0 %v1752_v41  ;;  %2439 = vmatprep.subr.bf16.mxu1 %v1768_v43  ;;  %v1557_v41 = vld [vmem:[%s3961_s10 + $0x3a8] sm:$0xff] }
 0x7b1   : > { %v1130_v59 = vpop.f32.mrb[12].mxu0  ;;  %v1171_v60 = vpop.f32.mrb[12].mxu1 }
 0x7b2   : > { %v1131_v61 = vadd.f32 %v1130_v59, %v1016_v55  ;;  %v1172_v62 = vadd.f32 %v1171_v60, %v1024_v56  ;;  %v1132_v63 = vpop.f32.mrb[13].mxu0  ;;  %v1173_v0 = vpop.f32.mrb[13].mxu1  ;;  %v1761_v59 = vpack.c.bf16 %v1539_v36, %v1538_v35  ;;  %v1508_v60 = vld [vmem:[%s3961_s10 + $0x220] sm:$0xff]  ;;  %v1747_v36 = vpack.c.bf16 %v1511_v49, %v1510_v22 }
 0x7b3   : > { %v1133_v2 = vadd.f32 %v1132_v63, %v1020_v57  ;;  %v1174_v4 = vadd.f32 %v1173_v0, %v1028_v58  ;;  %v1134_v5 = vpop.f32.mrb[14].mxu0  ;;  %v1175_v8 = vpop.f32.mrb[14].mxu1  ;;  %v1754_v0 = vpack.c.bf16 %v1525_v39, %v1524_v12  ;;  %v1512_v39 = vld [vmem:[%s3961_s10 + $0x240] sm:$0xff] }
 0x7b4   : > { %v1424_v14 = vmax.f32 %v1131_v61, 0.0  ;;  %v1426_v15 = vmax.f32 %v1172_v62, 0.0  ;;  %v1135_v16 = vpop.f32.mrb[15].mxu0  ;;  %v1176_v17 = vpop.f32.mrb[15].mxu1  ;;  %v1509_v61 = vld [vmem:[%s3961_s10 + $0x228] sm:$0xff]  ;;  %v1526_v8 = vld [vmem:[%s3961_s10 + $0x2b0] sm:$0xff] }
 0x7b5   : > { %v1425_v20 = vmax.f32 %v1133_v2, 0.0  ;;  %v1427_v21 = vmax.f32 %v1174_v4, 0.0  ;;  %v1770_v2 = vpack.c.bf16 %v1557_v41, %v1556_v40  ;;  %v1540_v4 = vld [vmem:[%s3961_s10 + $0x320] sm:$0xff]  ;;  %v1541_v5 = vld [vmem:[%s3961_s10 + $0x328] sm:$0xff]  ;;  %v1048_v16 = vrot.slane %v3255_v47, %v1015_v50 }
 0x7b6   : > { %v1696_v31 = vpack.c.bf16 %v1424_v14, %v1424_v14  ;;  %v1698_v32 = vpack.c.bf16 %v1426_v15, %v1426_v15  ;;  %v1558_v14 = vld [vmem:[%s3961_s10 + $0x3b0] sm:$0xff]  ;;  %v1559_v15 = vld [vmem:[%s3961_s10 + $0x3b8] sm:$0xff]  ;;  %v1056_v17 = vrot.slane %v3255_v47, %v1023_v51  ;;  %v1746_v18 = vpack.c.bf16 %v1509_v61, %v1508_v60  ;;  %v1513_v40 = vld [vmem:[%s3961_s10 + $0x248] sm:$0xff] }
 0x7b7   : > { %v1697_v25 = vpack.c.bf16 %v1425_v20, %v1425_v20  ;;  %v1699_v26 = vpack.c.bf16 %v1427_v21, %v1427_v21  ;;  %v1762_v21 = vpack.c.bf16 %v1541_v5, %v1540_v4  ;;  %v1755_v50 = vpack.c.bf16 %v1527_v13, %v1526_v8  ;;  %v1542_v51 = vld [vmem:[%s3961_s10 + $0x330] sm:$0xff]  ;;  %v1563_v61 = vld [vmem:[%s3961_s10 + $0x3d8] sm:$0xff]  ;;  %v1532_v13 = vld [vmem:[%s3961_s10 + $0x2e0] sm:$0xff] }
 0x7b8   : > { %v1771_v23 = vpack.c.bf16 %v1559_v15, %v1558_v14  ;;  %v1031_v41 = vsub.s32 4, %v3249_v45  ;;  %v1562_v60 = vld [vmem:[%s3961_s10 + $0x3d0] sm:$0xff]  ;;  %v1515_v4 = vld [vmem:[%s3961_s10 + $0x258] sm:$0xff] }
 0x7b9   : > { %v3330_v37 = vpop.f32.mrb[16].mxu0  ;;  %v3332_v38 = vpop.f32.mrb[16].mxu1  ;;  %1879 = vmatprep.mubr.bf16.mxu0 %v1697_v25  ;;  %1919 = vmatprep.mubr.bf16.mxu1 %v1699_v26  ;;  %v1773_v8 = vpack.c.bf16 %v1563_v61, %v1562_v60  ;;  %v1617_v61 = vld [vmem:[%s3961_s10 + $0x588] sm:$0xff]  ;;  %v1614_v45 = vld [vmem:[%s3961_s10 + $0x570] sm:$0xff] }
 0x7ba   : > { %v1214_v42 = vpop.f32.mrb[17].mxu0  ;;  %v1255_v43 = vpop.f32.mrb[17].mxu1  ;;  %1880 = vmatmul.mubr.bf16.vlgmr.msra.gmra.mrb[28].mxu0 %v1696_v31  ;;  %1920 = vmatmul.mubr.bf16.vlgmr.msra.gmra.mrb[28].mxu1 %v1698_v32  ;;  %v1032_v49 = vrot.slane %v3267_v52, %v1031_v41 }
 0x7bb   : > { %v1215_v55 = vadd.f32 %v1214_v42, %v1036_v24  ;;  %v1256_v56 = vadd.f32 %v1255_v43, %v1044_v27  ;;  %2418 = vmatpush3.bf16.msra.mxu0 %v1744_v7  ;;  %2440 = vmatpush3.bf16.msra.mxu1 %v1760_v28  ;;  %v1216_v57 = vpop.f32.mrb[18].mxu0  ;;  %v1257_v58 = vpop.f32.mrb[18].mxu1  ;;  %v1543_v24 = vld [vmem:[%s3961_s10 + $0x338] sm:$0xff]  ;;  %v1528_v7 = vld [vmem:[%s3961_s10 + $0x2c0] sm:$0xff]  ;;  %v1529_v27 = vld [vmem:[%s3961_s10 + $0x2c8] sm:$0xff] }
 0x7bc   : > { %v1217_v62 = vpop.f32.mrb[19].mxu0  ;;  %v1258_v63 = vpop.f32.mrb[19].mxu1  ;;  %2419 = vmatprep.subr.bf16.mxu0 %v1753_v33  ;;  %2441 = vmatprep.subr.bf16.mxu1 %v1769_v34  ;;  %v1560_v28 = vld [vmem:[%s3961_s10 + $0x3c0] sm:$0xff]  ;;  %v1763_v12 = vpack.c.bf16 %v1543_v24, %v1542_v51  ;;  %v1545_v57 = vld [vmem:[%s3961_s10 + $0x348] sm:$0xff]  ;;  %v1530_v58 = vld [vmem:[%s3961_s10 + $0x2d0] sm:$0xff] }
 0x7bd   : > { %v1429_v10 = vmax.f32 %v1215_v55, 0.0  ;;  %v1431_v11 = vmax.f32 %v1256_v56, 0.0  ;;  %v1772_v55 = vpack.c.bf16 %v1561_v29, %v1560_v28  ;;  %v1544_v56 = vld [vmem:[%s3961_s10 + $0x340] sm:$0xff]  ;;  %v1064_v62 = vrot.slane %v3255_v47, %v1031_v41 }
 0x7be   : > { %v1748_v63 = vpack.c.bf16 %v1513_v40, %v1512_v39  ;;  %v1567_v39 = vld [vmem:[%s3961_s10 + $0x3f8] sm:$0xff]  ;;  %v1060_v40 = vrot.slane %v3255_v47, %v1027_v54 }
 0x7bf   : > { %v1701_v19 = vpack.c.bf16 %v1429_v10, %v1429_v10  ;;  %v1703_v20 = vpack.c.bf16 %v1431_v11, %v1431_v11  ;;  %2420 = vmatpush3.bf16.msra.mxu0 %v1745_v44  ;;  %2442 = vmatpush3.bf16.msra.mxu1 %v1761_v59  ;;  %v1756_v44 = vpack.c.bf16 %v1529_v27, %v1528_v7  ;;  %v1531_v59 = vld [vmem:[%s3961_s10 + $0x2d8] sm:$0xff]  ;;  %v1546_v10 = vld [vmem:[%s3961_s10 + $0x350] sm:$0xff]  ;;  %v1516_v7 = vld [vmem:[%s3961_s10 + $0x260] sm:$0xff] }
 0x7c0   : > { %2421 = vmatprep.subr.bf16.mxu0 %v1754_v0  ;;  %2443 = vmatprep.subr.bf16.mxu1 %v1770_v2  ;;  %v1764_v0 = vpack.c.bf16 %v1545_v57, %v1544_v56  ;;  %v1514_v2 = vld [vmem:[%s3961_s10 + $0x250] sm:$0xff]  ;;  %v1757_v5 = vpack.c.bf16 %v1531_v59, %v1530_v58  ;;  %v1547_v11 = vld [vmem:[%s3961_s10 + $0x358] sm:$0xff]  ;;  %v1584_v59 = vld [vmem:[%s3961_s10 + $0x480] sm:$0xff] }
 0x7c1   : > { %v1294_v25 = vpop.f32.mrb[20].mxu0  ;;  %v1335_v26 = vpop.f32.mrb[20].mxu1  ;;  %1959 = vmatprep.mubr.bf16.mxu0 %v1701_v19  ;;  %1999 = vmatprep.mubr.bf16.mxu1 %v1703_v20  ;;  %v1749_v51 = vpack.c.bf16 %v1515_v4, %v1514_v2  ;;  %v1765_v24 = vpack.c.bf16 %v1547_v11, %v1546_v10  ;;  %v1550_v57 = vld [vmem:[%s3961_s10 + $0x370] sm:$0xff]  ;;  %v1551_v58 = vld [vmem:[%s3961_s10 + $0x378] sm:$0xff]  ;;  %v1569_v10 = vld [vmem:[%s3961_s10 + $0x408] sm:$0xff] }
 0x7c2   : > { %v3397_v30 = vadd.f32 %v1294_v25, %v1048_v16  ;;  %v3399_v31 = vadd.f32 %v1335_v26, %v1056_v17  ;;  %v3401_v32 = vpop.f32.mrb[21].mxu0  ;;  %v3403_v33 = vpop.f32.mrb[21].mxu1  ;;  %v1533_v16 = vld [vmem:[%s3961_s10 + $0x2e8] sm:$0xff]  ;;  %v1564_v17 = vld [vmem:[%s3961_s10 + $0x3e0] sm:$0xff]  ;;  %v1040_v26 = vrot.slane %v3267_v52, %v1039_v46  ;;  %v1052_v46 = vrot.slane %v3255_v47, %v1019_v53  ;;  %v1566_v52 = vld [vmem:[%s3961_s10 + $0x3f0] sm:$0xff] }
 0x7c3   : > { %2422 = vmatpush3.bf16.msra.mxu0 %v1746_v18  ;;  %2444 = vmatpush3.bf16.msra.mxu1 %v1762_v21  ;;  %v1298_v34 = vpop.f32.mrb[22].mxu0  ;;  %v1339_v35 = vpop.f32.mrb[22].mxu1  ;;  %v1565_v18 = vld [vmem:[%s3961_s10 + $0x3e8] sm:$0xff]  ;;  %v1548_v25 = vld [vmem:[%s3961_s10 + $0x360] sm:$0xff]  ;;  %v1758_v29 = vpack.c.bf16 %v1533_v16, %v1532_v13  ;;  %v1518_v53 = vld [vmem:[%s3961_s10 + $0x270] sm:$0xff]  ;;  %v1775_v54 = vpack.c.bf16 %v1567_v39, %v1566_v52 }
 0x7c4   : > { %v1299_v42 = vpop.f32.mrb[23].mxu0  ;;  %v1340_v43 = vpop.f32.mrb[23].mxu1  ;;  %2423 = vmatprep.subr.bf16.mxu0 %v1755_v50  ;;  %2445 = vmatprep.subr.bf16.mxu1 %v1771_v23  ;;  %v1774_v34 = vpack.c.bf16 %v1565_v18, %v1564_v17  ;;  %v1549_v35 = vld [vmem:[%s3961_s10 + $0x368] sm:$0xff]  ;;  %v1254_v56 = vadd.f32 %v3332_v38, %v1040_v26  ;;  %v1297_v60 = vadd.f32 %v3401_v32, %v1052_v46  ;;  %v1616_v38 = vld [vmem:[%s3961_s10 + $0x580] sm:$0xff]  ;;  %v1587_v16 = vld [vmem:[%s3961_s10 + $0x498] sm:$0xff] }
 0x7c5   : > { %v1766_v42 = vpack.c.bf16 %v1549_v35, %v1548_v25  ;;  %v1601_v13 = vld [vmem:[%s3961_s10 + $0x508] sm:$0xff]  ;;  %v1618_v17 = vld [vmem:[%s3961_s10 + $0x590] sm:$0xff]  ;;  %v1619_v18 = vld [vmem:[%s3961_s10 + $0x598] sm:$0xff] }
 0x7c6   : > { %v1430_v32 = vmax.f32 %v1254_v56, 0.0  ;;  %v1433_v11 = vmax.f32 %v1297_v60, 0.0  ;;  %v1622_v56 = vld [vmem:[%s3961_s10 + $0x5b0] sm:$0xff] }
 0x7c7   : > { %2424 = vmatpush3.bf16.msra.mxu0 %v1747_v36  ;;  %2446 = vmatpush3.bf16.msra.mxu1 %v1763_v12  ;;  %v1534_v36 = vld [vmem:[%s3961_s10 + $0x2f0] sm:$0xff]  ;;  %v1535_v12 = vld [vmem:[%s3961_s10 + $0x2f8] sm:$0xff] }
 0x7c8   : > { %2425 = vmatprep.subr.bf16.mxu0 %v1756_v44  ;;  %2447 = vmatprep.subr.bf16.mxu1 %v1772_v55  ;;  %v1759_v43 = vpack.c.bf16 %v1535_v12, %v1534_v36  ;;  %v1519_v44 = vld [vmem:[%s3961_s10 + $0x278] sm:$0xff]  ;;  %v1213_v55 = vadd.f32 %v3330_v37, %v1032_v49  ;;  %v1585_v37 = vld [vmem:[%s3961_s10 + $0x488] sm:$0xff]  ;;  %v1705_v25 = vpack.c.bf16 %v1433_v11, %v1433_v11  ;;  %v1620_v36 = vld [vmem:[%s3961_s10 + $0x5a0] sm:$0xff] }
 0x7c9   : > { %v1376_v14 = vpop.f32.mrb[24].mxu0  ;;  %v1417_v15 = vpop.f32.mrb[24].mxu1  ;;  %v1784_v4 = vpack.c.bf16 %v1585_v37, %v1584_v59  ;;  %v1621_v12 = vld [vmem:[%s3961_s10 + $0x5a8] sm:$0xff]  ;;  %v1574_v60 = vld [vmem:[%s3961_s10 + $0x430] sm:$0xff]  ;;  %v1575_v37 = vld [vmem:[%s3961_s10 + $0x438] sm:$0xff] }
 0x7ca   : > { %v3455_v19 = vadd.f32 %v1376_v14, %v1064_v62  ;;  %v3458_v20 = vadd.f32 %v1417_v15, %v3260_v48  ;;  %v3460_v21 = vpop.f32.mrb[25].mxu0  ;;  %v3462_v22 = vpop.f32.mrb[25].mxu1  ;;  %v1517_v48 = vld [vmem:[%s3961_s10 + $0x268] sm:$0xff]  ;;  %v1338_v62 = vadd.f32 %v3403_v33, %v1060_v40  ;;  %v1428_v2 = vmax.f32 %v1213_v55, 0.0  ;;  %v1600_v33 = vld [vmem:[%s3961_s10 + $0x500] sm:$0xff]  ;;  %v1586_v14 = vld [vmem:[%s3961_s10 + $0x490] sm:$0xff] }
 0x7cb   : > { %2426 = vmatpush3.bf16.msra.mxu0 %v1748_v63  ;;  %2448 = vmatpush3.bf16.msra.mxu1 %v1764_v0  ;;  %v1380_v50 = vpop.f32.mrb[26].mxu0  ;;  %v1421_v23 = vpop.f32.mrb[26].mxu1  ;;  %v1750_v41 = vpack.c.bf16 %v1517_v48, %v1516_v7  ;;  %v1751_v63 = vpack.c.bf16 %v1519_v44, %v1518_v53  ;;  %v1767_v0 = vpack.c.bf16 %v1551_v58, %v1550_v57  ;;  %v1571_v7 = vld [vmem:[%s3961_s10 + $0x418] sm:$0xff]  ;;  %v1602_v48 = vld [vmem:[%s3961_s10 + $0x510] sm:$0xff]  ;;  %v1572_v40 = vld [vmem:[%s3961_s10 + $0x420] sm:$0xff] }
 0x7cc   : > { %v1381_v27 = vpop.f32.mrb[27].mxu0  ;;  %v1422_v28 = vpop.f32.mrb[27].mxu1  ;;  %2427 = vmatprep.subr.bf16.mxu0 %v1757_v5  ;;  %2449 = vmatprep.subr.bf16.mxu1 %v1773_v8  ;;  %v1800_v5 = vpack.c.bf16 %v1617_v61, %v1616_v38  ;;  %v1568_v8 = vld [vmem:[%s3961_s10 + $0x400] sm:$0xff]  ;;  %v1435_v15 = vmax.f32 %v1338_v62, 0.0  ;;  %v1700_v50 = vpack.c.bf16 %v1428_v2, %v1428_v2  ;;  %v1702_v23 = vpack.c.bf16 %v1430_v32, %v1430_v32  ;;  %v1605_v53 = vld [vmem:[%s3961_s10 + $0x528] sm:$0xff]  ;;  %v1590_v44 = vld [vmem:[%s3961_s10 + $0x4b0] sm:$0xff] }
 0x7cd   : > { %v1776_v49 = vpack.c.bf16 %v1569_v10, %v1568_v8  ;;  %v1785_v26 = vpack.c.bf16 %v1587_v16, %v1586_v14  ;;  %v1801_v27 = vpack.c.bf16 %v1619_v18, %v1618_v17  ;;  %v1603_v28 = vld [vmem:[%s3961_s10 + $0x518] sm:$0xff]  ;;  %v1606_v38 = vld [vmem:[%s3961_s10 + $0x530] sm:$0xff]  ;;  %v1624_v2 = vld [vmem:[%s3961_s10 + $0x5c0] sm:$0xff] }
 0x7ce   : > { %v1707_v35 = vpack.c.bf16 %v1435_v15, %v1435_v15  ;;  %v1793_v52 = vpack.c.bf16 %v1603_v28, %v1602_v48  ;;  %v1591_v55 = vld [vmem:[%s3961_s10 + $0x4b8] sm:$0xff]  ;;  %v1625_v32 = vld [vmem:[%s3961_s10 + $0x5c8] sm:$0xff]  ;;  %v1576_v10 = vld [vmem:[%s3961_s10 + $0x440] sm:$0xff] }
 0x7cf   : > { %2428 = vmatpush3.bf16.msra.mxu0 %v1749_v51  ;;  %2450 = vmatpush3.bf16.msra.mxu1 %v1765_v24  ;;  %v1792_v51 = vpack.c.bf16 %v1601_v13, %v1600_v33  ;;  %v1570_v24 = vld [vmem:[%s3961_s10 + $0x410] sm:$0xff]  ;;  %v1787_v59 = vpack.c.bf16 %v1591_v55, %v1590_v44  ;;  %v1607_v62 = vld [vmem:[%s3961_s10 + $0x538] sm:$0xff]  ;;  %v1577_v11 = vld [vmem:[%s3961_s10 + $0x448] sm:$0xff]  ;;  %v1804_v13 = vpack.c.bf16 %v1625_v32, %v1624_v2 }
 0x7d0   : > { %2429 = vmatprep.subr.bf16.mxu0 %v1758_v29  ;;  %2451 = vmatprep.subr.bf16.mxu1 %v1774_v34  ;;  %v1588_v29 = vld [vmem:[%s3961_s10 + $0x4a0] sm:$0xff]  ;;  %v1589_v34 = vld [vmem:[%s3961_s10 + $0x4a8] sm:$0xff]  ;;  %v1777_v46 = vpack.c.bf16 %v1571_v7, %v1570_v24  ;;  %v1594_v15 = vld [vmem:[%s3961_s10 + $0x4d0] sm:$0xff]  ;;  %v1076_v55 = vrot.slane %v3255_v47, %v1043_v9 }
 0x7d1   : > { %v1786_v39 = vpack.c.bf16 %v1589_v34, %v1588_v29  ;;  %v1608_v33 = vld [vmem:[%s3961_s10 + $0x540] sm:$0xff]  ;;  %v1609_v14 = vld [vmem:[%s3961_s10 + $0x548] sm:$0xff]  ;;  %v1595_v16 = vld [vmem:[%s3961_s10 + $0x4d8] sm:$0xff] }
 0x7d2   : > { %v1626_v17 = vld [vmem:[%s3961_s10 + $0x5d0] sm:$0xff]  ;;  %v1627_v18 = vld [vmem:[%s3961_s10 + $0x5d8] sm:$0xff]  ;;  %v1628_v28 = vld [vmem:[%s3961_s10 + $0x5e0] sm:$0xff] }
 0x7d3   : > { %2430 = vmatpush3.bf16.msra.mxu0 %v1750_v41  ;;  %2452 = vmatpush3.bf16.msra.mxu1 %v1766_v42  ;;  %v1573_v41 = vld [vmem:[%s3961_s10 + $0x428] sm:$0xff]  ;;  %v1604_v42 = vld [vmem:[%s3961_s10 + $0x520] sm:$0xff]  ;;  %v1579_v24 = vld [vmem:[%s3961_s10 + $0x458] sm:$0xff]  ;;  %v1805_v48 = vpack.c.bf16 %v1627_v18, %v1626_v17 }
 0x7d4   : > { %2431 = vmatprep.subr.bf16.mxu0 %v1759_v43  ;;  %2453 = vmatprep.subr.bf16.mxu1 %v1775_v54  ;;  %v1802_v43 = vpack.c.bf16 %v1621_v12, %v1620_v36  ;;  %v1623_v54 = vld [vmem:[%s3961_s10 + $0x5b8] sm:$0xff]  ;;  %v1778_v57 = vpack.c.bf16 %v1573_v41, %v1572_v40  ;;  %v1794_v58 = vpack.c.bf16 %v1605_v53, %v1604_v42  ;;  %v1610_v7 = vld [vmem:[%s3961_s10 + $0x550] sm:$0xff]  ;;  %v1629_v29 = vld [vmem:[%s3961_s10 + $0x5e8] sm:$0xff] }
 0x7d5   : > { %v1803_v61 = vpack.c.bf16 %v1623_v54, %v1622_v56  ;;  %v1580_v12 = vld [vmem:[%s3961_s10 + $0x460] sm:$0xff]  ;;  %v1613_v40 = vld [vmem:[%s3961_s10 + $0x568] sm:$0xff]  ;;  %v1598_v41 = vld [vmem:[%s3961_s10 + $0x4f0] sm:$0xff] }
 0x7d6   : > { %v1599_v42 = vld [vmem:[%s3961_s10 + $0x4f8] sm:$0xff]  ;;  %v1630_v53 = vld [vmem:[%s3961_s10 + $0x5f0] sm:$0xff] }
 0x7d7   : > { %2432 = vmatpush3.bf16.msra.mxu0 %v1751_v63  ;;  %2454 = vmatpush3.bf16.msra.mxu1 %v1767_v0  ;;  %v1592_v63 = vld [vmem:[%s3961_s10 + $0x4c0] sm:$0xff]  ;;  %v1593_v0 = vld [vmem:[%s3961_s10 + $0x4c8] sm:$0xff]  ;;  %v1631_v44 = vld [vmem:[%s3961_s10 + $0x5f8] sm:$0xff] }
 0x7d8   : > { %2461 = vmatprep.subr.bf16.mxu0 %v1784_v4  ;;  %2483 = vmatprep.subr.bf16.mxu1 %v1800_v5  ;;  %v1779_v4 = vpack.c.bf16 %v1575_v37, %v1574_v60  ;;  %v1795_v5 = vpack.c.bf16 %v1607_v62, %v1606_v38  ;;  %v1788_v8 = vpack.c.bf16 %v1593_v0, %v1592_v63  ;;  %v1615_v9 = vld [vmem:[%s3961_s10 + $0x578] sm:$0xff]  ;;  %v1649_v60 = vld [vmem:[%s3961_s10 + $0x688] sm:$0xff]  ;;  %v1680_v38 = vld [vmem:[%s3961_s10 + $0x780] sm:$0xff]  ;;  %v1432_v0 = vmax.f32 %v3397_v30, 0.0 }
 0x7d9   : > { %v1420_v62 = vadd.f32 %v3462_v22, %v1076_v55  ;;  %v1799_v2 = vpack.c.bf16 %v1615_v9, %v1614_v45  ;;  %v1664_v30 = vld [vmem:[%s3961_s10 + $0x700] sm:$0xff]  ;;  %v1634_v18 = vld [vmem:[%s3961_s10 + $0x610] sm:$0xff]  ;;  %v1671_v45 = vld [vmem:[%s3961_s10 + $0x738] sm:$0xff] }
 0x7da   : > { %1960 = vmatmul.mubr.bf16.vlgmr.msra.gmra.mrb[32].mxu0 %v1700_v50  ;;  %2000 = vmatmul.mubr.bf16.vlgmr.msra.gmra.mrb[32].mxu1 %v1702_v23  ;;  %v1796_v50 = vpack.c.bf16 %v1609_v14, %v1608_v33  ;;  %v1789_v23 = vpack.c.bf16 %v1595_v16, %v1594_v15  ;;  %v1651_v33 = vld [vmem:[%s3961_s10 + $0x698] sm:$0xff]  ;;  %v1682_v14 = vld [vmem:[%s3961_s10 + $0x790] sm:$0xff]  ;;  %v1704_v16 = vpack.c.bf16 %v1432_v0, %v1432_v0  ;;  %v1657_v9 = vld [vmem:[%s3961_s10 + $0x6c8] sm:$0xff] }
 0x7db   : > { %2462 = vmatpush3.bf16.msra.mxu0 %v1776_v49  ;;  %2039 = vmatprep.mubr.bf16.mxu0 %v1705_v25  ;;  %v1780_v49 = vpack.c.bf16 %v1577_v11, %v1576_v10  ;;  %v1611_v25 = vld [vmem:[%s3961_s10 + $0x558] sm:$0xff]  ;;  %v1650_v11 = vld [vmem:[%s3961_s10 + $0x690] sm:$0xff]  ;;  %v1672_v0 = vld [vmem:[%s3961_s10 + $0x740] sm:$0xff] }
 0x7dc   : > { %2484 = vmatpush3.bf16.msra.mxu1 %v1792_v51  ;;  %2079 = vmatprep.mubr.bf16.mxu1 %v1707_v35  ;;  %v1578_v51 = vld [vmem:[%s3961_s10 + $0x450] sm:$0xff]  ;;  %v1797_v35 = vpack.c.bf16 %v1611_v25, %v1610_v7  ;;  %v1683_v15 = vld [vmem:[%s3961_s10 + $0x798] sm:$0xff]  ;;  %v1652_v7 = vld [vmem:[%s3961_s10 + $0x6a0] sm:$0xff] }
 0x7dd   : > { %2463 = vmatprep.subr.bf16.mxu0 %v1785_v26  ;;  %2485 = vmatprep.subr.bf16.mxu1 %v1801_v27  ;;  %v1596_v26 = vld [vmem:[%s3961_s10 + $0x4e0] sm:$0xff]  ;;  %v1597_v27 = vld [vmem:[%s3961_s10 + $0x4e8] sm:$0xff]  ;;  %v1781_v34 = vpack.c.bf16 %v1579_v24, %v1578_v51  ;;  %v1817_v51 = vpack.c.bf16 %v1651_v33, %v1650_v11  ;;  %v1667_v24 = vld [vmem:[%s3961_s10 + $0x718] sm:$0xff] }
 0x7de   : > { %v1790_v36 = vpack.c.bf16 %v1597_v27, %v1596_v26  ;;  %v1833_v26 = vpack.c.bf16 %v1683_v15, %v1682_v14  ;;  %v1684_v27 = vld [vmem:[%s3961_s10 + $0x7a0] sm:$0xff]  ;;  %v1642_v11 = vld [vmem:[%s3961_s10 + $0x650] sm:$0xff]  ;;  %v1643_v33 = vld [vmem:[%s3961_s10 + $0x658] sm:$0xff] }
 0x7df   : > { %2464 = vmatpush3.bf16.msra.mxu0 %v1777_v46  ;;  %v1581_v46 = vld [vmem:[%s3961_s10 + $0x468] sm:$0xff]  ;;  %v1675_v14 = vld [vmem:[%s3961_s10 + $0x758] sm:$0xff]  ;;  %v1660_v15 = vld [vmem:[%s3961_s10 + $0x6e0] sm:$0xff] }
 0x7e0   : > { %2486 = vmatpush3.bf16.msra.mxu1 %v1793_v52  ;;  %2465 = vmatprep.subr.bf16.mxu0 %v1786_v39  ;;  %v1612_v52 = vld [vmem:[%s3961_s10 + $0x560] sm:$0xff]  ;;  %v1806_v39 = vpack.c.bf16 %v1629_v29, %v1628_v28  ;;  %v1782_v56 = vpack.c.bf16 %v1581_v46, %v1580_v12  ;;  %v1685_v28 = vld [vmem:[%s3961_s10 + $0x7a8] sm:$0xff] }
 0x7e1   : > { %2487 = vmatprep.subr.bf16.mxu1 %v1802_v43  ;;  %v1068_v43 = vrot.slane %v3255_v47, %v1035_v1  ;;  %v1798_v54 = vpack.c.bf16 %v1613_v40, %v1612_v52  ;;  %v1582_v1 = vld [vmem:[%s3961_s10 + $0x470] sm:$0xff]  ;;  %v1807_v47 = vpack.c.bf16 %v1631_v44, %v1630_v53  ;;  %v1636_v12 = vld [vmem:[%s3961_s10 + $0x620] sm:$0xff]  ;;  %v1637_v46 = vld [vmem:[%s3961_s10 + $0x628] sm:$0xff] }
 0x7e2   : > { %v1668_v52 = vld [vmem:[%s3961_s10 + $0x720] sm:$0xff]  ;;  %v1669_v40 = vld [vmem:[%s3961_s10 + $0x728] sm:$0xff]  ;;  %v1687_v53 = vld [vmem:[%s3961_s10 + $0x7b8] sm:$0xff]  ;;  %v1810_v44 = vpack.c.bf16 %v1637_v46, %v1636_v12 }
 0x7e3   : > { %2466 = vmatpush3.bf16.msra.mxu0 %v1778_v57  ;;  %v1791_v57 = vpack.c.bf16 %v1599_v42, %v1598_v41  ;;  %v1379_v37 = vadd.f32 %v3460_v21, %v1068_v43  ;;  %v1632_v21 = vld [vmem:[%s3961_s10 + $0x600] sm:$0xff]  ;;  %v1654_v41 = vld [vmem:[%s3961_s10 + $0x6b0] sm:$0xff]  ;;  %v1655_v42 = vld [vmem:[%s3961_s10 + $0x6b8] sm:$0xff]  ;;  %v1826_v55 = vpack.c.bf16 %v1669_v40, %v1668_v52 }
 0x7e4   : > { %2488 = vmatpush3.bf16.msra.mxu1 %v1794_v58  ;;  %2467 = vmatprep.subr.bf16.mxu0 %v1787_v59  ;;  %v1583_v58 = vld [vmem:[%s3961_s10 + $0x478] sm:$0xff]  ;;  %v1648_v59 = vld [vmem:[%s3961_s10 + $0x680] sm:$0xff]  ;;  %v1686_v43 = vld [vmem:[%s3961_s10 + $0x7b0] sm:$0xff] }
 0x7e5   : > { %2489 = vmatprep.subr.bf16.mxu1 %v1803_v61  ;;  %v1681_v61 = vld [vmem:[%s3961_s10 + $0x788] sm:$0xff]  ;;  %v1783_v63 = vpack.c.bf16 %v1583_v58, %v1582_v1  ;;  %v1816_v32 = vpack.c.bf16 %v1649_v60, %v1648_v59  ;;  %v1437_v10 = vmax.f32 %v1379_v37, 0.0  ;;  %v1670_v1 = vld [vmem:[%s3961_s10 + $0x730] sm:$0xff]  ;;  %v1835_v58 = vpack.c.bf16 %v1687_v53, %v1686_v43  ;;  %v1688_v59 = vld [vmem:[%s3961_s10 + $0x7c0] sm:$0xff] }
 0x7e6   : > { %v1832_v22 = vpack.c.bf16 %v1681_v61, %v1680_v38  ;;  %v1689_v60 = vld [vmem:[%s3961_s10 + $0x7c8] sm:$0xff]  ;;  %v1827_v38 = vpack.c.bf16 %v1671_v45, %v1670_v1  ;;  %v1646_v12 = vld [vmem:[%s3961_s10 + $0x670] sm:$0xff]  ;;  %v1647_v46 = vld [vmem:[%s3961_s10 + $0x678] sm:$0xff]  ;;  %v1438_v53 = vmax.f32 %v3458_v20, 0.0 }
 0x7e7   : > { %2468 = vmatpush3.bf16.msra.mxu0 %v1779_v4  ;;  %v1633_v4 = vld [vmem:[%s3961_s10 + $0x608] sm:$0xff]  ;;  %v1709_v25 = vpack.c.bf16 %v1437_v10, %v1437_v10  ;;  %v1679_v40 = vld [vmem:[%s3961_s10 + $0x778] sm:$0xff]  ;;  %v2197_v1 = vld [vmem:[%s529_s19] sm:$0xff] }
 0x7e8   : > { %2490 = vmatpush3.bf16.msra.mxu1 %v1795_v5  ;;  %2469 = vmatprep.subr.bf16.mxu0 %v1788_v8  ;;  %v1434_v5 = vmax.f32 %v3399_v31, 0.0  ;;  %v1665_v8 = vld [vmem:[%s3961_s10 + $0x708] sm:$0xff]  ;;  %v1439_v31 = vmax.f32 %v1420_v62, 0.0  ;;  %v1640_v62 = vld [vmem:[%s3961_s10 + $0x640] sm:$0xff]  ;;  %v2201_v45 = vpack.c.bf16 %v2197_v1, %v2197_v1 }
 0x7e9   : > { %2491 = vmatprep.subr.bf16.mxu1 %v1804_v13  ;;  %v1808_v13 = vpack.c.bf16 %v1633_v4, %v1632_v21  ;;  %v1824_v17 = vpack.c.bf16 %v1665_v8, %v1664_v30  ;;  %v1658_v21 = vld [vmem:[%s3961_s10 + $0x6d0] sm:$0xff]  ;;  %v1659_v4 = vld [vmem:[%s3961_s10 + $0x6d8] sm:$0xff]  ;;  %v2199_v20 = vld [vmem:[%s3965_s14 + $0x8] sm:$0xff] }
 0x7ea   : > { %v1711_v29 = vpack.c.bf16 %v1439_v31, %v1439_v31  ;;  %v1821_v10 = vpack.c.bf16 %v1659_v4, %v1658_v21  ;;  %v1674_v31 = vld [vmem:[%s3961_s10 + $0x750] sm:$0xff] }
 0x7eb   : > { %2470 = vmatpush3.bf16.msra.mxu0 %v1780_v49  ;;  %v1635_v49 = vld [vmem:[%s3961_s10 + $0x618] sm:$0xff] }
 0x7ec   : > { %2492 = vmatpush3.bf16.msra.mxu1 %v1796_v50  ;;  %2471 = vmatprep.subr.bf16.mxu0 %v1789_v23  ;;  %v1666_v50 = vld [vmem:[%s3961_s10 + $0x710] sm:$0xff]  ;;  %v1706_v23 = vpack.c.bf16 %v1434_v5, %v1434_v5 }
 0x7ed   : > { %2493 = vmatprep.subr.bf16.mxu1 %v1805_v48  ;;  %v1653_v48 = vld [vmem:[%s3961_s10 + $0x6a8] sm:$0xff]  ;;  %v1690_v5 = vld [vmem:[%s3961_s10 + $0x7d0] sm:$0xff] }
 0x7ef   : > { %2472 = vmatpush3.bf16.msra.mxu0 %v1781_v34  ;;  %v1809_v34 = vpack.c.bf16 %v1635_v49, %v1634_v18  ;;  %v1693_v18 = vld [vmem:[%s3961_s10 + $0x7e8] sm:$0xff]  ;;  %v1813_v49 = vpack.c.bf16 %v1643_v33, %v1642_v11 }
 0x7f0   : > { %2494 = vmatpush3.bf16.msra.mxu1 %v1797_v35  ;;  %2473 = vmatprep.subr.bf16.mxu0 %v1790_v36  ;;  %v1825_v35 = vpack.c.bf16 %v1667_v24, %v1666_v50  ;;  %v1818_v36 = vpack.c.bf16 %v1653_v48, %v1652_v7  ;;  %v1829_v50 = vpack.c.bf16 %v1675_v14, %v1674_v31  ;;  %v1645_v24 = vld [vmem:[%s3961_s10 + $0x668] sm:$0xff]  ;;  %v1676_v7 = vld [vmem:[%s3961_s10 + $0x760] sm:$0xff] }
 0x7f1   : > { %2495 = vmatprep.subr.bf16.mxu1 %v1806_v39  ;;  %v1834_v39 = vpack.c.bf16 %v1685_v28, %v1684_v27  ;;  %v1663_v27 = vld [vmem:[%s3961_s10 + $0x6f8] sm:$0xff]  ;;  %v1694_v28 = vld [vmem:[%s3961_s10 + $0x7f0] sm:$0xff] }
 0x7f3   : > { %2474 = vmatpush3.bf16.msra.mxu0 %v1782_v56  ;;  %v1819_v56 = vpack.c.bf16 %v1655_v42, %v1654_v41  ;;  %v1815_v41 = vpack.c.bf16 %v1647_v46, %v1646_v12  ;;  %v1436_v42 = vmax.f32 %v3455_v19, 0.0  ;;  %v2198_v19 = vld [vmem:[%s3965_s14] sm:$0xff] }
 0x7f4   : > { %2496 = vmatpush3.bf16.msra.mxu1 %v1798_v54  ;;  %2475 = vmatprep.subr.bf16.mxu0 %v1791_v57  ;;  %v1638_v54 = vld [vmem:[%s3961_s10 + $0x630] sm:$0xff]  ;;  %v1639_v57 = vld [vmem:[%s3961_s10 + $0x638] sm:$0xff] }
 0x7f5   : > { %2497 = vmatprep.subr.bf16.mxu1 %v1807_v47  ;;  %v1656_v47 = vld [vmem:[%s3961_s10 + $0x6c0] sm:$0xff]  ;;  %v1811_v37 = vpack.c.bf16 %v1639_v57, %v1638_v54  ;;  %v2202_v54 = vpack.c.bf16 %v2199_v20, %v2198_v19 }
 0x7f6   : > { %v1820_v61 = vpack.c.bf16 %v1657_v9, %v1656_v47 }
 0x7f7   : > { %2476 = vmatpush3.bf16.msra.mxu0 %v1783_v63  ;;  %v1641_v63 = vld [vmem:[%s3961_s10 + $0x648] sm:$0xff] }
 0x7f8   : > { %2498 = vmatpush3.bf16.msra.mxu1 %v1799_v2  ;;  %2505 = vmatprep.subr.bf16.mxu0 %v1816_v32  ;;  %v1836_v2 = vpack.c.bf16 %v1689_v60, %v1688_v59  ;;  %v1673_v32 = vld [vmem:[%s3961_s10 + $0x748] sm:$0xff]  ;;  %v1812_v30 = vpack.c.bf16 %v1641_v63, %v1640_v62  ;;  %v2352_v59 = vld [vmem:[%s3962_s11] ss:$0 sm:$0xff] }
 0x7f9   : > { %2527 = vmatprep.subr.bf16.mxu1 %v1832_v22  ;;  %v1691_v22 = vld [vmem:[%s3961_s10 + $0x7d8] sm:$0xff]  ;;  %v1828_v8 = vpack.c.bf16 %v1673_v32, %v1672_v0 }
 0x7fa   : > { %2040 = vmatmul.mubr.bf16.vlgmr.msra.gmra.mrb[36].mxu0 %v1704_v16  ;;  %v1661_v16 = vld [vmem:[%s3961_s10 + $0x6e8] sm:$0xff] }
 0x7fb   : > { %2080 = vmatmul.mubr.bf16.vlgmr.msra.gmra.mrb[36].mxu1 %v1706_v23  ;;  %2506 = vmatpush3.bf16.msra.mxu0 %v1808_v13  ;;  %v1837_v13 = vpack.c.bf16 %v1691_v22, %v1690_v5  ;;  %v1822_v23 = vpack.c.bf16 %v1661_v16, %v1660_v15 }
 0x7fc   : > { %2119 = vmatprep.mubr.bf16.mxu0 %v1709_v25  ;;  %2528 = vmatpush3.bf16.msra.mxu1 %v1824_v17  ;;  %v1692_v17 = vld [vmem:[%s3961_s10 + $0x7e0] sm:$0xff]  ;;  %v1677_v25 = vld [vmem:[%s3961_s10 + $0x768] sm:$0xff] }
 0x7fd   : > { %2159 = vmatprep.mubr.bf16.mxu1 %v1711_v29  ;;  %2507 = vmatprep.subr.bf16.mxu0 %v1817_v51  ;;  %v1644_v51 = vld [vmem:[%s3961_s10 + $0x660] sm:$0xff]  ;;  %v1838_v48 = vpack.c.bf16 %v1693_v18, %v1692_v17  ;;  %v1695_v29 = vld [vmem:[%s3961_s10 + $0x7f8] sm:$0xff] }
 0x7fe   : > { %2529 = vmatprep.subr.bf16.mxu1 %v1833_v26  ;;  %v1662_v26 = vld [vmem:[%s3961_s10 + $0x6f0] sm:$0xff]  ;;  %v1839_v52 = vpack.c.bf16 %v1695_v29, %v1694_v28 }
 0x7ff   : > { %2508 = vmatpush3.bf16.msra.mxu0 %v1809_v34  ;;  %v1814_v34 = vpack.c.bf16 %v1645_v24, %v1644_v51 }
 0x800   : > { %2530 = vmatpush3.bf16.msra.mxu1 %v1825_v35  ;;  %2509 = vmatprep.subr.bf16.mxu0 %v1818_v36  ;;  %v1830_v35 = vpack.c.bf16 %v1677_v25, %v1676_v7  ;;  %v1823_v36 = vpack.c.bf16 %v1663_v27, %v1662_v26 }
 0x801   : > { %2531 = vmatprep.subr.bf16.mxu1 %v1834_v39  ;;  %v1678_v39 = vld [vmem:[%s3961_s10 + $0x770] sm:$0xff] }
 0x802   : > { %v1831_v43 = vpack.c.bf16 %v1679_v40, %v1678_v39 }
 0x803   : > { %2510 = vmatpush3.bf16.msra.mxu0 %v1810_v44  ;;  %v1708_v44 = vpack.c.bf16 %v1436_v42, %v1436_v42 }
 0x804   : > { %2532 = vmatpush3.bf16.msra.mxu1 %v1826_v55  ;;  %2511 = vmatprep.subr.bf16.mxu0 %v1819_v56  ;;  %v1710_v55 = vpack.c.bf16 %v1438_v53, %v1438_v53  ;;  %v2200_v56 = vld [vmem:[%s3965_s14 + $0x10] sm:$0xff] }
 0x805   : > { %2533 = vmatprep.subr.bf16.mxu1 %v1835_v58  ;;  %v2203_v57 = vpack.c.bf16 %v2200_v56, %v2200_v56 }
 0x807   : > { %2512 = vmatpush3.bf16.msra.mxu0 %v1811_v37  ;;  %v2216_v58 = vsel %vm664_vm4, %v2203_v57, 0 }
 0x808   : > { %2534 = vmatpush3.bf16.msra.mxu1 %v1827_v38  ;;  %2513 = vmatprep.subr.bf16.mxu0 %v1820_v61 }
 0x809   : > { %2535 = vmatprep.subr.bf16.mxu1 %v1836_v2 }
 0x80b   : > { %2514 = vmatpush3.bf16.msra.mxu0 %v1812_v30 }
 0x80c   : > { %2536 = vmatpush3.bf16.msra.mxu1 %v1828_v8  ;;  %2515 = vmatprep.subr.bf16.mxu0 %v1821_v10 }
 0x80d   : > { %2537 = vmatprep.subr.bf16.mxu1 %v1837_v13 }
 0x80f   : > { %2516 = vmatpush3.bf16.msra.mxu0 %v1813_v49 }
 0x810   : > { %2538 = vmatpush3.bf16.msra.mxu1 %v1829_v50  ;;  %2517 = vmatprep.subr.bf16.mxu0 %v1822_v23 }
 0x811   : > { %2539 = vmatprep.subr.bf16.mxu1 %v1838_v48 }
 0x813   : > { %2518 = vmatpush3.bf16.msra.mxu0 %v1814_v34 }
 0x814   : > { %2540 = vmatpush3.bf16.msra.mxu1 %v1830_v35  ;;  %2519 = vmatprep.subr.bf16.mxu0 %v1823_v36 }
 0x815   : > { %2541 = vmatprep.subr.bf16.mxu1 %v1839_v52 }
 0x817   : > { %2520 = vmatpush3.bf16.msra.mxu0 %v1815_v41 }
 0x818   : > { %2542 = vmatpush3.bf16.msra.mxu1 %v1831_v43  ;;  %2592 = vmatprep.subr.bf16.mxu0 %v2637_v3 }
 0x81a   : > { %2120 = vmatmul.mubr.bf16.vlgmr.msra.gmra.mrb[40].mxu0 %v1708_v44 }
 0x81b   : > { %2160 = vmatmul.mubr.bf16.vlgmr.msra.gmra.mrb[40].mxu1 %v1710_v55  ;;  %2596 = vmatprep.mubr.msk.bf16.mxu0 %vm2638_vm0, %v2637_v3 }
 0x81c   : > { %2593 = vmatpush3.bf16.msra.mxu0 %v2202_v54 }
 0x81d   : > { %2594 = vmatprep.subr.bf16.mxu0 %v2637_v3 }
 0x820   : > { %2595 = vmatpush3.bf16.msra.mxu0 %v2216_v58 }
 0x823   : > { %2597 = vmatmul.mubr.msk.bf16.vlgmr.msra.gmra.mrb[44].mxu0 %vm2211_vm5, %v2201_v45 }
 0x88d   : > { %v2389_v47 = vpop.f32.mrb[28].mxu0  ;;  %v2411_v9 = vpop.f32.mrb[28].mxu1 }
 0x88e   : > { %v2390_v60 = vpop.f32.mrb[29].mxu0  ;;  %v2412_v37 = vpop.f32.mrb[29].mxu1 }
 0x88f   : > { %v2391_v38 = vadd.f32 %v2390_v60, %v2389_v47  ;;  %v2413_v61 = vadd.f32 %v2412_v37, %v2411_v9  ;;  %v2392_v62 = vpop.f32.mrb[30].mxu0  ;;  %v2414_v63 = vpop.f32.mrb[30].mxu1  ;;  %v2354_v37 = vld [vmem:[%s3964_s13] ss:$0 sm:$0xff] }
 0x890   : > { %v2393_v0 = vpop.f32.mrb[31].mxu0  ;;  %v2415_v3 = vpop.f32.mrb[31].mxu1 }
 0x891   : > { %v1882_v2 = vadd.f32 %v2391_v38, %v2352_v59  ;;  %v2353_v59 = vld [vmem:[%s3963_s12] ss:$0 sm:$0xff] }
 0x893   : > { %v1922_v32 = vadd.f32 %v2413_v61, %v1882_v2 }
 0x8ad   : > { %v2433_v21 = vpop.f32.mrb[32].mxu0  ;;  %v2455_v4 = vpop.f32.mrb[32].mxu1 }
 0x8ae   : > { %v2434_v5 = vpop.f32.mrb[33].mxu0  ;;  %v2456_v22 = vpop.f32.mrb[33].mxu1 }
 0x8af   : > { %v2435_v30 = vadd.f32 %v2434_v5, %v2433_v21  ;;  %v2457_v8 = vadd.f32 %v2456_v22, %v2455_v4  ;;  %v2436_v10 = vpop.f32.mrb[34].mxu0  ;;  %v2458_v11 = vpop.f32.mrb[34].mxu1 }
 0x8b0   : > { %v2437_v33 = vpop.f32.mrb[35].mxu0  ;;  %v2459_v31 = vpop.f32.mrb[35].mxu1 }
 0x8b1   : > { %v1962_v13 = vadd.f32 %v2435_v30, %v1922_v32 }
 0x8b3   : > { %v2002_v14 = vadd.f32 %v2457_v8, %v1962_v13 }
 0x8cd   : > { %v2477_v15 = vpop.f32.mrb[36].mxu0 }
 0x8ce   : > { %v2499_v16 = vpop.f32.mrb[36].mxu1  ;;  %v2478_v17 = vpop.f32.mrb[37].mxu0 }
 0x8cf   : > { %v2479_v18 = vadd.f32 %v2478_v17, %v2477_v15  ;;  %v2500_v49 = vpop.f32.mrb[37].mxu1  ;;  %v2480_v50 = vpop.f32.mrb[38].mxu0 }
 0x8d0   : > { %v2501_v23 = vadd.f32 %v2500_v49, %v2499_v16  ;;  %v2502_v51 = vpop.f32.mrb[38].mxu1  ;;  %v2481_v24 = vpop.f32.mrb[39].mxu0 }
 0x8d1   : > { %v2042_v7 = vadd.f32 %v2479_v18, %v2002_v14  ;;  %v2503_v48 = vpop.f32.mrb[39].mxu1 }
 0x8d3   : > { %v2082_v25 = vadd.f32 %v2501_v23, %v2042_v7 }
 0x8ed   : > { %v2521_v26 = vpop.f32.mrb[40].mxu0 }
 0x8ee   : > { %v2543_v27 = vpop.f32.mrb[40].mxu1  ;;  %v2522_v28 = vpop.f32.mrb[41].mxu0 }
 0x8ef   : > { %v2523_v29 = vadd.f32 %v2522_v28, %v2521_v26  ;;  %v2544_v34 = vpop.f32.mrb[41].mxu1  ;;  %v2524_v35 = vpop.f32.mrb[42].mxu0 }
 0x8f0   : > { %v2545_v36 = vadd.f32 %v2544_v34, %v2543_v27  ;;  %v2546_v12 = vpop.f32.mrb[42].mxu1  ;;  %v2525_v46 = vpop.f32.mrb[43].mxu0 }
 0x8f1   : > { %v2122_v52 = vadd.f32 %v2523_v29, %v2082_v25  ;;  %v2547_v39 = vpop.f32.mrb[43].mxu1 }
 0x8f3   : > { %v2162_v40 = vadd.f32 %v2545_v36, %v2122_v52 }
 0x8f5   : > { %v2167_v41 = vadd.f32 %v2162_v40, %v2909_v6  ;;  %v2355_v6 = vld [vmem:[%s3966_s15] ss:$0 sm:$0xff] }
 0x8f6   : > { %v2252_v20 = vpop.f32.mrb[44].mxu0 }
 0x8f7   : > { %v2170_v42 = vsel %vm550_vm1, %v2167_v41, 0.0  ;;  %v2598_v56 = vpop.f32.mrb[45].mxu0  ;;  %v2253_v47 = vadd.f32 %v2355_v6, %v2252_v20 }
 0x8f8   : > { %2171 = vadd.xlane.f32.xlu0 %v2170_v42  ;;  %v2255_v54 = vpop.f32.mrb[46].mxu0 }
 0x8f9   : > { %v2599_v57 = vpop.f32.mrb[47].mxu0  ;;  %v2258_v61 = vmax.f32 %v2253_v47, 0.0 }
 0x985   : > { %v2172_v43 = vpop.xlane.xlu0 %2171 }
 0x986   : > { %v2173_v53 = vmul.f32 0.03125, %v2172_v43 }
 0x988   : > { %v2174_v44 = vsub.f32 %v2167_v41, %v2173_v53 }
 0x98a   : > { %v2175_v55 = vmul.f32 %v2174_v44, %v2174_v44 }
 0x98c   : > { %v2176_v19 = vsel %vm550_vm1, %v2175_v55, 0.0 }
 0x98d   : > { %2177 = vadd.xlane.f32.xlu0 %v2176_v19 }
 0xa1a   : > { %v2178_v1 = vpop.xlane.xlu0 %2177 }
 0xa1b   : > { %v2179_v58 = vmul.f32 0.03125, %v2178_v1 }
 0xa1d   : > { %v2180_v45 = vadd.f32 1e-05, %v2179_v58 }
 0xa1f   : > { %2627 = vrsqrt.f32 %v2180_v45 }
 0xa29   : > { %v2628_v9 = vpop.eup %2627 }
 0xa2a   : > { %v2182_v60 = vmul.f32 %v2628_v9, %v2174_v44 }
 0xa2c   : > { %v2189_v38 = vmul.f32 %v2353_v59, %v2182_v60 }
 0xa2e   : > { %v2196_v62 = vadd.f32 %v2354_v37, %v2189_v38 }
 0xa30   : > { %v2259_v63 = vadd.f32 %v2258_v61, %v2196_v62 }
 0xa32   : > { %2260 = vst.msk [vmem:[%s533_s17] sm:$0xff] %vm550_vm1, %v2259_v63 }
 0xa33 PF: > { %s26_s21 = sadd.s32 1, %s2635_s21  }
 0xa34   : > { %p23_p4 = scmp.ge.s32.totalorder %s26_s21, 4  }
 0xa36   :  { %25 = sbr.rel (!%p23_p4) target bundleno = 2 (0x2), region = 117 }

// kernel: iibmil_forward.15
= control target key start
LH: loop header
LB: loop body
LE: loop exit
PB: predicated region body
PF: predicated region fallthrough
CT: control target
= control target key end

     0   :  { %v156_v3 = vmov 0   ;;  %s256_s0 = inlined_call_operand.vmem [shape: f32[2,160], index: 0, kind: input, shape index: {}]   ;;  %s257_s1 = inlined_call_operand.vmem [shape: f32[160,4], index: 1, kind: input, shape index: {}]   ;;  %s258_s2 = inlined_call_operand.vmem [shape: f32[1,4], index: 2, kind: input, shape index: {}]   ;;  %s259_s3 = inlined_call_operand.hbm [shape: f32[2,4], index: 3, kind: output, shape index: {}]  }
   0x1   :  { %v17_v0 = vld [vmem:[%s257_s1] sm:$0xff]  ;;  %v18_v1 = vld [vmem:[%s257_s1 + $0x8] sm:$0xff]  ;;  %v19_v2 = vld [vmem:[%s257_s1 + $0x10] sm:$0xff]  ;;  %71 = vmatprep.subr.bf16.mxu0 %v156_v3 }
   0x2   :  { %v50_v4 = vpack.c.bf16 %v18_v1, %v17_v0  ;;  %v20_v5 = vld [vmem:[%s257_s1 + $0x18] sm:$0xff]  ;;  %v21_v7 = vld [vmem:[%s257_s1 + $0x20] sm:$0xff]  ;;  %v22_v8 = vld [vmem:[%s257_s1 + $0x28] sm:$0xff] }
   0x3   :  { %v51_v6 = vpack.c.bf16 %v20_v5, %v19_v2  ;;  %v127_v9 = vld.sshfl [vmem:[%s256_s0] sm:$0x33 pattern:$0x76325410]  ;;  %v52_v10 = vpack.c.bf16 %v22_v8, %v21_v7 }
   0x4   :  { %72 = vmatpush1.bf16.msra.mxu0 %v50_v4  ;;  %v45_v11 = vcombine.high %v127_v9, %v127_v9 }
   0x5   :  { %73 = vmatprep.subr.bf16.mxu0 %v156_v3 }
   0x8   :  { %74 = vmatpush1.bf16.msra.mxu0 %v51_v6 }
   0x9   :  { %8 = vsyncpa [#allocation3], 0  ;;  %75 = vmatprep.subr.bf16.mxu0 %v156_v3  ;;  %v23_v12 = vld [vmem:[%s257_s1 + $0x30] sm:$0xff]  ;;  %v24_v13 = vld [vmem:[%s257_s1 + $0x38] sm:$0xff]  ;;  %vm67_vm0 = vcmask 261120   ;;  %v49_v14 = vpack.c.bf16 %v45_v11, %v45_v11  ;;  %v48_v34 = vpack.c.bf16 %v127_v9, %v127_v9  ;;  %s157_s28 = smov [#allocation2]  }
   0xa   :  { %v53_v15 = vpack.c.bf16 %v24_v13, %v23_v12  ;;  %v25_v16 = vld [vmem:[%s257_s1 + $0x40] sm:$0xff]  ;;  %v26_v17 = vld [vmem:[%s257_s1 + $0x48] sm:$0xff]  ;;  %v27_v19 = vld [vmem:[%s257_s1 + $0x50] sm:$0xff]  ;;  %s119_s29 = sshll.u32 %s157_s28, 4  ;;  %vm111_vm1 = vcmask 25600   ;;  %s120_s29 = int_to_ptr.vmem [resolvable:$true] %s119_s29 }
   0xb   :  { %129 = vmatprep.mubr.msk.bf16.mxu0 %vm67_vm0, %v49_v14  ;;  %v54_v18 = vpack.c.bf16 %v26_v17, %v25_v16  ;;  %v28_v20 = vld [vmem:[%s257_s1 + $0x58] sm:$0xff]  ;;  %v29_v22 = vld [vmem:[%s257_s1 + $0x60] sm:$0xff]  ;;  %v30_v23 = vld [vmem:[%s257_s1 + $0x68] sm:$0xff]  ;;  %p137_p1 = scmp.lt.s32.totalorder %s120_s29, %s120_s29 }
   0xc   :  { %76 = vmatpush1.bf16.msra.mxu0 %v52_v10  ;;  %v55_v21 = vpack.c.bf16 %v28_v20, %v27_v19  ;;  %v56_v24 = vpack.c.bf16 %v30_v23, %v29_v22  ;;  %v31_v25 = vld [vmem:[%s257_s1 + $0x70] sm:$0xff]  ;;  %v32_v26 = vld [vmem:[%s257_s1 + $0x78] sm:$0xff]  ;;  %v33_v28 = vld [vmem:[%s257_s1 + $0x80] sm:$0xff] }
   0xd   :  { %77 = vmatprep.subr.bf16.mxu0 %v156_v3  ;;  %v57_v27 = vpack.c.bf16 %v32_v26, %v31_v25  ;;  %v34_v29 = vld [vmem:[%s257_s1 + $0x88] sm:$0xff]  ;;  %v35_v31 = vld [vmem:[%s257_s1 + $0x90] sm:$0xff]  ;;  %v36_v32 = vld [vmem:[%s257_s1 + $0x98] sm:$0xff]  ;;  %s132_s1 = scalar_lea.vmem %s120_s29, 32 }
   0xe   :  { %v58_v30 = vpack.c.bf16 %v34_v29, %v33_v28  ;;  %v59_v33 = vpack.c.bf16 %v36_v32, %v35_v31  ;;  %v128_v35 = vld [vmem:[%s258_s2] ss:$0 sm:$0xff]  ;;  %p133_p0 = scmp.ne.s32.totalorder %s120_s29, %s132_s1  ;;  %p138_p2 = scmp.lt.s32.totalorder %s132_s1, %s132_s1 }
  0x10   :  { %78 = vmatpush1.bf16.msra.mxu0 %v53_v15  ;;  %p139_p3 = por %p138_p2, %p137_p1 }
  0x11   :  { %79 = vmatprep.subr.bf16.mxu0 %v156_v3 }
  0x12   :  { %p140_p4 = pnand %p139_p3, %p133_p0 }
  0x14   :  { %80 = vmatpush1.bf16.msra.mxu0 %v54_v18 }
  0x15   :  { %81 = vmatprep.subr.bf16.mxu0 %v156_v3 }
  0x18   :  { %82 = vmatpush1.bf16.msra.mxu0 %v55_v21 }
  0x19   :  { %83 = vmatprep.subr.bf16.mxu0 %v156_v3 }
  0x1c   :  { %84 = vmatpush1.bf16.msra.mxu0 %v56_v24 }
  0x1d   :  { %85 = vmatprep.subr.bf16.mxu0 %v156_v3 }
  0x20   :  { %86 = vmatpush1.bf16.msra.mxu0 %v57_v27 }
  0x21   :  { %87 = vmatprep.subr.bf16.mxu0 %v156_v3 }
  0x24   :  { %88 = vmatpush1.bf16.msra.mxu0 %v58_v30 }
  0x25   :  { %89 = vmatprep.subr.bf16.mxu0 %v156_v3 }
  0x28   :  { %90 = vmatpush1.bf16.msra.mxu0 %v59_v33 }
  0x2b   :  { %104 = vmatmul.mubr.bf16.vlgmr.msra.gmra.mrb[0].mxu0 %v48_v34 }
  0xfe   :  { %v105_v36 = vpop.f32.mrb[0].mxu0 }
  0xff   :  { %v106_v37 = vadd.f32 %v128_v35, %v105_v36  ;;  %v107_v38 = vpop.f32.mrb[1].mxu0 }
 0x100   :  { %v108_v39 = vpop.f32.mrb[2].mxu0 }
 0x101   :  { %v109_v40 = vpop.f32.mrb[3].mxu0  ;;  %112 = vst.msk [vmem:[#allocation2] sm:$0x3] %vm111_vm1, %v106_v37 }
 0x102   :  { %143 = shalt.err (!%p140_p4)
}
 0x103   :  { %s144_s2 = scalar_lea.hbm %s259_s3, 32 }
 0x104   :  { %p145_p5 = scmp.ne.s32.totalorder %s259_s3, %s144_s2  ;;  %p148_p6 = scmp.lt.u32.totalorder %s144_s2, %s259_s3 }
 0x106   :  { %p150_p7 = pnand %p148_p6, %p145_p5 }
 0x108   :  { %153 = shalt.err (!%p150_p7)
}
 0x109   :  { %122 = dma.vmem_to_hbm [thread:$0]  %s120_s29, 32, %s259_s3, [#allocation3]  }
 0x10a   :  { %154 = dma.done.wait [#allocation3], 32  }
 0x10b   :  { %155 = vsyncadd [#allocation3], 4294967264 }
 0x10c   :  { %126 = vsyncpa [#allocation3], 1 }

// kernel: iibmil_forward.14
= control target key start
LH: loop header
LB: loop body
LE: loop exit
PB: predicated region body
PF: predicated region fallthrough
CT: control target
= control target key end

     0   :  { %s3012_s0 = inlined_call_operand.vmem [shape: f32[2,5,32], index: 0, kind: input, shape index: {}]   ;;  %s3013_s1 = inlined_call_operand.vmem [shape: f32[2,8,32], index: 1, kind: input, shape index: {}]   ;;  %s3014_s2 = inlined_call_operand.vmem [shape: f32[32,96], index: 2, kind: input, shape index: {}]   ;;  %s3015_s3 = inlined_call_operand.vmem [shape: f32[1,96], index: 3, kind: input, shape index: {}]   ;;  %s3016_s4 = inlined_call_operand.vmem [shape: f32[32,32], index: 4, kind: input, shape index: {}]   ;;  %s3017_s5 = inlined_call_operand.vmem [shape: f32[1,32], index: 5, kind: input, shape index: {}]   ;;  %s3018_s6 = inlined_call_operand.vmem [shape: f32[1,32], index: 6, kind: input, shape index: {}]   ;;  %s3019_s7 = inlined_call_operand.vmem [shape: f32[1,32], index: 7, kind: input, shape index: {}]   ;;  %s3020_s8 = inlined_call_operand.vmem [shape: f32[32,32], index: 8, kind: input, shape index: {}]   ;;  %s3021_s9 = inlined_call_operand.vmem [shape: f32[1,32], index: 9, kind: input, shape index: {}]   ;;  %s3022_s10 = inlined_call_operand.vmem [shape: f32[32,64], index: 10, kind: input, shape index: {}]   ;;  %s3023_s11 = inlined_call_operand.vmem [shape: f32[1,64], index: 11, kind: input, shape index: {}]   ;;  %s3024_s12 = inlined_call_operand.vmem [shape: f32[32,32], index: 12, kind: input, shape index: {}]   ;;  %s3025_s13 = inlined_call_operand.vmem [shape: f32[1,32], index: 13, kind: input, shape index: {}]   ;;  %s3026_s14 = inlined_call_operand.vmem [shape: f32[1,32], index: 14, kind: input, shape index: {}]   ;;  %s3027_s15 = inlined_call_operand.vmem [shape: f32[1,32], index: 15, kind: input, shape index: {}]   ;;  %s3028_s16 = inlined_call_operand.vmem [shape: f32[32,64], index: 16, kind: input, shape index: {}]   ;;  %s3029_s17 = inlined_call_operand.vmem [shape: f32[1,64], index: 17, kind: input, shape index: {}]   ;;  %s3030_s18 = inlined_call_operand.vmem [shape: f32[64,32], index: 18, kind: input, shape index: {}]   ;;  %s3031_s19 = inlined_call_operand.vmem [shape: f32[1,32], index: 19, kind: input, shape index: {}]   ;;  %s3032_s20 = inlined_call_operand.vmem [shape: f32[1,32], index: 20, kind: input, shape index: {}]   ;;  %s3033_s21 = inlined_call_operand.vmem [shape: f32[1,32], index: 21, kind: input, shape index: {}]   ;;  %s3034_s22 = inlined_call_operand.vmem [shape: f32[2,5,32], index: 22, kind: output, shape index: {}]  }
   0x1   :  { %3048 = sst [smem:[#allocation2_spill]] %s3012_s0 }
   0x2   :  { %3049 = sst [smem:[#allocation3_spill]] %s3013_s1 }
   0x3   :  { %3050 = sst [smem:[#allocation4_spill]] %s3014_s2 }
   0x4   :  { %3051 = sst [smem:[#allocation5_spill]] %s3015_s3  ;;  %s2654_s3 = smov 0  }
   0x5   :  { %3052 = sst [smem:[#allocation6_spill]] %s3016_s4 }
   0x6   :  { %3053 = sst [smem:[#allocation7_spill]] %s3017_s5 }
   0x7   :  { %3054 = sst [smem:[#allocation8_spill]] %s3018_s6 }
   0x8 LB: > { %s2194_s28 = sadd.s32 4294967295, %s2520_s3   ;;  %p2198_p0 = scmp.ge.s32.totalorder %s2520_s3, 1  ;;  %s2520_s3 = sphi %s2654_s3, %s32_s3  }
   0x9   : > { %p620_p1 = scmp.lt.s32.totalorder %s2520_s3, 3 }
   0xb   : > { %p621_p2 = pnand %p2198_p0, %p620_p1 }
   0xc   : > { %s3055_s4 = sld [smem:[#allocation4_spill]] (!%p621_p2)  ;;  %p684_p3 = scmp.lt.s32.totalorder (!%p621_p2), %s2194_s28, 1  ;;  %v2522_v3 = vmov (!%p621_p2), 0.0   ;;  %vm2523_vm0 = vmmov (!%p621_p2), 0   ;;  %vm713_vm1 = vcmask (!%p621_p2), 261120   ;;  %vm761_vm2 = vcmask (!%p621_p2), 64512  }
   0xd   : > { %624 = sbr.rel (%p621_p2) target bundleno = 4287 (0x10bf), region = 108  ;;  %2295 = vmatprep.subr.bf16.mxu1 (!%p621_p2), %v2522_v3  ;;  %2299 = vmatprep.mubr.msk.bf16.mxu1 (!%p621_p2), %vm2523_vm0, %v2522_v3  ;;  %s3056_s27 = sld [smem:[#allocation2_spill]] (!%p621_p2)  ;;  %vm809_vm3 = vcmask (!%p621_p2), 36864   ;;  %vm828_vm4 = vcmask (!%p621_p2), 1041408   ;;  %vm829_vm5 = vcmask (!%p621_p2), 1042432   ;;  %v2532_v63 = vmov (!%p621_p2), 65535  }
   0xe   : > { %2309 = vmatprep.subr.bf16.mxu0 (!%p621_p2), %v2522_v3  ;;  %2311 = vmatprep.mubr.msk.bf16.mxu0 (!%p621_p2), %vm2523_vm0, %v2522_v3  ;;  %s3057_s0 = sld [smem:[#allocation5_spill]] (!%p621_p2)  ;;  %s2524_s23 = smov (!%p621_p2), 120   ;;  %vm824_vm6 = vcmask (!%p621_p2), 39936   ;;  %vm1221_vm7 = vcmask (!%p621_p2), 130048   ;;  %vm1223_vm8 = vcmask (!%p621_p2), 195584   ;;  %vm1285_vm9 = vcmask (!%p621_p2), 258048  }
   0xf   : > { %s3043_s1 = smov (!%p621_p2), 96   ;;  %s3039_s5 = smov (!%p621_p2), 80   ;;  %vm1477_vm10 = vcmask (!%p621_p2), 61440   ;;  %vm1496_vm11 = vcmask (!%p621_p2), 1043456   ;;  %vm2054_vm12 = vcmask (!%p621_p2), 523264  }
  0x10   : > { %s3037_s24 = smov (!%p621_p2), 88   ;;  %s3038_s6 = smov (!%p621_p2), 72  }
  0x11   : > { %s3046_s26 = smov (!%p621_p2), 112   ;;  %s3044_s2 = smov (!%p621_p2), 104  }
  0x12   : > { %v699_v0 = vld [vmem:[%s3055_s4] sm:$0xff] (!%p621_p2)  ;;  %v700_v1 = vld [vmem:[%s3055_s4 + $0x8] sm:$0xff] (!%p621_p2)  ;;  %v701_v2 = vld [vmem:[%s3055_s4 + $0x10] sm:$0xff] (!%p621_p2)  ;;  %s2535_s30 = smov (!%p621_p2), 56  }
  0x13   : > { %v704_v4 = vpack.c.bf16 (!%p621_p2), %v700_v1, %v699_v0  ;;  %v702_v5 = vld [vmem:[%s3055_s4 + $0x18] sm:$0xff] (!%p621_p2)  ;;  %v830_v0 = vsel (!%p621_p2), %vm828_vm4, 4294967295, %v2532_v63 }
  0x14   : > { %s3072_s28 = smov (!%p684_p3, %s2194_s28), 1  ;;  %v705_v6 = vpack.c.bf16 %v702_v5, %v701_v2  ;;  %v2202_v9 = vld [vmem:[%s3057_s0] ss:$0 sm:$0xff]  ;;  %v831_v5 = vsel %vm829_vm5, %v830_v0, 0  ;;  %s3059_s0 = sld [smem:[#allocation7_spill]] }
  0x15   : > { %2296 = vmatpush3.bf16.msra.mxu1 %v704_v4  ;;  %s2681_s25 = sshll.u32 %s3072_s28, 3  ;;  %s2534_s28 = smov 40  }
  0x16   : > { %2297 = vmatprep.subr.bf16.mxu1 %v2522_v3  ;;  %s687_s29 = scalar_lea.vmem %s3056_s27, %s2681_s25  ;;  %s2531_s27 = smov 64  }
  0x17   : > { %v2687_v7 = vld [vmem:[%s687_s29] sm:$0x1f]  ;;  %s2533_s29 = smov 48  }
  0x18   : > { %v703_v8 = vpack.c.bf16 %v2687_v7, %v2687_v7 }
  0x19   : > { %2298 = vmatpush3.bf16.msra.mxu1 %v705_v6 }
  0x1a   : > { %2303 = vmatprep.subr.bf16.mxu1 %v2522_v3 }
  0x1c   : > { %2300 = vmatmul.mubr.msk.bf16.vlgmr.msra.gmra.mrb[0].mxu1 %vm713_vm1, %v703_v8 }
  0x1d   : > { %2305 = vmatprep.mubr.msk.bf16.mxu1 %vm2523_vm0, %v2522_v3 }
  0xef   : > { %v751_v10 = vpop.f32.mrb[0].mxu1 }
  0xf0   : > { %v752_v11 = vadd.f32 %v2202_v9, %v751_v10  ;;  %v2301_v12 = vpop.f32.mrb[1].mxu1 }
  0xf1   : > { %v754_v13 = vpop.f32.mrb[2].mxu1 }
  0xf2   : > { %v2698_v14 = vpack.c.bf16 %v752_v11, %v752_v11  ;;  %v2302_v15 = vpop.f32.mrb[3].mxu1 }
  0xf4   : > { %875 = vrot.lane.b32.xlu1 %v2698_v14, %s2524_s23  ;;  %759 = vrot.lane.b32.xlu0 %v2698_v14, %s3043_s1 }
  0xf8   : > { %988 = vrot.lane.b32.xlu1 %v2698_v14, %s3039_s5  ;;  %877 = vrot.lane.b32.xlu0 %v2698_v14, %s3037_s24  ;;  %s3042_s24 = smov 8   ;;  %s3060_s5 = sld [smem:[#allocation3_spill]] }
  0xfc   : > { %1099 = vrot.lane.b32.xlu1 %v2698_v14, %s3038_s6  ;;  %986 = vrot.lane.b32.xlu0 %v2698_v14, %s3046_s26  ;;  %s3063_s6 = smov 104  }
  0xfe   : > { %s691_s26 = scalar_lea.vmem %s3060_s5, %s2681_s25  ;;  %s3065_s5 = smov 80  }
 0x100   : > { %1097 = vrot.lane.b32.xlu0 %v2698_v14, %s3044_s2 }
 0x166   : > { %v760_v16 = vpop.permute.xlu0 %759  ;;  %v876_v19 = vpop.permute.xlu1 %875 }
 0x167   : > { %v766_v17 = vsel %vm761_vm2, %v760_v16, 0 }
 0x168   : > { %2304 = vmatpush3.bf16.xpose.msra.mxu1 %v766_v17 }
 0x169   : > { %2315 = vmatprep.subr.bf16.mxu1 %v2522_v3 }
 0x16a   : > { %v878_v18 = vpop.permute.xlu0 %877  ;;  %v989_v21 = vpop.permute.xlu1 %988 }
 0x16b   : > { %v883_v20 = vsel %vm761_vm2, %v878_v18, 0  ;;  %v994_v22 = vsel %vm761_vm2, %v989_v21, 0 }
 0x16e   : > { %v1100_v23 = vpop.permute.xlu1 %1099  ;;  %v987_v24 = vpop.permute.xlu0 %986 }
 0x16f   : > { %2306 = vmatmul.mubr.msk.bf16.vlgmr.msra.gmra.mrb[4].mxu1 %vm761_vm2, %v2698_v14  ;;  %v1105_v25 = vsel %vm761_vm2, %v1100_v23, 0 }
 0x170   : > { %2316 = vmatpush3.bf16.xpose.msra.mxu1 %v883_v20  ;;  %2317 = vmatprep.mubr.msk.bf16.mxu1 %vm2523_vm0, %v2522_v3 }
 0x171   : > { %2327 = vmatprep.subr.bf16.mxu1 %v2522_v3 }
 0x172   : > { %v1098_v26 = vpop.permute.xlu0 %1097 }
 0x177   : > { %2318 = vmatmul.mubr.msk.bf16.vlgmr.msra.gmra.mrb[8].mxu1 %vm761_vm2, %v876_v19 }
 0x178   : > { %2328 = vmatpush3.bf16.xpose.msra.mxu1 %v994_v22  ;;  %2329 = vmatprep.mubr.msk.bf16.mxu1 %vm2523_vm0, %v2522_v3 }
 0x179   : > { %2339 = vmatprep.subr.bf16.mxu1 %v2522_v3 }
 0x17f   : > { %2330 = vmatmul.mubr.msk.bf16.vlgmr.msra.gmra.mrb[12].mxu1 %vm761_vm2, %v987_v24 }
 0x180   : > { %2340 = vmatpush3.bf16.xpose.msra.mxu1 %v1105_v25  ;;  %2341 = vmatprep.mubr.msk.bf16.mxu1 %vm2523_vm0, %v2522_v3 }
 0x181   : > { %2351 = vmatprep.subr.bf16.mxu1 %v2522_v3 }
 0x187   : > { %2342 = vmatmul.mubr.msk.bf16.vlgmr.msra.gmra.mrb[16].mxu1 %vm761_vm2, %v1098_v26 }
 0x188   : > { %2355 = vmatprep.mubr.msk.bf16.mxu1 %vm2523_vm0, %v2522_v3 }
 0x242   : > { %v802_v27 = vpop.f32.mrb[4].mxu1 }
 0x243   : > { %v808_v28 = vmul.f32 0.35355338, %v802_v27  ;;  %v2307_v29 = vpop.f32.mrb[5].mxu1 }
 0x244   : > { %v805_v30 = vpop.f32.mrb[6].mxu1 }
 0x245   : > { %v2308_v31 = vpop.f32.mrb[7].mxu1  ;;  %v810_v32 = vsel %vm809_vm3, %v808_v28, -inf }
 0x246   : > { %811 = vmax.xlane.f32.xlu1 %v810_v32 }
 0x24a   : > { %v919_v33 = vpop.f32.mrb[8].mxu1 }
 0x24b   : > { %v925_v34 = vmul.f32 0.35355338, %v919_v33  ;;  %v2319_v35 = vpop.f32.mrb[9].mxu1 }
 0x24c   : > { %v922_v36 = vpop.f32.mrb[10].mxu1 }
 0x24d   : > { %v2320_v37 = vpop.f32.mrb[11].mxu1  ;;  %v926_v38 = vsel %vm809_vm3, %v925_v34, -inf }
 0x24e   : > { %927 = vmax.xlane.f32.xlu0 %v926_v38 }
 0x252   : > { %v1030_v39 = vpop.f32.mrb[12].mxu1 }
 0x253   : > { %v1036_v40 = vmul.f32 0.35355338, %v1030_v39  ;;  %v2331_v41 = vpop.f32.mrb[13].mxu1 }
 0x254   : > { %v1033_v42 = vpop.f32.mrb[14].mxu1 }
 0x255   : > { %v2332_v43 = vpop.f32.mrb[15].mxu1  ;;  %v1037_v44 = vsel %vm809_vm3, %v1036_v40, -inf }
 0x256   : > { %1038 = vmax.xlane.f32.xlu0 %v1037_v44 }
 0x25a   : > { %v1141_v45 = vpop.f32.mrb[16].mxu1 }
 0x25b   : > { %v1147_v46 = vmul.f32 0.35355338, %v1141_v45  ;;  %v2343_v47 = vpop.f32.mrb[17].mxu1 }
 0x25c   : > { %v1144_v48 = vpop.f32.mrb[18].mxu1 }
 0x25d   : > { %v2344_v49 = vpop.f32.mrb[19].mxu1  ;;  %v1148_v50 = vsel %vm809_vm3, %v1147_v46, -inf }
 0x25e   : > { %1149 = vmax.xlane.f32.xlu1 %v1148_v50 }
 0x26f   : > { %822 = vrot.lane.b32.xlu1 %v2698_v14, %s2531_s27 }
 0x2d3   : > { %v812_v51 = vpop.xlane.xlu1 %811 }
 0x2d4   : > { %v813_v52 = vsub.f32 %v808_v28, %v812_v51 }
 0x2d6   : > { %v814_v53 = vmul.f32 1.442695, %v813_v52 }
 0x2d8   : > { %2476 = vpow2.f32 %v814_v53 }
 0x2db   : > { %v928_v54 = vpop.xlane.xlu0 %927 }
 0x2dc   : > { %v929_v55 = vsub.f32 %v925_v34, %v928_v54 }
 0x2de   : > { %v930_v56 = vmul.f32 1.442695, %v929_v55 }
 0x2e0   : > { %2478 = vpow2.f32 %v930_v56 }
 0x2e2   : > { %v2477_v57 = vpop.eup %2476 }
 0x2e3   : > { %v1039_v58 = vpop.xlane.xlu0 %1038  ;;  %v816_v59 = vsel %vm809_vm3, %v2477_v57, 0.0 }
 0x2e4   : > { %v1040_v60 = vsub.f32 %v1036_v40, %v1039_v58  ;;  %817 = vadd.xlane.f32.xlu0 %v816_v59 }
 0x2e6   : > { %v1041_v61 = vmul.f32 1.442695, %v1040_v60 }
 0x2e8   : > { %2480 = vpow2.f32 %v1041_v61 }
 0x2ea   : > { %v2479_v62 = vpop.eup %2478 }
 0x2eb   : > { %v1150_v1 = vpop.xlane.xlu1 %1149  ;;  %v932_v2 = vsel %vm809_vm3, %v2479_v62, 0.0 }
 0x2ec   : > { %v1151_v4 = vsub.f32 %v1147_v46, %v1150_v1  ;;  %933 = vadd.xlane.f32.xlu1 %v932_v2  ;;  %v2212_v1 = vld [vmem:[%s3059_s0] ss:$0 sm:$0xff] }
 0x2ee   : > { %v1152_v6 = vmul.f32 1.442695, %v1151_v4 }
 0x2ef   : > { %v823_v8 = vpop.permute.xlu1 %822 }
 0x2f0   : > { %2482 = vpow2.f32 %v1152_v6  ;;  %v833_v9 = vand.u32 %v831_v5, %v823_v8 }
 0x2f2   : > { %v2481_v10 = vpop.eup %2480  ;;  %2310 = vmatpush3.bf16.msra.mxu0 %v833_v9 }
 0x2f3   : > { %v1043_v11 = vsel %vm809_vm3, %v2481_v10, 0.0  ;;  %2321 = vmatprep.subr.bf16.mxu0 %v2522_v3 }
 0x2f4   : > { %1044 = vadd.xlane.f32.xlu0 %v1043_v11 }
 0x2fa   : > { %v2483_v12 = vpop.eup %2482 }
 0x2fb   : > { %v1154_v13 = vsel %vm809_vm3, %v2483_v12, 0.0 }
 0x2fc   : > { %1155 = vadd.xlane.f32.xlu0 %v1154_v13 }
 0x2fd   : > { %1049 = vrot.lane.b32.xlu1 %v2698_v14, %s2533_s29  ;;  %s3058_s29 = sld [smem:[#allocation6_spill]] }
 0x301   : > { %1160 = vrot.lane.b32.xlu1 %v2698_v14, %s2534_s28  ;;  %s3041_s28 = smov 16  }
 0x303   : > { %v1225_v40 = vld [vmem:[%s3058_s29] sm:$0xff]  ;;  %v1226_v41 = vld [vmem:[%s3058_s29 + $0x8] sm:$0xff]  ;;  %v1227_v46 = vld [vmem:[%s3058_s29 + $0x10] sm:$0xff] }
 0x304   : > { %v1230_v42 = vpack.c.bf16 %v1226_v41, %v1225_v40  ;;  %v1228_v47 = vld [vmem:[%s3058_s29 + $0x18] sm:$0xff] }
 0x305   : > { %v1231_v49 = vpack.c.bf16 %v1228_v47, %v1227_v46  ;;  %v2216_v47 = vld [vmem:[%s3021_s9] ss:$0 sm:$0xff] }
 0x306   : > { %2352 = vmatpush3.bf16.msra.mxu1 %v1230_v42 }
 0x307   : > { %2353 = vmatprep.subr.bf16.mxu1 %v2522_v3 }
 0x30a   : > { %2354 = vmatpush3.bf16.msra.mxu1 %v1231_v49 }
 0x30b   : > { %2367 = vmatprep.subr.bf16.mxu1 %v2522_v3 }
 0x312   : > { %938 = vrot.lane.b32.xlu0 %v2698_v14, %s2535_s30  ;;  %s3040_s30 = smov 24  }
 0x371   : > { %v818_v15 = vpop.xlane.xlu0 %817 }
 0x372   : > { %2484 = vrcp.f32 %v818_v15 }
 0x379   : > { %v934_v17 = vpop.xlane.xlu1 %933 }
 0x37a   : > { %2486 = vrcp.f32 %v934_v17  ;;  %v1371_v17 = vld [vmem:[%s3022_s10] sm:$0xff] }
 0x37c   : > { %v2485_v16 = vpop.eup %2484 }
 0x37d   : > { %v820_v18 = vmul.f32 %v2485_v16, %v2477_v57  ;;  %v1050_v25 = vpop.permute.xlu1 %1049 }
 0x37e   : > { %v1055_v28 = vand.u32 %v1050_v25, %v831_v5 }
 0x37f   : > { %v821_v19 = vpack.c.bf16 %v820_v18, %v820_v18  ;;  %v1372_v18 = vld [vmem:[%s3022_s10 + $0x8] sm:$0xff] }
 0x381   : > { %2312 = vmatmul.mubr.msk.bf16.vlgmr.msra.gmra.mrb[0].mxu0 %vm824_vm6, %v821_v19  ;;  %v1045_v20 = vpop.xlane.xlu0 %1044  ;;  %v1161_v30 = vpop.permute.xlu1 %1160  ;;  %v1373_v19 = vld [vmem:[%s3022_s10 + $0x10] sm:$0xff] }
 0x382   : > { %2323 = vmatprep.mubr.msk.bf16.mxu0 %vm2523_vm0, %v2522_v3  ;;  %2488 = vrcp.f32 %v1045_v20  ;;  %v1166_v33 = vand.u32 %v1161_v30, %v831_v5  ;;  %v1374_v20 = vld [vmem:[%s3022_s10 + $0x18] sm:$0xff] }
 0x384   : > { %v2487_v22 = vpop.eup %2486 }
 0x385   : > { %v936_v23 = vmul.f32 %v2487_v22, %v2479_v62  ;;  %v698_v22 = vld [vmem:[%s691_s26] sm:$0xff]  ;;  %s3062_s26 = smov 112  }
 0x387   : > { %v937_v26 = vpack.c.bf16 %v936_v23, %v936_v23  ;;  %v1375_v23 = vpack.c.bf16 %v698_v22, %v698_v22 }
 0x389   : > { %v1156_v21 = vpop.xlane.xlu0 %1155 }
 0x38a   : > { %2490 = vrcp.f32 %v1156_v21  ;;  %v1377_v21 = vpack.c.bf16 %v1374_v20, %v1373_v19 }
 0x38c   : > { %v2489_v27 = vpop.eup %2488 }
 0x38d   : > { %v939_v24 = vpop.permute.xlu0 %938  ;;  %v1047_v29 = vmul.f32 %v2489_v27, %v2481_v10  ;;  %v1317_v27 = vld [vmem:[%s3020_s8 + $0x18] sm:$0xff] }
 0x38e   : > { %v944_v14 = vand.u32 %v939_v24, %v831_v5  ;;  %v1314_v24 = vld [vmem:[%s3020_s8] sm:$0xff] }
 0x38f   : > { %v1048_v31 = vpack.c.bf16 %v1047_v29, %v1047_v29 }
 0x390   : > { %2322 = vmatpush3.bf16.msra.mxu0 %v944_v14  ;;  %v1315_v14 = vld [vmem:[%s3020_s8 + $0x8] sm:$0xff] }
 0x391   : > { %2333 = vmatprep.subr.bf16.mxu0 %v2522_v3  ;;  %v1319_v25 = vpack.c.bf16 %v1315_v14, %v1314_v24 }
 0x393   : > { %2324 = vmatmul.mubr.msk.bf16.vlgmr.msra.gmra.mrb[4].mxu0 %vm824_vm6, %v937_v26  ;;  %v1316_v26 = vld [vmem:[%s3020_s8 + $0x10] sm:$0xff] }
 0x394   : > { %2334 = vmatpush3.bf16.msra.mxu0 %v1055_v28  ;;  %2335 = vmatprep.mubr.msk.bf16.mxu0 %vm2523_vm0, %v2522_v3  ;;  %v2491_v32 = vpop.eup %2490  ;;  %v1320_v28 = vpack.c.bf16 %v1317_v27, %v1316_v26 }
 0x395   : > { %2345 = vmatprep.subr.bf16.mxu0 %v2522_v3  ;;  %v1158_v34 = vmul.f32 %v2491_v32, %v2483_v12 }
 0x397   : > { %v1159_v35 = vpack.c.bf16 %v1158_v34, %v1158_v34 }
 0x39b   : > { %2336 = vmatmul.mubr.msk.bf16.vlgmr.msra.gmra.mrb[8].mxu0 %vm824_vm6, %v1048_v31 }
 0x39c   : > { %2346 = vmatpush3.bf16.msra.mxu0 %v1166_v33  ;;  %2347 = vmatprep.mubr.msk.bf16.mxu0 %vm2523_vm0, %v2522_v3 }
 0x39d   : > { %2359 = vmatprep.subr.bf16.mxu0 %v2522_v3 }
 0x3a3   : > { %2348 = vmatmul.mubr.msk.bf16.vlgmr.msra.gmra.mrb[12].mxu0 %vm824_vm6, %v1159_v35  ;;  %v2215_v35 = vld [vmem:[%s3019_s7] ss:$0 sm:$0xff] }
 0x3a4   : > { %2363 = vmatprep.mubr.msk.bf16.mxu0 %vm2523_vm0, %v2522_v3  ;;  %2360 = vmatpush3.bf16.msra.mxu0 %v1319_v25 }
 0x3a5   : > { %2361 = vmatprep.subr.bf16.mxu0 %v2522_v3 }
 0x3a8   : > { %2362 = vmatpush3.bf16.msra.mxu0 %v1320_v28 }
 0x3a9   : > { %2375 = vmatprep.subr.bf16.mxu0 %v2522_v3 }
 0x454   : > { %v869_v36 = vpop.f32.mrb[0].mxu0 }
 0x455   : > { %v2313_v37 = vpop.f32.mrb[1].mxu0 }
 0x456   : > { %v872_v38 = vpop.f32.mrb[2].mxu0 }
 0x457   : > { %v2314_v39 = vpop.f32.mrb[3].mxu0 }
 0x458   : > { %v2218_v39 = vld [vmem:[%s3023_s11] ss:$0 sm:$0xff] }
 0x466   : > { %v980_v43 = vpop.f32.mrb[4].mxu0 }
 0x467   : > { %1209 = vrot.lane.b32.xlu1 %v980_v43, %s3042_s24  ;;  %v2325_v44 = vpop.f32.mrb[5].mxu0 }
 0x468   : > { %v983_v45 = vpop.f32.mrb[6].mxu0 }
 0x469   : > { %v2326_v48 = vpop.f32.mrb[7].mxu0 }
 0x46e   : > { %v1091_v50 = vpop.f32.mrb[8].mxu0 }
 0x46f   : > { %1213 = vrot.lane.b32.xlu0 %v1091_v50, %s3041_s28  ;;  %v2337_v51 = vpop.f32.mrb[9].mxu0  ;;  %s3061_s28 = sld [smem:[#allocation8_spill]] }
 0x470   : > { %v1094_v52 = vpop.f32.mrb[10].mxu0 }
 0x471   : > { %v2338_v53 = vpop.f32.mrb[11].mxu0 }
 0x475   : > { %v2214_v33 = vld [vmem:[%s3061_s28] ss:$0 sm:$0xff]  ;;  %s3066_s28 = smov 72  }
 0x476   : > { %v1202_v54 = vpop.f32.mrb[12].mxu0 }
 0x477   : > { %1217 = vrot.lane.b32.xlu1 %v1202_v54, %s3040_s30  ;;  %v2349_v55 = vpop.f32.mrb[13].mxu0  ;;  %s3067_s30 = smov 88  }
 0x478   : > { %v1205_v56 = vpop.f32.mrb[14].mxu0 }
 0x479   : > { %v2350_v57 = vpop.f32.mrb[15].mxu0 }
 0x4d9   : > { %v1210_v58 = vpop.permute.xlu1 %1209 }
 0x4da   : > { %v1220_v60 = vsel %vm761_vm2, %v869_v36, %v1210_v58 }
 0x4e1   : > { %v1214_v59 = vpop.permute.xlu0 %1213 }
 0x4e2   : > { %v1222_v61 = vsel %vm1221_vm7, %v1220_v60, %v1214_v59 }
 0x4e9   : > { %v1218_v62 = vpop.permute.xlu1 %1217 }
 0x4ea   : > { %v1224_v63 = vsel %vm1223_vm8, %v1222_v61, %v1218_v62 }
 0x4eb   : > { %v1229_v0 = vpack.c.bf16 %v1224_v63, %v1224_v63 }
 0x4ed   : > { %2356 = vmatmul.mubr.msk.bf16.vlgmr.msra.gmra.mrb[20].mxu1 %vm713_vm1, %v1229_v0 }
 0x4ee   : > { %2371 = vmatprep.mubr.msk.bf16.mxu1 %vm2523_vm0, %v2522_v3 }
 0x5c0   : > { %v1276_v2 = vpop.f32.mrb[20].mxu1 }
 0x5c1   : > { %v1277_v4 = vadd.f32 %v2212_v1, %v1276_v2  ;;  %v2357_v5 = vpop.f32.mrb[21].mxu1 }
 0x5c2   : > { %v1279_v6 = vpop.f32.mrb[22].mxu1 }
 0x5c3   : > { %v2358_v8 = vpop.f32.mrb[23].mxu1  ;;  %v1282_v9 = vadd.f32 %v1277_v4, %v2687_v7  ;;  %v1376_v7 = vpack.c.bf16 %v1372_v18, %v1371_v17 }
 0x5c5   : > { %v1286_v10 = vsel %vm1285_vm9, %v1282_v9, 0.0  ;;  %2368 = vmatpush3.bf16.msra.mxu1 %v1376_v7 }
 0x5c6   : > { %1287 = vadd.xlane.f32.xlu0 %v1286_v10  ;;  %2369 = vmatprep.subr.bf16.mxu1 %v2522_v3 }
 0x5c9   : > { %2370 = vmatpush3.bf16.msra.mxu1 %v1377_v21 }
 0x5ca   : > { %2381 = vmatprep.subr.bf16.mxu1 %v2522_v3 }
 0x5cc   : > { %2372 = vmatmul.mubr.msk.bf16.vlgmr.msra.gmra.mrb[24].mxu1 %vm713_vm1, %v1375_v23 }
 0x5cd   : > { %2383 = vmatprep.mubr.msk.bf16.mxu1 %vm2523_vm0, %v2522_v3 }
 0x653   : > { %v1288_v11 = vpop.xlane.xlu0 %1287 }
 0x654   : > { %v1290_v12 = vmul.f32 0.03125, %v1288_v11 }
 0x656   : > { %v1291_v13 = vsub.f32 %v1282_v9, %v1290_v12 }
 0x658   : > { %v1292_v15 = vmul.f32 %v1291_v13, %v1291_v13 }
 0x65a   : > { %v1293_v16 = vsel %vm1285_vm9, %v1292_v15, 0.0 }
 0x65b   : > { %1294 = vadd.xlane.f32.xlu1 %v1293_v16 }
 0x69f   : > { %v1422_v40 = vpop.f32.mrb[24].mxu1 }
 0x6a0   : > { %v1423_v41 = vadd.f32 %v2218_v39, %v1422_v40  ;;  %v2373_v42 = vpop.f32.mrb[25].mxu1 }
 0x6a1   : > { %v1425_v43 = vpop.f32.mrb[26].mxu1 }
 0x6a2   : > { %v2843_v44 = vpack.c.bf16 %v1423_v41, %v1423_v41  ;;  %v2374_v45 = vpop.f32.mrb[27].mxu1 }
 0x6a4   : > { %1543 = vrot.lane.b32.xlu0 %v2843_v44, %s2524_s23  ;;  %v1434_v46 = vsel %vm761_vm2, %v2843_v44, 0 }
 0x6a8   : > { %1654 = vrot.lane.b32.xlu0 %v2843_v44, %s3062_s26 }
 0x6ac   : > { %1765 = vrot.lane.b32.xlu0 %v2843_v44, %s3063_s6 }
 0x6e8   : > { %v1295_v29 = vpop.xlane.xlu1 %1294 }
 0x6e9   : > { %v1296_v30 = vmul.f32 0.03125, %v1295_v29 }
 0x6eb   : > { %v1297_v31 = vadd.f32 1e-05, %v1296_v30 }
 0x6ed   : > { %2492 = vrsqrt.f32 %v1297_v31 }
 0x6f7   : > { %v2493_v32 = vpop.eup %2492 }
 0x6f8   : > { %v1299_v34 = vmul.f32 %v2493_v32, %v1291_v13 }
 0x6fa   : > { %v1306_v36 = vmul.f32 %v2214_v33, %v1299_v34 }
 0x6fc   : > { %v2833_v37 = vadd.f32 %v2215_v35, %v1306_v36 }
 0x6fe   : > { %v1318_v38 = vpack.c.bf16 %v2833_v37, %v2833_v37 }
 0x700   : > { %2364 = vmatmul.mubr.msk.bf16.vlgmr.msra.gmra.mrb[16].mxu0 %vm713_vm1, %v1318_v38 }
 0x701   : > { %2377 = vmatprep.mubr.msk.bf16.mxu0 %vm2523_vm0, %v2522_v3  ;;  %2376 = vmatpush3.bf16.xpose.msra.mxu0 %v1434_v46 }
 0x702   : > { %2387 = vmatprep.subr.bf16.mxu0 %v2522_v3 }
 0x716   : > { %v1544_v52 = vpop.permute.xlu0 %1543 }
 0x717   : > { %v1549_v55 = vsel %vm761_vm2, %v1544_v52, 0 }
 0x71a   : > { %v1655_v56 = vpop.permute.xlu0 %1654 }
 0x71b   : > { %v1660_v58 = vsel %vm761_vm2, %v1655_v56, 0 }
 0x71e   : > { %v1766_v59 = vpop.permute.xlu0 %1765 }
 0x71f   : > { %v1771_v61 = vsel %vm761_vm2, %v1766_v59, 0 }
 0x7d3   : > { %v1365_v48 = vpop.f32.mrb[16].mxu0 }
 0x7d4   : > { %v1366_v49 = vadd.f32 %v2216_v47, %v1365_v48  ;;  %v2365_v50 = vpop.f32.mrb[17].mxu0 }
 0x7d5   : > { %v1368_v51 = vpop.f32.mrb[18].mxu0 }
 0x7d6   : > { %v1428_v53 = vpack.c.bf16 %v1366_v49, %v1366_v49  ;;  %v2366_v54 = vpop.f32.mrb[19].mxu0 }
 0x7d8   : > { %1541 = vrot.lane.b32.xlu1 %v1428_v53, %s2524_s23  ;;  %2378 = vmatmul.mubr.msk.bf16.vlgmr.msra.gmra.mrb[20].mxu0 %vm761_vm2, %v1428_v53  ;;  %s3064_s23 = smov 96  }
 0x7d9   : > { %2388 = vmatpush3.bf16.xpose.msra.mxu0 %v1549_v55  ;;  %2389 = vmatprep.mubr.msk.bf16.mxu0 %vm2523_vm0, %v2522_v3 }
 0x7da   : > { %2399 = vmatprep.subr.bf16.mxu0 %v2522_v3 }
 0x7dc   : > { %1652 = vrot.lane.b32.xlu1 %v1428_v53, %s3062_s26 }
 0x7e0   : > { %1763 = vrot.lane.b32.xlu1 %v1428_v53, %s3063_s6  ;;  %s3068_s6 = smov 8  }
 0x84a   : > { %v1542_v57 = vpop.permute.xlu1 %1541 }
 0x84b   : > { %2390 = vmatmul.mubr.msk.bf16.vlgmr.msra.gmra.mrb[24].mxu0 %vm761_vm2, %v1542_v57 }
 0x84c   : > { %2400 = vmatpush3.bf16.xpose.msra.mxu0 %v1660_v58  ;;  %2401 = vmatprep.mubr.msk.bf16.mxu0 %vm2523_vm0, %v2522_v3 }
 0x84d   : > { %2411 = vmatprep.subr.bf16.mxu0 %v2522_v3 }
 0x84e   : > { %v1653_v60 = vpop.permute.xlu1 %1652 }
 0x852   : > { %v1764_v62 = vpop.permute.xlu1 %1763 }
 0x853   : > { %2402 = vmatmul.mubr.msk.bf16.vlgmr.msra.gmra.mrb[28].mxu0 %vm761_vm2, %v1653_v60 }
 0x854   : > { %2412 = vmatpush3.bf16.xpose.msra.mxu0 %v1771_v61  ;;  %2413 = vmatprep.mubr.msk.bf16.mxu0 %vm2523_vm0, %v2522_v3 }
 0x855   : > { %2423 = vmatprep.subr.bf16.mxu0 %v2522_v3 }
 0x85b   : > { %2414 = vmatmul.mubr.msk.bf16.vlgmr.msra.gmra.mrb[32].mxu0 %vm761_vm2, %v1764_v62 }
 0x85c   : > { %2427 = vmatprep.mubr.msk.bf16.mxu0 %vm2523_vm0, %v2522_v3 }
 0x8ab   : > { %v1470_v63 = vpop.f32.mrb[20].mxu0 }
 0x8ac   : > { %v1476_v0 = vmul.f32 0.35355338, %v1470_v63  ;;  %v2379_v1 = vpop.f32.mrb[21].mxu0 }
 0x8ad   : > { %v1473_v2 = vpop.f32.mrb[22].mxu0 }
 0x8ae   : > { %v2380_v4 = vpop.f32.mrb[23].mxu0  ;;  %v1478_v5 = vsel %vm1477_vm10, %v1476_v0, -inf }
 0x8af   : > { %1479 = vmax.xlane.f32.xlu0 %v1478_v5 }
 0x91e   : > { %v1585_v6 = vpop.f32.mrb[24].mxu0 }
 0x91f   : > { %v1591_v8 = vmul.f32 0.35355338, %v1585_v6  ;;  %v2391_v9 = vpop.f32.mrb[25].mxu0 }
 0x920   : > { %v1588_v10 = vpop.f32.mrb[26].mxu0 }
 0x921   : > { %v2392_v11 = vpop.f32.mrb[27].mxu0  ;;  %v1592_v12 = vsel %vm1477_vm10, %v1591_v8, -inf }
 0x922   : > { %1593 = vmax.xlane.f32.xlu1 %v1592_v12  ;;  %v1889_v11 = vld [vmem:[%s3024_s12] sm:$0xff]  ;;  %v1890_v12 = vld [vmem:[%s3024_s12 + $0x8] sm:$0xff] }
 0x926   : > { %v1696_v13 = vpop.f32.mrb[28].mxu0 }
 0x927   : > { %v1702_v15 = vmul.f32 0.35355338, %v1696_v13  ;;  %v2403_v16 = vpop.f32.mrb[29].mxu0  ;;  %v1894_v13 = vpack.c.bf16 %v1890_v12, %v1889_v11  ;;  %v2040_v11 = vld [vmem:[%s3030_s18 + $0x30] sm:$0xff]  ;;  %v2041_v12 = vld [vmem:[%s3030_s18 + $0x38] sm:$0xff] }
 0x928   : > { %v1699_v17 = vpop.f32.mrb[30].mxu0 }
 0x929   : > { %v2404_v18 = vpop.f32.mrb[31].mxu0  ;;  %v1703_v7 = vsel %vm1477_vm10, %v1702_v15, -inf  ;;  %2424 = vmatpush3.bf16.msra.mxu0 %v1894_v13  ;;  %v2046_v13 = vpack.c.bf16 %v2041_v12, %v2040_v11 }
 0x92a   : > { %1704 = vmax.xlane.f32.xlu0 %v1703_v7  ;;  %2425 = vmatprep.subr.bf16.mxu0 %v2522_v3  ;;  %v1891_v18 = vld [vmem:[%s3024_s12 + $0x10] sm:$0xff]  ;;  %v1892_v7 = vld [vmem:[%s3024_s12 + $0x18] sm:$0xff] }
 0x92e   : > { %v1807_v19 = vpop.f32.mrb[32].mxu0 }
 0x92f   : > { %v1813_v20 = vmul.f32 0.35355338, %v1807_v19  ;;  %v2415_v21 = vpop.f32.mrb[33].mxu0 }
 0x930   : > { %v1810_v22 = vpop.f32.mrb[34].mxu0 }
 0x931   : > { %v2416_v23 = vpop.f32.mrb[35].mxu0  ;;  %v1814_v24 = vsel %vm1477_vm10, %v1813_v20, -inf }
 0x932   : > { %1815 = vmax.xlane.f32.xlu0 %v1814_v24 }
 0x93c   : > { %v1480_v14 = vpop.xlane.xlu0 %1479 }
 0x93d   : > { %v1481_v25 = vsub.f32 %v1476_v0, %v1480_v14 }
 0x93f   : > { %v1482_v26 = vmul.f32 1.442695, %v1481_v25 }
 0x941   : > { %2494 = vpow2.f32 %v1482_v26 }
 0x94b   : > { %v2495_v27 = vpop.eup %2494 }
 0x94c   : > { %v1484_v28 = vsel %vm1477_vm10, %v2495_v27, 0.0 }
 0x94d   : > { %1485 = vadd.xlane.f32.xlu1 %v1484_v28 }
 0x95e   : > { %1491 = vrot.lane.b32.xlu1 %v2843_v44, %s3064_s23  ;;  %s695_s23 = scalar_lea.vmem %s3034_s22, %s2681_s25 }
 0x9af   : > { %v1594_v29 = vpop.xlane.xlu1 %1593 }
 0x9b0   : > { %v1595_v30 = vsub.f32 %v1591_v8, %v1594_v29 }
 0x9b2   : > { %v1596_v31 = vmul.f32 1.442695, %v1595_v30 }
 0x9b4   : > { %2496 = vpow2.f32 %v1596_v31 }
 0x9b7   : > { %v1705_v32 = vpop.xlane.xlu0 %1704 }
 0x9b8   : > { %v1706_v33 = vsub.f32 %v1702_v15, %v1705_v32 }
 0x9ba   : > { %v1707_v34 = vmul.f32 1.442695, %v1706_v33 }
 0x9bc   : > { %2498 = vpow2.f32 %v1707_v34 }
 0x9be   : > { %v2497_v35 = vpop.eup %2496 }
 0x9bf   : > { %v1816_v36 = vpop.xlane.xlu0 %1815  ;;  %v1598_v38 = vsel %vm1477_vm10, %v2497_v35, 0.0 }
 0x9c0   : > { %v1817_v39 = vsub.f32 %v1813_v20, %v1816_v36  ;;  %1599 = vadd.xlane.f32.xlu0 %v1598_v38  ;;  %v1895_v20 = vpack.c.bf16 %v1892_v7, %v1891_v18 }
 0x9c2   : > { %v1818_v40 = vmul.f32 1.442695, %v1817_v39  ;;  %2426 = vmatpush3.bf16.msra.mxu0 %v1895_v20 }
 0x9c3   : > { %2439 = vmatprep.subr.bf16.mxu0 %v2522_v3 }
 0x9c4   : > { %2500 = vpow2.f32 %v1818_v40 }
 0x9c6   : > { %v2499_v41 = vpop.eup %2498 }
 0x9c7   : > { %v1709_v42 = vsel %vm1477_vm10, %v2499_v41, 0.0 }
 0x9c8   : > { %1710 = vadd.xlane.f32.xlu1 %v1709_v42 }
 0x9ce   : > { %v2501_v43 = vpop.eup %2500 }
 0x9cf   : > { %v1820_v45 = vsel %vm1477_vm10, %v2501_v43, 0.0 }
 0x9d0   : > { %1821 = vadd.xlane.f32.xlu0 %v1820_v45 }
 0x9d9   : > { %1715 = vrot.lane.b32.xlu1 %v2843_v44, %s3065_s5 }
 0x9da   : > { %v1486_v46 = vpop.xlane.xlu1 %1485 }
 0x9db   : > { %2502 = vrcp.f32 %v1486_v46 }
 0x9dd   : > { %1826 = vrot.lane.b32.xlu1 %v2843_v44, %s3066_s28  ;;  %s3069_s28 = smov 16  }
 0x9de   : > { %v1492_v47 = vpop.permute.xlu1 %1491 }
 0x9df   : > { %v1498_v48 = vsel %vm1496_vm11, %v1492_v47, 0 }
 0x9e0   : > { %2382 = vmatpush3.bf16.msra.mxu1 %v1498_v48 }
 0x9e1   : > { %2393 = vmatprep.subr.bf16.mxu1 %v2522_v3 }
 0x9e5   : > { %v2503_v49 = vpop.eup %2502 }
 0x9e6   : > { %v1488_v50 = vmul.f32 %v2503_v49, %v2495_v27  ;;  %1604 = vrot.lane.b32.xlu0 %v2843_v44, %s3067_s30  ;;  %s3070_s30 = smov 24  }
 0x9e8   : > { %v1489_v51 = vpack.c.bf16 %v1488_v50, %v1488_v50  ;;  %v1976_v50 = vld [vmem:[%s3028_s16] sm:$0xff] }
 0x9ea   : > { %2384 = vmatmul.mubr.msk.bf16.vlgmr.msra.gmra.mrb[28].mxu1 %vm761_vm2, %v1489_v51  ;;  %v1977_v51 = vld [vmem:[%s3028_s16 + $0x8] sm:$0xff] }
 0x9eb   : > { %2395 = vmatprep.mubr.msk.bf16.mxu1 %vm2523_vm0, %v2522_v3 }
 0xa4d   : > { %v1600_v52 = vpop.xlane.xlu0 %1599 }
 0xa4e   : > { %2504 = vrcp.f32 %v1600_v52  ;;  %v1981_v52 = vpack.c.bf16 %v1977_v51, %v1976_v50 }
 0xa55   : > { %v1711_v53 = vpop.xlane.xlu1 %1710 }
 0xa56   : > { %2506 = vrcp.f32 %v1711_v53  ;;  %v1979_v53 = vld [vmem:[%s3028_s16 + $0x18] sm:$0xff] }
 0xa58   : > { %v2505_v54 = vpop.eup %2504 }
 0xa59   : > { %v1602_v56 = vmul.f32 %v2505_v54, %v2497_v35  ;;  %v1716_v59 = vpop.permute.xlu1 %1715  ;;  %v2228_v35 = vld [vmem:[%s3025_s13] ss:$0 sm:$0xff] }
 0xa5a   : > { %v1721_v61 = vsel %vm1496_vm11, %v1716_v59, 0  ;;  %v2037_v59 = vld [vmem:[%s3030_s18 + $0x18] sm:$0xff] }
 0xa5b   : > { %v1603_v44 = vpack.c.bf16 %v1602_v56, %v1602_v56  ;;  %v2035_v56 = vld [vmem:[%s3030_s18 + $0x8] sm:$0xff] }
 0xa5d   : > { %v1822_v55 = vpop.xlane.xlu0 %1821  ;;  %v1827_v63 = vpop.permute.xlu1 %1826 }
 0xa5e   : > { %2508 = vrcp.f32 %v1822_v55  ;;  %v1832_v2 = vsel %vm1496_vm11, %v1827_v63, 0  ;;  %v2034_v55 = vld [vmem:[%s3030_s18] sm:$0xff] }
 0xa60   : > { %v2507_v60 = vpop.eup %2506 }
 0xa61   : > { %v1605_v57 = vpop.permute.xlu0 %1604  ;;  %v1713_v62 = vmul.f32 %v2507_v60, %v2499_v41 }
 0xa62   : > { %v1610_v58 = vsel %vm1496_vm11, %v1605_v57, 0  ;;  %v2036_v57 = vld [vmem:[%s3030_s18 + $0x10] sm:$0xff] }
 0xa63   : > { %2394 = vmatpush3.bf16.msra.mxu1 %v1610_v58  ;;  %v1714_v0 = vpack.c.bf16 %v1713_v62, %v1713_v62  ;;  %v2043_v58 = vpack.c.bf16 %v2035_v56, %v2034_v55 }
 0xa64   : > { %2405 = vmatprep.subr.bf16.mxu1 %v2522_v3 }
 0xa66   : > { %2396 = vmatmul.mubr.msk.bf16.vlgmr.msra.gmra.mrb[32].mxu1 %vm761_vm2, %v1603_v44  ;;  %v2044_v44 = vpack.c.bf16 %v2037_v59, %v2036_v57 }
 0xa67   : > { %2406 = vmatpush3.bf16.msra.mxu1 %v1721_v61  ;;  %2407 = vmatprep.mubr.msk.bf16.mxu1 %vm2523_vm0, %v2522_v3 }
 0xa68   : > { %2417 = vmatprep.subr.bf16.mxu1 %v2522_v3  ;;  %v2509_v1 = vpop.eup %2508 }
 0xa69   : > { %v1824_v4 = vmul.f32 %v2509_v1, %v2501_v43 }
 0xa6b   : > { %v1825_v5 = vpack.c.bf16 %v1824_v4, %v1824_v4 }
 0xa6e   : > { %2408 = vmatmul.mubr.msk.bf16.vlgmr.msra.gmra.mrb[36].mxu1 %vm761_vm2, %v1714_v0  ;;  %v2230_v0 = vld [vmem:[%s3026_s14] ss:$0 sm:$0xff] }
 0xa6f   : > { %2418 = vmatpush3.bf16.msra.mxu1 %v1832_v2  ;;  %2419 = vmatprep.mubr.msk.bf16.mxu1 %vm2523_vm0, %v2522_v3  ;;  %v2231_v2 = vld [vmem:[%s3027_s15] ss:$0 sm:$0xff] }
 0xa70   : > { %2431 = vmatprep.subr.bf16.mxu1 %v2522_v3 }
 0xa76   : > { %2420 = vmatmul.mubr.msk.bf16.vlgmr.msra.gmra.mrb[40].mxu1 %vm761_vm2, %v1825_v5 }
 0xa77   : > { %2435 = vmatprep.mubr.msk.bf16.mxu1 %vm2523_vm0, %v2522_v3  ;;  %2432 = vmatpush3.bf16.msra.mxu1 %v1981_v52 }
 0xa78   : > { %2433 = vmatprep.subr.bf16.mxu1 %v2522_v3 }
 0xabd   : > { %v1534_v6 = vpop.f32.mrb[28].mxu1 }
 0xabe   : > { %v2385_v8 = vpop.f32.mrb[29].mxu1 }
 0xabf   : > { %v1537_v9 = vpop.f32.mrb[30].mxu1  ;;  %v2038_v8 = vld [vmem:[%s3030_s18 + $0x20] sm:$0xff] }
 0xac0   : > { %v2386_v10 = vpop.f32.mrb[31].mxu1  ;;  %v2039_v9 = vld [vmem:[%s3030_s18 + $0x28] sm:$0xff] }
 0xac1   : > { %v2045_v10 = vpack.c.bf16 %v2039_v9, %v2038_v8 }
 0xb39   : > { %v1646_v15 = vpop.f32.mrb[32].mxu1 }
 0xb3a   : > { %1875 = vrot.lane.b32.xlu0 %v1646_v15, %s3068_s6  ;;  %v2397_v16 = vpop.f32.mrb[33].mxu1  ;;  %v2232_v15 = vld [vmem:[%s3029_s17] ss:$0 sm:$0xff] }
 0xb3b   : > { %v1649_v17 = vpop.f32.mrb[34].mxu1 }
 0xb3c   : > { %v2398_v19 = vpop.f32.mrb[35].mxu1 }
 0xb41   : > { %v1757_v21 = vpop.f32.mrb[36].mxu1 }
 0xb42   : > { %1879 = vrot.lane.b32.xlu1 %v1757_v21, %s3069_s28  ;;  %v2409_v22 = vpop.f32.mrb[37].mxu1  ;;  %v2234_v21 = vld [vmem:[%s3031_s19] ss:$0 sm:$0xff] }
 0xb43   : > { %v1760_v23 = vpop.f32.mrb[38].mxu1 }
 0xb44   : > { %v2410_v24 = vpop.f32.mrb[39].mxu1 }
 0xb49   : > { %v1868_v14 = vpop.f32.mrb[40].mxu1 }
 0xb4a   : > { %1883 = vrot.lane.b32.xlu0 %v1868_v14, %s3070_s30  ;;  %v2421_v25 = vpop.f32.mrb[41].mxu1 }
 0xb4b   : > { %v1871_v26 = vpop.f32.mrb[42].mxu1 }
 0xb4c   : > { %v2422_v27 = vpop.f32.mrb[43].mxu1 }
 0xbac   : > { %v1876_v28 = vpop.permute.xlu0 %1875 }
 0xbad   : > { %v1886_v30 = vsel %vm761_vm2, %v1534_v6, %v1876_v28 }
 0xbb4   : > { %v1880_v29 = vpop.permute.xlu1 %1879 }
 0xbb5   : > { %v1887_v31 = vsel %vm1221_vm7, %v1886_v30, %v1880_v29 }
 0xbbc   : > { %v1884_v32 = vpop.permute.xlu0 %1883 }
 0xbbd   : > { %v1888_v33 = vsel %vm1223_vm8, %v1887_v31, %v1884_v32 }
 0xbbe   : > { %v1893_v34 = vpack.c.bf16 %v1888_v33, %v1888_v33 }
 0xbc0   : > { %2428 = vmatmul.mubr.msk.bf16.vlgmr.msra.gmra.mrb[36].mxu0 %vm713_vm1, %v1893_v34 }
 0xbc1   : > { %2447 = vmatprep.mubr.msk.bf16.mxu0 %vm2523_vm0, %v2522_v3  ;;  %2440 = vmatpush3.bf16.msra.mxu0 %v2043_v58 }
 0xbc2   : > { %2441 = vmatprep.subr.bf16.mxu0 %v2522_v3 }
 0xbc5   : > { %2442 = vmatpush3.bf16.msra.mxu0 %v2044_v44 }
 0xbc6   : > { %2443 = vmatprep.subr.bf16.mxu0 %v2522_v3 }
 0xbc9   : > { %2444 = vmatpush3.bf16.msra.mxu0 %v2045_v10 }
 0xbca   : > { %2445 = vmatprep.subr.bf16.mxu0 %v2522_v3 }
 0xbcd   : > { %2446 = vmatpush3.bf16.msra.mxu0 %v2046_v13 }
 0xc93   : > { %v1940_v36 = vpop.f32.mrb[36].mxu0 }
 0xc94   : > { %v1941_v38 = vadd.f32 %v2228_v35, %v1940_v36  ;;  %v2429_v39 = vpop.f32.mrb[37].mxu0 }
 0xc95   : > { %v1943_v40 = vpop.f32.mrb[38].mxu0 }
 0xc96   : > { %v2430_v41 = vpop.f32.mrb[39].mxu0  ;;  %v1946_v42 = vadd.f32 %v1941_v38, %v2833_v37  ;;  %v1978_v37 = vld [vmem:[%s3028_s16 + $0x10] sm:$0xff]  ;;  %v2236_v38 = vld [vmem:[%s3032_s20] ss:$0 sm:$0xff] }
 0xc97   : > { %v1982_v54 = vpack.c.bf16 %v1979_v53, %v1978_v37  ;;  %v2237_v40 = vld [vmem:[%s3033_s21] ss:$0 sm:$0xff] }
 0xc98   : > { %v1949_v43 = vsel %vm1285_vm9, %v1946_v42, 0.0 }
 0xc99   : > { %1950 = vadd.xlane.f32.xlu1 %v1949_v43  ;;  %2434 = vmatpush3.bf16.msra.mxu1 %v1982_v54 }
 0xd26   : > { %v1951_v45 = vpop.xlane.xlu1 %1950 }
 0xd27   : > { %v1952_v46 = vmul.f32 0.03125, %v1951_v45 }
 0xd29   : > { %v1953_v47 = vsub.f32 %v1946_v42, %v1952_v46 }
 0xd2b   : > { %v1954_v48 = vmul.f32 %v1953_v47, %v1953_v47 }
 0xd2d   : > { %v1955_v49 = vsel %vm1285_vm9, %v1954_v48, 0.0 }
 0xd2e   : > { %1956 = vadd.xlane.f32.xlu0 %v1955_v49 }
 0xdbb   : > { %v1957_v60 = vpop.xlane.xlu0 %1956 }
 0xdbc   : > { %v1958_v61 = vmul.f32 0.03125, %v1957_v60 }
 0xdbe   : > { %v1959_v62 = vadd.f32 1e-05, %v1958_v61 }
 0xdc0   : > { %2510 = vrsqrt.f32 %v1959_v62 }
 0xdca   : > { %v2511_v63 = vpop.eup %2510 }
 0xdcb   : > { %v1961_v1 = vmul.f32 %v2511_v63, %v1953_v47 }
 0xdcd   : > { %v1968_v4 = vmul.f32 %v2230_v0, %v1961_v1 }
 0xdcf   : > { %v1975_v5 = vadd.f32 %v2231_v2, %v1968_v4 }
 0xdd1   : > { %v1980_v6 = vpack.c.bf16 %v1975_v5, %v1975_v5 }
 0xdd3   : > { %2436 = vmatmul.mubr.msk.bf16.vlgmr.msra.gmra.mrb[44].mxu1 %vm713_vm1, %v1980_v6 }
 0xea6   : > { %v2027_v16 = vpop.f32.mrb[44].mxu1 }
 0xea7   : > { %v2028_v17 = vadd.f32 %v2232_v15, %v2027_v16  ;;  %v2437_v18 = vpop.f32.mrb[45].mxu1 }
 0xea8   : > { %v2030_v7 = vpop.f32.mrb[46].mxu1 }
 0xea9   : > { %v2033_v19 = vmax.f32 %v2028_v17, 0.0  ;;  %v2438_v3 = vpop.f32.mrb[47].mxu1 }
 0xeab   : > { %v2042_v20 = vpack.c.bf16 %v2033_v19, %v2033_v19 }
 0xead   : > { %2448 = vmatmul.mubr.msk.bf16.vlgmr.msra.gmra.mrb[40].mxu0 %vm2054_vm12, %v2042_v20 }
 0xf80   : > { %v2092_v22 = vpop.f32.mrb[40].mxu0 }
 0xf81   : > { %v2093_v23 = vadd.f32 %v2234_v21, %v2092_v22  ;;  %v2449_v24 = vpop.f32.mrb[41].mxu0 }
 0xf82   : > { %v2095_v14 = vpop.f32.mrb[42].mxu0 }
 0xf83   : > { %v2450_v25 = vpop.f32.mrb[43].mxu0  ;;  %v2098_v26 = vadd.f32 %v2093_v23, %v1975_v5 }
 0xf85   : > { %v2101_v27 = vsel %vm1285_vm9, %v2098_v26, 0.0 }
 0xf86   : > { %2102 = vadd.xlane.f32.xlu0 %v2101_v27 }
0x1013   : > { %v2103_v28 = vpop.xlane.xlu0 %2102 }
0x1014   : > { %v2104_v29 = vmul.f32 0.03125, %v2103_v28 }
0x1016   : > { %v2105_v30 = vsub.f32 %v2098_v26, %v2104_v29 }
0x1018   : > { %v2106_v31 = vmul.f32 %v2105_v30, %v2105_v30 }
0x101a   : > { %v2107_v32 = vsel %vm1285_vm9, %v2106_v31, 0.0 }
0x101b   : > { %2108 = vadd.xlane.f32.xlu1 %v2107_v32 }
0x10a8   : > { %v2109_v33 = vpop.xlane.xlu1 %2108 }
0x10a9   : > { %v2110_v34 = vmul.f32 0.03125, %v2109_v33 }
0x10ab   : > { %v2111_v35 = vadd.f32 1e-05, %v2110_v34 }
0x10ad   : > { %2512 = vrsqrt.f32 %v2111_v35 }
0x10b7   : > { %v2513_v36 = vpop.eup %2512 }
0x10b8   : > { %v2113_v39 = vmul.f32 %v2513_v36, %v2105_v30 }
0x10ba   : > { %v2120_v41 = vmul.f32 %v2236_v38, %v2113_v39 }
0x10bc   : > { %v2127_v42 = vadd.f32 %v2237_v40, %v2120_v41 }
0x10be   : > { %2128 = vst.msk [vmem:[%s695_s23] sm:$0x1f] %vm1285_vm9, %v2127_v42 }
0x10bf PF: > { %s32_s3 = sadd.s32 1, %s2520_s3  }
0x10c0   : > { %p29_p4 = scmp.ge.s32.totalorder %s32_s3, 4  }
0x10c2   :  { %31 = sbr.rel (!%p29_p4) target bundleno = 8 (0x8), region = 141 }

// kernel: iibmil_forward.13
= control target key start
LH: loop header
LB: loop body
LE: loop exit
PB: predicated region body
PF: predicated region fallthrough
CT: control target
= control target key end

     0   :  { %s3402_s0 = inlined_call_operand.vmem [shape: f32[2,5,32], index: 0, kind: input, shape index: {}]   ;;  %s3403_s1 = inlined_call_operand.vmem [shape: f32[2,8,32], index: 1, kind: input, shape index: {}]   ;;  %s3404_s2 = inlined_call_operand.vmem [shape: f32[32,96], index: 2, kind: input, shape index: {}]   ;;  %s3405_s3 = inlined_call_operand.vmem [shape: f32[1,96], index: 3, kind: input, shape index: {}]   ;;  %s3406_s4 = inlined_call_operand.vmem [shape: f32[32,32], index: 4, kind: input, shape index: {}]   ;;  %s3407_s5 = inlined_call_operand.vmem [shape: f32[1,32], index: 5, kind: input, shape index: {}]   ;;  %s3408_s6 = inlined_call_operand.vmem [shape: f32[1,32], index: 6, kind: input, shape index: {}]   ;;  %s3409_s7 = inlined_call_operand.vmem [shape: f32[1,32], index: 7, kind: input, shape index: {}]   ;;  %s3410_s8 = inlined_call_operand.vmem [shape: f32[32,32], index: 8, kind: input, shape index: {}]   ;;  %s3411_s9 = inlined_call_operand.vmem [shape: f32[1,32], index: 9, kind: input, shape index: {}]   ;;  %s3412_s10 = inlined_call_operand.vmem [shape: f32[32,64], index: 10, kind: input, shape index: {}]   ;;  %s3413_s11 = inlined_call_operand.vmem [shape: f32[1,64], index: 11, kind: input, shape index: {}]   ;;  %s3414_s12 = inlined_call_operand.vmem [shape: f32[32,32], index: 12, kind: input, shape index: {}]   ;;  %s3415_s13 = inlined_call_operand.vmem [shape: f32[1,32], index: 13, kind: input, shape index: {}]   ;;  %s3416_s14 = inlined_call_operand.vmem [shape: f32[1,32], index: 14, kind: input, shape index: {}]   ;;  %s3417_s15 = inlined_call_operand.vmem [shape: f32[1,32], index: 15, kind: input, shape index: {}]   ;;  %s3418_s16 = inlined_call_operand.vmem [shape: f32[32,64], index: 16, kind: input, shape index: {}]   ;;  %s3419_s17 = inlined_call_operand.hbm [shape: f32[1,64], index: 17, kind: input, shape index: {}]   ;;  %s3420_s18 = inlined_call_operand.vmem [shape: f32[64,32], index: 18, kind: input, shape index: {}]   ;;  %s3421_s19 = inlined_call_operand.hbm [shape: f32[1,32], index: 19, kind: input, shape index: {}]   ;;  %s3422_s20 = inlined_call_operand.hbm [shape: f32[1,32], index: 20, kind: input, shape index: {}]   ;;  %s3423_s21 = inlined_call_operand.hbm [shape: f32[1,32], index: 21, kind: input, shape index: {}]   ;;  %s3424_s22 = inlined_call_operand.vmem [shape: f32[2,5,32], index: 22, kind: output, shape index: {}]  }
   0x1   :  { %3436 = sst [smem:[#allocation13_spill]] %s3402_s0 }
   0x2   :  { %3437 = sst [smem:[#allocation14_spill]] %s3403_s1 }
   0x3   :  { %3438 = sst [smem:[#allocation15_spill]] %s3404_s2 }
   0x4   :  { %3439 = sst [smem:[#allocation16_spill]] %s3405_s3 }
   0x5   :  { %3440 = sst [smem:[#allocation17_spill]] %s3406_s4 }
   0x6   :  { %3441 = sst [smem:[#allocation18_spill]] %s3407_s5 }
   0x7   :  { %3442 = sst [smem:[#allocation19_spill]] %s3408_s6 }
   0x8   :  { %3443 = sst [smem:[#allocation20_spill]] %s3417_s15 }
   0x9   :  { %3444 = sst [smem:[#allocation21_spill]] %s3424_s22 }
   0xa   :  { %27 = vsyncpa [#allocation3], 0 }
   0xb   :  { %28 = vsyncpa [#allocation5], 0 }
   0xc   :  { %29 = vsyncpa [#allocation8], 0  ;;  %s2923_s3 = smov 0  }
   0xd LB: > { %3445 = sst [smem:[#allocation12_spill]] %s2785_s3  ;;  %s2929_s28 = sadd.s32 4294967295, %s2785_s3   ;;  %s2785_s3 = sphi %s2923_s3, %s35_s3  }
   0xe   : > { %p2288_p0 = scmp.ge.s32.totalorder %s2785_s3, 1  ;;  %p538_p1 = scmp.lt.s32.totalorder %s2785_s3, 3 }
   0xf   : > { %p3428_p2 = scmp.eq.s32.totalorder %s2929_s28, 0  ;;  %s2787_s29 = smov [#allocation4]  }
  0x10   : > { %s610_s30 = sshll.u32 %s2787_s29, 4  ;;  %p2934_p3 = pnand %p2288_p0, %p538_p1  ;;  %s611_s30 = int_to_ptr.vmem [resolvable:$true] %s610_s30 }
  0x11   : > { %s2788_s0 = smov [#allocation2]   ;;  %s2789_s1 = smov [#allocation6]  }
  0x12   : > { %s3446_s4 = scalar_select %p2934_p3, 1, 0 }
  0x13   : > { %s596_s23 = sshll.u32 %s2788_s0, 4  ;;  %p2567_p4 = pneg %p2934_p3  ;;  %s2946_s23 = int_to_ptr.vmem [resolvable:$true] %s596_s23 }
  0x14   : > { %s621_s5 = sshll.u32 %s2789_s1, 4  ;;  %s2790_s6 = smov [#allocation7]   ;;  %s2948_s5 = int_to_ptr.vmem [resolvable:$true] %s621_s5 }
  0x15   : > { %p2942_p5 = pnand %p3428_p2, %p2567_p4  ;;  %s632_s25 = sshll.u32 %s2790_s6, 4  ;;  %s2950_s25 = int_to_ptr.vmem [resolvable:$true] %s632_s25 }
  0x16   : > { %s2655_s27 = scalar_lea.hbm %s3421_s19, 16 }
  0x17   : > { %p2656_p6 = scmp.ne.s32.totalorder %s3421_s19, %s2655_s27  ;;  %p2960_p7 = pneg %p2942_p5 }
  0x18   : > { %p2662_p10 = scmp.lt.u32.totalorder %s2655_s27, %s3421_s19 }
  0x19   : > { %p2658_p8 = pnand %p2960_p7, %p2656_p6 }
  0x1b   : > { %p2659_p9 = pneg %p2658_p8 }
  0x1d   : > { %p2664_p11 = pnand %p2662_p10, %p2659_p9 }
  0x1f   : > { %2667 = shalt.err (!%p2664_p11)
}
  0x20   : > { %s2668_s26 = scalar_lea.vmem %s611_s30, 16  ;;  %s2675_s2 = scalar_lea.vmem %s611_s30, 32 }
  0x21   : > { %p2669_p12 = scmp.ne.s32.totalorder %s611_s30, %s2668_s26  ;;  %p2676_p1 = scmp.lt.s32.totalorder %s611_s30, %s611_s30 }
  0x22   : > { %p2677_p4 = scmp.lt.s32.totalorder %s2675_s2, %s2668_s26 }
  0x23   : > { %p2671_p13 = pnand %p2669_p12, %p2960_p7 }
  0x24   : > { %p2678_p2 = por %p2677_p4, %p2676_p1 }
  0x25   : > { %p2672_p0 = pneg %p2671_p13 }
  0x27   : > { %p2679_p3 = pnand %p2678_p2, %p2672_p0 }
  0x29   : > { %2682 = shalt.err (!%p2679_p3)
}
  0x2a   : > { %2573 = dma.hbm_to_vmem [thread:$0]  (!%p2942_p5), %s3421_s19, 16, %s611_s30, [#allocation5]  }
  0x2b   : > { %s2683_s6 = scalar_lea.hbm %s3419_s17, 16 }
  0x2c   : > { %p2684_p6 = scmp.ne.s32.totalorder %s3419_s17, %s2683_s6  ;;  %p2690_p2 = scmp.lt.u32.totalorder %s2683_s6, %s3419_s17 }
  0x2e   : > { %p2686_p8 = pnand %p2684_p6, %p2960_p7 }
  0x30   : > { %p2687_p9 = pneg %p2686_p8 }
  0x32   : > { %p2692_p3 = pnand %p2690_p2, %p2687_p9 }
  0x34   : > { %2695 = shalt.err (!%p2692_p3)
}
  0x35   : > { %s2696_s30 = scalar_lea.vmem %s2946_s23, 16  ;;  %s2703_s15 = scalar_lea.vmem %s2946_s23, 32 }
  0x36   : > { %p2697_p10 = scmp.ne.s32.totalorder %s2946_s23, %s2696_s30  ;;  %p2704_p13 = scmp.lt.s32.totalorder %s2946_s23, %s2946_s23 }
  0x37   : > { %p2705_p0 = scmp.lt.s32.totalorder %s2703_s15, %s2696_s30 }
  0x38   : > { %p2699_p11 = pnand %p2697_p10, %p2960_p7 }
  0x39   : > { %p2706_p1 = por %p2705_p0, %p2704_p13 }
  0x3a   : > { %p2700_p12 = pneg %p2699_p11 }
  0x3c   : > { %p2707_p4 = pnand %p2706_p1, %p2700_p12 }
  0x3e   : > { %2710 = shalt.err (!%p2707_p4)
}
  0x3f   : > { %2570 = dma.hbm_to_vmem [thread:$0]  (!%p2942_p5), %s3419_s17, 16, %s2946_s23, [#allocation3]  }
  0x40   : > { %s2711_s27 = scalar_lea.hbm %s3422_s20, 16 }
  0x41   : > { %p2712_p6 = scmp.ne.s32.totalorder %s3422_s20, %s2711_s27  ;;  %p2718_p2 = scmp.lt.u32.totalorder %s2711_s27, %s3422_s20 }
  0x43   : > { %p2714_p8 = pnand %p2712_p6, %p2960_p7 }
  0x45   : > { %p2715_p9 = pneg %p2714_p8 }
  0x47   : > { %p2720_p3 = pnand %p2718_p2, %p2715_p9 }
  0x49   : > { %2723 = shalt.err (!%p2720_p3)
}
  0x4a   : > { %s2724_s23 = scalar_lea.vmem %s2948_s5, 16  ;;  %s2731_s15 = scalar_lea.vmem %s2948_s5, 32 }
  0x4b   : > { %p2725_p10 = scmp.ne.s32.totalorder %s2948_s5, %s2724_s23  ;;  %p2732_p13 = scmp.lt.s32.totalorder %s2948_s5, %s2948_s5 }
  0x4c   : > { %p2733_p0 = scmp.lt.s32.totalorder %s2731_s15, %s2724_s23 }
  0x4d   : > { %p2727_p11 = pnand %p2725_p10, %p2960_p7 }
  0x4e   : > { %p2734_p1 = por %p2733_p0, %p2732_p13 }
  0x4f   : > { %p2728_p12 = pneg %p2727_p11 }
  0x51   : > { %p2735_p4 = pnand %p2734_p1, %p2728_p12 }
  0x53   : > { %2738 = shalt.err (!%p2735_p4)
}
  0x54   : > { %2576 = dma.hbm_to_vmem [thread:$0]  (!%p2942_p5), %s3422_s20, 16, %s2948_s5, [#allocation5]  }
  0x55   : > { %s2739_s27 = scalar_lea.hbm %s3423_s21, 16 }
  0x56   : > { %p2740_p6 = scmp.ne.s32.totalorder %s3423_s21, %s2739_s27  ;;  %p2746_p2 = scmp.lt.u32.totalorder %s2739_s27, %s3423_s21 }
  0x58   : > { %p2742_p8 = pnand %p2740_p6, %p2960_p7 }
  0x5a   : > { %p2743_p9 = pneg %p2742_p8 }
  0x5c   : > { %p2748_p3 = pnand %p2746_p2, %p2743_p9 }
  0x5e   : > { %2751 = shalt.err (!%p2748_p3)
}
  0x5f   : > { %s2752_s5 = scalar_lea.vmem %s2950_s25, 16  ;;  %s2759_s23 = scalar_lea.vmem %s2950_s25, 32 }
  0x60   : > { %p2753_p10 = scmp.ne.s32.totalorder %s2950_s25, %s2752_s5  ;;  %p2760_p13 = scmp.lt.s32.totalorder %s2950_s25, %s2950_s25 }
  0x61   : > { %p2761_p0 = scmp.lt.s32.totalorder %s2759_s23, %s2752_s5 }
  0x62   : > { %p2755_p11 = pnand %p2753_p10, %p2960_p7 }
  0x63   : > { %p2762_p1 = por %p2761_p0, %p2760_p13 }
  0x64   : > { %p2756_p12 = pneg %p2755_p11 }
  0x66   : > { %p2763_p4 = pnand %p2762_p1, %p2756_p12 }
  0x68   : > { %2766 = shalt.err (!%p2763_p4)
}
  0x69   : > { %2579 = dma.hbm_to_vmem [thread:$0]  (!%p2942_p5), %s3423_s21, 16, %s2950_s25, [#allocation8]  }
  0x6a   : > { %p3449_p6 = scmp.ne.s32.totalorder %s3446_s4, 0 }
  0x6b   : > { %p3450_p7 = scmp.eq.s32.totalorder (!%p3449_p6), %s2929_s28, 0 }
  0x6c   : > { %659 = sbr.rel (%p3449_p6) target bundleno = 4398 (0x112e), region = 108 }
  0x73   : > { %2772 = dma.done.wait (%p3450_p7), [#allocation3], 16   ;;  %p3451_p8 = pmov %p3450_p7 }
  0x74   : > { %p3452_p9 = pmov %p3450_p7 }
  0x75   : > { %2774 = vsyncadd (%p3451_p8), [#allocation3], 4294967280 }
  0x76   : > { %2776 = dma.done.wait (%p3452_p9), [#allocation5], 32   ;;  %p3453_p2 = pmov %p3450_p7 }
  0x78   : > { %2778 = vsyncadd (%p3453_p2), [#allocation5], 4294967264  ;;  %p3454_p3 = pmov %p3453_p2 }
  0x79   : > { %p3455_p5 = pmov %p3453_p2 }
  0x7a   : > { %2780 = dma.done.wait (%p3454_p3), [#allocation8], 16  }
  0x7b   : > { %2782 = vsyncadd (%p3455_p5), [#allocation8], 4294967280  ;;  %p735_p10 = scmp.lt.s32.totalorder %s2929_s28, 1  ;;  %v2791_v0 = vmov 0.0   ;;  %vm2792_vm0 = vmmov 0   ;;  %s3456_s1 = sld [smem:[#allocation15_spill]] }
  0x7c   : > { %2395 = vmatprep.subr.bf16.mxu1 %v2791_v0  ;;  %2399 = vmatprep.mubr.msk.bf16.mxu1 %vm2792_vm0, %v2791_v0  ;;  %s3457_s2 = sld [smem:[#allocation13_spill]]  ;;  %vm764_vm1 = vcmask 261120   ;;  %s3458_s22 = sld [smem:[#allocation16_spill]]  ;;  %vm812_vm2 = vcmask 64512   ;;  %vm860_vm3 = vcmask 36864   ;;  %vm879_vm4 = vcmask 1041408  }
  0x7d   : > { %s3473_s28 = smov (!%p735_p10, %s2929_s28), 1  ;;  %2409 = vmatprep.subr.bf16.mxu0 %v2791_v0  ;;  %2411 = vmatprep.mubr.msk.bf16.mxu0 %vm2792_vm0, %v2791_v0  ;;  %s2793_s24 = smov 120   ;;  %vm880_vm5 = vcmask 1042432   ;;  %v2801_v63 = vmov 65535   ;;  %vm875_vm6 = vcmask 39936   ;;  %vm1272_vm7 = vcmask 130048  }
  0x7e   : > { %s3070_s4 = sshll.u32 %s3473_s28, 3  ;;  %s2794_s25 = smov 96   ;;  %vm1274_vm8 = vcmask 195584   ;;  %vm1336_vm9 = vcmask 258048   ;;  %vm1528_vm10 = vcmask 61440   ;;  %vm1547_vm11 = vcmask 1043456  }
  0x7f   : > { %s3435_s29 = smov 80   ;;  %s3433_s0 = smov 88   ;;  %vm2105_vm12 = vcmask 523264  }
  0x80   : > { %s3434_s3 = smov 72   ;;  %s2798_s27 = smov 112  }
  0x81   : > { %v750_v1 = vld [vmem:[%s3456_s1] sm:$0xff]  ;;  %v751_v2 = vld [vmem:[%s3456_s1 + $0x8] sm:$0xff]  ;;  %v752_v3 = vld [vmem:[%s3456_s1 + $0x10] sm:$0xff]  ;;  %s2799_s6 = smov 104   ;;  %s2800_s26 = smov 64  }
  0x82   : > { %s738_s30 = scalar_lea.vmem %s3457_s2, %s3070_s4  ;;  %v755_v4 = vpack.c.bf16 %v751_v2, %v750_v1  ;;  %v753_v5 = vld [vmem:[%s3456_s1 + $0x18] sm:$0xff]  ;;  %v2302_v9 = vld [vmem:[%s3458_s22] ss:$0 sm:$0xff]  ;;  %v881_v1 = vsel %vm879_vm4, 4294967295, %v2801_v63  ;;  %s2802_s2 = smov 48  }
  0x83   : > { %v756_v6 = vpack.c.bf16 %v753_v5, %v752_v3  ;;  %v3088_v7 = vld [vmem:[%s738_s30] sm:$0x1f]  ;;  %v882_v5 = vsel %vm880_vm5, %v881_v1, 0  ;;  %s2803_s30 = smov 40   ;;  %s2804_s28 = smov 56  }
  0x84   : > { %2396 = vmatpush3.bf16.msra.mxu1 %v755_v4  ;;  %v754_v8 = vpack.c.bf16 %v3088_v7, %v3088_v7  ;;  %s3459_s15 = sld [smem:[#allocation17_spill]]  ;;  %s3431_s22 = smov 16  }
  0x85   : > { %2397 = vmatprep.subr.bf16.mxu1 %v2791_v0  ;;  %s3460_s5 = sld [smem:[#allocation18_spill]]  ;;  %s3470_s23 = sld [smem:[#allocation21_spill]] }
  0x88   : > { %2398 = vmatpush3.bf16.msra.mxu1 %v756_v6 }
  0x89   : > { %2403 = vmatprep.subr.bf16.mxu1 %v2791_v0 }
  0x8b   : > { %2400 = vmatmul.mubr.msk.bf16.vlgmr.msra.gmra.mrb[0].mxu1 %vm764_vm1, %v754_v8 }
  0x8c   : > { %2405 = vmatprep.mubr.msk.bf16.mxu1 %vm2792_vm0, %v2791_v0 }
 0x15e   : > { %v802_v10 = vpop.f32.mrb[0].mxu1 }
 0x15f   : > { %v803_v11 = vadd.f32 %v2302_v9, %v802_v10  ;;  %v2401_v12 = vpop.f32.mrb[1].mxu1 }
 0x160   : > { %v805_v13 = vpop.f32.mrb[2].mxu1 }
 0x161   : > { %v3100_v14 = vpack.c.bf16 %v803_v11, %v803_v11  ;;  %v2402_v15 = vpop.f32.mrb[3].mxu1 }
 0x163   : > { %926 = vrot.lane.b32.xlu1 %v3100_v14, %s2793_s24  ;;  %810 = vrot.lane.b32.xlu0 %v3100_v14, %s2794_s25 }
 0x167   : > { %1039 = vrot.lane.b32.xlu1 %v3100_v14, %s3435_s29  ;;  %928 = vrot.lane.b32.xlu0 %v3100_v14, %s3433_s0 }
 0x16b   : > { %1150 = vrot.lane.b32.xlu1 %v3100_v14, %s3434_s3  ;;  %1037 = vrot.lane.b32.xlu0 %v3100_v14, %s2798_s27 }
 0x16f   : > { %1148 = vrot.lane.b32.xlu0 %v3100_v14, %s2799_s6 }
 0x1d5   : > { %v811_v16 = vpop.permute.xlu0 %810  ;;  %v927_v19 = vpop.permute.xlu1 %926 }
 0x1d6   : > { %v817_v17 = vsel %vm812_vm2, %v811_v16, 0 }
 0x1d7   : > { %2404 = vmatpush3.bf16.xpose.msra.mxu1 %v817_v17 }
 0x1d8   : > { %2415 = vmatprep.subr.bf16.mxu1 %v2791_v0 }
 0x1d9   : > { %v929_v18 = vpop.permute.xlu0 %928  ;;  %v1040_v21 = vpop.permute.xlu1 %1039 }
 0x1da   : > { %v934_v20 = vsel %vm812_vm2, %v929_v18, 0  ;;  %v1045_v22 = vsel %vm812_vm2, %v1040_v21, 0 }
 0x1dd   : > { %v1151_v23 = vpop.permute.xlu1 %1150  ;;  %v1038_v24 = vpop.permute.xlu0 %1037 }
 0x1de   : > { %2406 = vmatmul.mubr.msk.bf16.vlgmr.msra.gmra.mrb[4].mxu1 %vm812_vm2, %v3100_v14  ;;  %v1156_v25 = vsel %vm812_vm2, %v1151_v23, 0 }
 0x1df   : > { %2416 = vmatpush3.bf16.xpose.msra.mxu1 %v934_v20  ;;  %2417 = vmatprep.mubr.msk.bf16.mxu1 %vm2792_vm0, %v2791_v0 }
 0x1e0   : > { %2427 = vmatprep.subr.bf16.mxu1 %v2791_v0 }
 0x1e1   : > { %v1149_v26 = vpop.permute.xlu0 %1148 }
 0x1e6   : > { %2418 = vmatmul.mubr.msk.bf16.vlgmr.msra.gmra.mrb[8].mxu1 %vm812_vm2, %v927_v19 }
 0x1e7   : > { %2428 = vmatpush3.bf16.xpose.msra.mxu1 %v1045_v22  ;;  %2429 = vmatprep.mubr.msk.bf16.mxu1 %vm2792_vm0, %v2791_v0 }
 0x1e8   : > { %2439 = vmatprep.subr.bf16.mxu1 %v2791_v0 }
 0x1ee   : > { %2430 = vmatmul.mubr.msk.bf16.vlgmr.msra.gmra.mrb[12].mxu1 %vm812_vm2, %v1038_v24 }
 0x1ef   : > { %2440 = vmatpush3.bf16.xpose.msra.mxu1 %v1156_v25  ;;  %2441 = vmatprep.mubr.msk.bf16.mxu1 %vm2792_vm0, %v2791_v0 }
 0x1f0   : > { %2451 = vmatprep.subr.bf16.mxu1 %v2791_v0 }
 0x1f6   : > { %2442 = vmatmul.mubr.msk.bf16.vlgmr.msra.gmra.mrb[16].mxu1 %vm812_vm2, %v1149_v26 }
 0x1f7   : > { %2455 = vmatprep.mubr.msk.bf16.mxu1 %vm2792_vm0, %v2791_v0 }
 0x2b1   : > { %v853_v27 = vpop.f32.mrb[4].mxu1 }
 0x2b2   : > { %v859_v28 = vmul.f32 0.35355338, %v853_v27  ;;  %v2407_v29 = vpop.f32.mrb[5].mxu1 }
 0x2b3   : > { %v856_v30 = vpop.f32.mrb[6].mxu1 }
 0x2b4   : > { %v2408_v31 = vpop.f32.mrb[7].mxu1  ;;  %v861_v32 = vsel %vm860_vm3, %v859_v28, -inf }
 0x2b5   : > { %862 = vmax.xlane.f32.xlu1 %v861_v32 }
 0x2b9   : > { %v970_v33 = vpop.f32.mrb[8].mxu1 }
 0x2ba   : > { %v976_v34 = vmul.f32 0.35355338, %v970_v33  ;;  %v2419_v35 = vpop.f32.mrb[9].mxu1 }
 0x2bb   : > { %v973_v36 = vpop.f32.mrb[10].mxu1 }
 0x2bc   : > { %v2420_v37 = vpop.f32.mrb[11].mxu1  ;;  %v977_v38 = vsel %vm860_vm3, %v976_v34, -inf }
 0x2bd   : > { %978 = vmax.xlane.f32.xlu0 %v977_v38 }
 0x2c1   : > { %v1081_v39 = vpop.f32.mrb[12].mxu1 }
 0x2c2   : > { %v1087_v40 = vmul.f32 0.35355338, %v1081_v39  ;;  %v2431_v41 = vpop.f32.mrb[13].mxu1 }
 0x2c3   : > { %v1084_v42 = vpop.f32.mrb[14].mxu1  ;;  %v1277_v41 = vld [vmem:[%s3459_s15 + $0x8] sm:$0xff] }
 0x2c4   : > { %v2432_v43 = vpop.f32.mrb[15].mxu1  ;;  %v1088_v44 = vsel %vm860_vm3, %v1087_v40, -inf }
 0x2c5   : > { %1089 = vmax.xlane.f32.xlu0 %v1088_v44 }
 0x2c9   : > { %v1192_v45 = vpop.f32.mrb[16].mxu1 }
 0x2ca   : > { %v1198_v46 = vmul.f32 0.35355338, %v1192_v45  ;;  %v2443_v47 = vpop.f32.mrb[17].mxu1 }
 0x2cb   : > { %v1195_v48 = vpop.f32.mrb[18].mxu1  ;;  %v1279_v47 = vld [vmem:[%s3459_s15 + $0x18] sm:$0xff] }
 0x2cc   : > { %v2444_v49 = vpop.f32.mrb[19].mxu1  ;;  %v1199_v50 = vsel %vm860_vm3, %v1198_v46, -inf }
 0x2cd   : > { %1200 = vmax.xlane.f32.xlu1 %v1199_v50 }
 0x2de   : > { %873 = vrot.lane.b32.xlu1 %v3100_v14, %s2800_s26  ;;  %s3430_s26 = smov 24  }
 0x342   : > { %v863_v51 = vpop.xlane.xlu1 %862 }
 0x343   : > { %v864_v52 = vsub.f32 %v859_v28, %v863_v51 }
 0x345   : > { %v865_v53 = vmul.f32 1.442695, %v864_v52 }
 0x347   : > { %2617 = vpow2.f32 %v865_v53 }
 0x34a   : > { %v979_v54 = vpop.xlane.xlu0 %978 }
 0x34b   : > { %v980_v55 = vsub.f32 %v976_v34, %v979_v54 }
 0x34d   : > { %v981_v56 = vmul.f32 1.442695, %v980_v55 }
 0x34f   : > { %2619 = vpow2.f32 %v981_v56 }
 0x351   : > { %v2618_v57 = vpop.eup %2617 }
 0x352   : > { %v1090_v58 = vpop.xlane.xlu0 %1089  ;;  %v867_v59 = vsel %vm860_vm3, %v2618_v57, 0.0 }
 0x353   : > { %v1091_v60 = vsub.f32 %v1087_v40, %v1090_v58  ;;  %868 = vadd.xlane.f32.xlu0 %v867_v59  ;;  %v1276_v40 = vld [vmem:[%s3459_s15] sm:$0xff] }
 0x354   : > { %v1281_v42 = vpack.c.bf16 %v1277_v41, %v1276_v40 }
 0x355   : > { %v1092_v61 = vmul.f32 1.442695, %v1091_v60 }
 0x356   : > { %2452 = vmatpush3.bf16.msra.mxu1 %v1281_v42 }
 0x357   : > { %2621 = vpow2.f32 %v1092_v61  ;;  %2453 = vmatprep.subr.bf16.mxu1 %v2791_v0 }
 0x359   : > { %v2620_v62 = vpop.eup %2619 }
 0x35a   : > { %v1201_v2 = vpop.xlane.xlu1 %1200  ;;  %v983_v3 = vsel %vm860_vm3, %v2620_v62, 0.0 }
 0x35b   : > { %v1202_v4 = vsub.f32 %v1198_v46, %v1201_v2  ;;  %984 = vadd.xlane.f32.xlu1 %v983_v3  ;;  %v1278_v46 = vld [vmem:[%s3459_s15 + $0x10] sm:$0xff]  ;;  %v2312_v2 = vld [vmem:[%s3460_s5] ss:$0 sm:$0xff] }
 0x35c   : > { %v1282_v49 = vpack.c.bf16 %v1279_v47, %v1278_v46  ;;  %v2316_v47 = vld [vmem:[%s3411_s9] ss:$0 sm:$0xff] }
 0x35d   : > { %v1203_v6 = vmul.f32 1.442695, %v1202_v4 }
 0x35e   : > { %v874_v8 = vpop.permute.xlu1 %873  ;;  %2454 = vmatpush3.bf16.msra.mxu1 %v1282_v49 }
 0x35f   : > { %2623 = vpow2.f32 %v1203_v6  ;;  %v884_v9 = vand.u32 %v882_v5, %v874_v8  ;;  %2467 = vmatprep.subr.bf16.mxu1 %v2791_v0 }
 0x361   : > { %v2622_v10 = vpop.eup %2621  ;;  %2410 = vmatpush3.bf16.msra.mxu0 %v884_v9 }
 0x362   : > { %v1094_v11 = vsel %vm860_vm3, %v2622_v10, 0.0  ;;  %2421 = vmatprep.subr.bf16.mxu0 %v2791_v0 }
 0x363   : > { %1095 = vadd.xlane.f32.xlu0 %v1094_v11 }
 0x369   : > { %v2624_v12 = vpop.eup %2623 }
 0x36a   : > { %v1205_v13 = vsel %vm860_vm3, %v2624_v12, 0.0 }
 0x36b   : > { %1206 = vadd.xlane.f32.xlu0 %v1205_v13 }
 0x36c   : > { %1100 = vrot.lane.b32.xlu1 %v3100_v14, %s2802_s2  ;;  %s3432_s2 = smov 8  }
 0x370   : > { %1211 = vrot.lane.b32.xlu1 %v3100_v14, %s2803_s30  ;;  %s3461_s30 = sld [smem:[#allocation14_spill]] }
 0x376   : > { %s742_s29 = scalar_lea.vmem %s3461_s30, %s3070_s4  ;;  %s746_s30 = scalar_lea.vmem %s3470_s23, %s3070_s4 }
 0x381   : > { %989 = vrot.lane.b32.xlu0 %v3100_v14, %s2804_s28  ;;  %s3468_s28 = smov 24  }
 0x3e0   : > { %v869_v15 = vpop.xlane.xlu0 %868 }
 0x3e1   : > { %2625 = vrcp.f32 %v869_v15 }
 0x3e8   : > { %v985_v17 = vpop.xlane.xlu1 %984 }
 0x3e9   : > { %2627 = vrcp.f32 %v985_v17  ;;  %v1422_v17 = vld [vmem:[%s3412_s10] sm:$0xff] }
 0x3eb   : > { %v2626_v16 = vpop.eup %2625 }
 0x3ec   : > { %v871_v18 = vmul.f32 %v2626_v16, %v2618_v57  ;;  %v1101_v25 = vpop.permute.xlu1 %1100 }
 0x3ed   : > { %v1106_v28 = vand.u32 %v1101_v25, %v882_v5 }
 0x3ee   : > { %v872_v19 = vpack.c.bf16 %v871_v18, %v871_v18  ;;  %v1423_v18 = vld [vmem:[%s3412_s10 + $0x8] sm:$0xff] }
 0x3f0   : > { %2412 = vmatmul.mubr.msk.bf16.vlgmr.msra.gmra.mrb[0].mxu0 %vm875_vm6, %v872_v19  ;;  %v1096_v20 = vpop.xlane.xlu0 %1095  ;;  %v1212_v30 = vpop.permute.xlu1 %1211  ;;  %v1424_v19 = vld [vmem:[%s3412_s10 + $0x10] sm:$0xff] }
 0x3f1   : > { %2423 = vmatprep.mubr.msk.bf16.mxu0 %vm2792_vm0, %v2791_v0  ;;  %2629 = vrcp.f32 %v1096_v20  ;;  %v1217_v33 = vand.u32 %v1212_v30, %v882_v5  ;;  %v1425_v20 = vld [vmem:[%s3412_s10 + $0x18] sm:$0xff] }
 0x3f3   : > { %v2628_v22 = vpop.eup %2627 }
 0x3f4   : > { %v987_v23 = vmul.f32 %v2628_v22, %v2620_v62  ;;  %v749_v22 = vld [vmem:[%s742_s29] sm:$0xff]  ;;  %s3467_s29 = smov 16  }
 0x3f6   : > { %v988_v26 = vpack.c.bf16 %v987_v23, %v987_v23  ;;  %v1426_v23 = vpack.c.bf16 %v749_v22, %v749_v22 }
 0x3f8   : > { %v1207_v21 = vpop.xlane.xlu0 %1206 }
 0x3f9   : > { %2631 = vrcp.f32 %v1207_v21  ;;  %v1428_v21 = vpack.c.bf16 %v1425_v20, %v1424_v19 }
 0x3fb   : > { %v2630_v27 = vpop.eup %2629 }
 0x3fc   : > { %v990_v24 = vpop.permute.xlu0 %989  ;;  %v1098_v29 = vmul.f32 %v2630_v27, %v2622_v10  ;;  %v1368_v27 = vld [vmem:[%s3410_s8 + $0x18] sm:$0xff] }
 0x3fd   : > { %v995_v14 = vand.u32 %v990_v24, %v882_v5  ;;  %v1365_v24 = vld [vmem:[%s3410_s8] sm:$0xff] }
 0x3fe   : > { %v1099_v31 = vpack.c.bf16 %v1098_v29, %v1098_v29 }
 0x3ff   : > { %2422 = vmatpush3.bf16.msra.mxu0 %v995_v14  ;;  %v1366_v14 = vld [vmem:[%s3410_s8 + $0x8] sm:$0xff] }
 0x400   : > { %2433 = vmatprep.subr.bf16.mxu0 %v2791_v0  ;;  %v1370_v25 = vpack.c.bf16 %v1366_v14, %v1365_v24 }
 0x402   : > { %2424 = vmatmul.mubr.msk.bf16.vlgmr.msra.gmra.mrb[4].mxu0 %vm875_vm6, %v988_v26  ;;  %v1367_v26 = vld [vmem:[%s3410_s8 + $0x10] sm:$0xff] }
 0x403   : > { %2434 = vmatpush3.bf16.msra.mxu0 %v1106_v28  ;;  %2435 = vmatprep.mubr.msk.bf16.mxu0 %vm2792_vm0, %v2791_v0  ;;  %v2632_v32 = vpop.eup %2631  ;;  %v1371_v28 = vpack.c.bf16 %v1368_v27, %v1367_v26 }
 0x404   : > { %2445 = vmatprep.subr.bf16.mxu0 %v2791_v0  ;;  %v1209_v34 = vmul.f32 %v2632_v32, %v2624_v12 }
 0x406   : > { %v1210_v35 = vpack.c.bf16 %v1209_v34, %v1209_v34 }
 0x40a   : > { %2436 = vmatmul.mubr.msk.bf16.vlgmr.msra.gmra.mrb[8].mxu0 %vm875_vm6, %v1099_v31 }
 0x40b   : > { %2446 = vmatpush3.bf16.msra.mxu0 %v1217_v33  ;;  %2447 = vmatprep.mubr.msk.bf16.mxu0 %vm2792_vm0, %v2791_v0 }
 0x40c   : > { %2459 = vmatprep.subr.bf16.mxu0 %v2791_v0 }
 0x412   : > { %2448 = vmatmul.mubr.msk.bf16.vlgmr.msra.gmra.mrb[12].mxu0 %vm875_vm6, %v1210_v35  ;;  %v2315_v35 = vld [vmem:[%s3409_s7] ss:$0 sm:$0xff] }
 0x413   : > { %2463 = vmatprep.mubr.msk.bf16.mxu0 %vm2792_vm0, %v2791_v0  ;;  %2460 = vmatpush3.bf16.msra.mxu0 %v1370_v25 }
 0x414   : > { %2461 = vmatprep.subr.bf16.mxu0 %v2791_v0 }
 0x417   : > { %2462 = vmatpush3.bf16.msra.mxu0 %v1371_v28 }
 0x418   : > { %2475 = vmatprep.subr.bf16.mxu0 %v2791_v0 }
 0x4c3   : > { %v920_v36 = vpop.f32.mrb[0].mxu0 }
 0x4c4   : > { %v2413_v37 = vpop.f32.mrb[1].mxu0 }
 0x4c5   : > { %v923_v38 = vpop.f32.mrb[2].mxu0 }
 0x4c6   : > { %v2414_v39 = vpop.f32.mrb[3].mxu0 }
 0x4c7   : > { %v2318_v39 = vld [vmem:[%s3413_s11] ss:$0 sm:$0xff] }
 0x4d5   : > { %v1031_v43 = vpop.f32.mrb[4].mxu0 }
 0x4d6   : > { %1260 = vrot.lane.b32.xlu1 %v1031_v43, %s3432_s2  ;;  %v2425_v44 = vpop.f32.mrb[5].mxu0 }
 0x4d7   : > { %v1034_v45 = vpop.f32.mrb[6].mxu0 }
 0x4d8   : > { %v2426_v48 = vpop.f32.mrb[7].mxu0 }
 0x4dd   : > { %v1142_v50 = vpop.f32.mrb[8].mxu0 }
 0x4de   : > { %1264 = vrot.lane.b32.xlu0 %v1142_v50, %s3431_s22  ;;  %v2437_v51 = vpop.f32.mrb[9].mxu0  ;;  %s3462_s22 = sld [smem:[#allocation19_spill]] }
 0x4df   : > { %v1145_v52 = vpop.f32.mrb[10].mxu0 }
 0x4e0   : > { %v2438_v53 = vpop.f32.mrb[11].mxu0 }
 0x4e4   : > { %v2314_v33 = vld [vmem:[%s3462_s22] ss:$0 sm:$0xff]  ;;  %s3466_s22 = smov 8  }
 0x4e5   : > { %v1253_v54 = vpop.f32.mrb[12].mxu0 }
 0x4e6   : > { %1268 = vrot.lane.b32.xlu1 %v1253_v54, %s3430_s26  ;;  %v2449_v55 = vpop.f32.mrb[13].mxu0  ;;  %s3469_s26 = sld [smem:[#allocation20_spill]] }
 0x4e7   : > { %v1256_v56 = vpop.f32.mrb[14].mxu0 }
 0x4e8   : > { %v2450_v57 = vpop.f32.mrb[15].mxu0 }
 0x548   : > { %v1261_v58 = vpop.permute.xlu1 %1260 }
 0x549   : > { %v1271_v60 = vsel %vm812_vm2, %v920_v36, %v1261_v58 }
 0x550   : > { %v1265_v59 = vpop.permute.xlu0 %1264 }
 0x551   : > { %v1273_v61 = vsel %vm1272_vm7, %v1271_v60, %v1265_v59 }
 0x558   : > { %v1269_v62 = vpop.permute.xlu1 %1268 }
 0x559   : > { %v1275_v63 = vsel %vm1274_vm8, %v1273_v61, %v1269_v62 }
 0x55a   : > { %v1280_v1 = vpack.c.bf16 %v1275_v63, %v1275_v63 }
 0x55c   : > { %2456 = vmatmul.mubr.msk.bf16.vlgmr.msra.gmra.mrb[20].mxu1 %vm764_vm1, %v1280_v1 }
 0x55d   : > { %2471 = vmatprep.mubr.msk.bf16.mxu1 %vm2792_vm0, %v2791_v0 }
 0x62f   : > { %v1327_v3 = vpop.f32.mrb[20].mxu1 }
 0x630   : > { %v1328_v4 = vadd.f32 %v2312_v2, %v1327_v3  ;;  %v2457_v5 = vpop.f32.mrb[21].mxu1 }
 0x631   : > { %v1330_v6 = vpop.f32.mrb[22].mxu1 }
 0x632   : > { %v2458_v8 = vpop.f32.mrb[23].mxu1  ;;  %v1333_v9 = vadd.f32 %v1328_v4, %v3088_v7  ;;  %v1427_v7 = vpack.c.bf16 %v1423_v18, %v1422_v17 }
 0x634   : > { %v1337_v10 = vsel %vm1336_vm9, %v1333_v9, 0.0  ;;  %2468 = vmatpush3.bf16.msra.mxu1 %v1427_v7 }
 0x635   : > { %1338 = vadd.xlane.f32.xlu0 %v1337_v10  ;;  %2469 = vmatprep.subr.bf16.mxu1 %v2791_v0 }
 0x638   : > { %2470 = vmatpush3.bf16.msra.mxu1 %v1428_v21 }
 0x639   : > { %2481 = vmatprep.subr.bf16.mxu1 %v2791_v0 }
 0x63b   : > { %2472 = vmatmul.mubr.msk.bf16.vlgmr.msra.gmra.mrb[24].mxu1 %vm764_vm1, %v1426_v23 }
 0x63c   : > { %2483 = vmatprep.mubr.msk.bf16.mxu1 %vm2792_vm0, %v2791_v0 }
 0x6c2   : > { %v1339_v11 = vpop.xlane.xlu0 %1338 }
 0x6c3   : > { %v1341_v12 = vmul.f32 0.03125, %v1339_v11 }
 0x6c5   : > { %v1342_v13 = vsub.f32 %v1333_v9, %v1341_v12 }
 0x6c7   : > { %v1343_v15 = vmul.f32 %v1342_v13, %v1342_v13 }
 0x6c9   : > { %v1344_v16 = vsel %vm1336_vm9, %v1343_v15, 0.0 }
 0x6ca   : > { %1345 = vadd.xlane.f32.xlu1 %v1344_v16 }
 0x70e   : > { %v1473_v40 = vpop.f32.mrb[24].mxu1 }
 0x70f   : > { %v1474_v41 = vadd.f32 %v2318_v39, %v1473_v40  ;;  %v2473_v42 = vpop.f32.mrb[25].mxu1 }
 0x710   : > { %v1476_v43 = vpop.f32.mrb[26].mxu1 }
 0x711   : > { %v3245_v44 = vpack.c.bf16 %v1474_v41, %v1474_v41  ;;  %v2474_v45 = vpop.f32.mrb[27].mxu1 }
 0x713   : > { %1594 = vrot.lane.b32.xlu0 %v3245_v44, %s2793_s24  ;;  %v1485_v46 = vsel %vm812_vm2, %v3245_v44, 0 }
 0x717   : > { %1705 = vrot.lane.b32.xlu0 %v3245_v44, %s2798_s27 }
 0x71b   : > { %1816 = vrot.lane.b32.xlu0 %v3245_v44, %s2799_s6 }
 0x757   : > { %v1346_v29 = vpop.xlane.xlu1 %1345 }
 0x758   : > { %v1347_v30 = vmul.f32 0.03125, %v1346_v29 }
 0x75a   : > { %v1348_v31 = vadd.f32 1e-05, %v1347_v30 }
 0x75c   : > { %2633 = vrsqrt.f32 %v1348_v31 }
 0x766   : > { %v2634_v32 = vpop.eup %2633 }
 0x767   : > { %v1350_v34 = vmul.f32 %v2634_v32, %v1342_v13 }
 0x769   : > { %v1357_v36 = vmul.f32 %v2314_v33, %v1350_v34 }
 0x76b   : > { %v3235_v37 = vadd.f32 %v2315_v35, %v1357_v36 }
 0x76d   : > { %v1369_v38 = vpack.c.bf16 %v3235_v37, %v3235_v37 }
 0x76f   : > { %2464 = vmatmul.mubr.msk.bf16.vlgmr.msra.gmra.mrb[16].mxu0 %vm764_vm1, %v1369_v38 }
 0x770   : > { %2477 = vmatprep.mubr.msk.bf16.mxu0 %vm2792_vm0, %v2791_v0  ;;  %2476 = vmatpush3.bf16.xpose.msra.mxu0 %v1485_v46 }
 0x771   : > { %2487 = vmatprep.subr.bf16.mxu0 %v2791_v0 }
 0x785   : > { %v1595_v52 = vpop.permute.xlu0 %1594 }
 0x786   : > { %v1600_v55 = vsel %vm812_vm2, %v1595_v52, 0 }
 0x789   : > { %v1706_v56 = vpop.permute.xlu0 %1705 }
 0x78a   : > { %v1711_v58 = vsel %vm812_vm2, %v1706_v56, 0 }
 0x78d   : > { %v1817_v59 = vpop.permute.xlu0 %1816 }
 0x78e   : > { %v1822_v61 = vsel %vm812_vm2, %v1817_v59, 0 }
 0x842   : > { %v1416_v48 = vpop.f32.mrb[16].mxu0 }
 0x843   : > { %v1417_v49 = vadd.f32 %v2316_v47, %v1416_v48  ;;  %v2465_v50 = vpop.f32.mrb[17].mxu0 }
 0x844   : > { %v1419_v51 = vpop.f32.mrb[18].mxu0 }
 0x845   : > { %v1479_v53 = vpack.c.bf16 %v1417_v49, %v1417_v49  ;;  %v2466_v54 = vpop.f32.mrb[19].mxu0 }
 0x847   : > { %1592 = vrot.lane.b32.xlu1 %v1479_v53, %s2793_s24  ;;  %2478 = vmatmul.mubr.msk.bf16.vlgmr.msra.gmra.mrb[20].mxu0 %vm812_vm2, %v1479_v53  ;;  %s3463_s24 = smov 80  }
 0x848   : > { %2488 = vmatpush3.bf16.xpose.msra.mxu0 %v1600_v55  ;;  %2489 = vmatprep.mubr.msk.bf16.mxu0 %vm2792_vm0, %v2791_v0 }
 0x849   : > { %2499 = vmatprep.subr.bf16.mxu0 %v2791_v0 }
 0x84b   : > { %1703 = vrot.lane.b32.xlu1 %v1479_v53, %s2798_s27  ;;  %s3465_s27 = smov 88  }
 0x84f   : > { %1814 = vrot.lane.b32.xlu1 %v1479_v53, %s2799_s6 }
 0x8b9   : > { %v1593_v57 = vpop.permute.xlu1 %1592 }
 0x8ba   : > { %2490 = vmatmul.mubr.msk.bf16.vlgmr.msra.gmra.mrb[24].mxu0 %vm812_vm2, %v1593_v57 }
 0x8bb   : > { %2500 = vmatpush3.bf16.xpose.msra.mxu0 %v1711_v58  ;;  %2501 = vmatprep.mubr.msk.bf16.mxu0 %vm2792_vm0, %v2791_v0 }
 0x8bc   : > { %2511 = vmatprep.subr.bf16.mxu0 %v2791_v0 }
 0x8bd   : > { %v1704_v60 = vpop.permute.xlu1 %1703 }
 0x8c1   : > { %v1815_v62 = vpop.permute.xlu1 %1814 }
 0x8c2   : > { %2502 = vmatmul.mubr.msk.bf16.vlgmr.msra.gmra.mrb[28].mxu0 %vm812_vm2, %v1704_v60 }
 0x8c3   : > { %2512 = vmatpush3.bf16.xpose.msra.mxu0 %v1822_v61  ;;  %2513 = vmatprep.mubr.msk.bf16.mxu0 %vm2792_vm0, %v2791_v0 }
 0x8c4   : > { %2523 = vmatprep.subr.bf16.mxu0 %v2791_v0 }
 0x8ca   : > { %2514 = vmatmul.mubr.msk.bf16.vlgmr.msra.gmra.mrb[32].mxu0 %vm812_vm2, %v1815_v62 }
 0x8cb   : > { %2527 = vmatprep.mubr.msk.bf16.mxu0 %vm2792_vm0, %v2791_v0 }
 0x91a   : > { %v1521_v63 = vpop.f32.mrb[20].mxu0 }
 0x91b   : > { %v1527_v1 = vmul.f32 0.35355338, %v1521_v63  ;;  %v2479_v2 = vpop.f32.mrb[21].mxu0 }
 0x91c   : > { %v1524_v3 = vpop.f32.mrb[22].mxu0 }
 0x91d   : > { %v2480_v4 = vpop.f32.mrb[23].mxu0  ;;  %v1529_v5 = vsel %vm1528_vm10, %v1527_v1, -inf }
 0x91e   : > { %1530 = vmax.xlane.f32.xlu0 %v1529_v5 }
 0x98d   : > { %v1636_v6 = vpop.f32.mrb[24].mxu0 }
 0x98e   : > { %v1642_v8 = vmul.f32 0.35355338, %v1636_v6  ;;  %v2491_v9 = vpop.f32.mrb[25].mxu0 }
 0x98f   : > { %v1639_v10 = vpop.f32.mrb[26].mxu0 }
 0x990   : > { %v2492_v11 = vpop.f32.mrb[27].mxu0  ;;  %v1643_v12 = vsel %vm1528_vm10, %v1642_v8, -inf }
 0x991   : > { %1644 = vmax.xlane.f32.xlu1 %v1643_v12  ;;  %v1940_v11 = vld [vmem:[%s3414_s12] sm:$0xff]  ;;  %v1941_v12 = vld [vmem:[%s3414_s12 + $0x8] sm:$0xff] }
 0x995   : > { %v1747_v13 = vpop.f32.mrb[28].mxu0 }
 0x996   : > { %v1753_v15 = vmul.f32 0.35355338, %v1747_v13  ;;  %v2503_v16 = vpop.f32.mrb[29].mxu0  ;;  %v1945_v13 = vpack.c.bf16 %v1941_v12, %v1940_v11  ;;  %v2091_v11 = vld [vmem:[%s3420_s18 + $0x30] sm:$0xff]  ;;  %v2092_v12 = vld [vmem:[%s3420_s18 + $0x38] sm:$0xff] }
 0x997   : > { %v1750_v17 = vpop.f32.mrb[30].mxu0 }
 0x998   : > { %v2504_v18 = vpop.f32.mrb[31].mxu0  ;;  %v1754_v7 = vsel %vm1528_vm10, %v1753_v15, -inf  ;;  %2524 = vmatpush3.bf16.msra.mxu0 %v1945_v13  ;;  %v2097_v13 = vpack.c.bf16 %v2092_v12, %v2091_v11 }
 0x999   : > { %1755 = vmax.xlane.f32.xlu0 %v1754_v7  ;;  %2525 = vmatprep.subr.bf16.mxu0 %v2791_v0  ;;  %v1942_v18 = vld [vmem:[%s3414_s12 + $0x10] sm:$0xff]  ;;  %v1943_v7 = vld [vmem:[%s3414_s12 + $0x18] sm:$0xff] }
 0x99d   : > { %v1858_v19 = vpop.f32.mrb[32].mxu0 }
 0x99e   : > { %v1864_v20 = vmul.f32 0.35355338, %v1858_v19  ;;  %v2515_v21 = vpop.f32.mrb[33].mxu0 }
 0x99f   : > { %v1861_v22 = vpop.f32.mrb[34].mxu0 }
 0x9a0   : > { %v2516_v23 = vpop.f32.mrb[35].mxu0  ;;  %v1865_v24 = vsel %vm1528_vm10, %v1864_v20, -inf }
 0x9a1   : > { %1866 = vmax.xlane.f32.xlu0 %v1865_v24 }
 0x9ab   : > { %v1531_v14 = vpop.xlane.xlu0 %1530 }
 0x9ac   : > { %v1532_v25 = vsub.f32 %v1527_v1, %v1531_v14 }
 0x9ae   : > { %v1533_v26 = vmul.f32 1.442695, %v1532_v25 }
 0x9b0   : > { %2635 = vpow2.f32 %v1533_v26 }
 0x9ba   : > { %v2636_v27 = vpop.eup %2635 }
 0x9bb   : > { %v1535_v28 = vsel %vm1528_vm10, %v2636_v27, 0.0 }
 0x9bc   : > { %1536 = vadd.xlane.f32.xlu1 %v1535_v28 }
 0x9cd   : > { %1542 = vrot.lane.b32.xlu1 %v3245_v44, %s2794_s25  ;;  %s3464_s25 = smov 72  }
 0xa1e   : > { %v1645_v29 = vpop.xlane.xlu1 %1644 }
 0xa1f   : > { %v1646_v30 = vsub.f32 %v1642_v8, %v1645_v29 }
 0xa21   : > { %v1647_v31 = vmul.f32 1.442695, %v1646_v30 }
 0xa23   : > { %2637 = vpow2.f32 %v1647_v31 }
 0xa26   : > { %v1756_v32 = vpop.xlane.xlu0 %1755 }
 0xa27   : > { %v1757_v33 = vsub.f32 %v1753_v15, %v1756_v32 }
 0xa29   : > { %v1758_v34 = vmul.f32 1.442695, %v1757_v33 }
 0xa2b   : > { %2639 = vpow2.f32 %v1758_v34 }
 0xa2d   : > { %v2638_v35 = vpop.eup %2637 }
 0xa2e   : > { %v1867_v36 = vpop.xlane.xlu0 %1866  ;;  %v1649_v38 = vsel %vm1528_vm10, %v2638_v35, 0.0 }
 0xa2f   : > { %v1868_v39 = vsub.f32 %v1864_v20, %v1867_v36  ;;  %1650 = vadd.xlane.f32.xlu0 %v1649_v38  ;;  %v1946_v20 = vpack.c.bf16 %v1943_v7, %v1942_v18 }
 0xa31   : > { %v1869_v40 = vmul.f32 1.442695, %v1868_v39  ;;  %2526 = vmatpush3.bf16.msra.mxu0 %v1946_v20 }
 0xa32   : > { %2539 = vmatprep.subr.bf16.mxu0 %v2791_v0 }
 0xa33   : > { %2641 = vpow2.f32 %v1869_v40 }
 0xa35   : > { %v2640_v41 = vpop.eup %2639 }
 0xa36   : > { %v1760_v42 = vsel %vm1528_vm10, %v2640_v41, 0.0 }
 0xa37   : > { %1761 = vadd.xlane.f32.xlu1 %v1760_v42 }
 0xa3d   : > { %v2642_v43 = vpop.eup %2641 }
 0xa3e   : > { %v1871_v45 = vsel %vm1528_vm10, %v2642_v43, 0.0 }
 0xa3f   : > { %1872 = vadd.xlane.f32.xlu0 %v1871_v45 }
 0xa48   : > { %1766 = vrot.lane.b32.xlu1 %v3245_v44, %s3463_s24 }
 0xa49   : > { %v1537_v46 = vpop.xlane.xlu1 %1536 }
 0xa4a   : > { %2643 = vrcp.f32 %v1537_v46 }
 0xa4c   : > { %1877 = vrot.lane.b32.xlu1 %v3245_v44, %s3464_s25 }
 0xa4d   : > { %v1543_v47 = vpop.permute.xlu1 %1542 }
 0xa4e   : > { %v1549_v48 = vsel %vm1547_vm11, %v1543_v47, 0 }
 0xa4f   : > { %2482 = vmatpush3.bf16.msra.mxu1 %v1549_v48 }
 0xa50   : > { %2493 = vmatprep.subr.bf16.mxu1 %v2791_v0 }
 0xa54   : > { %v2644_v49 = vpop.eup %2643 }
 0xa55   : > { %v1539_v50 = vmul.f32 %v2644_v49, %v2636_v27  ;;  %1655 = vrot.lane.b32.xlu0 %v3245_v44, %s3465_s27 }
 0xa57   : > { %v1540_v51 = vpack.c.bf16 %v1539_v50, %v1539_v50  ;;  %v2027_v50 = vld [vmem:[%s3418_s16] sm:$0xff] }
 0xa59   : > { %2484 = vmatmul.mubr.msk.bf16.vlgmr.msra.gmra.mrb[28].mxu1 %vm812_vm2, %v1540_v51  ;;  %v2028_v51 = vld [vmem:[%s3418_s16 + $0x8] sm:$0xff] }
 0xa5a   : > { %2495 = vmatprep.mubr.msk.bf16.mxu1 %vm2792_vm0, %v2791_v0 }
 0xabc   : > { %v1651_v52 = vpop.xlane.xlu0 %1650 }
 0xabd   : > { %2645 = vrcp.f32 %v1651_v52  ;;  %v2032_v52 = vpack.c.bf16 %v2028_v51, %v2027_v50 }
 0xac4   : > { %v1762_v53 = vpop.xlane.xlu1 %1761 }
 0xac5   : > { %2647 = vrcp.f32 %v1762_v53  ;;  %v2030_v53 = vld [vmem:[%s3418_s16 + $0x18] sm:$0xff] }
 0xac7   : > { %v2646_v54 = vpop.eup %2645 }
 0xac8   : > { %v1653_v56 = vmul.f32 %v2646_v54, %v2638_v35  ;;  %v1767_v59 = vpop.permute.xlu1 %1766  ;;  %v2328_v35 = vld [vmem:[%s3415_s13] ss:$0 sm:$0xff] }
 0xac9   : > { %v1772_v61 = vsel %vm1547_vm11, %v1767_v59, 0  ;;  %v2088_v59 = vld [vmem:[%s3420_s18 + $0x18] sm:$0xff] }
 0xaca   : > { %v1654_v44 = vpack.c.bf16 %v1653_v56, %v1653_v56  ;;  %v2086_v56 = vld [vmem:[%s3420_s18 + $0x8] sm:$0xff] }
 0xacc   : > { %v1873_v55 = vpop.xlane.xlu0 %1872  ;;  %v1878_v63 = vpop.permute.xlu1 %1877 }
 0xacd   : > { %2649 = vrcp.f32 %v1873_v55  ;;  %v1883_v3 = vsel %vm1547_vm11, %v1878_v63, 0  ;;  %v2085_v55 = vld [vmem:[%s3420_s18] sm:$0xff] }
 0xacf   : > { %v2648_v60 = vpop.eup %2647 }
 0xad0   : > { %v1656_v57 = vpop.permute.xlu0 %1655  ;;  %v1764_v62 = vmul.f32 %v2648_v60, %v2640_v41 }
 0xad1   : > { %v1661_v58 = vsel %vm1547_vm11, %v1656_v57, 0  ;;  %v2087_v57 = vld [vmem:[%s3420_s18 + $0x10] sm:$0xff] }
 0xad2   : > { %2494 = vmatpush3.bf16.msra.mxu1 %v1661_v58  ;;  %v1765_v1 = vpack.c.bf16 %v1764_v62, %v1764_v62  ;;  %v2094_v58 = vpack.c.bf16 %v2086_v56, %v2085_v55 }
 0xad3   : > { %2505 = vmatprep.subr.bf16.mxu1 %v2791_v0 }
 0xad5   : > { %2496 = vmatmul.mubr.msk.bf16.vlgmr.msra.gmra.mrb[32].mxu1 %vm812_vm2, %v1654_v44  ;;  %v2095_v44 = vpack.c.bf16 %v2088_v59, %v2087_v57 }
 0xad6   : > { %2506 = vmatpush3.bf16.msra.mxu1 %v1772_v61  ;;  %2507 = vmatprep.mubr.msk.bf16.mxu1 %vm2792_vm0, %v2791_v0 }
 0xad7   : > { %2517 = vmatprep.subr.bf16.mxu1 %v2791_v0  ;;  %v2650_v2 = vpop.eup %2649 }
 0xad8   : > { %v1875_v4 = vmul.f32 %v2650_v2, %v2642_v43 }
 0xada   : > { %v1876_v5 = vpack.c.bf16 %v1875_v4, %v1875_v4 }
 0xadd   : > { %2508 = vmatmul.mubr.msk.bf16.vlgmr.msra.gmra.mrb[36].mxu1 %vm812_vm2, %v1765_v1  ;;  %v2330_v1 = vld [vmem:[%s3416_s14] ss:$0 sm:$0xff] }
 0xade   : > { %2518 = vmatpush3.bf16.msra.mxu1 %v1883_v3  ;;  %2519 = vmatprep.mubr.msk.bf16.mxu1 %vm2792_vm0, %v2791_v0  ;;  %v2331_v3 = vld [vmem:[%s3469_s26] ss:$0 sm:$0xff] }
 0xadf   : > { %2531 = vmatprep.subr.bf16.mxu1 %v2791_v0 }
 0xae5   : > { %2520 = vmatmul.mubr.msk.bf16.vlgmr.msra.gmra.mrb[40].mxu1 %vm812_vm2, %v1876_v5 }
 0xae6   : > { %2535 = vmatprep.mubr.msk.bf16.mxu1 %vm2792_vm0, %v2791_v0  ;;  %2532 = vmatpush3.bf16.msra.mxu1 %v2032_v52 }
 0xae7   : > { %2533 = vmatprep.subr.bf16.mxu1 %v2791_v0 }
 0xb2c   : > { %v1585_v6 = vpop.f32.mrb[28].mxu1 }
 0xb2d   : > { %v2485_v8 = vpop.f32.mrb[29].mxu1 }
 0xb2e   : > { %v1588_v9 = vpop.f32.mrb[30].mxu1  ;;  %v2089_v8 = vld [vmem:[%s3420_s18 + $0x20] sm:$0xff] }
 0xb2f   : > { %v2486_v10 = vpop.f32.mrb[31].mxu1  ;;  %v2090_v9 = vld [vmem:[%s3420_s18 + $0x28] sm:$0xff] }
 0xb30   : > { %v2096_v10 = vpack.c.bf16 %v2090_v9, %v2089_v8 }
 0xba8   : > { %v1697_v15 = vpop.f32.mrb[32].mxu1 }
 0xba9   : > { %1926 = vrot.lane.b32.xlu0 %v1697_v15, %s3466_s22  ;;  %v2497_v16 = vpop.f32.mrb[33].mxu1  ;;  %v2332_v15 = vld [vmem:[#allocation2] ss:$0 sm:$0xff] }
 0xbaa   : > { %v1700_v17 = vpop.f32.mrb[34].mxu1 }
 0xbab   : > { %v2498_v19 = vpop.f32.mrb[35].mxu1 }
 0xbb0   : > { %v1808_v21 = vpop.f32.mrb[36].mxu1 }
 0xbb1   : > { %1930 = vrot.lane.b32.xlu1 %v1808_v21, %s3467_s29  ;;  %v2509_v22 = vpop.f32.mrb[37].mxu1 }
 0xbb2   : > { %v1811_v23 = vpop.f32.mrb[38].mxu1 }
 0xbb3   : > { %v2510_v24 = vpop.f32.mrb[39].mxu1 }
 0xbb8   : > { %v1919_v14 = vpop.f32.mrb[40].mxu1 }
 0xbb9   : > { %1934 = vrot.lane.b32.xlu0 %v1919_v14, %s3468_s28  ;;  %v2521_v25 = vpop.f32.mrb[41].mxu1 }
 0xbba   : > { %v1922_v26 = vpop.f32.mrb[42].mxu1 }
 0xbbb   : > { %v2522_v27 = vpop.f32.mrb[43].mxu1 }
 0xc1b   : > { %v1927_v28 = vpop.permute.xlu0 %1926 }
 0xc1c   : > { %v1937_v30 = vsel %vm812_vm2, %v1585_v6, %v1927_v28 }
 0xc23   : > { %v1931_v29 = vpop.permute.xlu1 %1930 }
 0xc24   : > { %v1938_v31 = vsel %vm1272_vm7, %v1937_v30, %v1931_v29 }
 0xc2b   : > { %v1935_v32 = vpop.permute.xlu0 %1934 }
 0xc2c   : > { %v1939_v33 = vsel %vm1274_vm8, %v1938_v31, %v1935_v32 }
 0xc2d   : > { %v1944_v34 = vpack.c.bf16 %v1939_v33, %v1939_v33 }
 0xc2f   : > { %2528 = vmatmul.mubr.msk.bf16.vlgmr.msra.gmra.mrb[36].mxu0 %vm764_vm1, %v1944_v34 }
 0xc30   : > { %2547 = vmatprep.mubr.msk.bf16.mxu0 %vm2792_vm0, %v2791_v0  ;;  %2540 = vmatpush3.bf16.msra.mxu0 %v2094_v58 }
 0xc31   : > { %2541 = vmatprep.subr.bf16.mxu0 %v2791_v0 }
 0xc34   : > { %2542 = vmatpush3.bf16.msra.mxu0 %v2095_v44 }
 0xc35   : > { %2543 = vmatprep.subr.bf16.mxu0 %v2791_v0 }
 0xc38   : > { %2544 = vmatpush3.bf16.msra.mxu0 %v2096_v10 }
 0xc39   : > { %2545 = vmatprep.subr.bf16.mxu0 %v2791_v0  ;;  %v2334_v0 = vld [vmem:[#allocation4] ss:$0 sm:$0xff] }
 0xc3c   : > { %2546 = vmatpush3.bf16.msra.mxu0 %v2097_v13 }
 0xd02   : > { %v1991_v36 = vpop.f32.mrb[36].mxu0 }
 0xd03   : > { %v1992_v38 = vadd.f32 %v2328_v35, %v1991_v36  ;;  %v2529_v39 = vpop.f32.mrb[37].mxu0 }
 0xd04   : > { %v1994_v40 = vpop.f32.mrb[38].mxu0 }
 0xd05   : > { %v2530_v41 = vpop.f32.mrb[39].mxu0  ;;  %v1997_v42 = vadd.f32 %v1992_v38, %v3235_v37  ;;  %v2029_v37 = vld [vmem:[%s3418_s16 + $0x10] sm:$0xff]  ;;  %v2336_v38 = vld [vmem:[#allocation6] ss:$0 sm:$0xff]  ;;  %v2337_v40 = vld [vmem:[#allocation7] ss:$0 sm:$0xff] }
 0xd06   : > { %v2033_v54 = vpack.c.bf16 %v2030_v53, %v2029_v37 }
 0xd07   : > { %v2000_v43 = vsel %vm1336_vm9, %v1997_v42, 0.0 }
 0xd08   : > { %2001 = vadd.xlane.f32.xlu1 %v2000_v43  ;;  %2534 = vmatpush3.bf16.msra.mxu1 %v2033_v54 }
 0xd95   : > { %v2002_v45 = vpop.xlane.xlu1 %2001 }
 0xd96   : > { %v2003_v46 = vmul.f32 0.03125, %v2002_v45 }
 0xd98   : > { %v2004_v47 = vsub.f32 %v1997_v42, %v2003_v46 }
 0xd9a   : > { %v2005_v48 = vmul.f32 %v2004_v47, %v2004_v47 }
 0xd9c   : > { %v2006_v49 = vsel %vm1336_vm9, %v2005_v48, 0.0 }
 0xd9d   : > { %2007 = vadd.xlane.f32.xlu0 %v2006_v49 }
 0xe2a   : > { %v2008_v60 = vpop.xlane.xlu0 %2007 }
 0xe2b   : > { %v2009_v61 = vmul.f32 0.03125, %v2008_v60 }
 0xe2d   : > { %v2010_v62 = vadd.f32 1e-05, %v2009_v61 }
 0xe2f   : > { %2651 = vrsqrt.f32 %v2010_v62 }
 0xe39   : > { %v2652_v63 = vpop.eup %2651 }
 0xe3a   : > { %v2012_v2 = vmul.f32 %v2652_v63, %v2004_v47 }
 0xe3c   : > { %v2019_v4 = vmul.f32 %v2330_v1, %v2012_v2 }
 0xe3e   : > { %v2026_v5 = vadd.f32 %v2331_v3, %v2019_v4 }
 0xe40   : > { %v2031_v6 = vpack.c.bf16 %v2026_v5, %v2026_v5 }
 0xe42   : > { %2536 = vmatmul.mubr.msk.bf16.vlgmr.msra.gmra.mrb[44].mxu1 %vm764_vm1, %v2031_v6 }
 0xf15   : > { %v2078_v16 = vpop.f32.mrb[44].mxu1 }
 0xf16   : > { %v2079_v17 = vadd.f32 %v2332_v15, %v2078_v16  ;;  %v2537_v18 = vpop.f32.mrb[45].mxu1 }
 0xf17   : > { %v2081_v7 = vpop.f32.mrb[46].mxu1 }
 0xf18   : > { %v2084_v19 = vmax.f32 %v2079_v17, 0.0  ;;  %v2538_v20 = vpop.f32.mrb[47].mxu1 }
 0xf1a   : > { %v2093_v21 = vpack.c.bf16 %v2084_v19, %v2084_v19 }
 0xf1c   : > { %2548 = vmatmul.mubr.msk.bf16.vlgmr.msra.gmra.mrb[40].mxu0 %vm2105_vm12, %v2093_v21 }
 0xfef   : > { %v2143_v22 = vpop.f32.mrb[40].mxu0 }
 0xff0   : > { %v2144_v23 = vadd.f32 %v2334_v0, %v2143_v22  ;;  %v2549_v24 = vpop.f32.mrb[41].mxu0 }
 0xff1   : > { %v2146_v14 = vpop.f32.mrb[42].mxu0 }
 0xff2   : > { %v2550_v25 = vpop.f32.mrb[43].mxu0  ;;  %v2149_v26 = vadd.f32 %v2144_v23, %v2026_v5 }
 0xff4   : > { %v2152_v27 = vsel %vm1336_vm9, %v2149_v26, 0.0 }
 0xff5   : > { %2153 = vadd.xlane.f32.xlu0 %v2152_v27 }
0x1082   : > { %v2154_v28 = vpop.xlane.xlu0 %2153 }
0x1083   : > { %v2155_v29 = vmul.f32 0.03125, %v2154_v28 }
0x1085   : > { %v2156_v30 = vsub.f32 %v2149_v26, %v2155_v29 }
0x1087   : > { %v2157_v31 = vmul.f32 %v2156_v30, %v2156_v30 }
0x1089   : > { %v2158_v32 = vsel %vm1336_vm9, %v2157_v31, 0.0 }
0x108a   : > { %2159 = vadd.xlane.f32.xlu1 %v2158_v32 }
0x1117   : > { %v2160_v33 = vpop.xlane.xlu1 %2159 }
0x1118   : > { %v2161_v34 = vmul.f32 0.03125, %v2160_v33 }
0x111a   : > { %v2162_v35 = vadd.f32 1e-05, %v2161_v34 }
0x111c   : > { %2653 = vrsqrt.f32 %v2162_v35 }
0x1126   : > { %v2654_v36 = vpop.eup %2653 }
0x1127   : > { %v2164_v39 = vmul.f32 %v2654_v36, %v2156_v30 }
0x1129   : > { %v2171_v41 = vmul.f32 %v2336_v38, %v2164_v39 }
0x112b   : > { %v2178_v42 = vadd.f32 %v2337_v40, %v2171_v41 }
0x112d   : > { %2179 = vst.msk [vmem:[%s746_s30] sm:$0x1f] %vm1336_vm9, %v2178_v42 }
0x112e PF: > { %s3471_s22 = sld [smem:[#allocation12_spill]] }
0x1134   : > { %s35_s3 = sadd.s32 1, %s3471_s22  }
0x1135   : > { %p32_p11 = scmp.ge.s32.totalorder %s35_s3, 4  }
0x1137   :  { %34 = sbr.rel (!%p32_p11) target bundleno = 13 (0xd), region = 158 }
0x113e   :  { %2199 = vsyncpa [#allocation3], 1 }
0x113f   :  { %2201 = vsyncpa [#allocation3 + $0x1], 1 }
0x1140   :  { %2202 = vsyncpa [#allocation5], 1 }
0x1141   :  { %2203 = vsyncpa [#allocation8], 1 }

</bundles_post_ra>
